<compile_context>
chip_gen: v7x
topology: tpu7x:2x2x1
jax: 0.10.0
libtpu: 0.0.40
codegen_flags: <defaults>
</compile_context>

<pallas_src>
import jax
import jax.numpy as jnp
from jax.experimental import pallas as pl
from jax.experimental.pallas import tpu as pltpu

NEG_SLOPE = 0.1        # Conv_Bn_Activation 'leaky' -> LeakyReLU(0.1)
BN_EPS = 1e-5
VMEM_LIMIT = 32 * 1024 * 1024   # conservative for v7x (64 MiB physical)


def _tile(dim, cap, align):
    """Largest multiple of `align` that divides `dim` and is <= cap."""
    if dim <= cap:
        return dim
    t = (cap // align) * align
    while t >= align:
        if dim % t == 0:
            return t
        t -= align
    return dim


def _fold_bn(w2d, gamma, beta, mean, var):
    """Fold BN (eval-mode running stats) into a (Cout, Cin*) weight matrix."""
    inv_std = 1.0 / jnp.sqrt(var + BN_EPS)
    scale = gamma * inv_std                               # (Cout,)
    bias = (beta - mean * scale).astype(jnp.float32)      # (Cout,)
    w_folded = w2d * scale[:, None]                       # scale output channels
    return w_folded, bias


# ----------------------------------------------------------------------------
# Kernel 1: tiled matmul + bias + LeakyReLU  (1x1 conv with BN folded)
# ----------------------------------------------------------------------------
def _mm_bn_leaky_kernel(x_ref, w_ref, b_ref, o_ref, acc_ref):
    # x_ref: (tm, tk) bf16   w_ref: (tk, tn) bf16 (BN scale folded)
    # b_ref: (1, tn) f32     o_ref: (tm, tn) bf16   acc_ref: (tm, tn) f32
    @pl.when(pl.program_id(2) == 0)
    def _():
        acc_ref[...] = jnp.zeros_like(acc_ref)

    acc = acc_ref[...] + jnp.dot(x_ref[...], w_ref[...],
                                 preferred_element_type=jnp.float32)
    acc_ref[...] = acc

    @pl.when(pl.program_id(2) == pl.num_programs(2) - 1)
    def _():
        y = acc + b_ref[...]
        o_ref[...] = jnp.where(y >= 0, y, NEG_SLOPE * y).astype(o_ref.dtype)


def conv1x1_bn_leaky(x_nhwc, params):
    w, gamma, beta, mean, var = params
    cout, cin, kh, kw = w.shape
    assert kh == 1 and kw == 1
    n, h, wd, c = x_nhwc.shape
    assert c == cin

    wf, bias = _fold_bn(w.reshape(cout, cin), gamma, beta, mean, var)
    wm = wf.T.astype(jnp.bfloat16)                       # (Cin, Cout)
    bias = bias.reshape(1, cout)

    xm = x_nhwc.reshape(n * h * wd, cin)
    M, K = xm.shape
    tm = _tile(M, 256, 8)
    tn = _tile(cout, 256, 128)
    tk = _tile(K, 512, 128)
    grid = (M // tm, cout // tn, K // tk)

    out = pl.pallas_call(
        _mm_bn_leaky_kernel,
        out_shape=jax.ShapeDtypeStruct((M, cout), jnp.bfloat16),
        grid_spec=pltpu.PrefetchScalarGridSpec(
            num_scalar_prefetch=0,
            grid=grid,
            in_specs=[
                pl.BlockSpec((tm, tk), lambda i, j, k: (i, k)),
                pl.BlockSpec((tk, tn), lambda i, j, k: (k, j)),
                pl.BlockSpec((1, tn), lambda i, j, k: (0, j)),   # bias: re-DMA'd only when j changes
            ],
            out_specs=pl.BlockSpec((tm, tn), lambda i, j, k: (i, j)),
            scratch_shapes=[pltpu.VMEM((tm, tn), jnp.float32)],
        ),
        compiler_params=pltpu.CompilerParams(
            dimension_semantics=("parallel", "parallel", "arbitrary"),
            vmem_limit_bytes=VMEM_LIMIT),
    )(xm, wm, bias)
    return out.reshape(n, h, wd, cout)


# ----------------------------------------------------------------------------
# Kernel 2: 3x3 conv (implicit im2col) + bias + LeakyReLU
# ----------------------------------------------------------------------------
def _conv3x3_bn_leaky_kernel(xp_ref, w_ref, b_ref, o_ref):
    # xp_ref: (1, H+2, W+2, Cin)  zero-padded image, resident across (h, j)
    # w_ref:  (9, Cin, tn)        weights (BN scale folded)
    # b_ref:  (1, tn)             bias (f32)
    # o_ref:  (1, th, W, tn)
    th = o_ref.shape[1]
    wd = o_ref.shape[2]
    tn = o_ref.shape[3]
    cin = xp_ref.shape[3]
    row0 = pl.program_id(1) * th

    acc = jnp.zeros((th * wd, tn), jnp.float32)
    for ki in range(3):
        for kj in range(3):
            patch = xp_ref[0, pl.ds(row0 + ki, th), pl.ds(kj, wd), :]   # (th, wd, cin)
            acc = acc + jnp.dot(patch.reshape(th * wd, cin),
                                w_ref[ki * 3 + kj],
                                preferred_element_type=jnp.float32)
    y = acc + b_ref[...]
    y = jnp.where(y >= 0, y, NEG_SLOPE * y)
    o_ref[...] = y.reshape(1, th, wd, tn).astype(o_ref.dtype)


def conv3x3_bn_leaky(x_nhwc, params):
    w, gamma, beta, mean, var = params
    cout, cin, kh, kw = w.shape
    assert kh == 3 and kw == 3
    n, h, wd, c = x_nhwc.shape
    assert c == cin

    wf, bias = _fold_bn(w.reshape(cout, cin * 9), gamma, beta, mean, var)
    # (Cout, Cin, 3, 3) scaled -> (3,3,Cin,Cout) -> (9, Cin, Cout)
    wm = jnp.transpose(wf.reshape(cout, cin, 3, 3), (2, 3, 1, 0)) \
            .reshape(9, cin, cout).astype(jnp.bfloat16)
    bias = bias.reshape(1, cout)

    xp = jnp.pad(x_nhwc, ((0, 0), (1, 1), (1, 1), (0, 0)))   # conv padding = 1

    th = _tile(h, 64, 1)
    tn = _tile(cout, 256, 128)
    grid = (n, h // th, cout // tn)

    out = pl.pallas_call(
        _conv3x3_bn_leaky_kernel,
        out_shape=jax.ShapeDtypeStruct((n, h, wd, cout), jnp.bfloat16),
        grid_spec=pltpu.PrefetchScalarGridSpec(
            num_scalar_prefetch=0,
            grid=grid,
            in_specs=[
                pl.BlockSpec((1, h + 2, wd + 2, cin), lambda b, hh, j: (b, 0, 0, 0)),
                pl.BlockSpec((9, cin, tn), lambda b, hh, j: (0, 0, j)),
                pl.BlockSpec((1, tn), lambda b, hh, j: (0, j)),
            ],
            out_specs=pl.BlockSpec((1, th, wd, tn), lambda b, hh, j: (b, hh, 0, j)),
        ),
        compiler_params=pltpu.CompilerParams(
            dimension_semantics=("parallel", "parallel", "parallel"),
            vmem_limit_bytes=VMEM_LIMIT),
    )(xp, wm, bias)
    return out


# ----------------------------------------------------------------------------
# Kernel 3: fused SPP pooling (5/9/13, stride 1, 'same') + concat + conv4 (1x1)
# ----------------------------------------------------------------------------
def _spp_conv4_kernel(xp_ref, w_ref, b_ref, o_ref):
    # xp_ref: (1, H+12, W+12, C)  -inf padded input (output of conv3)
    # w_ref:  (4, C, Cout) bf16   conv4 weight split along the concat axis
    #                             order = [identity, pool5, pool9, pool13]
    # b_ref:  (1, Cout) f32
    # o_ref:  (1, H, W, Cout) bf16
    h = o_ref.shape[1]
    wd = o_ref.shape[2]
    cout = o_ref.shape[3]
    c = xp_ref.shape[3]

    def wslice(kj):                       # (H+12, W, C) window shifted along W
        return xp_ref[0, :, pl.ds(kj, wd), :]

    # Row (width) pass: incremental running max 5 -> 9 -> 13.
    r5 = wslice(4)
    for kj in (5, 6, 7, 8):
        r5 = jnp.maximum(r5, wslice(kj))
    r9 = r5
    for kj in (2, 3, 9, 10):
        r9 = jnp.maximum(r9, wslice(kj))
    r13 = r9
    for kj in (0, 1, 11, 12):
        r13 = jnp.maximum(r13, wslice(kj))

    # Column (height) pass.
    def hmax(r, lo, k):
        out = r[lo:lo + h]
        for ki in range(lo + 1, lo + k):
            out = jnp.maximum(out, r[ki:ki + h])
        return out

    x0 = xp_ref[0, pl.ds(6, h), pl.ds(6, wd), :]     # pass-through branch
    p5 = hmax(r5, 4, 5)
    p9 = hmax(r9, 2, 9)
    p13 = hmax(r13, 0, 13)

    # conv4 on the (virtual) concat: sum of per-branch matmuls, f32 accumulate.
    def mm(branch, idx):
        return jnp.dot(branch.reshape(h * wd, c), w_ref[idx],
                       preferred_element_type=jnp.float32)

    acc = mm(x0, 0) + mm(p5, 1) + mm(p9, 2) + mm(p13, 3)
    y = acc + b_ref[...]
    y = jnp.where(y >= 0, y, NEG_SLOPE * y)
    o_ref[...] = y.reshape(1, h, wd, cout).astype(o_ref.dtype)


def spp_conv4_bn_leaky(x_nhwc, params):
    """MaxPool{5,9,13} + channel concat + conv4 (1x1, BN, leaky) in one kernel."""
    w, gamma, beta, mean, var = params
    cout, cin4, kh, kw = w.shape
    assert kh == 1 and kw == 1
    n, h, wd, c = x_nhwc.shape
    assert cin4 == 4 * c

    wf, bias = _fold_bn(w.reshape(cout, cin4), gamma, beta, mean, var)
    wm = wf.T.reshape(4, c, cout).astype(jnp.bfloat16)   # chunk per concat branch
    bias = bias.reshape(1, cout)

    pad = 6   # 13 // 2 ; -inf padding so it never wins a max (matches MaxPool2d)
    xp = jnp.pad(x_nhwc, ((0, 0), (pad, pad), (pad, pad), (0, 0)),
                 constant_values=-jnp.inf)

    out = pl.pallas_call(
        _spp_conv4_kernel,
        out_shape=jax.ShapeDtypeStruct((n, h, wd, cout), jnp.bfloat16),
        grid_spec=pltpu.PrefetchScalarGridSpec(
            num_scalar_prefetch=0,
            grid=(n,),
            in_specs=[
                pl.BlockSpec((1, h + 2 * pad, wd + 2 * pad, c),
                             lambda i: (i, 0, 0, 0)),
                pl.BlockSpec((4, c, cout), lambda i: (0, 0, 0)),
                pl.BlockSpec((1, cout), lambda i: (0, 0)),
            ],
            out_specs=pl.BlockSpec((1, h, wd, cout), lambda i: (i, 0, 0, 0)),
        ),
        compiler_params=pltpu.CompilerParams(
            dimension_semantics=("parallel",),
            vmem_limit_bytes=VMEM_LIMIT),
    )(xp, wm, bias)
    return out


# ----------------------------------------------------------------------------
# SppBlock
# ----------------------------------------------------------------------------
def init_layer(key, cin, cout, k):
    kw_, kg, kb, km, kv = jax.random.split(key, 5)
    weight = 0.05 * jax.random.normal(kw_, (cout, cin, k, k), jnp.float32)
    gamma = 1.0 + 0.1 * jax.random.normal(kg, (cout,), jnp.float32)
    beta = 0.1 * jax.random.normal(kb, (cout,), jnp.float32)
    mean = 0.1 * jax.random.normal(km, (cout,), jnp.float32)
    var = 1.0 + 0.1 * jax.random.uniform(kv, (cout,), jnp.float32)
    return (weight, gamma, beta, mean, var)


def init_spp_block(key, c):
    # Real module uses c = 1024; channel ratios identical.
    half = c // 2
    keys = jax.random.split(key, 6)
    return {
        "conv1": init_layer(keys[0], c, half, 1),
        "conv2": init_layer(keys[1], half, c, 1),
        "conv3": init_layer(keys[2], c, half, 1),
        "conv4": init_layer(keys[3], 2 * c, half, 1),   # 4 * (c/2) concat channels
        "conv5": init_layer(keys[4], half, c, 3),
        "conv6": init_layer(keys[5], c, half, 1),
    }


@jax.jit
def spp_block(x_nchw, params):
    # NCHW -> NHWC, bf16 activations (f32 accumulation inside the kernels).
    x = jnp.transpose(x_nchw, (0, 2, 3, 1)).astype(jnp.bfloat16)
    x = conv1x1_bn_leaky(x, params["conv1"])
    x = conv1x1_bn_leaky(x, params["conv2"])
    x = conv1x1_bn_leaky(x, params["conv3"])
    x = spp_conv4_bn_leaky(x, params["conv4"])   # pools + concat + conv4 fused
    x = conv3x3_bn_leaky(x, params["conv5"])
    x = conv1x1_bn_leaky(x, params["conv6"])
    # NHWC -> NCHW, back to f32 to match the PyTorch output convention.
    return jnp.transpose(x.astype(jnp.float32), (0, 3, 1, 2))


if __name__ == "__main__":
    key = jax.random.PRNGKey(0)
    k_params, kx = jax.random.split(key)

    # Small test config (real module uses C=1024); channels kept multiples of
    # 128 so every matmul lane dimension is 128-dense.
    C, N, H, W = 256, 2, 8, 8
    x = jax.random.normal(kx, (N, C, H, W), jnp.float32)     # NCHW

    params = init_spp_block(k_params, C)
    out = jax.block_until_ready(spp_block(x, params))

    expected_shape = (N, C // 2, H, W)
    assert out.shape == expected_shape, (out.shape, expected_shape)
    assert jnp.all(jnp.isfinite(out))
    print("KERNEL_OK")
</pallas_src>

<mosaic_0001>
module attributes {stable_mosaic.version = 11 : i64} {
  func.func @_mm_bn_leaky_kernel(%arg0: i32, %arg1: i32, %arg2: i32, %arg3: memref<128x256xbf16, #tpu.memory_space<vmem>>, %arg4: memref<256x128xbf16, #tpu.memory_space<vmem>>, %arg5: memref<1x128xf32, #tpu.memory_space<vmem>>, %arg6: memref<128x128xbf16, #tpu.memory_space<vmem>>, %arg7: memref<128x128xf32, #tpu.memory_space<vmem>>) attributes {dimension_semantics = [#tpu.dimension_semantics<parallel>, #tpu.dimension_semantics<parallel>, #tpu.dimension_semantics<arbitrary>], iteration_bounds = array<i64: 1, 1, 1>, scalar_prefetch = 0 : i64, scratch_operands = 1 : i64, tpu.core_type = #tpu.core_type<tc>, window_params = [{transform_indices = @transform_0, window_bounds = array<i64: 128, 256>}, {transform_indices = @transform_1, window_bounds = array<i64: 256, 128>}, {transform_indices = @transform_2, window_bounds = array<i64: 1, 128>}, {transform_indices = @transform_3, window_bounds = array<i64: 128, 128>}]} {
    %c0_i32 = arith.constant 0 : i32
    %0 = arith.cmpi eq, %arg2, %c0_i32 : i32
    %1 = arith.extui %0 : i1 to i32
    %c0_i32_0 = arith.constant 0 : i32
    %2 = arith.cmpi ne, %1, %c0_i32_0 : i32
    scf.if %2 {
      %cst_10 = arith.constant 0.000000e+00 : f32
      %12 = vector.broadcast %cst_10 : f32 to vector<128x128xf32>
      %c0_11 = arith.constant 0 : index
      %c0_12 = arith.constant 0 : index
      %13 = vector.load %arg7[%c0_11, %c0_12] : memref<128x128xf32, #tpu.memory_space<vmem>>, vector<128x128xf32>
      tpu.vector_store %arg7[%c0_11, %c0_12], %12 {strides = array<i32>} : memref<128x128xf32, #tpu.memory_space<vmem>>, vector<128x128xf32>,
    } else {
    }
    %c0 = arith.constant 0 : index
    %c0_1 = arith.constant 0 : index
    %3 = vector.load %arg7[%c0, %c0_1] : memref<128x128xf32, #tpu.memory_space<vmem>>, vector<128x128xf32>
    %c0_2 = arith.constant 0 : index
    %c0_3 = arith.constant 0 : index
    %4 = vector.load %arg3[%c0_2, %c0_3] : memref<128x256xbf16, #tpu.memory_space<vmem>>, vector<128x256xbf16>
    %c0_4 = arith.constant 0 : index
    %c0_5 = arith.constant 0 : index
    %5 = vector.load %arg4[%c0_4, %c0_5] : memref<256x128xbf16, #tpu.memory_space<vmem>>, vector<256x128xbf16>
    %cst = arith.constant dense<0.000000e+00> : vector<128x128xf32>
    %6 = tpu.matmul %4, %5, %cst {dimension_numbers = #tpu.dot_dimension_numbers<[1], [0], [0], [1], [0, 0, 1, 1], [], []>} : vector<128x256xbf16>, vector<256x128xbf16>, vector<128x128xf32> -> vector<128x128xf32>
    %7 = arith.addf %3, %6 : vector<128x128xf32>
    %c0_6 = arith.constant 0 : index
    %c0_7 = arith.constant 0 : index
    %8 = vector.load %arg7[%c0_6, %c0_7] : memref<128x128xf32, #tpu.memory_space<vmem>>, vector<128x128xf32>
    tpu.vector_store %arg7[%c0_6, %c0_7], %7 {strides = array<i32>} : memref<128x128xf32, #tpu.memory_space<vmem>>, vector<128x128xf32>,
    %c0_i32_8 = arith.constant 0 : i32
    %9 = arith.cmpi eq, %arg2, %c0_i32_8 : i32
    %10 = arith.extui %9 : i1 to i32
    %c0_i32_9 = arith.constant 0 : i32
    %11 = arith.cmpi ne, %10, %c0_i32_9 : i32
    scf.if %11 {
      %c0_10 = arith.constant 0 : index
      %c0_11 = arith.constant 0 : index
      %12 = vector.load %arg5[%c0_10, %c0_11] : memref<1x128xf32, #tpu.memory_space<vmem>>, vector<1x128xf32>
      %13 = vector.broadcast %12 : vector<1x128xf32> to vector<128x128xf32>
      %14 = arith.addf %7, %13 : vector<128x128xf32>
      %cst_12 = arith.constant 0.000000e+00 : f32
      %15 = vector.broadcast %cst_12 : f32 to vector<128x128xf32>
      %16 = arith.cmpf oge, %14, %15 : vector<128x128xf32>
      %cst_13 = arith.constant 1.000000e-01 : f32
      %17 = vector.broadcast %cst_13 : f32 to vector<128x128xf32>
      %18 = arith.mulf %17, %14 : vector<128x128xf32>
      %19 = arith.select %16, %14, %18 : vector<128x128xi1>, vector<128x128xf32>
      %20 = arith.truncf %19 : vector<128x128xf32> to vector<128x128xbf16>
      %c0_14 = arith.constant 0 : index
      %c0_15 = arith.constant 0 : index
      %21 = vector.load %arg6[%c0_14, %c0_15] : memref<128x128xbf16, #tpu.memory_space<vmem>>, vector<128x128xbf16>
      tpu.vector_store %arg6[%c0_14, %c0_15], %20 {strides = array<i32>} : memref<128x128xbf16, #tpu.memory_space<vmem>>, vector<128x128xbf16>,
    } else {
    }
    return
  }
  func.func @transform_0(%arg0: i32, %arg1: i32, %arg2: i32) -> (i32, i32) {
    %c0_i32 = arith.constant 0 : i32
    return %arg0, %arg2 : i32, i32
  }
  func.func @transform_1(%arg0: i32, %arg1: i32, %arg2: i32) -> (i32, i32) {
    %c0_i32 = arith.constant 0 : i32
    return %arg2, %arg1 : i32, i32
  }
  func.func @transform_2(%arg0: i32, %arg1: i32, %arg2: i32) -> (i32, i32) {
    %c0_i32 = arith.constant 0 : i32
    %c0_i32_0 = arith.constant 0 : i32
    return %c0_i32, %arg1 : i32, i32
  }
  func.func @transform_3(%arg0: i32, %arg1: i32, %arg2: i32) -> (i32, i32) {
    %c0_i32 = arith.constant 0 : i32
    return %arg0, %arg1 : i32, i32
  }
}

module attributes {stable_mosaic.version = 11 : i64} {
  func.func @_mm_bn_leaky_kernel(%arg0: i32, %arg1: i32, %arg2: i32, %arg3: memref<128x128xbf16, #tpu.memory_space<vmem>>, %arg4: memref<128x256xbf16, #tpu.memory_space<vmem>>, %arg5: memref<1x256xf32, #tpu.memory_space<vmem>>, %arg6: memref<128x256xbf16, #tpu.memory_space<vmem>>, %arg7: memref<128x256xf32, #tpu.memory_space<vmem>>) attributes {dimension_semantics = [#tpu.dimension_semantics<parallel>, #tpu.dimension_semantics<parallel>, #tpu.dimension_semantics<arbitrary>], iteration_bounds = array<i64: 1, 1, 1>, scalar_prefetch = 0 : i64, scratch_operands = 1 : i64, tpu.core_type = #tpu.core_type<tc>, window_params = [{transform_indices = @transform_0, window_bounds = array<i64: 128, 128>}, {transform_indices = @transform_1, window_bounds = array<i64: 128, 256>}, {transform_indices = @transform_2, window_bounds = array<i64: 1, 256>}, {transform_indices = @transform_3, window_bounds = array<i64: 128, 256>}]} {
    %c0_i32 = arith.constant 0 : i32
    %0 = arith.cmpi eq, %arg2, %c0_i32 : i32
    %1 = arith.extui %0 : i1 to i32
    %c0_i32_0 = arith.constant 0 : i32
    %2 = arith.cmpi ne, %1, %c0_i32_0 : i32
    scf.if %2 {
      %cst_10 = arith.constant 0.000000e+00 : f32
      %12 = vector.broadcast %cst_10 : f32 to vector<128x256xf32>
      %c0_11 = arith.constant 0 : index
      %c0_12 = arith.constant 0 : index
      %13 = vector.load %arg7[%c0_11, %c0_12] : memref<128x256xf32, #tpu.memory_space<vmem>>, vector<128x256xf32>
      tpu.vector_store %arg7[%c0_11, %c0_12], %12 {strides = array<i32>} : memref<128x256xf32, #tpu.memory_space<vmem>>, vector<128x256xf32>,
    } else {
    }
    %c0 = arith.constant 0 : index
    %c0_1 = arith.constant 0 : index
    %3 = vector.load %arg7[%c0, %c0_1] : memref<128x256xf32, #tpu.memory_space<vmem>>, vector<128x256xf32>
    %c0_2 = arith.constant 0 : index
    %c0_3 = arith.constant 0 : index
    %4 = vector.load %arg3[%c0_2, %c0_3] : memref<128x128xbf16, #tpu.memory_space<vmem>>, vector<128x128xbf16>
    %c0_4 = arith.constant 0 : index
    %c0_5 = arith.constant 0 : index
    %5 = vector.load %arg4[%c0_4, %c0_5] : memref<128x256xbf16, #tpu.memory_space<vmem>>, vector<128x256xbf16>
    %cst = arith.constant dense<0.000000e+00> : vector<128x256xf32>
    %6 = tpu.matmul %4, %5, %cst {dimension_numbers = #tpu.dot_dimension_numbers<[1], [0], [0], [1], [0, 0, 1, 1], [], []>} : vector<128x128xbf16>, vector<128x256xbf16>, vector<128x256xf32> -> vector<128x256xf32>
    %7 = arith.addf %3, %6 : vector<128x256xf32>
    %c0_6 = arith.constant 0 : index
    %c0_7 = arith.constant 0 : index
    %8 = vector.load %arg7[%c0_6, %c0_7] : memref<128x256xf32, #tpu.memory_space<vmem>>, vector<128x256xf32>
    tpu.vector_store %arg7[%c0_6, %c0_7], %7 {strides = array<i32>} : memref<128x256xf32, #tpu.memory_space<vmem>>, vector<128x256xf32>,
    %c0_i32_8 = arith.constant 0 : i32
    %9 = arith.cmpi eq, %arg2, %c0_i32_8 : i32
    %10 = arith.extui %9 : i1 to i32
    %c0_i32_9 = arith.constant 0 : i32
    %11 = arith.cmpi ne, %10, %c0_i32_9 : i32
    scf.if %11 {
      %c0_10 = arith.constant 0 : index
      %c0_11 = arith.constant 0 : index
      %12 = vector.load %arg5[%c0_10, %c0_11] : memref<1x256xf32, #tpu.memory_space<vmem>>, vector<1x256xf32>
      %13 = vector.broadcast %12 : vector<1x256xf32> to vector<128x256xf32>
      %14 = arith.addf %7, %13 : vector<128x256xf32>
      %cst_12 = arith.constant 0.000000e+00 : f32
      %15 = vector.broadcast %cst_12 : f32 to vector<128x256xf32>
      %16 = arith.cmpf oge, %14, %15 : vector<128x256xf32>
      %cst_13 = arith.constant 1.000000e-01 : f32
      %17 = vector.broadcast %cst_13 : f32 to vector<128x256xf32>
      %18 = arith.mulf %17, %14 : vector<128x256xf32>
      %19 = arith.select %16, %14, %18 : vector<128x256xi1>, vector<128x256xf32>
      %20 = arith.truncf %19 : vector<128x256xf32> to vector<128x256xbf16>
      %c0_14 = arith.constant 0 : index
      %c0_15 = arith.constant 0 : index
      %21 = vector.load %arg6[%c0_14, %c0_15] : memref<128x256xbf16, #tpu.memory_space<vmem>>, vector<128x256xbf16>
      tpu.vector_store %arg6[%c0_14, %c0_15], %20 {strides = array<i32>} : memref<128x256xbf16, #tpu.memory_space<vmem>>, vector<128x256xbf16>,
    } else {
    }
    return
  }
  func.func @transform_0(%arg0: i32, %arg1: i32, %arg2: i32) -> (i32, i32) {
    %c0_i32 = arith.constant 0 : i32
    return %arg0, %arg2 : i32, i32
  }
  func.func @transform_1(%arg0: i32, %arg1: i32, %arg2: i32) -> (i32, i32) {
    %c0_i32 = arith.constant 0 : i32
    return %arg2, %arg1 : i32, i32
  }
  func.func @transform_2(%arg0: i32, %arg1: i32, %arg2: i32) -> (i32, i32) {
    %c0_i32 = arith.constant 0 : i32
    %c0_i32_0 = arith.constant 0 : i32
    return %c0_i32, %arg1 : i32, i32
  }
  func.func @transform_3(%arg0: i32, %arg1: i32, %arg2: i32) -> (i32, i32) {
    %c0_i32 = arith.constant 0 : i32
    return %arg0, %arg1 : i32, i32
  }
}

module attributes {stable_mosaic.version = 11 : i64} {
  func.func @_spp_conv4_kernel(%arg0: i32, %arg1: memref<1x20x20x128xbf16, #tpu.memory_space<vmem>>, %arg2: memref<4x128x128xbf16, #tpu.memory_space<vmem>>, %arg3: memref<1x128xf32, #tpu.memory_space<vmem>>, %arg4: memref<1x8x8x128xbf16, #tpu.memory_space<vmem>>) attributes {dimension_semantics = [#tpu.dimension_semantics<parallel>], iteration_bounds = array<i64: 2>, scalar_prefetch = 0 : i64, scratch_operands = 0 : i64, tpu.core_type = #tpu.core_type<tc>, window_params = [{transform_indices = @transform_0, window_bounds = array<i64: 1, 20, 20, 128>}, {pipeline_mode = #tpu.pipeline_mode<synchronous>, transform_indices = @transform_1, window_bounds = array<i64: 4, 128, 128>}, {pipeline_mode = #tpu.pipeline_mode<synchronous>, transform_indices = @transform_2, window_bounds = array<i64: 1, 128>}, {transform_indices = @transform_3, window_bounds = array<i64: 1, 8, 8, 128>}]} {
    %c0 = arith.constant 0 : index
    %c0_0 = arith.constant 0 : index
    %c4 = arith.constant 4 : index
    %c0_1 = arith.constant 0 : index
    %0 = vector.load %arg1[%c0, %c0_0, %c4, %c0_1] : memref<1x20x20x128xbf16, #tpu.memory_space<vmem>>, vector<1x20x8x128xbf16>
    %1 = vector.shape_cast %0 : vector<1x20x8x128xbf16> to vector<20x8x128xbf16>
    %c0_2 = arith.constant 0 : index
    %c0_3 = arith.constant 0 : index
    %c5 = arith.constant 5 : index
    %c0_4 = arith.constant 0 : index
    %2 = vector.load %arg1[%c0_2, %c0_3, %c5, %c0_4] : memref<1x20x20x128xbf16, #tpu.memory_space<vmem>>, vector<1x20x8x128xbf16>
    %3 = vector.shape_cast %2 : vector<1x20x8x128xbf16> to vector<20x8x128xbf16>
    %4 = arith.maximumf %1, %3 : vector<20x8x128xbf16>
    %c0_5 = arith.constant 0 : index
    %c0_6 = arith.constant 0 : index
    %c6 = arith.constant 6 : index
    %c0_7 = arith.constant 0 : index
    %5 = vector.load %arg1[%c0_5, %c0_6, %c6, %c0_7] : memref<1x20x20x128xbf16, #tpu.memory_space<vmem>>, vector<1x20x8x128xbf16>
    %6 = vector.shape_cast %5 : vector<1x20x8x128xbf16> to vector<20x8x128xbf16>
    %7 = arith.maximumf %4, %6 : vector<20x8x128xbf16>
    %c0_8 = arith.constant 0 : index
    %c0_9 = arith.constant 0 : index
    %c7 = arith.constant 7 : index
    %c0_10 = arith.constant 0 : index
    %8 = vector.load %arg1[%c0_8, %c0_9, %c7, %c0_10] : memref<1x20x20x128xbf16, #tpu.memory_space<vmem>>, vector<1x20x8x128xbf16>
    %9 = vector.shape_cast %8 : vector<1x20x8x128xbf16> to vector<20x8x128xbf16>
    %10 = arith.maximumf %7, %9 : vector<20x8x128xbf16>
    %c0_11 = arith.constant 0 : index
    %c0_12 = arith.constant 0 : index
    %c8 = arith.constant 8 : index
    %c0_13 = arith.constant 0 : index
    %11 = vector.load %arg1[%c0_11, %c0_12, %c8, %c0_13] : memref<1x20x20x128xbf16, #tpu.memory_space<vmem>>, vector<1x20x8x128xbf16>
    %12 = vector.shape_cast %11 : vector<1x20x8x128xbf16> to vector<20x8x128xbf16>
    %13 = arith.maximumf %10, %12 : vector<20x8x128xbf16>
    %c0_14 = arith.constant 0 : index
    %c0_15 = arith.constant 0 : index
    %c2 = arith.constant 2 : index
    %c0_16 = arith.constant 0 : index
    %14 = vector.load %arg1[%c0_14, %c0_15, %c2, %c0_16] : memref<1x20x20x128xbf16, #tpu.memory_space<vmem>>, vector<1x20x8x128xbf16>
    %15 = vector.shape_cast %14 : vector<1x20x8x128xbf16> to vector<20x8x128xbf16>
    %16 = arith.maximumf %13, %15 : vector<20x8x128xbf16>
    %c0_17 = arith.constant 0 : index
    %c0_18 = arith.constant 0 : index
    %c3 = arith.constant 3 : index
    %c0_19 = arith.constant 0 : index
    %17 = vector.load %arg1[%c0_17, %c0_18, %c3, %c0_19] : memref<1x20x20x128xbf16, #tpu.memory_space<vmem>>, vector<1x20x8x128xbf16>
    %18 = vector.shape_cast %17 : vector<1x20x8x128xbf16> to vector<20x8x128xbf16>
    %19 = arith.maximumf %16, %18 : vector<20x8x128xbf16>
    %c0_20 = arith.constant 0 : index
    %c0_21 = arith.constant 0 : index
    %c9 = arith.constant 9 : index
    %c0_22 = arith.constant 0 : index
    %20 = vector.load %arg1[%c0_20, %c0_21, %c9, %c0_22] : memref<1x20x20x128xbf16, #tpu.memory_space<vmem>>, vector<1x20x8x128xbf16>
    %21 = vector.shape_cast %20 : vector<1x20x8x128xbf16> to vector<20x8x128xbf16>
    %22 = arith.maximumf %19, %21 : vector<20x8x128xbf16>
    %c0_23 = arith.constant 0 : index
    %c0_24 = arith.constant 0 : index
    %c10 = arith.constant 10 : index
    %c0_25 = arith.constant 0 : index
    %23 = vector.load %arg1[%c0_23, %c0_24, %c10, %c0_25] : memref<1x20x20x128xbf16, #tpu.memory_space<vmem>>, vector<1x20x8x128xbf16>
    %24 = vector.shape_cast %23 : vector<1x20x8x128xbf16> to vector<20x8x128xbf16>
    %25 = arith.maximumf %22, %24 : vector<20x8x128xbf16>
    %c0_26 = arith.constant 0 : index
    %c0_27 = arith.constant 0 : index
    %c0_28 = arith.constant 0 : index
    %c0_29 = arith.constant 0 : index
    %26 = vector.load %arg1[%c0_26, %c0_27, %c0_28, %c0_29] : memref<1x20x20x128xbf16, #tpu.memory_space<vmem>>, vector<1x20x8x128xbf16>
    %27 = vector.shape_cast %26 : vector<1x20x8x128xbf16> to vector<20x8x128xbf16>
    %28 = arith.maximumf %25, %27 : vector<20x8x128xbf16>
    %c0_30 = arith.constant 0 : index
    %c0_31 = arith.constant 0 : index
    %c1 = arith.constant 1 : index
    %c0_32 = arith.constant 0 : index
    %29 = vector.load %arg1[%c0_30, %c0_31, %c1, %c0_32] : memref<1x20x20x128xbf16, #tpu.memory_space<vmem>>, vector<1x20x8x128xbf16>
    %30 = vector.shape_cast %29 : vector<1x20x8x128xbf16> to vector<20x8x128xbf16>
    %31 = arith.maximumf %28, %30 : vector<20x8x128xbf16>
    %c0_33 = arith.constant 0 : index
    %c0_34 = arith.constant 0 : index
    %c11 = arith.constant 11 : index
    %c0_35 = arith.constant 0 : index
    %32 = vector.load %arg1[%c0_33, %c0_34, %c11, %c0_35] : memref<1x20x20x128xbf16, #tpu.memory_space<vmem>>, vector<1x20x8x128xbf16>
    %33 = vector.shape_cast %32 : vector<1x20x8x128xbf16> to vector<20x8x128xbf16>
    %34 = arith.maximumf %31, %33 : vector<20x8x128xbf16>
    %c0_36 = arith.constant 0 : index
    %c0_37 = arith.constant 0 : index
    %c12 = arith.constant 12 : index
    %c0_38 = arith.constant 0 : index
    %35 = vector.load %arg1[%c0_36, %c0_37, %c12, %c0_38] : memref<1x20x20x128xbf16, #tpu.memory_space<vmem>>, vector<1x20x8x128xbf16>
    %36 = vector.shape_cast %35 : vector<1x20x8x128xbf16> to vector<20x8x128xbf16>
    %37 = arith.maximumf %34, %36 : vector<20x8x128xbf16>
    %c0_39 = arith.constant 0 : index
    %c6_40 = arith.constant 6 : index
    %c6_41 = arith.constant 6 : index
    %c0_42 = arith.constant 0 : index
    %38 = vector.load %arg1[%c0_39, %c6_40, %c6_41, %c0_42] : memref<1x20x20x128xbf16, #tpu.memory_space<vmem>>, vector<1x8x8x128xbf16>
    %39 = vector.shape_cast %38 : vector<1x8x8x128xbf16> to vector<8x8x128xbf16>
    %40 = vector.extract_strided_slice %13 {offsets = [4, 0, 0], sizes = [8, 8, 128], strides = [1, 1, 1]} : vector<20x8x128xbf16> to vector<8x8x128xbf16>
    %41 = vector.extract_strided_slice %13 {offsets = [5, 0, 0], sizes = [8, 8, 128], strides = [1, 1, 1]} : vector<20x8x128xbf16> to vector<8x8x128xbf16>
    %42 = arith.maximumf %40, %41 : vector<8x8x128xbf16>
    %43 = vector.extract_strided_slice %13 {offsets = [6, 0, 0], sizes = [8, 8, 128], strides = [1, 1, 1]} : vector<20x8x128xbf16> to vector<8x8x128xbf16>
    %44 = arith.maximumf %42, %43 : vector<8x8x128xbf16>
    %45 = vector.extract_strided_slice %13 {offsets = [7, 0, 0], sizes = [8, 8, 128], strides = [1, 1, 1]} : vector<20x8x128xbf16> to vector<8x8x128xbf16>
    %46 = arith.maximumf %44, %45 : vector<8x8x128xbf16>
    %47 = vector.extract_strided_slice %13 {offsets = [8, 0, 0], sizes = [8, 8, 128], strides = [1, 1, 1]} : vector<20x8x128xbf16> to vector<8x8x128xbf16>
    %48 = arith.maximumf %46, %47 : vector<8x8x128xbf16>
    %49 = vector.extract_strided_slice %25 {offsets = [2, 0, 0], sizes = [8, 8, 128], strides = [1, 1, 1]} : vector<20x8x128xbf16> to vector<8x8x128xbf16>
    %50 = vector.extract_strided_slice %25 {offsets = [3, 0, 0], sizes = [8, 8, 128], strides = [1, 1, 1]} : vector<20x8x128xbf16> to vector<8x8x128xbf16>
    %51 = arith.maximumf %49, %50 : vector<8x8x128xbf16>
    %52 = vector.extract_strided_slice %25 {offsets = [4, 0, 0], sizes = [8, 8, 128], strides = [1, 1, 1]} : vector<20x8x128xbf16> to vector<8x8x128xbf16>
    %53 = arith.maximumf %51, %52 : vector<8x8x128xbf16>
    %54 = vector.extract_strided_slice %25 {offsets = [5, 0, 0], sizes = [8, 8, 128], strides = [1, 1, 1]} : vector<20x8x128xbf16> to vector<8x8x128xbf16>
    %55 = arith.maximumf %53, %54 : vector<8x8x128xbf16>
    %56 = vector.extract_strided_slice %25 {offsets = [6, 0, 0], sizes = [8, 8, 128], strides = [1, 1, 1]} : vector<20x8x128xbf16> to vector<8x8x128xbf16>
    %57 = arith.maximumf %55, %56 : vector<8x8x128xbf16>
    %58 = vector.extract_strided_slice %25 {offsets = [7, 0, 0], sizes = [8, 8, 128], strides = [1, 1, 1]} : vector<20x8x128xbf16> to vector<8x8x128xbf16>
    %59 = arith.maximumf %57, %58 : vector<8x8x128xbf16>
    %60 = vector.extract_strided_slice %25 {offsets = [8, 0, 0], sizes = [8, 8, 128], strides = [1, 1, 1]} : vector<20x8x128xbf16> to vector<8x8x128xbf16>
    %61 = arith.maximumf %59, %60 : vector<8x8x128xbf16>
    %62 = vector.extract_strided_slice %25 {offsets = [9, 0, 0], sizes = [8, 8, 128], strides = [1, 1, 1]} : vector<20x8x128xbf16> to vector<8x8x128xbf16>
    %63 = arith.maximumf %61, %62 : vector<8x8x128xbf16>
    %64 = vector.extract_strided_slice %25 {offsets = [10, 0, 0], sizes = [8, 8, 128], strides = [1, 1, 1]} : vector<20x8x128xbf16> to vector<8x8x128xbf16>
    %65 = arith.maximumf %63, %64 : vector<8x8x128xbf16>
    %66 = vector.extract_strided_slice %37 {offsets = [0, 0, 0], sizes = [8, 8, 128], strides = [1, 1, 1]} : vector<20x8x128xbf16> to vector<8x8x128xbf16>
    %67 = vector.extract_strided_slice %37 {offsets = [1, 0, 0], sizes = [8, 8, 128], strides = [1, 1, 1]} : vector<20x8x128xbf16> to vector<8x8x128xbf16>
    %68 = arith.maximumf %66, %67 : vector<8x8x128xbf16>
    %69 = vector.extract_strided_slice %37 {offsets = [2, 0, 0], sizes = [8, 8, 128], strides = [1, 1, 1]} : vector<20x8x128xbf16> to vector<8x8x128xbf16>
    %70 = arith.maximumf %68, %69 : vector<8x8x128xbf16>
    %71 = vector.extract_strided_slice %37 {offsets = [3, 0, 0], sizes = [8, 8, 128], strides = [1, 1, 1]} : vector<20x8x128xbf16> to vector<8x8x128xbf16>
    %72 = arith.maximumf %70, %71 : vector<8x8x128xbf16>
    %73 = vector.extract_strided_slice %37 {offsets = [4, 0, 0], sizes = [8, 8, 128], strides = [1, 1, 1]} : vector<20x8x128xbf16> to vector<8x8x128xbf16>
    %74 = arith.maximumf %72, %73 : vector<8x8x128xbf16>
    %75 = vector.extract_strided_slice %37 {offsets = [5, 0, 0], sizes = [8, 8, 128], strides = [1, 1, 1]} : vector<20x8x128xbf16> to vector<8x8x128xbf16>
    %76 = arith.maximumf %74, %75 : vector<8x8x128xbf16>
    %77 = vector.extract_strided_slice %37 {offsets = [6, 0, 0], sizes = [8, 8, 128], strides = [1, 1, 1]} : vector<20x8x128xbf16> to vector<8x8x128xbf16>
    %78 = arith.maximumf %76, %77 : vector<8x8x128xbf16>
    %79 = vector.extract_strided_slice %37 {offsets = [7, 0, 0], sizes = [8, 8, 128], strides = [1, 1, 1]} : vector<20x8x128xbf16> to vector<8x8x128xbf16>
    %80 = arith.maximumf %78, %79 : vector<8x8x128xbf16>
    %81 = vector.extract_strided_slice %37 {offsets = [8, 0, 0], sizes = [8, 8, 128], strides = [1, 1, 1]} : vector<20x8x128xbf16> to vector<8x8x128xbf16>
    %82 = arith.maximumf %80, %81 : vector<8x8x128xbf16>
    %83 = vector.extract_strided_slice %37 {offsets = [9, 0, 0], sizes = [8, 8, 128], strides = [1, 1, 1]} : vector<20x8x128xbf16> to vector<8x8x128xbf16>
    %84 = arith.maximumf %82, %83 : vector<8x8x128xbf16>
    %85 = vector.extract_strided_slice %37 {offsets = [10, 0, 0], sizes = [8, 8, 128], strides = [1, 1, 1]} : vector<20x8x128xbf16> to vector<8x8x128xbf16>
    %86 = arith.maximumf %84, %85 : vector<8x8x128xbf16>
    %87 = vector.extract_strided_slice %37 {offsets = [11, 0, 0], sizes = [8, 8, 128], strides = [1, 1, 1]} : vector<20x8x128xbf16> to vector<8x8x128xbf16>
    %88 = arith.maximumf %86, %87 : vector<8x8x128xbf16>
    %89 = vector.extract_strided_slice %37 {offsets = [12, 0, 0], sizes = [8, 8, 128], strides = [1, 1, 1]} : vector<20x8x128xbf16> to vector<8x8x128xbf16>
    %90 = arith.maximumf %88, %89 : vector<8x8x128xbf16>
    %91 = vector.shape_cast %39 : vector<8x8x128xbf16> to vector<64x128xbf16>
    %c0_43 = arith.constant 0 : index
    %c0_44 = arith.constant 0 : index
    %c0_45 = arith.constant 0 : index
    %92 = vector.load %arg2[%c0_43, %c0_44, %c0_45] : memref<4x128x128xbf16, #tpu.memory_space<vmem>>, vector<1x128x128xbf16>
    %93 = vector.shape_cast %92 : vector<1x128x128xbf16> to vector<128x128xbf16>
    %cst = arith.constant dense<0.000000e+00> : vector<64x128xf32>
    %94 = tpu.matmul %91, %93, %cst {dimension_numbers = #tpu.dot_dimension_numbers<[1], [0], [0], [1], [0, 0, 1, 1], [], []>} : vector<64x128xbf16>, vector<128x128xbf16>, vector<64x128xf32> -> vector<64x128xf32>
    %95 = vector.shape_cast %48 : vector<8x8x128xbf16> to vector<64x128xbf16>
    %c1_46 = arith.constant 1 : index
    %c0_47 = arith.constant 0 : index
    %c0_48 = arith.constant 0 : index
    %96 = vector.load %arg2[%c1_46, %c0_47, %c0_48] : memref<4x128x128xbf16, #tpu.memory_space<vmem>>, vector<1x128x128xbf16>
    %97 = vector.shape_cast %96 : vector<1x128x128xbf16> to vector<128x128xbf16>
    %cst_49 = arith.constant dense<0.000000e+00> : vector<64x128xf32>
    %98 = tpu.matmul %95, %97, %cst_49 {dimension_numbers = #tpu.dot_dimension_numbers<[1], [0], [0], [1], [0, 0, 1, 1], [], []>} : vector<64x128xbf16>, vector<128x128xbf16>, vector<64x128xf32> -> vector<64x128xf32>
    %99 = arith.addf %94, %98 : vector<64x128xf32>
    %100 = vector.shape_cast %65 : vector<8x8x128xbf16> to vector<64x128xbf16>
    %c2_50 = arith.constant 2 : index
    %c0_51 = arith.constant 0 : index
    %c0_52 = arith.constant 0 : index
    %101 = vector.load %arg2[%c2_50, %c0_51, %c0_52] : memref<4x128x128xbf16, #tpu.memory_space<vmem>>, vector<1x128x128xbf16>
    %102 = vector.shape_cast %101 : vector<1x128x128xbf16> to vector<128x128xbf16>
    %cst_53 = arith.constant dense<0.000000e+00> : vector<64x128xf32>
    %103 = tpu.matmul %100, %102, %cst_53 {dimension_numbers = #tpu.dot_dimension_numbers<[1], [0], [0], [1], [0, 0, 1, 1], [], []>} : vector<64x128xbf16>, vector<128x128xbf16>, vector<64x128xf32> -> vector<64x128xf32>
    %104 = arith.addf %99, %103 : vector<64x128xf32>
    %105 = vector.shape_cast %90 : vector<8x8x128xbf16> to vector<64x128xbf16>
    %c3_54 = arith.constant 3 : index
    %c0_55 = arith.constant 0 : index
    %c0_56 = arith.constant 0 : index
    %106 = vector.load %arg2[%c3_54, %c0_55, %c0_56] : memref<4x128x128xbf16, #tpu.memory_space<vmem>>, vector<1x128x128xbf16>
    %107 = vector.shape_cast %106 : vector<1x128x128xbf16> to vector<128x128xbf16>
    %cst_57 = arith.constant dense<0.000000e+00> : vector<64x128xf32>
    %108 = tpu.matmul %105, %107, %cst_57 {dimension_numbers = #tpu.dot_dimension_numbers<[1], [0], [0], [1], [0, 0, 1, 1], [], []>} : vector<64x128xbf16>, vector<128x128xbf16>, vector<64x128xf32> -> vector<64x128xf32>
    %109 = arith.addf %104, %108 : vector<64x128xf32>
    %c0_58 = arith.constant 0 : index
    %c0_59 = arith.constant 0 : index
    %110 = vector.load %arg3[%c0_58, %c0_59] : memref<1x128xf32, #tpu.memory_space<vmem>>, vector<1x128xf32>
    %111 = vector.broadcast %110 : vector<1x128xf32> to vector<64x128xf32>
    %112 = arith.addf %109, %111 : vector<64x128xf32>
    %cst_60 = arith.constant 0.000000e+00 : f32
    %113 = vector.broadcast %cst_60 : f32 to vector<64x128xf32>
    %114 = arith.cmpf oge, %112, %113 : vector<64x128xf32>
    %cst_61 = arith.constant 1.000000e-01 : f32
    %115 = vector.broadcast %cst_61 : f32 to vector<64x128xf32>
    %116 = arith.mulf %115, %112 : vector<64x128xf32>
    %117 = arith.select %114, %112, %116 : vector<64x128xi1>, vector<64x128xf32>
    %118 = vector.shape_cast %117 : vector<64x128xf32> to vector<1x8x8x128xf32>
    %119 = arith.truncf %118 : vector<1x8x8x128xf32> to vector<1x8x8x128xbf16>
    %c0_62 = arith.constant 0 : index
    %c0_63 = arith.constant 0 : index
    %c0_64 = arith.constant 0 : index
    %c0_65 = arith.constant 0 : index
    %120 = vector.load %arg4[%c0_62, %c0_63, %c0_64, %c0_65] : memref<1x8x8x128xbf16, #tpu.memory_space<vmem>>, vector<1x8x8x128xbf16>
    tpu.vector_store %arg4[%c0_62, %c0_63, %c0_64, %c0_65], %119 {strides = array<i32>} : memref<1x8x8x128xbf16, #tpu.memory_space<vmem>>, vector<1x8x8x128xbf16>,
    return
  }
  func.func @transform_0(%arg0: i32) -> (i32, i32, i32, i32) {
    %c0_i32 = arith.constant 0 : i32
    %c0_i32_0 = arith.constant 0 : i32
    %c0_i32_1 = arith.constant 0 : i32
    %c0_i32_2 = arith.constant 0 : i32
    return %arg0, %c0_i32, %c0_i32_0, %c0_i32_1 : i32, i32, i32, i32
  }
  func.func @transform_1(%arg0: i32) -> (i32, i32, i32) {
    %c0_i32 = arith.constant 0 : i32
    %c0_i32_0 = arith.constant 0 : i32
    %c0_i32_1 = arith.constant 0 : i32
    %c0_i32_2 = arith.constant 0 : i32
    return %c0_i32, %c0_i32_0, %c0_i32_1 : i32, i32, i32
  }
  func.func @transform_2(%arg0: i32) -> (i32, i32) {
    %c0_i32 = arith.constant 0 : i32
    %c0_i32_0 = arith.constant 0 : i32
    %c0_i32_1 = arith.constant 0 : i32
    return %c0_i32, %c0_i32_0 : i32, i32
  }
  func.func @transform_3(%arg0: i32) -> (i32, i32, i32, i32) {
    %c0_i32 = arith.constant 0 : i32
    %c0_i32_0 = arith.constant 0 : i32
    %c0_i32_1 = arith.constant 0 : i32
    %c0_i32_2 = arith.constant 0 : i32
    return %arg0, %c0_i32, %c0_i32_0, %c0_i32_1 : i32, i32, i32, i32
  }
}

module attributes {stable_mosaic.version = 11 : i64} {
  func.func @_conv3x3_bn_leaky_kernel(%arg0: i32, %arg1: i32, %arg2: i32, %arg3: memref<1x10x10x128xbf16, #tpu.memory_space<vmem>>, %arg4: memref<9x128x256xbf16, #tpu.memory_space<vmem>>, %arg5: memref<1x256xf32, #tpu.memory_space<vmem>>, %arg6: memref<1x8x8x256xbf16, #tpu.memory_space<vmem>>) attributes {dimension_semantics = [#tpu.dimension_semantics<parallel>, #tpu.dimension_semantics<parallel>, #tpu.dimension_semantics<parallel>], iteration_bounds = array<i64: 2, 1, 1>, scalar_prefetch = 0 : i64, scratch_operands = 0 : i64, tpu.core_type = #tpu.core_type<tc>, window_params = [{transform_indices = @transform_0, window_bounds = array<i64: 1, 10, 10, 128>}, {transform_indices = @transform_1, window_bounds = array<i64: 9, 128, 256>}, {transform_indices = @transform_2, window_bounds = array<i64: 1, 256>}, {transform_indices = @transform_3, window_bounds = array<i64: 1, 8, 8, 256>}]} {
    %c8_i32 = arith.constant 8 : i32
    %0 = arith.muli %arg1, %c8_i32 : i32
    %cst = arith.constant 0.000000e+00 : f32
    %1 = vector.broadcast %cst : f32 to vector<64x256xf32>
    %c0_i32 = arith.constant 0 : i32
    %2 = arith.addi %0, %c0_i32 : i32
    %c0 = arith.constant 0 : index
    %3 = arith.index_cast %2 : i32 to index
    %c0_0 = arith.constant 0 : index
    %c0_1 = arith.constant 0 : index
    %4 = vector.load %arg3[%c0, %3, %c0_0, %c0_1] : memref<1x10x10x128xbf16, #tpu.memory_space<vmem>>, vector<1x8x8x128xbf16>
    %5 = vector.shape_cast %4 : vector<1x8x8x128xbf16> to vector<8x8x128xbf16>
    %6 = vector.shape_cast %5 : vector<8x8x128xbf16> to vector<64x128xbf16>
    %c0_2 = arith.constant 0 : index
    %c0_3 = arith.constant 0 : index
    %c0_4 = arith.constant 0 : index
    %7 = vector.load %arg4[%c0_2, %c0_3, %c0_4] : memref<9x128x256xbf16, #tpu.memory_space<vmem>>, vector<1x128x256xbf16>
    %8 = vector.shape_cast %7 : vector<1x128x256xbf16> to vector<128x256xbf16>
    %cst_5 = arith.constant dense<0.000000e+00> : vector<64x256xf32>
    %9 = tpu.matmul %6, %8, %cst_5 {dimension_numbers = #tpu.dot_dimension_numbers<[1], [0], [0], [1], [0, 0, 1, 1], [], []>} : vector<64x128xbf16>, vector<128x256xbf16>, vector<64x256xf32> -> vector<64x256xf32>
    %10 = arith.addf %1, %9 : vector<64x256xf32>
    %c0_i32_6 = arith.constant 0 : i32
    %11 = arith.addi %0, %c0_i32_6 : i32
    %c0_7 = arith.constant 0 : index
    %12 = arith.index_cast %11 : i32 to index
    %c1 = arith.constant 1 : index
    %c0_8 = arith.constant 0 : index
    %13 = vector.load %arg3[%c0_7, %12, %c1, %c0_8] : memref<1x10x10x128xbf16, #tpu.memory_space<vmem>>, vector<1x8x8x128xbf16>
    %14 = vector.shape_cast %13 : vector<1x8x8x128xbf16> to vector<8x8x128xbf16>
    %15 = vector.shape_cast %14 : vector<8x8x128xbf16> to vector<64x128xbf16>
    %c1_9 = arith.constant 1 : index
    %c0_10 = arith.constant 0 : index
    %c0_11 = arith.constant 0 : index
    %16 = vector.load %arg4[%c1_9, %c0_10, %c0_11] : memref<9x128x256xbf16, #tpu.memory_space<vmem>>, vector<1x128x256xbf16>
    %17 = vector.shape_cast %16 : vector<1x128x256xbf16> to vector<128x256xbf16>
    %cst_12 = arith.constant dense<0.000000e+00> : vector<64x256xf32>
    %18 = tpu.matmul %15, %17, %cst_12 {dimension_numbers = #tpu.dot_dimension_numbers<[1], [0], [0], [1], [0, 0, 1, 1], [], []>} : vector<64x128xbf16>, vector<128x256xbf16>, vector<64x256xf32> -> vector<64x256xf32>
    %19 = arith.addf %10, %18 : vector<64x256xf32>
    %c0_i32_13 = arith.constant 0 : i32
    %20 = arith.addi %0, %c0_i32_13 : i32
    %c0_14 = arith.constant 0 : index
    %21 = arith.index_cast %20 : i32 to index
    %c2 = arith.constant 2 : index
    %c0_15 = arith.constant 0 : index
    %22 = vector.load %arg3[%c0_14, %21, %c2, %c0_15] : memref<1x10x10x128xbf16, #tpu.memory_space<vmem>>, vector<1x8x8x128xbf16>
    %23 = vector.shape_cast %22 : vector<1x8x8x128xbf16> to vector<8x8x128xbf16>
    %24 = vector.shape_cast %23 : vector<8x8x128xbf16> to vector<64x128xbf16>
    %c2_16 = arith.constant 2 : index
    %c0_17 = arith.constant 0 : index
    %c0_18 = arith.constant 0 : index
    %25 = vector.load %arg4[%c2_16, %c0_17, %c0_18] : memref<9x128x256xbf16, #tpu.memory_space<vmem>>, vector<1x128x256xbf16>
    %26 = vector.shape_cast %25 : vector<1x128x256xbf16> to vector<128x256xbf16>
    %cst_19 = arith.constant dense<0.000000e+00> : vector<64x256xf32>
    %27 = tpu.matmul %24, %26, %cst_19 {dimension_numbers = #tpu.dot_dimension_numbers<[1], [0], [0], [1], [0, 0, 1, 1], [], []>} : vector<64x128xbf16>, vector<128x256xbf16>, vector<64x256xf32> -> vector<64x256xf32>
    %28 = arith.addf %19, %27 : vector<64x256xf32>
    %c1_i32 = arith.constant 1 : i32
    %29 = arith.addi %0, %c1_i32 : i32
    %c0_20 = arith.constant 0 : index
    %30 = arith.index_cast %29 : i32 to index
    %c0_21 = arith.constant 0 : index
    %c0_22 = arith.constant 0 : index
    %31 = vector.load %arg3[%c0_20, %30, %c0_21, %c0_22] : memref<1x10x10x128xbf16, #tpu.memory_space<vmem>>, vector<1x8x8x128xbf16>
    %32 = vector.shape_cast %31 : vector<1x8x8x128xbf16> to vector<8x8x128xbf16>
    %33 = vector.shape_cast %32 : vector<8x8x128xbf16> to vector<64x128xbf16>
    %c3 = arith.constant 3 : index
    %c0_23 = arith.constant 0 : index
    %c0_24 = arith.constant 0 : index
    %34 = vector.load %arg4[%c3, %c0_23, %c0_24] : memref<9x128x256xbf16, #tpu.memory_space<vmem>>, vector<1x128x256xbf16>
    %35 = vector.shape_cast %34 : vector<1x128x256xbf16> to vector<128x256xbf16>
    %cst_25 = arith.constant dense<0.000000e+00> : vector<64x256xf32>
    %36 = tpu.matmul %33, %35, %cst_25 {dimension_numbers = #tpu.dot_dimension_numbers<[1], [0], [0], [1], [0, 0, 1, 1], [], []>} : vector<64x128xbf16>, vector<128x256xbf16>, vector<64x256xf32> -> vector<64x256xf32>
    %37 = arith.addf %28, %36 : vector<64x256xf32>
    %c1_i32_26 = arith.constant 1 : i32
    %38 = arith.addi %0, %c1_i32_26 : i32
    %c0_27 = arith.constant 0 : index
    %39 = arith.index_cast %38 : i32 to index
    %c1_28 = arith.constant 1 : index
    %c0_29 = arith.constant 0 : index
    %40 = vector.load %arg3[%c0_27, %39, %c1_28, %c0_29] : memref<1x10x10x128xbf16, #tpu.memory_space<vmem>>, vector<1x8x8x128xbf16>
    %41 = vector.shape_cast %40 : vector<1x8x8x128xbf16> to vector<8x8x128xbf16>
    %42 = vector.shape_cast %41 : vector<8x8x128xbf16> to vector<64x128xbf16>
    %c4 = arith.constant 4 : index
    %c0_30 = arith.constant 0 : index
    %c0_31 = arith.constant 0 : index
    %43 = vector.load %arg4[%c4, %c0_30, %c0_31] : memref<9x128x256xbf16, #tpu.memory_space<vmem>>, vector<1x128x256xbf16>
    %44 = vector.shape_cast %43 : vector<1x128x256xbf16> to vector<128x256xbf16>
    %cst_32 = arith.constant dense<0.000000e+00> : vector<64x256xf32>
    %45 = tpu.matmul %42, %44, %cst_32 {dimension_numbers = #tpu.dot_dimension_numbers<[1], [0], [0], [1], [0, 0, 1, 1], [], []>} : vector<64x128xbf16>, vector<128x256xbf16>, vector<64x256xf32> -> vector<64x256xf32>
    %46 = arith.addf %37, %45 : vector<64x256xf32>
    %c1_i32_33 = arith.constant 1 : i32
    %47 = arith.addi %0, %c1_i32_33 : i32
    %c0_34 = arith.constant 0 : index
    %48 = arith.index_cast %47 : i32 to index
    %c2_35 = arith.constant 2 : index
    %c0_36 = arith.constant 0 : index
    %49 = vector.load %arg3[%c0_34, %48, %c2_35, %c0_36] : memref<1x10x10x128xbf16, #tpu.memory_space<vmem>>, vector<1x8x8x128xbf16>
    %50 = vector.shape_cast %49 : vector<1x8x8x128xbf16> to vector<8x8x128xbf16>
    %51 = vector.shape_cast %50 : vector<8x8x128xbf16> to vector<64x128xbf16>
    %c5 = arith.constant 5 : index
    %c0_37 = arith.constant 0 : index
    %c0_38 = arith.constant 0 : index
    %52 = vector.load %arg4[%c5, %c0_37, %c0_38] : memref<9x128x256xbf16, #tpu.memory_space<vmem>>, vector<1x128x256xbf16>
    %53 = vector.shape_cast %52 : vector<1x128x256xbf16> to vector<128x256xbf16>
    %cst_39 = arith.constant dense<0.000000e+00> : vector<64x256xf32>
    %54 = tpu.matmul %51, %53, %cst_39 {dimension_numbers = #tpu.dot_dimension_numbers<[1], [0], [0], [1], [0, 0, 1, 1], [], []>} : vector<64x128xbf16>, vector<128x256xbf16>, vector<64x256xf32> -> vector<64x256xf32>
    %55 = arith.addf %46, %54 : vector<64x256xf32>
    %c2_i32 = arith.constant 2 : i32
    %56 = arith.addi %0, %c2_i32 : i32
    %c0_40 = arith.constant 0 : index
    %57 = arith.index_cast %56 : i32 to index
    %c0_41 = arith.constant 0 : index
    %c0_42 = arith.constant 0 : index
    %58 = vector.load %arg3[%c0_40, %57, %c0_41, %c0_42] : memref<1x10x10x128xbf16, #tpu.memory_space<vmem>>, vector<1x8x8x128xbf16>
    %59 = vector.shape_cast %58 : vector<1x8x8x128xbf16> to vector<8x8x128xbf16>
    %60 = vector.shape_cast %59 : vector<8x8x128xbf16> to vector<64x128xbf16>
    %c6 = arith.constant 6 : index
    %c0_43 = arith.constant 0 : index
    %c0_44 = arith.constant 0 : index
    %61 = vector.load %arg4[%c6, %c0_43, %c0_44] : memref<9x128x256xbf16, #tpu.memory_space<vmem>>, vector<1x128x256xbf16>
    %62 = vector.shape_cast %61 : vector<1x128x256xbf16> to vector<128x256xbf16>
    %cst_45 = arith.constant dense<0.000000e+00> : vector<64x256xf32>
    %63 = tpu.matmul %60, %62, %cst_45 {dimension_numbers = #tpu.dot_dimension_numbers<[1], [0], [0], [1], [0, 0, 1, 1], [], []>} : vector<64x128xbf16>, vector<128x256xbf16>, vector<64x256xf32> -> vector<64x256xf32>
    %64 = arith.addf %55, %63 : vector<64x256xf32>
    %c2_i32_46 = arith.constant 2 : i32
    %65 = arith.addi %0, %c2_i32_46 : i32
    %c0_47 = arith.constant 0 : index
    %66 = arith.index_cast %65 : i32 to index
    %c1_48 = arith.constant 1 : index
    %c0_49 = arith.constant 0 : index
    %67 = vector.load %arg3[%c0_47, %66, %c1_48, %c0_49] : memref<1x10x10x128xbf16, #tpu.memory_space<vmem>>, vector<1x8x8x128xbf16>
    %68 = vector.shape_cast %67 : vector<1x8x8x128xbf16> to vector<8x8x128xbf16>
    %69 = vector.shape_cast %68 : vector<8x8x128xbf16> to vector<64x128xbf16>
    %c7 = arith.constant 7 : index
    %c0_50 = arith.constant 0 : index
    %c0_51 = arith.constant 0 : index
    %70 = vector.load %arg4[%c7, %c0_50, %c0_51] : memref<9x128x256xbf16, #tpu.memory_space<vmem>>, vector<1x128x256xbf16>
    %71 = vector.shape_cast %70 : vector<1x128x256xbf16> to vector<128x256xbf16>
    %cst_52 = arith.constant dense<0.000000e+00> : vector<64x256xf32>
    %72 = tpu.matmul %69, %71, %cst_52 {dimension_numbers = #tpu.dot_dimension_numbers<[1], [0], [0], [1], [0, 0, 1, 1], [], []>} : vector<64x128xbf16>, vector<128x256xbf16>, vector<64x256xf32> -> vector<64x256xf32>
    %73 = arith.addf %64, %72 : vector<64x256xf32>
    %c2_i32_53 = arith.constant 2 : i32
    %74 = arith.addi %0, %c2_i32_53 : i32
    %c0_54 = arith.constant 0 : index
    %75 = arith.index_cast %74 : i32 to index
    %c2_55 = arith.constant 2 : index
    %c0_56 = arith.constant 0 : index
    %76 = vector.load %arg3[%c0_54, %75, %c2_55, %c0_56] : memref<1x10x10x128xbf16, #tpu.memory_space<vmem>>, vector<1x8x8x128xbf16>
    %77 = vector.shape_cast %76 : vector<1x8x8x128xbf16> to vector<8x8x128xbf16>
    %78 = vector.shape_cast %77 : vector<8x8x128xbf16> to vector<64x128xbf16>
    %c8 = arith.constant 8 : index
    %c0_57 = arith.constant 0 : index
    %c0_58 = arith.constant 0 : index
    %79 = vector.load %arg4[%c8, %c0_57, %c0_58] : memref<9x128x256xbf16, #tpu.memory_space<vmem>>, vector<1x128x256xbf16>
    %80 = vector.shape_cast %79 : vector<1x128x256xbf16> to vector<128x256xbf16>
    %cst_59 = arith.constant dense<0.000000e+00> : vector<64x256xf32>
    %81 = tpu.matmul %78, %80, %cst_59 {dimension_numbers = #tpu.dot_dimension_numbers<[1], [0], [0], [1], [0, 0, 1, 1], [], []>} : vector<64x128xbf16>, vector<128x256xbf16>, vector<64x256xf32> -> vector<64x256xf32>
    %82 = arith.addf %73, %81 : vector<64x256xf32>
    %c0_60 = arith.constant 0 : index
    %c0_61 = arith.constant 0 : index
    %83 = vector.load %arg5[%c0_60, %c0_61] : memref<1x256xf32, #tpu.memory_space<vmem>>, vector<1x256xf32>
    %84 = vector.broadcast %83 : vector<1x256xf32> to vector<64x256xf32>
    %85 = arith.addf %82, %84 : vector<64x256xf32>
    %cst_62 = arith.constant 0.000000e+00 : f32
    %86 = vector.broadcast %cst_62 : f32 to vector<64x256xf32>
    %87 = arith.cmpf oge, %85, %86 : vector<64x256xf32>
    %cst_63 = arith.constant 1.000000e-01 : f32
    %88 = vector.broadcast %cst_63 : f32 to vector<64x256xf32>
    %89 = arith.mulf %88, %85 : vector<64x256xf32>
    %90 = arith.select %87, %85, %89 : vector<64x256xi1>, vector<64x256xf32>
    %91 = vector.shape_cast %90 : vector<64x256xf32> to vector<1x8x8x256xf32>
    %92 = arith.truncf %91 : vector<1x8x8x256xf32> to vector<1x8x8x256xbf16>
    %c0_64 = arith.constant 0 : index
    %c0_65 = arith.constant 0 : index
    %c0_66 = arith.constant 0 : index
    %c0_67 = arith.constant 0 : index
    %93 = vector.load %arg6[%c0_64, %c0_65, %c0_66, %c0_67] : memref<1x8x8x256xbf16, #tpu.memory_space<vmem>>, vector<1x8x8x256xbf16>
    tpu.vector_store %arg6[%c0_64, %c0_65, %c0_66, %c0_67], %92 {strides = array<i32>} : memref<1x8x8x256xbf16, #tpu.memory_space<vmem>>, vector<1x8x8x256xbf16>,
    return
  }
  func.func @transform_0(%arg0: i32, %arg1: i32, %arg2: i32) -> (i32, i32, i32, i32) {
    %c0_i32 = arith.constant 0 : i32
    %c0_i32_0 = arith.constant 0 : i32
    %c0_i32_1 = arith.constant 0 : i32
    %c0_i32_2 = arith.constant 0 : i32
    return %arg0, %c0_i32, %c0_i32_0, %c0_i32_1 : i32, i32, i32, i32
  }
  func.func @transform_1(%arg0: i32, %arg1: i32, %arg2: i32) -> (i32, i32, i32) {
    %c0_i32 = arith.constant 0 : i32
    %c0_i32_0 = arith.constant 0 : i32
    %c0_i32_1 = arith.constant 0 : i32
    return %c0_i32, %c0_i32_0, %arg2 : i32, i32, i32
  }
  func.func @transform_2(%arg0: i32, %arg1: i32, %arg2: i32) -> (i32, i32) {
    %c0_i32 = arith.constant 0 : i32
    %c0_i32_0 = arith.constant 0 : i32
    return %c0_i32, %arg2 : i32, i32
  }
  func.func @transform_3(%arg0: i32, %arg1: i32, %arg2: i32) -> (i32, i32, i32, i32) {
    %c0_i32 = arith.constant 0 : i32
    %c0_i32_0 = arith.constant 0 : i32
    return %arg0, %arg1, %c0_i32, %arg2 : i32, i32, i32, i32
  }
}

</mosaic_0001>

<bundles_post_ra>
// kernel: spp_block.6
= control target key start
LH: loop header
LB: loop body
LE: loop exit
PB: predicated region body
PF: predicated region fallthrough
CT: control target
= control target key end

     0   :  { %s955_s1 = inlined_call_operand.vmem [shape: bf16[256,128], index: 1, kind: input, shape index: {}]   ;;  %s956_s0 = inlined_call_operand.vmem [shape: bf16[128,256], index: 0, kind: input, shape index: {}]   ;;  %s957_s2 = inlined_call_operand.vmem [shape: f32[1,128], index: 2, kind: input, shape index: {}]   ;;  %s958_s3 = inlined_call_operand.vmem [shape: bf16[128,128], index: 3, kind: output, shape index: {}]  }
   0x1   :  { %v754_v0 = vld [vmem:[%s955_s1 + $0x40] sm:$0xff]   ;;  %v756_v2 = vld [vmem:[%s955_s1 + $0x48] sm:$0xff]   ;;  %v758_v4 = vld [vmem:[%s955_s1 + $0x50] sm:$0xff]  }
   0x2   :  { %v755_v1 = vld [vmem:[%s955_s1] sm:$0xff]   ;;  %674 = vmatprep.subr.bf16.mxu0 %v754_v0  ;;  %738 = vmatprep.subr.bf16.mxu1 %v754_v0  ;;  %v757_v3 = vld [vmem:[%s955_s1 + $0x8] sm:$0xff]   ;;  %v759_v5 = vld [vmem:[%s955_s1 + $0x10] sm:$0xff]  }
   0x3   :  { %675 = vmatpush3.bf16.msra.mxu0 %v755_v1  ;;  %746 = vmatpush3.bf16.msra.mxu1 %v755_v1  ;;  %v760_v6 = vld [vmem:[%s955_s1 + $0x58] sm:$0xff]   ;;  %v762_v8 = vld [vmem:[%s955_s1 + $0x60] sm:$0xff]   ;;  %v764_v10 = vld [vmem:[%s955_s1 + $0x68] sm:$0xff]  }
   0x4   :  { %676 = vmatprep.subr.bf16.mxu0 %v756_v2  ;;  %739 = vmatprep.subr.bf16.mxu1 %v756_v2  ;;  %v761_v7 = vld [vmem:[%s955_s1 + $0x18] sm:$0xff]   ;;  %v763_v9 = vld [vmem:[%s955_s1 + $0x20] sm:$0xff]   ;;  %v765_v13 = vld [vmem:[%s955_s1 + $0x28] sm:$0xff]  }
   0x5   :  { %v772_v11 = vld [vmem:[%s956_s0 + $0x4] ss:$8 sps:$4 sm:$0xff]   ;;  %v766_v14 = vld [vmem:[%s955_s1 + $0x70] sm:$0xff]   ;;  %v768_v16 = vld [vmem:[%s955_s1 + $0x78] sm:$0xff]  }
   0x6   :  { %v775_v12 = vld [vmem:[%s956_s0 + $0x44] ss:$8 sps:$4 sm:$0xff]   ;;  %307 = vmatprep.mubr.bf16.mxu0 %v772_v11  ;;  %v767_v15 = vld [vmem:[%s955_s1 + $0x30] sm:$0xff]   ;;  %v769_v17 = vld [vmem:[%s955_s1 + $0x38] sm:$0xff]  }
   0x7   :  { %677 = vmatpush3.bf16.msra.mxu0 %v757_v3  ;;  %747 = vmatpush3.bf16.msra.mxu1 %v757_v3  ;;  %v770_v18 = vld [vmem:[%s956_s0] ss:$8 sps:$4 sm:$0xff]   ;;  %v776_v20 = vld [vmem:[%s956_s0 + $0x14] ss:$8 sps:$4 sm:$0xff]   ;;  %v780_v22 = vld [vmem:[%s956_s0 + $0x10] ss:$8 sps:$4 sm:$0xff]  }
   0x8   :  { %678 = vmatprep.subr.bf16.mxu0 %v758_v4  ;;  %740 = vmatprep.subr.bf16.mxu1 %v758_v4  ;;  %v773_v19 = vld [vmem:[%s956_s0 + $0x40] ss:$8 sps:$4 sm:$0xff]   ;;  %v778_v21 = vld [vmem:[%s956_s0 + $0x54] ss:$8 sps:$4 sm:$0xff]   ;;  %v781_v23 = vld [vmem:[%s956_s0 + $0x50] ss:$8 sps:$4 sm:$0xff]  }
   0x9   :  { %339 = vmatprep.mubr.bf16.mxu1 %v775_v12  ;;  %v782_v24 = vld [vmem:[%s956_s0 + $0x24] ss:$8 sps:$4 sm:$0xff]   ;;  %v786_v26 = vld [vmem:[%s956_s0 + $0x20] ss:$8 sps:$4 sm:$0xff]   ;;  %v788_v28 = vld [vmem:[%s956_s0 + $0x34] ss:$8 sps:$4 sm:$0xff]  }
   0xa   :  { %v784_v25 = vld [vmem:[%s956_s0 + $0x64] ss:$8 sps:$4 sm:$0xff]   ;;  %v787_v27 = vld [vmem:[%s956_s0 + $0x60] ss:$8 sps:$4 sm:$0xff]   ;;  %v790_v29 = vld [vmem:[%s956_s0 + $0x74] ss:$8 sps:$4 sm:$0xff]  }
   0xb   :  { %679 = vmatpush3.bf16.msra.mxu0 %v759_v5  ;;  %748 = vmatpush3.bf16.msra.mxu1 %v759_v5  ;;  %v792_v30 = vld [vmem:[%s956_s0 + $0x30] ss:$8 sps:$4 sm:$0xff]   ;;  %v913_v35 = vld [vmem:[%s957_s2] ss:$0 sm:$0xff] }
   0xc   :  { %680 = vmatprep.subr.bf16.mxu0 %v760_v6  ;;  %741 = vmatprep.subr.bf16.mxu1 %v760_v6  ;;  %v793_v31 = vld [vmem:[%s956_s0 + $0x70] ss:$8 sps:$4 sm:$0xff]  }
   0xf   :  { %681 = vmatpush3.bf16.msra.mxu0 %v761_v7  ;;  %749 = vmatpush3.bf16.msra.mxu1 %v761_v7 }
  0x10   :  { %682 = vmatprep.subr.bf16.mxu0 %v762_v8  ;;  %742 = vmatprep.subr.bf16.mxu1 %v762_v8 }
  0x13   :  { %683 = vmatpush3.bf16.msra.mxu0 %v763_v9  ;;  %750 = vmatpush3.bf16.msra.mxu1 %v763_v9 }
  0x14   :  { %684 = vmatprep.subr.bf16.mxu0 %v764_v10  ;;  %743 = vmatprep.subr.bf16.mxu1 %v764_v10 }
  0x17   :  { %685 = vmatpush3.bf16.msra.mxu0 %v765_v13  ;;  %751 = vmatpush3.bf16.msra.mxu1 %v765_v13 }
  0x18   :  { %686 = vmatprep.subr.bf16.mxu0 %v766_v14  ;;  %744 = vmatprep.subr.bf16.mxu1 %v766_v14 }
  0x1b   :  { %687 = vmatpush3.bf16.msra.mxu0 %v767_v15  ;;  %752 = vmatpush3.bf16.msra.mxu1 %v767_v15 }
  0x1c   :  { %688 = vmatprep.subr.bf16.mxu0 %v768_v16  ;;  %745 = vmatprep.subr.bf16.mxu1 %v768_v16 }
  0x1f   :  { %689 = vmatpush3.bf16.msra.mxu0 %v769_v17  ;;  %753 = vmatpush3.bf16.msra.mxu1 %v769_v17 }
  0x22   :  { %308 = vmatmul.mubr.bf16.vlgmr.msra.gmra.mrb[0].mxu0 %v770_v18  ;;  %340 = vmatmul.mubr.bf16.vlgmr.msra.gmra.mrb[0].mxu1 %v773_v19 }
  0x23   :  { %315 = vmatprep.mubr.bf16.mxu0 %v776_v20  ;;  %347 = vmatprep.mubr.bf16.mxu1 %v778_v21 }
  0x2a   :  { %316 = vmatmul.mubr.bf16.gmra.mrb[4].mxu0 %v780_v22  ;;  %348 = vmatmul.mubr.bf16.gmra.mrb[4].mxu1 %v781_v23 }
  0x2b   :  { %323 = vmatprep.mubr.bf16.mxu0 %v782_v24  ;;  %355 = vmatprep.mubr.bf16.mxu1 %v784_v25 }
  0x32   :  { %324 = vmatmul.mubr.bf16.gmra.mrb[8].mxu0 %v786_v26  ;;  %356 = vmatmul.mubr.bf16.gmra.mrb[8].mxu1 %v787_v27 }
  0x33   :  { %331 = vmatprep.mubr.bf16.mxu0 %v788_v28  ;;  %363 = vmatprep.mubr.bf16.mxu1 %v790_v29 }
  0x3a   :  { %332 = vmatmul.mubr.bf16.gmra.mrb[12].mxu0 %v792_v30  ;;  %364 = vmatmul.mubr.bf16.gmra.mrb[12].mxu1 %v793_v31 }
  0xf5   :  { %v690_v32 = vpop.f32.mrb[0].mxu0  ;;  %v714_v33 = vpop.f32.mrb[0].mxu1 }
  0xf6   :  { %v691_v34 = vpop.f32.mrb[1].mxu0  ;;  %v715_v36 = vpop.f32.mrb[1].mxu1 }
  0xf7   :  { %v692_v37 = vadd.f32 %v691_v34, %v690_v32  ;;  %v716_v38 = vadd.f32 %v715_v36, %v714_v33  ;;  %v693_v39 = vpop.f32.mrb[2].mxu0  ;;  %v717_v40 = vpop.f32.mrb[2].mxu1 }
  0xf8   :  { %v694_v41 = vpop.f32.mrb[3].mxu0  ;;  %v718_v42 = vpop.f32.mrb[3].mxu1 }
  0xf9   :  { %v414_v43 = vadd.f32 %v692_v37, %v913_v35  ;;  %v422_v44 = vadd.f32 %v716_v38, %v913_v35  ;;  %v695_v45 = vadd.f32 %v694_v41, %v693_v39  ;;  %v719_v46 = vadd.f32 %v718_v42, %v717_v40 }
  0xfb   :  { %v446_v47 = vmul.f32 0.1, %v414_v43  ;;  %v454_v48 = vmul.f32 0.1, %v422_v44  ;;  %vm430_vm0 = vcmp.ge.f32.partialorder %v414_v43, 0.0  ;;  %vm438_vm1 = vcmp.ge.f32.partialorder %v422_v44, 0.0 }
  0xfc   :  { %v415_v49 = vadd.f32 %v695_v45, %v913_v35  ;;  %v423_v50 = vadd.f32 %v719_v46, %v913_v35 }
  0xfd   :  { %v696_v51 = vpop.f32.mrb[4].mxu0  ;;  %v720_v52 = vpop.f32.mrb[4].mxu1  ;;  %v462_v55 = vsel %vm430_vm0, %v414_v43, %v446_v47  ;;  %v470_v56 = vsel %vm438_vm1, %v422_v44, %v454_v48 }
  0xfe   :  { %vm431_vm2 = vcmp.ge.f32.partialorder %v415_v49, 0.0  ;;  %v447_v53 = vmul.f32 0.1, %v415_v49  ;;  %vm439_vm3 = vcmp.ge.f32.partialorder %v423_v50, 0.0  ;;  %v455_v54 = vmul.f32 0.1, %v423_v50 }
  0xff   :  { %v697_v57 = vpop.f32.mrb[5].mxu0  ;;  %v721_v58 = vpop.f32.mrb[5].mxu1 }
 0x100   :  { %v463_v59 = vsel %vm431_vm2, %v415_v49, %v447_v53  ;;  %v471_v60 = vsel %vm439_vm3, %v423_v50, %v455_v54  ;;  %v698_v61 = vadd.f32 %v697_v57, %v696_v51  ;;  %v722_v62 = vadd.f32 %v721_v58, %v720_v52  ;;  %v699_v63 = vpop.f32.mrb[6].mxu0  ;;  %v723_v0 = vpop.f32.mrb[6].mxu1 }
 0x101   :  { %v630_v1 = vpack.c.bf16 %v463_v59, %v462_v55  ;;  %v650_v2 = vpack.c.bf16 %v471_v60, %v470_v56  ;;  %v700_v3 = vpop.f32.mrb[7].mxu0  ;;  %v724_v4 = vpop.f32.mrb[7].mxu1 }
 0x102   :  { %v416_v5 = vadd.f32 %v698_v61, %v913_v35  ;;  %v424_v6 = vadd.f32 %v722_v62, %v913_v35  ;;  %v701_v7 = vadd.f32 %v700_v3, %v699_v63  ;;  %v725_v8 = vadd.f32 %v724_v4, %v723_v0 }
 0x103   :  { %631 = vst [vmem:[%s958_s3] sm:$0xff] %v630_v1   ;;  %670 = vst [vmem:[%s958_s3 + $0x20] sm:$0xff] %v650_v2  }
 0x104   :  { %v448_v9 = vmul.f32 0.1, %v416_v5  ;;  %v456_v10 = vmul.f32 0.1, %v424_v6  ;;  %v417_v11 = vadd.f32 %v701_v7, %v913_v35  ;;  %v425_v12 = vadd.f32 %v725_v8, %v913_v35 }
 0x105   :  { %v702_v13 = vpop.f32.mrb[8].mxu0  ;;  %v726_v14 = vpop.f32.mrb[8].mxu1  ;;  %vm432_vm4 = vcmp.ge.f32.partialorder %v416_v5, 0.0  ;;  %vm440_vm5 = vcmp.ge.f32.partialorder %v424_v6, 0.0 }
 0x106   :  { %v703_v15 = vpop.f32.mrb[9].mxu0  ;;  %v727_v16 = vpop.f32.mrb[9].mxu1  ;;  %vm433_vm6 = vcmp.ge.f32.partialorder %v417_v11, 0.0  ;;  %v449_v17 = vmul.f32 0.1, %v417_v11  ;;  %vm441_vm7 = vcmp.ge.f32.partialorder %v425_v12, 0.0  ;;  %v464_v23 = vsel %vm432_vm4, %v416_v5, %v448_v9 }
 0x107   :  { %v457_v18 = vmul.f32 0.1, %v425_v12  ;;  %v704_v19 = vadd.f32 %v703_v15, %v702_v13  ;;  %v728_v20 = vadd.f32 %v727_v16, %v726_v14  ;;  %v705_v21 = vpop.f32.mrb[10].mxu0  ;;  %v729_v22 = vpop.f32.mrb[10].mxu1  ;;  %v472_v24 = vsel %vm440_vm5, %v424_v6, %v456_v10 }
 0x108   :  { %v465_v25 = vsel %vm433_vm6, %v417_v11, %v449_v17  ;;  %v706_v27 = vpop.f32.mrb[11].mxu0  ;;  %v730_v28 = vpop.f32.mrb[11].mxu1 }
 0x109   :  { %v473_v26 = vsel %vm441_vm7, %v425_v12, %v457_v18  ;;  %v635_v29 = vpack.c.bf16 %v465_v25, %v464_v23  ;;  %v418_v31 = vadd.f32 %v704_v19, %v913_v35  ;;  %v426_v32 = vadd.f32 %v728_v20, %v913_v35 }
 0x10a   :  { %v655_v30 = vpack.c.bf16 %v473_v26, %v472_v24  ;;  %v707_v33 = vadd.f32 %v706_v27, %v705_v21  ;;  %v731_v34 = vadd.f32 %v730_v28, %v729_v22 }
 0x10b   :  { %667 = vst [vmem:[%s958_s3 + $0x8] sm:$0xff] %v635_v29   ;;  %v450_v36 = vmul.f32 0.1, %v418_v31  ;;  %v458_v37 = vmul.f32 0.1, %v426_v32  ;;  %vm434_vm8 = vcmp.ge.f32.partialorder %v418_v31, 0.0 }
 0x10c   :  { %671 = vst [vmem:[%s958_s3 + $0x28] sm:$0xff] %v655_v30   ;;  %v419_v38 = vadd.f32 %v707_v33, %v913_v35  ;;  %v427_v39 = vadd.f32 %v731_v34, %v913_v35  ;;  %vm442_vm9 = vcmp.ge.f32.partialorder %v426_v32, 0.0 }
 0x10d   :  { %v708_v40 = vpop.f32.mrb[12].mxu0  ;;  %v732_v41 = vpop.f32.mrb[12].mxu1  ;;  %v466_v50 = vsel %vm434_vm8, %v418_v31, %v450_v36  ;;  %v474_v51 = vsel %vm442_vm9, %v426_v32, %v458_v37 }
 0x10e   :  { %v709_v42 = vpop.f32.mrb[13].mxu0  ;;  %v733_v43 = vpop.f32.mrb[13].mxu1  ;;  %vm435_vm10 = vcmp.ge.f32.partialorder %v419_v38, 0.0  ;;  %v451_v44 = vmul.f32 0.1, %v419_v38  ;;  %vm443_vm11 = vcmp.ge.f32.partialorder %v427_v39, 0.0 }
 0x10f   :  { %v459_v45 = vmul.f32 0.1, %v427_v39  ;;  %v710_v46 = vadd.f32 %v709_v42, %v708_v40  ;;  %v734_v47 = vadd.f32 %v733_v43, %v732_v41  ;;  %v711_v48 = vpop.f32.mrb[14].mxu0  ;;  %v735_v49 = vpop.f32.mrb[14].mxu1 }
 0x110   :  { %v467_v52 = vsel %vm435_vm10, %v419_v38, %v451_v44  ;;  %v712_v54 = vpop.f32.mrb[15].mxu0  ;;  %v736_v55 = vpop.f32.mrb[15].mxu1 }
 0x111   :  { %v475_v53 = vsel %vm443_vm11, %v427_v39, %v459_v45  ;;  %v640_v56 = vpack.c.bf16 %v467_v52, %v466_v50  ;;  %v420_v58 = vadd.f32 %v710_v46, %v913_v35  ;;  %v428_v59 = vadd.f32 %v734_v47, %v913_v35 }
 0x112   :  { %v660_v57 = vpack.c.bf16 %v475_v53, %v474_v51  ;;  %v713_v60 = vadd.f32 %v712_v54, %v711_v48  ;;  %v737_v61 = vadd.f32 %v736_v55, %v735_v49 }
 0x113   :  { %668 = vst [vmem:[%s958_s3 + $0x10] sm:$0xff] %v640_v56   ;;  %v452_v62 = vmul.f32 0.1, %v420_v58  ;;  %v460_v63 = vmul.f32 0.1, %v428_v59  ;;  %vm436_vm12 = vcmp.ge.f32.partialorder %v420_v58, 0.0 }
 0x114   :  { %672 = vst [vmem:[%s958_s3 + $0x30] sm:$0xff] %v660_v57   ;;  %v421_v0 = vadd.f32 %v713_v60, %v913_v35  ;;  %v429_v1 = vadd.f32 %v737_v61, %v913_v35  ;;  %vm444_vm13 = vcmp.ge.f32.partialorder %v428_v59, 0.0 }
 0x115   :  { %v468_v4 = vsel %vm436_vm12, %v420_v58, %v452_v62  ;;  %v476_v5 = vsel %vm444_vm13, %v428_v59, %v460_v63 }
 0x116   :  { %vm437_vm14 = vcmp.ge.f32.partialorder %v421_v0, 0.0  ;;  %v453_v2 = vmul.f32 0.1, %v421_v0  ;;  %vm445_vm15 = vcmp.ge.f32.partialorder %v429_v1, 0.0  ;;  %v461_v3 = vmul.f32 0.1, %v429_v1 }
 0x118   :  { %v469_v6 = vsel %vm437_vm14, %v421_v0, %v453_v2  ;;  %v477_v7 = vsel %vm445_vm15, %v429_v1, %v461_v3 }
 0x119   :  { %v645_v8 = vpack.c.bf16 %v469_v6, %v468_v4  ;;  %v665_v9 = vpack.c.bf16 %v477_v7, %v476_v5 }
 0x11b   :  { %669 = vst [vmem:[%s958_s3 + $0x18] sm:$0xff] %v645_v8   ;;  %673 = vst [vmem:[%s958_s3 + $0x38] sm:$0xff] %v665_v9  }

// kernel: spp_block.7
= control target key start
LH: loop header
LB: loop body
LE: loop exit
PB: predicated region body
PF: predicated region fallthrough
CT: control target
= control target key end

     0   :  { %v784_v1 = vmov 0   ;;  %v425_v25 = vlaneseq  ;;  %s973_s1 = inlined_call_operand.vmem [shape: bf16[128,256], index: 1, kind: input, shape index: {}]   ;;  %s974_s0 = inlined_call_operand.vmem [shape: bf16[128,128], index: 0, kind: input, shape index: {}]   ;;  %s975_s2 = inlined_call_operand.vmem [shape: f32[1,256], index: 2, kind: input, shape index: {}]   ;;  %s976_s3 = inlined_call_operand.vmem [shape: bf16[128,256], index: 3, kind: output, shape index: {}]  }
   0x1   :  { %v752_v0 = vld [vmem:[%s973_s1 + $0x4] ss:$8 sps:$4 sm:$0xff]   ;;  %275 = vmatprep.mubr.bf16.mxu0 %v784_v1  ;;  %315 = vmatprep.mubr.bf16.mxu1 %v784_v1  ;;  %v754_v2 = vld [vmem:[%s973_s1] ss:$8 sps:$4 sm:$0xff]   ;;  %v755_v3 = vld [vmem:[%s973_s1 + $0x14] ss:$8 sps:$4 sm:$0xff]  }
   0x2   :  { %243 = vmatprep.subr.bf16.mxu0 %v752_v0  ;;  %735 = vmatprep.subr.bf16.mxu1 %v752_v0  ;;  %v757_v4 = vld [vmem:[%s973_s1 + $0x10] ss:$8 sps:$4 sm:$0xff]   ;;  %v758_v5 = vld [vmem:[%s973_s1 + $0x24] ss:$8 sps:$4 sm:$0xff]   ;;  %v760_v6 = vld [vmem:[%s973_s1 + $0x20] ss:$8 sps:$4 sm:$0xff]  }
   0x3   :  { %244 = vmatpush1.bf16.msra.mxu0 %v754_v2  ;;  %743 = vmatpush1.bf16.msra.mxu1 %v754_v2  ;;  %v761_v7 = vld [vmem:[%s973_s1 + $0x34] ss:$8 sps:$4 sm:$0xff]   ;;  %v763_v8 = vld [vmem:[%s973_s1 + $0x30] ss:$8 sps:$4 sm:$0xff]   ;;  %v764_v9 = vld [vmem:[%s973_s1 + $0x44] ss:$8 sps:$4 sm:$0xff]  }
   0x4   :  { %245 = vmatprep.subr.bf16.mxu0 %v755_v3  ;;  %736 = vmatprep.subr.bf16.mxu1 %v755_v3  ;;  %v766_v10 = vld [vmem:[%s973_s1 + $0x40] ss:$8 sps:$4 sm:$0xff]   ;;  %v767_v11 = vld [vmem:[%s973_s1 + $0x54] ss:$8 sps:$4 sm:$0xff]   ;;  %v769_v12 = vld [vmem:[%s973_s1 + $0x50] ss:$8 sps:$4 sm:$0xff]  }
   0x5   :  { %v770_v13 = vld [vmem:[%s973_s1 + $0x64] ss:$8 sps:$4 sm:$0xff]   ;;  %v772_v14 = vld [vmem:[%s973_s1 + $0x60] ss:$8 sps:$4 sm:$0xff]   ;;  %v773_v15 = vld [vmem:[%s973_s1 + $0x74] ss:$8 sps:$4 sm:$0xff]  }
   0x6   :  { %v775_v16 = vld [vmem:[%s973_s1 + $0x70] ss:$8 sps:$4 sm:$0xff]   ;;  %v776_v17 = vld [vmem:[%s974_s0] sm:$0xff]   ;;  %v778_v19 = vld [vmem:[%s974_s0 + $0x8] sm:$0xff]   ;;  %v426_v26 = vshrl.u32 %v425_v25, 7 }
   0x7   :  { %246 = vmatpush1.bf16.msra.mxu0 %v757_v4  ;;  %744 = vmatpush1.bf16.msra.mxu1 %v757_v4  ;;  %v777_v18 = vld [vmem:[%s974_s0 + $0x20] sm:$0xff]   ;;  %v779_v20 = vld [vmem:[%s974_s0 + $0x28] sm:$0xff]   ;;  %v780_v21 = vld [vmem:[%s974_s0 + $0x10] sm:$0xff]  }
   0x8   :  { %247 = vmatprep.subr.bf16.mxu0 %v758_v5  ;;  %737 = vmatprep.subr.bf16.mxu1 %v758_v5  ;;  %v781_v22 = vld [vmem:[%s974_s0 + $0x30] sm:$0xff]   ;;  %v782_v23 = vld [vmem:[%s974_s0 + $0x18] sm:$0xff]   ;;  %v427_v27 = vsub.s32 0, %v426_v26  ;;  %v423_v28 = vld [vmem:[%s975_s2] sm:$0x3]  ;;  %v431_v29 = vsub.s32 1, %v426_v26 }
   0x9   :  { %v783_v24 = vld [vmem:[%s974_s0 + $0x38] sm:$0xff]  }
   0xa   :  { %v888_v30 = vrot.slane %v423_v28, %v427_v27  ;;  %v890_v31 = vrot.slane %v423_v28, %v431_v29 }
   0xb   :  { %248 = vmatpush1.bf16.msra.mxu0 %v760_v6  ;;  %745 = vmatpush1.bf16.msra.mxu1 %v760_v6 }
   0xc   :  { %249 = vmatprep.subr.bf16.mxu0 %v761_v7  ;;  %738 = vmatprep.subr.bf16.mxu1 %v761_v7 }
   0xf   :  { %250 = vmatpush1.bf16.msra.mxu0 %v763_v8  ;;  %746 = vmatpush1.bf16.msra.mxu1 %v763_v8 }
  0x10   :  { %251 = vmatprep.subr.bf16.mxu0 %v764_v9  ;;  %739 = vmatprep.subr.bf16.mxu1 %v764_v9 }
  0x13   :  { %252 = vmatpush1.bf16.msra.mxu0 %v766_v10  ;;  %747 = vmatpush1.bf16.msra.mxu1 %v766_v10 }
  0x14   :  { %253 = vmatprep.subr.bf16.mxu0 %v767_v11  ;;  %740 = vmatprep.subr.bf16.mxu1 %v767_v11 }
  0x17   :  { %254 = vmatpush1.bf16.msra.mxu0 %v769_v12  ;;  %748 = vmatpush1.bf16.msra.mxu1 %v769_v12 }
  0x18   :  { %255 = vmatprep.subr.bf16.mxu0 %v770_v13  ;;  %741 = vmatprep.subr.bf16.mxu1 %v770_v13 }
  0x1b   :  { %256 = vmatpush1.bf16.msra.mxu0 %v772_v14  ;;  %749 = vmatpush1.bf16.msra.mxu1 %v772_v14 }
  0x1c   :  { %257 = vmatprep.subr.bf16.mxu0 %v773_v15  ;;  %742 = vmatprep.subr.bf16.mxu1 %v773_v15 }
  0x1f   :  { %258 = vmatpush1.bf16.msra.mxu0 %v775_v16  ;;  %750 = vmatpush1.bf16.msra.mxu1 %v775_v16 }
  0x22   :  { %276 = vmatmul.mubr.bf16.vlgmr.msra.gmra.mrb[0].mxu0 %v776_v17  ;;  %316 = vmatmul.mubr.bf16.vlgmr.msra.gmra.mrb[0].mxu1 %v777_v18 }
  0x23   :  { %285 = vmatprep.mubr.bf16.mxu0 %v784_v1  ;;  %325 = vmatprep.mubr.bf16.mxu1 %v784_v1 }
  0x2a   :  { %286 = vmatmul.mubr.bf16.gmra.mrb[4].mxu0 %v778_v19  ;;  %326 = vmatmul.mubr.bf16.gmra.mrb[4].mxu1 %v779_v20 }
  0x2b   :  { %295 = vmatprep.mubr.bf16.mxu0 %v784_v1  ;;  %335 = vmatprep.mubr.bf16.mxu1 %v784_v1 }
  0x32   :  { %296 = vmatmul.mubr.bf16.gmra.mrb[8].mxu0 %v780_v21  ;;  %336 = vmatmul.mubr.bf16.gmra.mrb[8].mxu1 %v781_v22 }
  0x33   :  { %305 = vmatprep.mubr.bf16.mxu0 %v784_v1  ;;  %345 = vmatprep.mubr.bf16.mxu1 %v784_v1 }
  0x3a   :  { %306 = vmatmul.mubr.bf16.gmra.mrb[12].mxu0 %v782_v23  ;;  %346 = vmatmul.mubr.bf16.gmra.mrb[12].mxu1 %v783_v24 }
  0xf5   :  { %v277_v32 = vpop.f32.mrb[0].mxu0  ;;  %v317_v33 = vpop.f32.mrb[0].mxu1 }
  0xf6   :  { %v435_v34 = vadd.f32 %v888_v30, %v277_v32  ;;  %v451_v35 = vadd.f32 %v888_v30, %v317_v33  ;;  %v279_v36 = vpop.f32.mrb[1].mxu0  ;;  %v319_v37 = vpop.f32.mrb[1].mxu1 }
  0xf7   :  { %v436_v38 = vadd.f32 %v890_v31, %v279_v36  ;;  %v452_v39 = vadd.f32 %v890_v31, %v319_v37  ;;  %v281_v40 = vpop.f32.mrb[2].mxu0  ;;  %v321_v41 = vpop.f32.mrb[2].mxu1 }
  0xf8   :  { %vm467_vm0 = vcmp.ge.f32.partialorder %v435_v34, 0.0  ;;  %v499_v42 = vmul.f32 0.1, %v435_v34  ;;  %vm483_vm1 = vcmp.ge.f32.partialorder %v451_v35, 0.0  ;;  %v515_v43 = vmul.f32 0.1, %v451_v35 }
  0xf9   :  { %vm468_vm2 = vcmp.ge.f32.partialorder %v436_v38, 0.0  ;;  %v500_v44 = vmul.f32 0.1, %v436_v38  ;;  %vm484_vm3 = vcmp.ge.f32.partialorder %v452_v39, 0.0  ;;  %v516_v45 = vmul.f32 0.1, %v452_v39 }
  0xfa   :  { %v531_v46 = vsel %vm467_vm0, %v435_v34, %v499_v42  ;;  %v547_v47 = vsel %vm483_vm1, %v451_v35, %v515_v43  ;;  %v437_v48 = vadd.f32 %v888_v30, %v281_v40  ;;  %v453_v49 = vadd.f32 %v888_v30, %v321_v41  ;;  %v283_v50 = vpop.f32.mrb[3].mxu0  ;;  %v323_v51 = vpop.f32.mrb[3].mxu1 }
  0xfb   :  { %v532_v52 = vsel %vm468_vm2, %v436_v38, %v500_v44  ;;  %v548_v53 = vsel %vm484_vm3, %v452_v39, %v516_v45  ;;  %v438_v54 = vadd.f32 %v890_v31, %v283_v50  ;;  %v454_v55 = vadd.f32 %v890_v31, %v323_v51 }
  0xfc   :  { %v719_v56 = vpack.c.bf16 %v532_v52, %v531_v46  ;;  %v727_v57 = vpack.c.bf16 %v548_v53, %v547_v47  ;;  %vm469_vm4 = vcmp.ge.f32.partialorder %v437_v48, 0.0  ;;  %v501_v58 = vmul.f32 0.1, %v437_v48 }
  0xfd   :  { %vm485_vm5 = vcmp.ge.f32.partialorder %v453_v49, 0.0  ;;  %v517_v59 = vmul.f32 0.1, %v453_v49  ;;  %vm470_vm6 = vcmp.ge.f32.partialorder %v438_v54, 0.0  ;;  %v502_v60 = vmul.f32 0.1, %v438_v54 }
  0xfe   :  { %659 = vst [vmem:[%s976_s3] sm:$0xff] %v719_v56  ;;  %667 = vst [vmem:[%s976_s3 + $0x40] sm:$0xff] %v727_v57  ;;  %v533_v61 = vsel %vm469_vm4, %v437_v48, %v501_v58  ;;  %vm486_vm7 = vcmp.ge.f32.partialorder %v454_v55, 0.0  ;;  %v518_v62 = vmul.f32 0.1, %v454_v55  ;;  %v287_v63 = vpop.f32.mrb[4].mxu0  ;;  %v327_v0 = vpop.f32.mrb[4].mxu1 }
  0xff   :  { %v549_v1 = vsel %vm485_vm5, %v453_v49, %v517_v59  ;;  %v534_v2 = vsel %vm470_vm6, %v438_v54, %v502_v60  ;;  %v439_v3 = vadd.f32 %v888_v30, %v287_v63  ;;  %v455_v4 = vadd.f32 %v888_v30, %v327_v0  ;;  %v289_v5 = vpop.f32.mrb[5].mxu0  ;;  %v329_v6 = vpop.f32.mrb[5].mxu1 }
 0x100   :  { %v720_v7 = vpack.c.bf16 %v534_v2, %v533_v61  ;;  %v550_v8 = vsel %vm486_vm7, %v454_v55, %v518_v62  ;;  %v440_v9 = vadd.f32 %v890_v31, %v289_v5  ;;  %v456_v10 = vadd.f32 %v890_v31, %v329_v6  ;;  %v291_v11 = vpop.f32.mrb[6].mxu0  ;;  %v331_v12 = vpop.f32.mrb[6].mxu1 }
 0x101   :  { %v728_v13 = vpack.c.bf16 %v550_v8, %v549_v1  ;;  %vm471_vm8 = vcmp.ge.f32.partialorder %v439_v3, 0.0  ;;  %v503_v14 = vmul.f32 0.1, %v439_v3  ;;  %vm487_vm9 = vcmp.ge.f32.partialorder %v455_v4, 0.0  ;;  %v293_v15 = vpop.f32.mrb[7].mxu0  ;;  %v333_v16 = vpop.f32.mrb[7].mxu1 }
 0x102   :  { %660 = vst [vmem:[%s976_s3 + $0x8] sm:$0xff] %v720_v7  ;;  %v519_v17 = vmul.f32 0.1, %v455_v4  ;;  %vm472_vm10 = vcmp.ge.f32.partialorder %v440_v9, 0.0  ;;  %v504_v18 = vmul.f32 0.1, %v440_v9  ;;  %v441_v21 = vadd.f32 %v888_v30, %v291_v11 }
 0x103   :  { %vm488_vm11 = vcmp.ge.f32.partialorder %v456_v10, 0.0  ;;  %668 = vst [vmem:[%s976_s3 + $0x48] sm:$0xff] %v728_v13  ;;  %v535_v19 = vsel %vm471_vm8, %v439_v3, %v503_v14  ;;  %v520_v20 = vmul.f32 0.1, %v456_v10  ;;  %v457_v22 = vadd.f32 %v888_v30, %v331_v12 }
 0x104   :  { %v551_v23 = vsel %vm487_vm9, %v455_v4, %v519_v17  ;;  %v536_v24 = vsel %vm472_vm10, %v440_v9, %v504_v18  ;;  %v442_v25 = vadd.f32 %v890_v31, %v293_v15  ;;  %v458_v26 = vadd.f32 %v890_v31, %v333_v16 }
 0x105   :  { %v721_v27 = vpack.c.bf16 %v536_v24, %v535_v19  ;;  %v552_v28 = vsel %vm488_vm11, %v456_v10, %v520_v20  ;;  %vm473_vm12 = vcmp.ge.f32.partialorder %v441_v21, 0.0  ;;  %v505_v29 = vmul.f32 0.1, %v441_v21  ;;  %v297_v32 = vpop.f32.mrb[8].mxu0  ;;  %v337_v33 = vpop.f32.mrb[8].mxu1 }
 0x106   :  { %v729_v34 = vpack.c.bf16 %v552_v28, %v551_v23  ;;  %vm489_vm13 = vcmp.ge.f32.partialorder %v457_v22, 0.0  ;;  %v521_v35 = vmul.f32 0.1, %v457_v22  ;;  %vm474_vm14 = vcmp.ge.f32.partialorder %v442_v25, 0.0  ;;  %v299_v36 = vpop.f32.mrb[9].mxu0  ;;  %v339_v37 = vpop.f32.mrb[9].mxu1 }
 0x107   :  { %661 = vst [vmem:[%s976_s3 + $0x10] sm:$0xff] %v721_v27  ;;  %v537_v38 = vsel %vm473_vm12, %v441_v21, %v505_v29  ;;  %v506_v39 = vmul.f32 0.1, %v442_v25  ;;  %vm490_vm15 = vcmp.ge.f32.partialorder %v458_v26, 0.0  ;;  %v522_v40 = vmul.f32 0.1, %v458_v26 }
 0x108   :  { %v301_v41 = vpop.f32.mrb[10].mxu0  ;;  %669 = vst [vmem:[%s976_s3 + $0x50] sm:$0xff] %v729_v34  ;;  %v553_v42 = vsel %vm489_vm13, %v457_v22, %v521_v35  ;;  %v443_v43 = vadd.f32 %v888_v30, %v297_v32  ;;  %v459_v44 = vadd.f32 %v888_v30, %v337_v33  ;;  %v444_v45 = vadd.f32 %v890_v31, %v299_v36  ;;  %v341_v46 = vpop.f32.mrb[10].mxu1 }
 0x109   :  { %v303_v47 = vpop.f32.mrb[11].mxu0  ;;  %v538_v48 = vsel %vm474_vm14, %v442_v25, %v506_v39  ;;  %v554_v49 = vsel %vm490_vm15, %v458_v26, %v522_v40  ;;  %v460_v50 = vadd.f32 %v890_v31, %v339_v37  ;;  %v445_v51 = vadd.f32 %v888_v30, %v301_v41  ;;  %v343_v52 = vpop.f32.mrb[11].mxu1 }
 0x10a   :  { %v722_v53 = vpack.c.bf16 %v538_v48, %v537_v38  ;;  %v730_v54 = vpack.c.bf16 %v554_v49, %v553_v42  ;;  %vm475_vm0 = vcmp.ge.f32.partialorder %v443_v43, 0.0  ;;  %v507_v55 = vmul.f32 0.1, %v443_v43 }
 0x10b   :  { %vm491_vm1 = vcmp.ge.f32.partialorder %v459_v44, 0.0  ;;  %v523_v56 = vmul.f32 0.1, %v459_v44  ;;  %vm476_vm2 = vcmp.ge.f32.partialorder %v444_v45, 0.0  ;;  %v508_v57 = vmul.f32 0.1, %v444_v45 }
 0x10c   :  { %662 = vst [vmem:[%s976_s3 + $0x18] sm:$0xff] %v722_v53  ;;  %670 = vst [vmem:[%s976_s3 + $0x58] sm:$0xff] %v730_v54  ;;  %v539_v58 = vsel %vm475_vm0, %v443_v43, %v507_v55  ;;  %vm492_vm3 = vcmp.ge.f32.partialorder %v460_v50, 0.0  ;;  %v524_v59 = vmul.f32 0.1, %v460_v50  ;;  %vm477_vm4 = vcmp.ge.f32.partialorder %v445_v51, 0.0 }
 0x10d   :  { %v555_v60 = vsel %vm491_vm1, %v459_v44, %v523_v56  ;;  %v540_v61 = vsel %vm476_vm2, %v444_v45, %v508_v57  ;;  %v509_v62 = vmul.f32 0.1, %v445_v51  ;;  %v461_v63 = vadd.f32 %v888_v30, %v341_v46  ;;  %v307_v0 = vpop.f32.mrb[12].mxu0  ;;  %v347_v1 = vpop.f32.mrb[12].mxu1 }
 0x10e   :  { %v723_v2 = vpack.c.bf16 %v540_v61, %v539_v58  ;;  %v556_v3 = vsel %vm492_vm3, %v460_v50, %v524_v59  ;;  %v446_v4 = vadd.f32 %v890_v31, %v303_v47  ;;  %v462_v5 = vadd.f32 %v890_v31, %v343_v52  ;;  %v309_v6 = vpop.f32.mrb[13].mxu0  ;;  %v349_v7 = vpop.f32.mrb[13].mxu1 }
 0x10f   :  { %v731_v8 = vpack.c.bf16 %v556_v3, %v555_v60  ;;  %v541_v9 = vsel %vm477_vm4, %v445_v51, %v509_v62  ;;  %vm493_vm5 = vcmp.ge.f32.partialorder %v461_v63, 0.0  ;;  %v525_v10 = vmul.f32 0.1, %v461_v63  ;;  %v311_v11 = vpop.f32.mrb[14].mxu0  ;;  %v351_v12 = vpop.f32.mrb[14].mxu1 }
 0x110   :  { %663 = vst [vmem:[%s976_s3 + $0x20] sm:$0xff] %v723_v2  ;;  %vm478_vm6 = vcmp.ge.f32.partialorder %v446_v4, 0.0  ;;  %v510_v13 = vmul.f32 0.1, %v446_v4  ;;  %vm494_vm7 = vcmp.ge.f32.partialorder %v462_v5, 0.0  ;;  %v447_v16 = vadd.f32 %v888_v30, %v307_v0  ;;  %v313_v19 = vpop.f32.mrb[15].mxu0 }
 0x111   :  { %v526_v14 = vmul.f32 0.1, %v462_v5  ;;  %671 = vst [vmem:[%s976_s3 + $0x60] sm:$0xff] %v731_v8  ;;  %v557_v15 = vsel %vm493_vm5, %v461_v63, %v525_v10  ;;  %v463_v17 = vadd.f32 %v888_v30, %v347_v1  ;;  %v448_v18 = vadd.f32 %v890_v31, %v309_v6  ;;  %v353_v20 = vpop.f32.mrb[15].mxu1 }
 0x112   :  { %v542_v21 = vsel %vm478_vm6, %v446_v4, %v510_v13  ;;  %v464_v23 = vadd.f32 %v890_v31, %v349_v7  ;;  %v449_v24 = vadd.f32 %v888_v30, %v311_v11  ;;  %vm479_vm8 = vcmp.ge.f32.partialorder %v447_v16, 0.0 }
 0x113   :  { %v558_v22 = vsel %vm494_vm7, %v462_v5, %v526_v14  ;;  %v724_v25 = vpack.c.bf16 %v542_v21, %v541_v9  ;;  %v511_v27 = vmul.f32 0.1, %v447_v16  ;;  %vm495_vm9 = vcmp.ge.f32.partialorder %v463_v17, 0.0 }
 0x114   :  { %v732_v26 = vpack.c.bf16 %v558_v22, %v557_v15  ;;  %v527_v28 = vmul.f32 0.1, %v463_v17  ;;  %vm480_vm10 = vcmp.ge.f32.partialorder %v448_v18, 0.0  ;;  %v512_v29 = vmul.f32 0.1, %v448_v18 }
 0x115   :  { %664 = vst [vmem:[%s976_s3 + $0x28] sm:$0xff] %v724_v25  ;;  %v543_v32 = vsel %vm479_vm8, %v447_v16, %v511_v27  ;;  %vm496_vm11 = vcmp.ge.f32.partialorder %v464_v23, 0.0  ;;  %v528_v33 = vmul.f32 0.1, %v464_v23  ;;  %vm481_vm12 = vcmp.ge.f32.partialorder %v449_v24, 0.0 }
 0x116   :  { %672 = vst [vmem:[%s976_s3 + $0x68] sm:$0xff] %v732_v26  ;;  %v559_v34 = vsel %vm495_vm9, %v463_v17, %v527_v28  ;;  %v544_v35 = vsel %vm480_vm10, %v448_v18, %v512_v29  ;;  %v513_v36 = vmul.f32 0.1, %v449_v24  ;;  %v465_v37 = vadd.f32 %v888_v30, %v351_v12 }
 0x117   :  { %v725_v38 = vpack.c.bf16 %v544_v35, %v543_v32  ;;  %v560_v39 = vsel %vm496_vm11, %v464_v23, %v528_v33  ;;  %v450_v40 = vadd.f32 %v890_v31, %v313_v19  ;;  %v466_v41 = vadd.f32 %v890_v31, %v353_v20 }
 0x118   :  { %v733_v42 = vpack.c.bf16 %v560_v39, %v559_v34  ;;  %v545_v43 = vsel %vm481_vm12, %v449_v24, %v513_v36  ;;  %vm497_vm13 = vcmp.ge.f32.partialorder %v465_v37, 0.0  ;;  %v529_v44 = vmul.f32 0.1, %v465_v37 }
 0x119   :  { %665 = vst [vmem:[%s976_s3 + $0x30] sm:$0xff] %v725_v38  ;;  %vm482_vm14 = vcmp.ge.f32.partialorder %v450_v40, 0.0  ;;  %v514_v45 = vmul.f32 0.1, %v450_v40  ;;  %vm498_vm15 = vcmp.ge.f32.partialorder %v466_v41, 0.0 }
 0x11a   :  { %v530_v46 = vmul.f32 0.1, %v466_v41  ;;  %673 = vst [vmem:[%s976_s3 + $0x70] sm:$0xff] %v733_v42  ;;  %v561_v30 = vsel %vm497_vm13, %v465_v37, %v529_v44 }
 0x11b   :  { %v546_v47 = vsel %vm482_vm14, %v450_v40, %v514_v45 }
 0x11c   :  { %v562_v48 = vsel %vm498_vm15, %v466_v41, %v530_v46  ;;  %v726_v31 = vpack.c.bf16 %v546_v47, %v545_v43 }
 0x11d   :  { %v734_v49 = vpack.c.bf16 %v562_v48, %v561_v30 }
 0x11e   :  { %666 = vst [vmem:[%s976_s3 + $0x38] sm:$0xff] %v726_v31 }
 0x11f   :  { %674 = vst [vmem:[%s976_s3 + $0x78] sm:$0xff] %v734_v49 }

// kernel: spp_block.10
= control target key start
LH: loop header
LB: loop body
LE: loop exit
PB: predicated region body
PF: predicated region fallthrough
CT: control target
= control target key end

     0   :  { %s3807_s12 = smov 0   ;;  %s3809_s13 = smov 0   ;;  %s4716_s0 = inlined_call_operand.vmem [shape: bf16[2,10,10,128], index: 0, kind: input, shape index: {}]   ;;  %s4717_s1 = inlined_call_operand.vmem [shape: bf16[9,128,256], index: 1, kind: input, shape index: {}]   ;;  %s4718_s2 = inlined_call_operand.vmem [shape: f32[1,256], index: 2, kind: input, shape index: {}]   ;;  %s4719_s3 = inlined_call_operand.vmem [shape: bf16[2,8,8,256], index: 3, kind: output, shape index: {}]  }
   0x1   :  { %s3811_s14 = smov 0  }
   0x2 LB: > { %s32_s15 = sadd.s32 1, %s3780_s13  ;;  %p2945_p0 = scmp.ge.s32.totalorder %s3784_s14, 1  ;;  %s3784_s14 = sphi %s3811_s14, %s13_s14   ;;  %s3780_s13 = sphi %s3809_s13, %s4725_s13   ;;  %s3776_s12 = sphi %s3807_s12, %s4724_s12  }
   0x3   : > { %p34_p1 = scmp.ge.s32.totalorder %s32_s15, 2  ;;  %p181_p2 = scmp.lt.s32.totalorder %s3784_s14, 3 }
   0x5   : > { %s4727_s15 = smov (%p34_p1, %s32_s15), 0  ;;  %p182_p3 = pnand %p2945_p0, %p181_p2 }
   0x6   : > { %v3534_v0 = vld [vmem:[%s4717_s1 + $0x84] ss:$8 sps:$4 sm:$0xff] (!%p182_p3)   ;;  %v3786_v2 = vmov (!%p182_p3), 0   ;;  %v3538_v3 = vld [vmem:[%s4717_s1 + $0x80] ss:$8 sps:$4 sm:$0xff] (!%p182_p3)   ;;  %p223_p4 = scmp.lt.s32.totalorder (!%p182_p3), %s3776_s12, 1 }
   0x7   : > { %185 = sbr.rel (%p182_p3) target bundleno = 414 (0x19e), region = 32  ;;  %v3536_v1 = vld [vmem:[%s4717_s1 + $0x204] ss:$8 sps:$4 sm:$0xff] (!%p182_p3)   ;;  %552 = vmatprep.mubr.bf16.mxu1 (!%p182_p3), %v3786_v2  ;;  %1526 = vmatprep.mubr.bf16.mxu0 (!%p182_p3), %v3786_v2  ;;  %v3539_v4 = vld [vmem:[%s4717_s1 + $0x200] ss:$8 sps:$4 sm:$0xff] (!%p182_p3)   ;;  %vm794_vm3 = vcmask (!%p182_p3), 1042432  }
   0x8   : > { %520 = vmatprep.subr.bf16.mxu1 (!%p182_p3), %v3534_v0  ;;  %1494 = vmatprep.subr.bf16.mxu0 (!%p182_p3), %v3536_v1  ;;  %v3540_v5 = vld [vmem:[%s4717_s1 + $0x94] ss:$8 sps:$4 sm:$0xff] (!%p182_p3)   ;;  %v3544_v7 = vld [vmem:[%s4717_s1 + $0x90] ss:$8 sps:$4 sm:$0xff] (!%p182_p3)   ;;  %v3546_v9 = vld [vmem:[%s4717_s1 + $0xa4] ss:$8 sps:$4 sm:$0xff] (!%p182_p3)  }
   0x9   : > { %521 = vmatpush1.bf16.msra.mxu1 (!%p182_p3), %v3538_v3  ;;  %1495 = vmatpush1.bf16.msra.mxu0 (!%p182_p3), %v3539_v4  ;;  %v3542_v6 = vld [vmem:[%s4717_s1 + $0x214] ss:$8 sps:$4 sm:$0xff] (!%p182_p3)   ;;  %v3545_v8 = vld [vmem:[%s4717_s1 + $0x210] ss:$8 sps:$4 sm:$0xff] (!%p182_p3)   ;;  %v3548_v10 = vld [vmem:[%s4717_s1 + $0x224] ss:$8 sps:$4 sm:$0xff] (!%p182_p3)  }
   0xa   : > { %522 = vmatprep.subr.bf16.mxu1 (!%p182_p3), %v3540_v5  ;;  %1496 = vmatprep.subr.bf16.mxu0 (!%p182_p3), %v3542_v6  ;;  %v3550_v11 = vld [vmem:[%s4717_s1 + $0xa0] ss:$8 sps:$4 sm:$0xff] (!%p182_p3)   ;;  %v3552_v13 = vld [vmem:[%s4717_s1 + $0xb4] ss:$8 sps:$4 sm:$0xff] (!%p182_p3)   ;;  %v3556_v15 = vld [vmem:[%s4717_s1 + $0xb0] ss:$8 sps:$4 sm:$0xff] (!%p182_p3)  }
   0xb   : > { %v3551_v12 = vld [vmem:[%s4717_s1 + $0x220] ss:$8 sps:$4 sm:$0xff] (!%p182_p3)   ;;  %v3554_v14 = vld [vmem:[%s4717_s1 + $0x234] ss:$8 sps:$4 sm:$0xff] (!%p182_p3)   ;;  %v3557_v16 = vld [vmem:[%s4717_s1 + $0x230] ss:$8 sps:$4 sm:$0xff] (!%p182_p3)  }
   0xc   : > { %v3558_v17 = vld [vmem:[%s4717_s1 + $0xc4] ss:$8 sps:$4 sm:$0xff] (!%p182_p3)   ;;  %v3562_v19 = vld [vmem:[%s4717_s1 + $0xc0] ss:$8 sps:$4 sm:$0xff] (!%p182_p3)   ;;  %v3564_v21 = vld [vmem:[%s4717_s1 + $0xd4] ss:$8 sps:$4 sm:$0xff] (!%p182_p3)  }
   0xd   : > { %523 = vmatpush1.bf16.msra.mxu1 (!%p182_p3), %v3544_v7  ;;  %1497 = vmatpush1.bf16.msra.mxu0 (!%p182_p3), %v3545_v8  ;;  %v3560_v18 = vld [vmem:[%s4717_s1 + $0x244] ss:$8 sps:$4 sm:$0xff] (!%p182_p3)   ;;  %v3563_v20 = vld [vmem:[%s4717_s1 + $0x240] ss:$8 sps:$4 sm:$0xff] (!%p182_p3)   ;;  %v3566_v22 = vld [vmem:[%s4717_s1 + $0x254] ss:$8 sps:$4 sm:$0xff] (!%p182_p3)  }
   0xe   : > { %524 = vmatprep.subr.bf16.mxu1 %v3546_v9  ;;  %1498 = vmatprep.subr.bf16.mxu0 %v3548_v10  ;;  %s4729_s12 = smov (!%p223_p4, %s3776_s12), 1  ;;  %vm292_vm0 = vsmask.f32 3328  ;;  %v3568_v23 = vld [vmem:[%s4717_s1 + $0xd0] ss:$8 sps:$4 sm:$0xff]   ;;  %vm795_vm4 = vcmask 1046532  }
   0xf   : > { %s3508_s29 = smul.u32 80, %s4729_s12  ;;  %vm293_vm1 = vsmask.f32 7440  ;;  %v3569_v24 = vld [vmem:[%s4717_s1 + $0x250] ss:$8 sps:$4 sm:$0xff]   ;;  %vm4200_vm5 = vmor %vm794_vm3, %vm795_vm4  ;;  %s3355_s21 = sshll.u32 %s4729_s12, 6 }
  0x10   : > { %v3570_v25 = vld [vmem:[%s4717_s1 + $0xe4] ss:$8 sps:$4 sm:$0xff]   ;;  %v3574_v29 = vld [vmem:[%s4717_s1 + $0xe0] ss:$8 sps:$4 sm:$0xff]   ;;  %v3576_v39 = vld [vmem:[%s4717_s1 + $0xf4] ss:$8 sps:$4 sm:$0xff]   ;;  %s4675_s24 = scalar_lea.vmem %s4719_s3, %s3355_s21 }
  0x11   : > { %525 = vmatpush1.bf16.msra.mxu1 %v3550_v11  ;;  %1499 = vmatpush1.bf16.msra.mxu0 %v3551_v12  ;;  %s3903_s17 = scalar_lea.vmem %s4716_s0, %s3508_s29  ;;  %v3572_v26 = vld [vmem:[%s4717_s1 + $0x264] ss:$8 sps:$4 sm:$0xff]   ;;  %v3575_v38 = vld [vmem:[%s4717_s1 + $0x260] ss:$8 sps:$4 sm:$0xff]   ;;  %v3578_v42 = vld [vmem:[%s4717_s1 + $0x274] ss:$8 sps:$4 sm:$0xff]  }
  0x12   : > { %526 = vmatprep.subr.bf16.mxu1 %v3552_v13  ;;  %1500 = vmatprep.subr.bf16.mxu0 %v3554_v14  ;;  %v3918_v27 = vld [vmem:[%s3903_s17] sm:$0xf]  ;;  %v3921_v28 = vld [vmem:[%s3903_s17 + $0x8] sm:$0xf]  ;;  %v3927_v30 = vld [vmem:[%s3903_s17 + $0x4] sm:$0x1] }
  0x13   : > { %v3930_v31 = vld [vmem:[%s3903_s17 + $0xc] sm:$0x1]  ;;  %v296_v32 = vshrl.u32 %v3918_v27, 16  ;;  %v299_v33 = vshll.u32 %v3918_v27, 16  ;;  %v305_v34 = vshll.u32 %v3927_v30, 16  ;;  %v310_v35 = vshrl.u32 %v3921_v28, 16  ;;  %vm3960_vm2 = vmor %vm292_vm0, %vm293_vm1 }
  0x14   : > { %v313_v36 = vshll.u32 %v3921_v28, 16  ;;  %v319_v37 = vshll.u32 %v3930_v31, 16  ;;  %v3580_v47 = vld [vmem:[%s4717_s1 + $0xf0] ss:$8 sps:$4 sm:$0xff]   ;;  %v3093_v50 = vld [vmem:[%s3903_s17 + $0x8] sm:$0xf] }
  0x15   : > { %527 = vmatpush1.bf16.msra.mxu1 %v3556_v15  ;;  %1501 = vmatpush1.bf16.msra.mxu0 %v3557_v16  ;;  %v298_v40 = vrot.slane %v296_v32, 4  ;;  %v301_v41 = vrot.slane %v299_v33, 5  ;;  %v307_v43 = vrot.slane %v305_v34, 5  ;;  %v312_v44 = vrot.slane %v310_v35, 4  ;;  %v3581_v48 = vld [vmem:[%s4717_s1 + $0x270] ss:$8 sps:$4 sm:$0xff]  }
  0x16   : > { %528 = vmatprep.subr.bf16.mxu1 %v3558_v17  ;;  %1502 = vmatprep.subr.bf16.mxu0 %v3560_v18  ;;  %v315_v45 = vrot.slane %v313_v36, 5  ;;  %v321_v46 = vrot.slane %v319_v37, 5  ;;  %v3955_v51 = vld [vmem:[%s3903_s17 + $0xc] sm:$0x1]  ;;  %v3095_v52 = vld [vmem:[%s3903_s17 + $0x10] sm:$0xf] }
  0x17   : > { %v302_v49 = vor.u32 %v301_v41, %v298_v40  ;;  %v3965_v55 = vld [vmem:[%s3903_s17 + $0x14] sm:$0x1]  ;;  %v1270_v56 = vshrl.u32 %v3093_v50, 16  ;;  %v1273_v57 = vshll.u32 %v3093_v50, 16  ;;  %v1279_v58 = vshll.u32 %v3955_v51, 16 }
  0x18   : > { %v316_v54 = vor.u32 %v315_v45, %v312_v44  ;;  %v1284_v60 = vshrl.u32 %v3095_v52, 16  ;;  %v1287_v61 = vshll.u32 %v3095_v52, 16  ;;  %v1293_v62 = vshll.u32 %v3965_v55, 16  ;;  %v3584_v0 = vld [vmem:[%s4717_s1 + $0x4] ss:$8 sps:$4 sm:$0xff]  }
  0x19   : > { %529 = vmatpush1.bf16.msra.mxu1 %v3562_v19  ;;  %1503 = vmatpush1.bf16.msra.mxu0 %v3563_v20  ;;  %v303_v59 = vrot.slane %v302_v49, 4  ;;  %v1272_v1 = vrot.slane %v1270_v56, 4  ;;  %v1275_v3 = vrot.slane %v1273_v57, 5  ;;  %v3587_v7 = vld [vmem:[%s4717_s1 + $0x284] ss:$8 sps:$4 sm:$0xff]   ;;  %v1281_v10 = vrot.slane %v1279_v58, 5 }
  0x1a   : > { %530 = vmatprep.subr.bf16.mxu1 %v3564_v21  ;;  %1504 = vmatprep.subr.bf16.mxu0 %v3566_v22  ;;  %v317_v63 = vrot.slane %v316_v54, 4  ;;  %v1286_v5 = vrot.slane %v1284_v60, 4  ;;  %v1289_v6 = vrot.slane %v1287_v61, 5  ;;  %v3582_v12 = vld [vmem:[%s4717_s1] ss:$8 sps:$4 sm:$0xff]   ;;  %v1295_v14 = vrot.slane %v1293_v62, 5 }
  0x1b   : > { %v308_v4 = vsel %vm3960_vm2, %v303_v59, %v307_v43  ;;  %v1276_v9 = vor.u32 %v1275_v3, %v1272_v1  ;;  %v3590_v16 = vld [vmem:[%s4717_s1 + $0x14] ss:$8 sps:$4 sm:$0xff]   ;;  %v3986_v17 = vld [vmem:[%s3903_s17 + $0x10] sm:$0xf]  ;;  %v3585_v19 = vld [vmem:[%s4717_s1 + $0x280] ss:$8 sps:$4 sm:$0xff]  }
  0x1c   : > { %v322_v8 = vsel %vm3960_vm2, %v317_v63, %v321_v46  ;;  %v1290_v13 = vor.u32 %v1289_v6, %v1286_v5  ;;  %v3588_v20 = vld [vmem:[%s4717_s1 + $0x10] ss:$8 sps:$4 sm:$0xff]   ;;  %v3998_v22 = vld [vmem:[%s3903_s17 + $0x14] sm:$0x1]  ;;  %v3099_v49 = vld [vmem:[%s3903_s17 + $0x20] sm:$0xf] }
  0x1d   : > { %531 = vmatpush1.bf16.msra.mxu1 %v3568_v23  ;;  %1505 = vmatpush1.bf16.msra.mxu0 %v3569_v24  ;;  %v2965_v11 = vcombine.low %v308_v4, %v322_v8  ;;  %v1277_v15 = vrot.slane %v1276_v9, 4  ;;  %v3995_v21 = vld [vmem:[%s3903_s17 + $0x18] sm:$0xf]  ;;  %v324_v23 = vshrl.u32 %v3986_v17, 16  ;;  %v3593_v34 = vld [vmem:[%s4717_s1 + $0x294] ss:$8 sps:$4 sm:$0xff]  }
  0x1e   : > { %532 = vmatprep.subr.bf16.mxu1 %v3570_v25  ;;  %1506 = vmatprep.subr.bf16.mxu0 %v3572_v26  ;;  %v1291_v18 = vrot.slane %v1290_v13, 4  ;;  %v4004_v25 = vld [vmem:[%s3903_s17 + $0x1c] sm:$0x1]  ;;  %v327_v26 = vshll.u32 %v3986_v17, 16  ;;  %v338_v32 = vshrl.u32 %v3995_v21, 16  ;;  %v341_v36 = vshll.u32 %v3995_v21, 16 }
  0x1f   : > { %v1282_v24 = vsel %vm3960_vm2, %v1277_v15, %v1281_v10  ;;  %v326_v35 = vrot.slane %v324_v23, 4  ;;  %v347_v37 = vshll.u32 %v4004_v25, 16  ;;  %v3591_v43 = vld [vmem:[%s4717_s1 + $0x290] ss:$8 sps:$4 sm:$0xff]   ;;  %v4029_v50 = vld [vmem:[%s3903_s17 + $0x24] sm:$0x1] }
  0x20   : > { %v1296_v33 = vsel %vm3960_vm2, %v1291_v18, %v1295_v14  ;;  %v340_v41 = vrot.slane %v338_v32, 4  ;;  %v343_v44 = vrot.slane %v341_v36, 5  ;;  %v3097_v46 = vld [vmem:[%s3903_s17 + $0x18] sm:$0xf]  ;;  %v3594_v57 = vld [vmem:[%s4717_s1 + $0x20] ss:$8 sps:$4 sm:$0xff]  }
  0x21   : > { %533 = vmatpush1.bf16.msra.mxu1 %v3574_v29  ;;  %1507 = vmatpush1.bf16.msra.mxu0 %v3575_v38  ;;  %v333_v29 = vshll.u32 %v3998_v22, 16  ;;  %v3125_v38 = vcombine.low %v1282_v24, %v1296_v33  ;;  %v349_v45 = vrot.slane %v347_v37, 5  ;;  %v1298_v52 = vshrl.u32 %v3097_v46, 16  ;;  %v3599_v1 = vld [vmem:[%s4717_s1 + $0x2a4] ss:$8 sps:$4 sm:$0xff]  }
  0x22   : > { %534 = vmatprep.subr.bf16.mxu1 %v3576_v39  ;;  %1508 = vmatprep.subr.bf16.mxu0 %v3578_v42  ;;  %v329_v39 = vrot.slane %v327_v26, 5  ;;  %v3596_v42 = vld [vmem:[%s4717_s1 + $0x24] ss:$8 sps:$4 sm:$0xff]   ;;  %v1301_v54 = vshll.u32 %v3097_v46, 16  ;;  %v344_v56 = vor.u32 %v343_v44, %v340_v41  ;;  %v1312_v59 = vshrl.u32 %v3099_v49, 16 }
  0x23   : > { %v335_v40 = vrot.slane %v333_v29, 5  ;;  %v1315_v60 = vshll.u32 %v3099_v49, 16  ;;  %v1300_v62 = vrot.slane %v1298_v52, 4  ;;  %v3597_v6 = vld [vmem:[%s4717_s1 + $0x2a0] ss:$8 sps:$4 sm:$0xff]  }
  0x24   : > { %v1303_v63 = vrot.slane %v1301_v54, 5  ;;  %v345_v3 = vrot.slane %v344_v56, 4  ;;  %v1314_v4 = vrot.slane %v1312_v59, 4  ;;  %v3600_v14 = vld [vmem:[%s4717_s1 + $0x30] ss:$8 sps:$4 sm:$0xff]  }
  0x25   : > { %535 = vmatpush1.bf16.msra.mxu1 %v3580_v47  ;;  %1509 = vmatpush1.bf16.msra.mxu0 %v3581_v48  ;;  %v4025_v47 = vld [vmem:[%s3903_s17 + $0x1c] sm:$0x1]  ;;  %v330_v48 = vor.u32 %v329_v39, %v326_v35  ;;  %v1317_v5 = vrot.slane %v1315_v60, 5  ;;  %v4063_v23 = vld [vmem:[%s3903_s17 + $0x24] sm:$0x1] }
  0x26   : > { %697 = vmatprep.subr.bf16.mxu1 %v3584_v0  ;;  %1752 = vmatprep.subr.bf16.mxu0 %v3587_v7  ;;  %v1307_v58 = vshll.u32 %v4025_v47, 16  ;;  %v1321_v0 = vshll.u32 %v4029_v50, 16  ;;  %v1304_v8 = vor.u32 %v1303_v63, %v1300_v62  ;;  %v3605_v15 = vld [vmem:[%s4717_s1 + $0x2b4] ss:$8 sps:$4 sm:$0xff]   ;;  %v3603_v29 = vld [vmem:[%s4717_s1 + $0x2b0] ss:$8 sps:$4 sm:$0xff]  }
  0x27   : > { %v331_v61 = vrot.slane %v330_v48, 4  ;;  %v1318_v13 = vor.u32 %v1317_v5, %v1314_v4  ;;  %v4070_v32 = vld [vmem:[%s3903_s17 + $0x2c] sm:$0x1]  ;;  %v3606_v44 = vld [vmem:[%s4717_s1 + $0x40] ss:$8 sps:$4 sm:$0xff]  }
  0x28   : > { %553 = vmatmul.mubr.bf16.vlgmr.msra.gmra.mrb[0].mxu1 %v2965_v11  ;;  %1527 = vmatmul.mubr.bf16.vlgmr.msra.gmra.mrb[0].mxu0 %v3125_v38  ;;  %v1309_v9 = vrot.slane %v1307_v58, 5  ;;  %v1323_v10 = vrot.slane %v1321_v0, 5  ;;  %v3602_v11 = vld [vmem:[%s4717_s1 + $0x34] ss:$8 sps:$4 sm:$0xff]   ;;  %v375_v39 = vshll.u32 %v4070_v32, 16 }
  0x29   : > { %698 = vmatpush1.bf16.msra.mxu1 %v3582_v12  ;;  %562 = vmatprep.mubr.bf16.mxu1 %v3786_v2  ;;  %v336_v7 = vsel %vm3960_vm2, %v331_v61, %v335_v40  ;;  %v350_v12 = vsel %vm3960_vm2, %v345_v3, %v349_v45  ;;  %v1319_v26 = vrot.slane %v1318_v13, 4  ;;  %v3608_v49 = vld [vmem:[%s4717_s1 + $0x44] ss:$8 sps:$4 sm:$0xff]   ;;  %v3101_v52 = vld [vmem:[%s3903_s17 + $0x28] sm:$0xf] }
  0x2a   : > { %699 = vmatprep.subr.bf16.mxu1 %v3590_v16  ;;  %1753 = vmatpush1.bf16.msra.mxu0 %v3585_v19  ;;  %v4057_v16 = vld [vmem:[%s3903_s17 + $0x20] sm:$0xf]  ;;  %v2966_v18 = vcombine.low %v336_v7, %v350_v12  ;;  %v1305_v19 = vrot.slane %v1304_v8, 4  ;;  %v377_v48 = vrot.slane %v375_v39, 5  ;;  %v4090_v56 = vld [vmem:[%s3903_s17 + $0x2c] sm:$0x1] }
  0x2b   : > { %1754 = vmatprep.subr.bf16.mxu0 %v3593_v34  ;;  %1536 = vmatprep.mubr.bf16.mxu0 %v3786_v2  ;;  %v352_v24 = vshrl.u32 %v4057_v16, 16  ;;  %v355_v33 = vshll.u32 %v4057_v16, 16  ;;  %v361_v34 = vshll.u32 %v4063_v23, 16  ;;  %v1324_v40 = vsel %vm3960_vm2, %v1319_v26, %v1323_v10  ;;  %v4094_v58 = vld [vmem:[%s3903_s17 + $0x34] sm:$0x1] }
  0x2c   : > { %v1310_v36 = vsel %vm3960_vm2, %v1305_v19, %v1309_v9  ;;  %v1326_v60 = vshrl.u32 %v3101_v52, 16  ;;  %v1329_v61 = vshll.u32 %v3101_v52, 16  ;;  %v1335_v62 = vshll.u32 %v4090_v56, 16  ;;  %v3609_v63 = vld [vmem:[%s4717_s1 + $0x2c0] ss:$8 sps:$4 sm:$0xff]  }
  0x2d   : > { %700 = vmatpush1.bf16.msra.mxu1 %v3588_v20  ;;  %v4060_v20 = vld [vmem:[%s3903_s17 + $0x28] sm:$0xf]  ;;  %v354_v37 = vrot.slane %v352_v24, 4  ;;  %v357_v41 = vrot.slane %v355_v33, 5  ;;  %v3126_v45 = vcombine.low %v1310_v36, %v1324_v40  ;;  %v1349_v4 = vshll.u32 %v4094_v58, 16 }
  0x2e   : > { %701 = vmatprep.subr.bf16.mxu1 %v3596_v42  ;;  %1755 = vmatpush1.bf16.msra.mxu0 %v3591_v43  ;;  %v366_v35 = vshrl.u32 %v4060_v20, 16  ;;  %v369_v38 = vshll.u32 %v4060_v20, 16  ;;  %v363_v42 = vrot.slane %v361_v34, 5  ;;  %v3611_v5 = vld [vmem:[%s4717_s1 + $0x2c4] ss:$8 sps:$4 sm:$0xff]   ;;  %v1328_v7 = vrot.slane %v1326_v60, 4 }
  0x2f   : > { %1756 = vmatprep.subr.bf16.mxu0 %v3599_v1  ;;  %v358_v54 = vor.u32 %v357_v41, %v354_v37  ;;  %v1331_v8 = vrot.slane %v1329_v61, 5  ;;  %v1337_v9 = vrot.slane %v1335_v62, 5  ;;  %v1351_v13 = vrot.slane %v1349_v4, 5  ;;  %v3614_v19 = vld [vmem:[%s4717_s1 + $0x54] ss:$8 sps:$4 sm:$0xff]  }
  0x30   : > { %563 = vmatmul.mubr.bf16.gmra.mrb[4].mxu1 %v2966_v18  ;;  %v368_v43 = vrot.slane %v366_v35, 4  ;;  %v371_v46 = vrot.slane %v369_v38, 5  ;;  %1537 = vmatmul.mubr.bf16.gmra.mrb[4].mxu0 %v3126_v45  ;;  %v3615_v24 = vld [vmem:[%s4717_s1 + $0x2d0] ss:$8 sps:$4 sm:$0xff]   ;;  %v3617_v26 = vld [vmem:[%s4717_s1 + $0x2d4] ss:$8 sps:$4 sm:$0xff]  }
  0x31   : > { %702 = vmatpush1.bf16.msra.mxu1 %v3594_v57  ;;  %572 = vmatprep.mubr.bf16.mxu1 %v3786_v2  ;;  %v3103_v57 = vld [vmem:[%s3903_s17 + $0x30] sm:$0xf]  ;;  %v359_v0 = vrot.slane %v358_v54, 4  ;;  %v1332_v18 = vor.u32 %v1331_v8, %v1328_v7  ;;  %v4125_v35 = vld [vmem:[%s3903_s17 + $0x38] sm:$0xf] }
  0x32   : > { %703 = vmatprep.subr.bf16.mxu1 %v3602_v11  ;;  %1757 = vmatpush1.bf16.msra.mxu0 %v3597_v6  ;;  %v372_v59 = vor.u32 %v371_v46, %v368_v43  ;;  %v1340_v1 = vshrl.u32 %v3103_v57, 16  ;;  %v1343_v3 = vshll.u32 %v3103_v57, 16  ;;  %v4122_v34 = vld [vmem:[%s3903_s17 + $0x30] sm:$0xf]  ;;  %v4128_v36 = vld [vmem:[%s3903_s17 + $0x34] sm:$0x1] }
  0x33   : > { %1758 = vmatprep.subr.bf16.mxu0 %v3605_v15  ;;  %1546 = vmatprep.mubr.bf16.mxu0 %v3786_v2  ;;  %v364_v10 = vsel %vm3960_vm2, %v359_v0, %v363_v42  ;;  %v1333_v37 = vrot.slane %v1332_v18, 4  ;;  %v4131_v38 = vld [vmem:[%s3903_s17 + $0x3c] sm:$0x1]  ;;  %v380_v39 = vshrl.u32 %v4122_v34, 16  ;;  %v383_v40 = vshll.u32 %v4122_v34, 16 }
  0x34   : > { %v373_v6 = vrot.slane %v372_v59, 4  ;;  %v1342_v11 = vrot.slane %v1340_v1, 4  ;;  %v1345_v12 = vrot.slane %v1343_v3, 5  ;;  %v389_v41 = vshll.u32 %v4128_v36, 16  ;;  %v3618_v54 = vld [vmem:[%s4717_s1 + $0x60] ss:$8 sps:$4 sm:$0xff]  }
  0x35   : > { %704 = vmatpush1.bf16.msra.mxu1 %v3600_v14  ;;  %v3612_v14 = vld [vmem:[%s4717_s1 + $0x50] ss:$8 sps:$4 sm:$0xff]   ;;  %v394_v43 = vshrl.u32 %v4125_v35, 16  ;;  %v403_v45 = vshll.u32 %v4131_v38, 16  ;;  %v1338_v46 = vsel %vm3960_vm2, %v1333_v37, %v1337_v9  ;;  %v3620_v62 = vld [vmem:[%s4717_s1 + $0x64] ss:$8 sps:$4 sm:$0xff]  }
  0x36   : > { %705 = vmatprep.subr.bf16.mxu1 %v3608_v49  ;;  %1759 = vmatpush1.bf16.msra.mxu0 %v3603_v29  ;;  %v378_v15 = vsel %vm3960_vm2, %v373_v6, %v377_v48  ;;  %v1346_v33 = vor.u32 %v1345_v12, %v1342_v11  ;;  %v382_v48 = vrot.slane %v380_v39, 4  ;;  %v385_v49 = vrot.slane %v383_v40, 5  ;;  %v3105_v1 = vld [vmem:[%s3903_s17 + $0x38] sm:$0xf]  ;;  %v4152_v3 = vld [vmem:[%s3903_s17 + $0x3c] sm:$0x1] }
  0x37   : > { %1760 = vmatprep.subr.bf16.mxu0 %v3611_v5  ;;  %v2967_v29 = vcombine.low %v364_v10, %v378_v15  ;;  %v391_v52 = vrot.slane %v389_v41, 5  ;;  %v396_v59 = vrot.slane %v394_v43, 4  ;;  %v405_v61 = vrot.slane %v403_v45, 5  ;;  %v3107_v4 = vld [vmem:[%s3903_s17 + $0x40] sm:$0xf] }
  0x38   : > { %v1347_v42 = vrot.slane %v1346_v33, 4  ;;  %v386_v0 = vor.u32 %v385_v49, %v382_v48  ;;  %v4156_v6 = vld [vmem:[%s3903_s17 + $0x44] sm:$0x1]  ;;  %v1354_v7 = vshrl.u32 %v3105_v1, 16  ;;  %v1357_v8 = vshll.u32 %v3105_v1, 16 }
  0x39   : > { %706 = vmatpush1.bf16.msra.mxu1 %v3606_v44  ;;  %v397_v44 = vshll.u32 %v4125_v35, 16  ;;  %v1363_v9 = vshll.u32 %v4152_v3, 16  ;;  %v1368_v11 = vshrl.u32 %v3107_v4, 16  ;;  %v1371_v12 = vshll.u32 %v3107_v4, 16  ;;  %v3624_v37 = vld [vmem:[%s4717_s1 + $0x70] ss:$8 sps:$4 sm:$0xff]  }
  0x3a   : > { %1761 = vmatpush1.bf16.msra.mxu0 %v3609_v63  ;;  %707 = vmatprep.subr.bf16.mxu1 %v3614_v19  ;;  %v1352_v57 = vsel %vm3960_vm2, %v1347_v42, %v1351_v13  ;;  %v387_v10 = vrot.slane %v386_v0, 4  ;;  %v1377_v13 = vshll.u32 %v4156_v6, 16  ;;  %v1356_v18 = vrot.slane %v1354_v7, 4  ;;  %v3626_v42 = vld [vmem:[%s4717_s1 + $0x74] ss:$8 sps:$4 sm:$0xff]  }
  0x3b   : > { %1762 = vmatprep.subr.bf16.mxu0 %v3617_v26  ;;  %573 = vmatmul.mubr.bf16.gmra.mrb[8].mxu1 %v2967_v29  ;;  %v399_v60 = vrot.slane %v397_v44, 5  ;;  %v3127_v63 = vcombine.low %v1338_v46, %v1352_v57  ;;  %v1359_v19 = vrot.slane %v1357_v8, 5  ;;  %v1370_v29 = vrot.slane %v1368_v11, 4  ;;  %v3627_v46 = vld [vmem:[%s4717_s1 + $0x2f0] ss:$8 sps:$4 sm:$0xff]  }
  0x3c   : > { %582 = vmatprep.mubr.bf16.mxu1 %v3786_v2  ;;  %v392_v26 = vsel %vm3960_vm2, %v387_v10, %v391_v52  ;;  %v1373_v33 = vrot.slane %v1371_v12, 5  ;;  %v1365_v41 = vrot.slane %v1363_v9, 5  ;;  %v1379_v45 = vrot.slane %v1377_v13, 5  ;;  %v3629_v48 = vld [vmem:[%s4717_s1 + $0x2f4] ss:$8 sps:$4 sm:$0xff]  }
  0x3d   : > { %708 = vmatpush1.bf16.msra.mxu1 %v3612_v14  ;;  %v400_v5 = vor.u32 %v399_v60, %v396_v59  ;;  %1547 = vmatmul.mubr.bf16.gmra.mrb[8].mxu0 %v3127_v63  ;;  %v3621_v14 = vld [vmem:[%s4717_s1 + $0x2e0] ss:$8 sps:$4 sm:$0xff]   ;;  %v1360_v40 = vor.u32 %v1359_v19, %v1356_v18  ;;  %v3633_v52 = vld [vmem:[%s4717_s1 + $0x104] ss:$8 sps:$4 sm:$0xff]   ;;  %v3146_v59 = vld [vmem:[%s3903_s17 + $0x10] sm:$0xe] }
  0x3e   : > { %1763 = vmatpush1.bf16.msra.mxu0 %v3615_v24  ;;  %709 = vmatprep.subr.bf16.mxu1 %v3620_v62  ;;  %v3623_v24 = vld [vmem:[%s4717_s1 + $0x2e4] ss:$8 sps:$4 sm:$0xff]   ;;  %v1374_v44 = vor.u32 %v1373_v33, %v1370_v29  ;;  %v3145_v57 = vld [vmem:[%s3903_s17 + $0x8] sm:$0xe]  ;;  %v1609_v60 = vrot.slane %v3955_v51, 5  ;;  %v1613_v62 = vrot.slane %v3965_v55, 5  ;;  %v2985_v55 = vcombine.low %v3918_v27, %v3921_v28 }
  0x3f   : > { %1556 = vmatprep.mubr.bf16.mxu0 %v3786_v2  ;;  %v401_v15 = vrot.slane %v400_v5, 4  ;;  %1764 = vmatprep.subr.bf16.mxu0 %v3623_v24  ;;  %v1361_v49 = vrot.slane %v1360_v40, 4  ;;  %v3153_v0 = vrot.slane %v3145_v57, 9  ;;  %v3154_v1 = vrot.slane %v3146_v59, 9  ;;  %v3636_v51 = vld [vmem:[%s4717_s1 + $0x304] ss:$8 sps:$4 sm:$0xff]  }
  0x40   : > { %v3631_v7 = vld [vmem:[%s4717_s1 + $0x100] ss:$8 sps:$4 sm:$0xff]   ;;  %v3639_v10 = vld [vmem:[%s4717_s1 + $0x114] ss:$8 sps:$4 sm:$0xff]   ;;  %v3147_v11 = vld [vmem:[%s3903_s17 + $0x18] sm:$0xe]  ;;  %v2986_v29 = vcombine.low %v3986_v17, %v3995_v21 }
  0x41   : > { %710 = vmatpush1.bf16.msra.mxu1 %v3618_v54  ;;  %v406_v39 = vsel %vm3960_vm2, %v401_v15, %v405_v61  ;;  %v1375_v54 = vrot.slane %v1374_v44, 4  ;;  %v1366_v61 = vsel %vm3960_vm2, %v1361_v49, %v1365_v41  ;;  %v1610_v8 = vsel %vm4200_vm5, %v3153_v0, %v1609_v60  ;;  %v3148_v27 = vld [vmem:[%s3903_s17 + $0x20] sm:$0xe]  ;;  %v3637_v12 = vld [vmem:[%s4717_s1 + $0x110] ss:$8 sps:$4 sm:$0xff]  }
  0x42   : > { %v2968_v43 = vcombine.low %v392_v26, %v406_v39  ;;  %1765 = vmatpush1.bf16.msra.mxu0 %v3621_v14  ;;  %711 = vmatprep.subr.bf16.mxu1 %v3626_v42  ;;  %v1614_v9 = vsel %vm4200_vm5, %v3154_v1, %v1613_v62  ;;  %v1617_v13 = vrot.slane %v4025_v47, 5  ;;  %v3634_v14 = vld [vmem:[%s4717_s1 + $0x300] ss:$8 sps:$4 sm:$0xff]   ;;  %v3155_v15 = vrot.slane %v3147_v11, 9  ;;  %v3642_v24 = vld [vmem:[%s4717_s1 + $0x314] ss:$8 sps:$4 sm:$0xff]  }
  0x43   : > { %1766 = vmatprep.subr.bf16.mxu0 %v3629_v48  ;;  %v1380_v63 = vsel %vm3960_vm2, %v1375_v54, %v1379_v45  ;;  %v3177_v28 = vcombine.low %v1610_v8, %v1614_v9  ;;  %v3156_v18 = vrot.slane %v3148_v27, 9  ;;  %v1621_v19 = vrot.slane %v4029_v50, 5  ;;  %v3646_v26 = vld [vmem:[%s4717_s1 + $0x124] ss:$8 sps:$4 sm:$0xff]   ;;  %v3640_v47 = vld [vmem:[%s4717_s1 + $0x310] ss:$8 sps:$4 sm:$0xff]  }
  0x44   : > { %583 = vmatmul.mubr.bf16.gmra.mrb[12].mxu1 %v2968_v43  ;;  %v3128_v4 = vcombine.low %v1366_v61, %v1380_v63  ;;  %v3644_v50 = vld [vmem:[%s4717_s1 + $0x120] ss:$8 sps:$4 sm:$0xff]   ;;  %v3649_v33 = vld [vmem:[%s4717_s1 + $0x324] ss:$8 sps:$4 sm:$0xff]   ;;  %v3652_v17 = vld [vmem:[%s4717_s1 + $0x134] ss:$8 sps:$4 sm:$0xff]   ;;  %v2987_v54 = vcombine.low %v4057_v16, %v4060_v20 }
  0x45   : > { %712 = vmatpush1.bf16.msra.mxu1 %v3624_v37  ;;  %729 = vmatprep.mubr.bf16.mxu1 %v3786_v2  ;;  %v1618_v37 = vsel %vm4200_vm5, %v3155_v15, %v1617_v13  ;;  %v1622_v39 = vsel %vm4200_vm5, %v3156_v18, %v1621_v19  ;;  %v3149_v21 = vld [vmem:[%s3903_s17 + $0x28] sm:$0xe]  ;;  %v3150_v40 = vld [vmem:[%s3903_s17 + $0x30] sm:$0xe]  ;;  %v1625_v44 = vrot.slane %v4090_v56, 5  ;;  %v1629_v49 = vrot.slane %v4094_v58, 5 }
  0x46   : > { %1767 = vmatpush1.bf16.msra.mxu0 %v3627_v46  ;;  %942 = vmatprep.subr.bf16.mxu1 %v3633_v52  ;;  %v3178_v41 = vcombine.low %v1618_v37, %v1622_v39  ;;  %v3647_v42 = vld [vmem:[%s4717_s1 + $0x320] ss:$8 sps:$4 sm:$0xff]   ;;  %v3650_v43 = vld [vmem:[%s4717_s1 + $0x130] ss:$8 sps:$4 sm:$0xff]   ;;  %v3655_v45 = vld [vmem:[%s4717_s1 + $0x334] ss:$8 sps:$4 sm:$0xff]  }
  0x47   : > { %1974 = vmatprep.subr.bf16.mxu0 %v3636_v51  ;;  %1557 = vmatmul.mubr.bf16.gmra.mrb[12].mxu0 %v3128_v4  ;;  %v3157_v46 = vrot.slane %v3149_v21, 9  ;;  %v3158_v48 = vrot.slane %v3150_v40, 9  ;;  %v3659_v52 = vld [vmem:[%s4717_s1 + $0x144] ss:$8 sps:$4 sm:$0xff]   ;;  %v3653_v56 = vld [vmem:[%s4717_s1 + $0x330] ss:$8 sps:$4 sm:$0xff]  }
  0x48   : > { %1784 = vmatprep.mubr.bf16.mxu0 %v3786_v2  ;;  %v3657_v57 = vld [vmem:[%s4717_s1 + $0x140] ss:$8 sps:$4 sm:$0xff]   ;;  %v799_v58 = vrot.slane %v3927_v30, 5  ;;  %v803_v59 = vrot.slane %v3930_v31, 5  ;;  %v3662_v60 = vld [vmem:[%s4717_s1 + $0x344] ss:$8 sps:$4 sm:$0xff]  }
  0x49   : > { %v3665_v61 = vld [vmem:[%s4717_s1 + $0x154] ss:$8 sps:$4 sm:$0xff]   ;;  %v1626_v16 = vsel %vm4200_vm5, %v3157_v46, %v1625_v44  ;;  %v1630_v30 = vsel %vm4200_vm5, %v3158_v48, %v1629_v49  ;;  %v3151_v31 = vld [vmem:[%s3903_s17 + $0x38] sm:$0xe]  ;;  %v3152_v20 = vld [vmem:[%s3903_s17 + $0x40] sm:$0xe] }
  0x4a   : > { %v770_v62 = vld [vmem:[%s3903_s17] sm:$0xe]  ;;  %v771_v63 = vld [vmem:[%s3903_s17 + $0x8] sm:$0xe]  ;;  %v1633_v51 = vrot.slane %v4152_v3, 5  ;;  %v3159_v3 = vrot.slane %v3151_v31, 9 }
  0x4b   : > { %v3005_v0 = vrot.slane %v770_v62, 9  ;;  %v3660_v1 = vld [vmem:[%s4717_s1 + $0x340] ss:$8 sps:$4 sm:$0xff]   ;;  %v3006_v4 = vrot.slane %v771_v63, 9  ;;  %v3668_v9 = vld [vmem:[%s4717_s1 + $0x354] ss:$8 sps:$4 sm:$0xff]  }
  0x4c   : > { %730 = vmatmul.mubr.bf16.vlgmr.msra.gmra.mrb[0].mxu1 %v2985_v55  ;;  %v3179_v55 = vcombine.low %v1626_v16, %v1630_v30  ;;  %v1637_v11 = vrot.slane %v4156_v6, 5  ;;  %v3666_v13 = vld [vmem:[%s4717_s1 + $0x350] ss:$8 sps:$4 sm:$0xff]   ;;  %v807_v15 = vrot.slane %v3998_v22, 5  ;;  %v811_v6 = vrot.slane %v4004_v25, 5 }
  0x4d   : > { %943 = vmatpush1.bf16.msra.mxu1 %v3631_v7  ;;  %739 = vmatprep.mubr.bf16.mxu1 %v3786_v2  ;;  %v3663_v7 = vld [vmem:[%s4717_s1 + $0x150] ss:$8 sps:$4 sm:$0xff]   ;;  %v800_v8 = vsel %vm4200_vm5, %v3005_v0, %v799_v58  ;;  %v804_v27 = vsel %vm4200_vm5, %v3006_v4, %v803_v59  ;;  %v3670_v18 = vld [vmem:[%s4717_s1 + $0x160] ss:$8 sps:$4 sm:$0xff]   ;;  %v3678_v19 = vld [vmem:[%s4717_s1 + $0x174] ss:$8 sps:$4 sm:$0xff]  }
  0x4e   : > { %944 = vmatprep.subr.bf16.mxu1 %v3639_v10  ;;  %v3160_v10 = vrot.slane %v3152_v20, 9  ;;  %v773_v25 = vld [vmem:[%s3903_s17 + $0x18] sm:$0xe]  ;;  %v3684_v40 = vld [vmem:[%s4717_s1 + $0x184] ss:$8 sps:$4 sm:$0xff]   ;;  %v819_v44 = vrot.slane %v4070_v32, 5 }
  0x4f   : > { %1785 = vmatmul.mubr.bf16.vlgmr.msra.gmra.mrb[0].mxu0 %v3177_v28  ;;  %v3672_v28 = vld [vmem:[%s4717_s1 + $0x164] ss:$8 sps:$4 sm:$0xff]   ;;  %v3676_v37 = vld [vmem:[%s4717_s1 + $0x170] ss:$8 sps:$4 sm:$0xff]   ;;  %v3686_v59 = vld [vmem:[%s4717_s1 + $0x380] ss:$8 sps:$4 sm:$0xff]  }
  0x50   : > { %1975 = vmatpush1.bf16.msra.mxu0 %v3634_v14  ;;  %1794 = vmatprep.mubr.bf16.mxu0 %v3786_v2  ;;  %v2988_v14 = vcombine.low %v4122_v34, %v4125_v35  ;;  %v1634_v34 = vsel %vm4200_vm5, %v3159_v3, %v1633_v51  ;;  %v1638_v22 = vsel %vm4200_vm5, %v3160_v10, %v1637_v11  ;;  %v3679_v48 = vld [vmem:[%s4717_s1 + $0x370] ss:$8 sps:$4 sm:$0xff]   ;;  %v3688_v32 = vld [vmem:[%s4717_s1 + $0x384] ss:$8 sps:$4 sm:$0xff]   ;;  %v3694_v16 = vld [vmem:[%s4717_s1 + $0x394] ss:$8 sps:$4 sm:$0xff]  }
  0x51   : > { %945 = vmatpush1.bf16.msra.mxu1 %v3637_v12  ;;  %1976 = vmatprep.subr.bf16.mxu0 %v3642_v24  ;;  %v3029_v12 = vcombine.low %v800_v8, %v804_v27  ;;  %v772_v24 = vld [vmem:[%s3903_s17 + $0x10] sm:$0xe]  ;;  %v3697_v30 = vld [vmem:[%s4717_s1 + $0x1a4] ss:$8 sps:$4 sm:$0xff]   ;;  %v777_v20 = vld [vmem:[%s3903_s17 + $0x38] sm:$0xe] }
  0x52   : > { %946 = vmatprep.subr.bf16.mxu1 %v3646_v26  ;;  %v3007_v35 = vrot.slane %v772_v24, 9  ;;  %v3675_v26 = vld [vmem:[%s4717_s1 + $0x364] ss:$8 sps:$4 sm:$0xff]   ;;  %v776_v31 = vld [vmem:[%s3903_s17 + $0x30] sm:$0xe]  ;;  %v3012_v63 = vrot.slane %v777_v20, 9 }
  0x53   : > { %v3011_v62 = vrot.slane %v776_v31, 9  ;;  %v3704_v0 = vld [vmem:[%s4717_s1 + $0x1b4] ss:$8 sps:$4 sm:$0xff]   ;;  %v3701_v51 = vld [vmem:[%s4717_s1 + $0x3a4] ss:$8 sps:$4 sm:$0xff]  }
  0x54   : > { %740 = vmatmul.mubr.bf16.gmra.mrb[4].mxu1 %v2986_v29  ;;  %1977 = vmatpush1.bf16.msra.mxu0 %v3640_v47  ;;  %v3008_v47 = vrot.slane %v773_v25, 9  ;;  %v808_v29 = vsel %vm4200_vm5, %v3007_v35, %v807_v15  ;;  %v3702_v8 = vld [vmem:[%s4717_s1 + $0x1b0] ss:$8 sps:$4 sm:$0xff]   ;;  %v3707_v3 = vld [vmem:[%s4717_s1 + $0x3b4] ss:$8 sps:$4 sm:$0xff]  }
  0x55   : > { %947 = vmatpush1.bf16.msra.mxu1 %v3644_v50  ;;  %749 = vmatprep.mubr.bf16.mxu1 %v3786_v2  ;;  %v3180_v50 = vcombine.low %v1634_v34, %v1638_v22  ;;  %v3710_v10 = vld [vmem:[%s4717_s1 + $0x1c4] ss:$8 sps:$4 sm:$0xff]   ;;  %v3241_v11 = vld [vmem:[%s3903_s17 + $0x10] sm:$0xf]  ;;  %v4452_v24 = vld [vmem:[%s3903_s17 + $0x1c] sm:$0x1] }
  0x56   : > { %948 = vmatprep.subr.bf16.mxu1 %v3652_v17  ;;  %1978 = vmatprep.subr.bf16.mxu0 %v3649_v33  ;;  %v3673_v33 = vld [vmem:[%s4717_s1 + $0x360] ss:$8 sps:$4 sm:$0xff]   ;;  %v812_v39 = vsel %vm4200_vm5, %v3008_v47, %v811_v6  ;;  %v3681_v17 = vld [vmem:[%s4717_s1 + $0x374] ss:$8 sps:$4 sm:$0xff]   ;;  %v3705_v27 = vld [vmem:[%s4717_s1 + $0x3b0] ss:$8 sps:$4 sm:$0xff]  }
  0x57   : > { %1795 = vmatmul.mubr.bf16.gmra.mrb[4].mxu0 %v3178_v41  ;;  %v3030_v21 = vcombine.low %v808_v29, %v812_v39  ;;  %v815_v41 = vrot.slane %v4063_v23, 5  ;;  %v3691_v23 = vld [vmem:[%s4717_s1 + $0x194] ss:$8 sps:$4 sm:$0xff]   ;;  %v2080_v15 = vshrl.u32 %v3241_v11, 16  ;;  %v2083_v6 = vshll.u32 %v3241_v11, 16 }
  0x58   : > { %1979 = vmatpush1.bf16.msra.mxu0 %v3647_v42  ;;  %1804 = vmatprep.mubr.bf16.mxu0 %v3786_v2  ;;  %v3682_v42 = vld [vmem:[%s4717_s1 + $0x180] ss:$8 sps:$4 sm:$0xff]  }
  0x59   : > { %949 = vmatpush1.bf16.msra.mxu1 %v3650_v43  ;;  %1980 = vmatprep.subr.bf16.mxu0 %v3655_v45  ;;  %v774_v43 = vld [vmem:[%s3903_s17 + $0x20] sm:$0xe]  ;;  %v775_v45 = vld [vmem:[%s3903_s17 + $0x28] sm:$0xe]  ;;  %v2082_v22 = vrot.slane %v2080_v15, 4  ;;  %v2085_v25 = vrot.slane %v2083_v6, 5 }
  0x5a   : > { %950 = vmatprep.subr.bf16.mxu1 %v3659_v52  ;;  %v3009_v46 = vrot.slane %v774_v43, 9  ;;  %v3010_v49 = vrot.slane %v775_v45, 9  ;;  %v3712_v47 = vld [vmem:[%s4717_s1 + $0x3c0] ss:$8 sps:$4 sm:$0xff]   ;;  %v3738_v6 = vld [vmem:[%s4717_s1 + $0x410] ss:$8 sps:$4 sm:$0xff]  }
  0x5b   : > { %v3245_v39 = vld [vmem:[%s3903_s17 + $0x20] sm:$0xf] }
  0x5c   : > { %750 = vmatmul.mubr.bf16.gmra.mrb[8].mxu1 %v2987_v54  ;;  %1981 = vmatpush1.bf16.msra.mxu0 %v3653_v56  ;;  %v4373_v52 = vsel %vm4200_vm5, %v3009_v46, %v815_v41  ;;  %v3685_v56 = vld [vmem:[%s3903_s17 + $0x10] ss:$8 sps:$4 sm:$0xff]   ;;  %v820_v54 = vsel %vm4200_vm5, %v3010_v49, %v819_v44  ;;  %v3723_v41 = vld [vmem:[%s4717_s1 + $0x1e4] ss:$8 sps:$4 sm:$0xff]   ;;  %v2108_v45 = vshrl.u32 %v3245_v39, 16  ;;  %v2111_v46 = vshll.u32 %v3245_v39, 16 }
  0x5d   : > { %951 = vmatpush1.bf16.msra.mxu1 %v3657_v57  ;;  %759 = vmatprep.mubr.bf16.mxu1 %v3786_v2  ;;  %v3689_v57 = vld [vmem:[%s4717_s1 + $0x190] ss:$8 sps:$4 sm:$0xff]   ;;  %v3031_v58 = vcombine.low %v4373_v52, %v820_v54  ;;  %v3727_v49 = vld [vmem:[%s4717_s1 + $0x3e4] ss:$8 sps:$4 sm:$0xff]   ;;  %v3725_v20 = vld [vmem:[%s4717_s1 + $0x3e0] ss:$8 sps:$4 sm:$0xff]  }
  0x5e   : > { %952 = vmatprep.subr.bf16.mxu1 %v3665_v61  ;;  %1982 = vmatprep.subr.bf16.mxu0 %v3662_v60  ;;  %v823_v60 = vrot.slane %v4128_v36, 5  ;;  %v827_v61 = vrot.slane %v4131_v38, 5  ;;  %v3692_v36 = vld [vmem:[%s4717_s1 + $0x390] ss:$8 sps:$4 sm:$0xff]   ;;  %v3695_v38 = vld [vmem:[%s4717_s1 + $0x1a0] ss:$8 sps:$4 sm:$0xff]  }
  0x5f   : > { %1805 = vmatmul.mubr.bf16.gmra.mrb[8].mxu0 %v3179_v55  ;;  %v3698_v55 = vld [vmem:[%s3903_s17 + $0x20] ss:$8 sps:$4 sm:$0xff]   ;;  %v3718_v44 = vld [vmem:[%s4717_s1 + $0x3d0] ss:$8 sps:$4 sm:$0xff]   ;;  %v4486_v54 = vld [vmem:[%s3903_s17 + $0x24] sm:$0x1] }
  0x60   : > { %1983 = vmatpush1.bf16.msra.mxu0 %v3660_v1  ;;  %1814 = vmatprep.mubr.bf16.mxu0 %v3786_v2  ;;  %v4408_v1 = vsel %vm4200_vm5, %v3011_v62, %v823_v60  ;;  %v4415_v4 = vsel %vm4200_vm5, %v3012_v63, %v827_v61  ;;  %v4490_v60 = vld [vmem:[%s3903_s17 + $0x2c] sm:$0x1]  ;;  %v2110_v61 = vrot.slane %v2108_v45, 4  ;;  %v3728_v62 = vld [vmem:[%s4717_s1 + $0x1f0] ss:$8 sps:$4 sm:$0xff]  }
  0x61   : > { %953 = vmatpush1.bf16.msra.mxu1 %v3663_v7  ;;  %1984 = vmatprep.subr.bf16.mxu0 %v3668_v9  ;;  %v3032_v7 = vcombine.low %v4408_v1, %v4415_v4  ;;  %v3699_v9 = vld [vmem:[%s4717_s1 + $0x3a0] ss:$8 sps:$4 sm:$0xff]   ;;  %v3249_v63 = vld [vmem:[%s3903_s17 + $0x30] sm:$0xf]  ;;  %v2117_v1 = vshll.u32 %v4486_v54, 16 }
  0x62   : > { %954 = vmatprep.subr.bf16.mxu1 %v3672_v28  ;;  %v3708_v28 = vld [vmem:[%s4717_s1 + $0x1c0] ss:$8 sps:$4 sm:$0xff]   ;;  %v2139_v11 = vshll.u32 %v3249_v63, 16 }
  0x63   : > { %v3734_v4 = vld [vmem:[%s3903_s17 + $0x8] ss:$8 sps:$4 sm:$0xff]  }
  0x64   : > { %760 = vmatmul.mubr.bf16.gmra.mrb[12].mxu1 %v2988_v14  ;;  %1985 = vmatpush1.bf16.msra.mxu0 %v3666_v13  ;;  %v3243_v13 = vld [vmem:[%s3903_s17 + $0x18] sm:$0xf]  ;;  %v3714_v14 = vld [vmem:[%s4717_s1 + $0x3c4] ss:$8 sps:$4 sm:$0xff]   ;;  %v3255_v39 = vld [vmem:[%s3903_s17 + $0x48] sm:$0xf] }
  0x65   : > { %955 = vmatpush1.bf16.msra.mxu1 %v3670_v18  ;;  %974 = vmatprep.mubr.bf16.mxu1 %v3786_v2  ;;  %v2094_v18 = vshrl.u32 %v3243_v13, 16  ;;  %v2097_v34 = vshll.u32 %v3243_v13, 16  ;;  %v3740_v13 = vld [vmem:[%s4717_s1 + $0x414] ss:$8 sps:$4 sm:$0xff]  }
  0x66   : > { %956 = vmatprep.subr.bf16.mxu1 %v3678_v19  ;;  %1986 = vmatprep.subr.bf16.mxu0 %v3675_v26  ;;  %v4449_v19 = vld [vmem:[%s3903_s17 + $0x14] sm:$0x1]  ;;  %v3711_v26 = vld [vmem:[%s3903_s17 + $0x30] ss:$8 sps:$4 sm:$0xff]  }
  0x67   : > { %1815 = vmatmul.mubr.bf16.gmra.mrb[12].mxu0 %v3180_v50  ;;  %v2096_v35 = vrot.slane %v2094_v18, 4  ;;  %v2099_v29 = vrot.slane %v2097_v34, 5  ;;  %v3715_v50 = vld [vmem:[%s4717_s1 + $0x1d0] ss:$8 sps:$4 sm:$0xff]   ;;  %v2419_v53 = vrot.slane %v4449_v19, 5 }
  0x68   : > { %1987 = vmatpush1.bf16.msra.mxu0 %v3673_v33  ;;  %2006 = vmatprep.mubr.bf16.mxu0 %v3786_v2  ;;  %v2089_v33 = vshll.u32 %v4449_v19, 16 }
  0x69   : > { %957 = vmatpush1.bf16.msra.mxu1 %v3676_v37  ;;  %1988 = vmatprep.subr.bf16.mxu0 %v3681_v17  ;;  %v2103_v37 = vshll.u32 %v4452_v24, 16  ;;  %v3247_v17 = vld [vmem:[%s3903_s17 + $0x28] sm:$0xf]  ;;  %v2100_v43 = vor.u32 %v2099_v29, %v2096_v35 }
  0x6a   : > { %1164 = vmatprep.subr.bf16.mxu1 %v3684_v40  ;;  %v3721_v40 = vld [vmem:[%s4717_s1 + $0x1e0] ss:$8 sps:$4 sm:$0xff]   ;;  %v2091_v52 = vrot.slane %v2089_v33, 5  ;;  %v3744_v33 = vld [vmem:[%s4717_s1 + $0x424] ss:$8 sps:$4 sm:$0xff]  }
  0x6c   : > { %975 = vmatmul.mubr.bf16.vlgmr.msra.gmra.mrb[0].mxu1 %v3029_v12  ;;  %1989 = vmatpush1.bf16.msra.mxu0 %v3679_v48  ;;  %v3717_v12 = vld [vmem:[%s4717_s1 + $0x1d4] ss:$8 sps:$4 sm:$0xff]   ;;  %v2122_v48 = vshrl.u32 %v3247_v17, 16 }
  0x6d   : > { %1165 = vmatpush1.bf16.msra.mxu1 %v3682_v42  ;;  %984 = vmatprep.mubr.bf16.mxu1 %v3786_v2  ;;  %v2086_v42 = vor.u32 %v2085_v25, %v2082_v22  ;;  %v4532_v25 = vld [vmem:[%s3903_s17 + $0x34] sm:$0x1] }
  0x6e   : > { %1166 = vmatprep.subr.bf16.mxu1 %v3691_v23  ;;  %2304 = vmatprep.subr.bf16.mxu0 %v3688_v32  ;;  %v2125_v23 = vshll.u32 %v3247_v17, 16  ;;  %v3730_v32 = vld [vmem:[%s4717_s1 + $0x1f4] ss:$8 sps:$4 sm:$0xff]   ;;  %v3741_v17 = vld [vmem:[%s3903_s17 + $0x18] ss:$8 sps:$4 sm:$0xff]  }
  0x6f   : > { %2007 = vmatmul.mubr.bf16.vlgmr.msra.gmra.mrb[0].mxu0 %v3685_v56  ;;  %v2105_v56 = vrot.slane %v2103_v37, 5  ;;  %v3253_v37 = vld [vmem:[%s3903_s17 + $0x40] sm:$0xf] }
  0x70   : > { %2305 = vmatpush1.bf16.msra.mxu0 %v3686_v59  ;;  %2016 = vmatprep.mubr.bf16.mxu0 %v3786_v2  ;;  %v2101_v59 = vrot.slane %v2100_v43, 4  ;;  %v2127_v31 = vrot.slane %v2125_v23, 5  ;;  %v2167_v23 = vshll.u32 %v3253_v37, 16 }
  0x71   : > { %1167 = vmatpush1.bf16.msra.mxu1 %v3689_v57  ;;  %2306 = vmatprep.subr.bf16.mxu0 %v3694_v16  ;;  %v3724_v57 = vld [vmem:[%s3903_s17 + $0x40] ss:$8 sps:$4 sm:$0xff]   ;;  %v2113_v16 = vrot.slane %v2111_v46, 5  ;;  %v3747_v46 = vld [vmem:[%s4717_s1 + $0x434] ss:$8 sps:$4 sm:$0xff]  }
  0x72   : > { %1168 = vmatprep.subr.bf16.mxu1 %v3697_v30  ;;  %v2124_v30 = vrot.slane %v2122_v48, 4  ;;  %v2164_v48 = vshrl.u32 %v3253_v37, 16 }
  0x74   : > { %985 = vmatmul.mubr.bf16.gmra.mrb[4].mxu1 %v3030_v21  ;;  %2307 = vmatpush1.bf16.msra.mxu0 %v3692_v36  ;;  %v3720_v21 = vld [vmem:[%s4717_s1 + $0x3d4] ss:$8 sps:$4 sm:$0xff]  }
  0x75   : > { %1169 = vmatpush1.bf16.msra.mxu1 %v3695_v38  ;;  %994 = vmatprep.mubr.bf16.mxu1 %v3786_v2  ;;  %v3733_v36 = vld [vmem:[%s4717_s1 + $0x3f4] ss:$8 sps:$4 sm:$0xff]   ;;  %v3737_v38 = vld [vmem:[%s4717_s1 + $0x404] ss:$8 sps:$4 sm:$0xff]  }
  0x76   : > { %1170 = vmatprep.subr.bf16.mxu1 %v3704_v0  ;;  %2308 = vmatprep.subr.bf16.mxu0 %v3701_v51  ;;  %v3251_v0 = vld [vmem:[%s3903_s17 + $0x38] sm:$0xf]  ;;  %v2131_v51 = vshll.u32 %v4490_v60, 16 }
  0x77   : > { %2017 = vmatmul.mubr.bf16.gmra.mrb[4].mxu0 %v3698_v55 }
  0x78   : > { %2309 = vmatpush1.bf16.msra.mxu0 %v3699_v9  ;;  %2026 = vmatprep.mubr.bf16.mxu0 %v3786_v2  ;;  %v2114_v9 = vor.u32 %v2113_v16, %v2110_v61  ;;  %v2133_v22 = vrot.slane %v2131_v51, 5  ;;  %v4561_v16 = vld [vmem:[%s3903_s17 + $0x44] sm:$0x1] }
  0x79   : > { %1171 = vmatpush1.bf16.msra.mxu1 %v3702_v8  ;;  %2310 = vmatprep.subr.bf16.mxu0 %v3707_v3  ;;  %v3735_v8 = vld [vmem:[%s4717_s1 + $0x400] ss:$8 sps:$4 sm:$0xff]   ;;  %v2128_v3 = vor.u32 %v2127_v31, %v2124_v30  ;;  %v4564_v30 = vld [vmem:[%s3903_s17 + $0x4c] sm:$0x1]  ;;  %v2166_v31 = vrot.slane %v2164_v48, 4  ;;  %v2173_v51 = vshll.u32 %v4561_v16, 16 }
  0x7a   : > { %1172 = vmatprep.subr.bf16.mxu1 %v3710_v10  ;;  %v2136_v10 = vshrl.u32 %v3249_v63, 16  ;;  %v2115_v18 = vrot.slane %v2114_v9, 4  ;;  %v3748_v63 = vld [vmem:[%s3903_s17 + $0x28] ss:$8 sps:$4 sm:$0xff]  }
  0x7b   : > { %v2129_v34 = vrot.slane %v2128_v3, 4 }
  0x7c   : > { %995 = vmatmul.mubr.bf16.gmra.mrb[8].mxu1 %v3031_v58  ;;  %2311 = vmatpush1.bf16.msra.mxu0 %v3705_v27  ;;  %v2087_v58 = vrot.slane %v2086_v42, 4  ;;  %v2150_v27 = vshrl.u32 %v3251_v0, 16  ;;  %v2138_v35 = vrot.slane %v2136_v10, 4  ;;  %v3742_v42 = vld [vmem:[%s4717_s1 + $0x420] ss:$8 sps:$4 sm:$0xff]  }
  0x7d   : > { %1173 = vmatpush1.bf16.msra.mxu1 %v3708_v28  ;;  %1004 = vmatprep.mubr.bf16.mxu1 %v3786_v2  ;;  %v2153_v28 = vshll.u32 %v3251_v0, 16  ;;  %v3752_v10 = vld [vmem:[%s4717_s1 + $0x450] ss:$8 sps:$4 sm:$0xff]  }
  0x7e   : > { %1174 = vmatprep.subr.bf16.mxu1 %v3717_v12  ;;  %2312 = vmatprep.subr.bf16.mxu0 %v3714_v14  ;;  %v2092_v55 = vsel %vm3960_vm2, %v2087_v58, %v2091_v52  ;;  %v3731_v12 = vld [vmem:[%s4717_s1 + $0x3f0] ss:$8 sps:$4 sm:$0xff]   ;;  %v2119_v14 = vrot.slane %v2117_v1, 5  ;;  %v3749_v1 = vld [vmem:[%s4717_s1 + $0x440] ss:$8 sps:$4 sm:$0xff]  }
  0x7f   : > { %2027 = vmatmul.mubr.bf16.gmra.mrb[8].mxu0 %v3711_v26  ;;  %v2141_v26 = vrot.slane %v2139_v11, 5  ;;  %v2155_v29 = vrot.slane %v2153_v28, 5  ;;  %v3745_v52 = vld [vmem:[%s4717_s1 + $0x430] ss:$8 sps:$4 sm:$0xff]   ;;  %v2175_v11 = vrot.slane %v2173_v51, 5 }
  0x80   : > { %2313 = vmatpush1.bf16.msra.mxu0 %v3712_v47  ;;  %2036 = vmatprep.mubr.bf16.mxu0 %v3786_v2  ;;  %v2152_v47 = vrot.slane %v2150_v27, 4 }
  0x81   : > { %1175 = vmatpush1.bf16.msra.mxu1 %v3715_v50  ;;  %2314 = vmatprep.subr.bf16.mxu0 %v3720_v21  ;;  %v4535_v50 = vld [vmem:[%s3903_s17 + $0x3c] sm:$0x1]  ;;  %v2120_v21 = vsel %vm3960_vm2, %v2115_v18, %v2119_v14  ;;  %v2142_v43 = vor.u32 %v2141_v26, %v2138_v35  ;;  %v3298_v14 = vld [vmem:[%s3903_s17 + $0x38] sm:$0xe]  ;;  %v3293_v35 = vld [vmem:[%s3903_s17 + $0x10] sm:$0xe] }
  0x82   : > { %1176 = vmatprep.subr.bf16.mxu1 %v3723_v41  ;;  %v2134_v41 = vsel %vm3960_vm2, %v2129_v34, %v2133_v22  ;;  %v2159_v45 = vshll.u32 %v4535_v50, 16  ;;  %v2439_v18 = vrot.slane %v4535_v50, 5  ;;  %v3755_v34 = vld [vmem:[%s3903_s17 + $0x38] ss:$8 sps:$4 sm:$0xff]   ;;  %v3761_v50 = vld [vmem:[%s4717_s1 + $0x474] ss:$8 sps:$4 sm:$0xff]  }
  0x83   : > { %v2143_v58 = vrot.slane %v2142_v43, 4  ;;  %v3756_v22 = vld [vmem:[%s4717_s1 + $0x460] ss:$8 sps:$4 sm:$0xff]   ;;  %v3301_v37 = vrot.slane %v3293_v35, 9 }
  0x84   : > { %1005 = vmatmul.mubr.bf16.gmra.mrb[12].mxu1 %v3032_v7  ;;  %2315 = vmatpush1.bf16.msra.mxu0 %v3718_v44  ;;  %v2106_v7 = vsel %vm3960_vm2, %v2101_v59, %v2105_v56  ;;  %v2156_v44 = vor.u32 %v2155_v29, %v2152_v47  ;;  %v2161_v61 = vrot.slane %v2159_v45, 5  ;;  %v3306_v47 = vrot.slane %v3298_v14, 9  ;;  %v3299_v43 = vld [vmem:[%s3903_s17 + $0x40] sm:$0xe] }
  0x85   : > { %1177 = vmatpush1.bf16.msra.mxu1 %v3721_v40  ;;  %1196 = vmatprep.mubr.bf16.mxu1 %v3786_v2  ;;  %v3273_v15 = vcombine.low %v2092_v55, %v2106_v7  ;;  %v2145_v40 = vshll.u32 %v4532_v25, 16  ;;  %v3754_v7 = vld [vmem:[%s4717_s1 + $0x454] ss:$8 sps:$4 sm:$0xff]   ;;  %v3307_v19 = vrot.slane %v3299_v43, 9  ;;  %v2651_v35 = vld [vmem:[%s4718_s2] sm:$0x3] }
  0x86   : > { %1178 = vmatprep.subr.bf16.mxu1 %v3730_v32  ;;  %2316 = vmatprep.subr.bf16.mxu0 %v3727_v49  ;;  %v2178_v49 = vshrl.u32 %v3255_v39, 16  ;;  %v2181_v32 = vshll.u32 %v3255_v39, 16  ;;  %v2157_v59 = vrot.slane %v2156_v44, 4  ;;  %v3300_v44 = vld [vmem:[%s3903_s17 + $0x48] sm:$0xe] }
  0x87   : > { %2037 = vmatmul.mubr.bf16.gmra.mrb[12].mxu0 %v3724_v57  ;;  %v2147_v56 = vrot.slane %v2145_v40, 5  ;;  %v3274_v57 = vcombine.low %v2120_v21, %v2134_v41  ;;  %v2440_v40 = vsel %vm4200_vm5, %v3306_v47, %v2439_v18  ;;  %v3308_v48 = vrot.slane %v3300_v44, 9 }
  0x88   : > { %2317 = vmatpush1.bf16.msra.mxu0 %v3725_v20  ;;  %2336 = vmatprep.mubr.bf16.mxu0 %v3786_v2  ;;  %v2169_v20 = vrot.slane %v2167_v23, 5  ;;  %v2162_v55 = vsel %vm3960_vm2, %v2157_v59, %v2161_v61  ;;  %v2447_v23 = vrot.slane %v4564_v30, 5  ;;  %v2427_v61 = vrot.slane %v4486_v54, 5 }
  0x89   : > { %1179 = vmatpush1.bf16.msra.mxu1 %v3728_v62  ;;  %2318 = vmatprep.subr.bf16.mxu0 %v3733_v36  ;;  %v2180_v62 = vrot.slane %v2178_v49, 4  ;;  %v2183_v36 = vrot.slane %v2181_v32, 5  ;;  %v2148_v0 = vsel %vm3960_vm2, %v2143_v58, %v2147_v56  ;;  %v3295_v32 = vld [vmem:[%s3903_s17 + $0x20] sm:$0xe] }
  0x8a   : > { %3364 = vmatprep.subr.bf16.mxu1 %v3737_v38  ;;  %v3275_v3 = vcombine.low %v2148_v0, %v2162_v55  ;;  %v2448_v58 = vsel %vm4200_vm5, %v3308_v48, %v2447_v23  ;;  %v3303_v59 = vrot.slane %v3295_v32, 9 }
  0x8b   : > { %v2184_v9 = vor.u32 %v2183_v36, %v2180_v62 }
  0x8c   : > { %1197 = vmatmul.mubr.bf16.vlgmr.msra.gmra.mrb[0].mxu1 %v3734_v4  ;;  %2319 = vmatpush1.bf16.msra.mxu0 %v3731_v12  ;;  %v2187_v4 = vshll.u32 %v4564_v30, 16  ;;  %v2431_v30 = vrot.slane %v4490_v60, 5 }
  0x8d   : > { %3372 = vmatpush1.bf16.msra.mxu1 %v3735_v8  ;;  %1206 = vmatprep.mubr.bf16.mxu1 %v3786_v2  ;;  %v2185_v12 = vrot.slane %v2184_v9, 4 }
  0x8e   : > { %3365 = vmatprep.subr.bf16.mxu1 %v3740_v13  ;;  %2562 = vmatprep.subr.bf16.mxu0 %v3737_v38  ;;  %v3751_v38 = vld [vmem:[%s4717_s1 + $0x444] ss:$8 sps:$4 sm:$0xff]   ;;  %v2189_v27 = vrot.slane %v2187_v4, 5 }
  0x8f   : > { %2337 = vmatmul.mubr.bf16.vlgmr.msra.gmra.mrb[0].mxu0 %v3273_v15  ;;  %v3758_v15 = vld [vmem:[%s4717_s1 + $0x464] ss:$8 sps:$4 sm:$0xff]  }
  0x90   : > { %2563 = vmatpush1.bf16.msra.mxu0 %v3735_v8  ;;  %2346 = vmatprep.mubr.bf16.mxu0 %v3786_v2  ;;  %v2170_v8 = vor.u32 %v2169_v20, %v2166_v31  ;;  %v2428_v20 = vsel %vm4200_vm5, %v3303_v59, %v2427_v61 }
  0x91   : > { %3373 = vmatpush1.bf16.msra.mxu1 %v3738_v6  ;;  %2564 = vmatprep.subr.bf16.mxu0 %v3740_v13  ;;  %v3297_v13 = vld [vmem:[%s3903_s17 + $0x30] sm:$0xe] }
  0x92   : > { %3366 = vmatprep.subr.bf16.mxu1 %v3744_v33  ;;  %v2171_v28 = vrot.slane %v2170_v8, 4  ;;  %v3305_v26 = vrot.slane %v3297_v13, 9  ;;  %v2653_v8 = vlaneseq }
  0x94   : > { %1207 = vmatmul.mubr.bf16.gmra.mrb[4].mxu1 %v3741_v17  ;;  %2565 = vmatpush1.bf16.msra.mxu0 %v3738_v6  ;;  %v2435_v6 = vrot.slane %v4532_v25, 5  ;;  %v2176_v29 = vsel %vm3960_vm2, %v2171_v28, %v2175_v11  ;;  %v2190_v25 = vsel %vm3960_vm2, %v2185_v12, %v2189_v27  ;;  %v3759_v17 = vld [vmem:[%s4717_s1 + $0x470] ss:$8 sps:$4 sm:$0xff]   ;;  %v2654_v28 = vshrl.u32 %v2653_v8, 7 }
  0x95   : > { %3374 = vmatpush1.bf16.msra.mxu1 %v3742_v42  ;;  %1216 = vmatprep.mubr.bf16.mxu1 %v3786_v2  ;;  %v3276_v39 = vcombine.low %v2176_v29, %v2190_v25 }
  0x96   : > { %3367 = vmatprep.subr.bf16.mxu1 %v3747_v46  ;;  %2566 = vmatprep.subr.bf16.mxu0 %v3744_v33  ;;  %v3294_v33 = vld [vmem:[%s3903_s17 + $0x18] sm:$0xe]  ;;  %v2436_v21 = vsel %vm4200_vm5, %v3305_v26, %v2435_v6  ;;  %v2659_v26 = vsub.s32 1, %v2654_v28 }
  0x97   : > { %2347 = vmatmul.mubr.bf16.gmra.mrb[4].mxu0 %v3274_v57  ;;  %v3302_v41 = vrot.slane %v3294_v33, 9  ;;  %v3327_v45 = vcombine.low %v2436_v21, %v2440_v40 }
  0x98   : > { %2567 = vmatpush1.bf16.msra.mxu0 %v3742_v42  ;;  %2356 = vmatprep.mubr.bf16.mxu0 %v3786_v2  ;;  %v2423_v42 = vrot.slane %v4452_v24, 5  ;;  %v2420_v24 = vsel %vm4200_vm5, %v3301_v37, %v2419_v53  ;;  %v4662_v21 = vrot.slane %v2651_v35, %v2659_v26 }
  0x99   : > { %3375 = vmatpush1.bf16.msra.mxu1 %v3745_v52  ;;  %2568 = vmatprep.subr.bf16.mxu0 %v3747_v46  ;;  %v2443_v46 = vrot.slane %v4561_v16, 5 }
  0x9a   : > { %3368 = vmatprep.subr.bf16.mxu1 %v3751_v38  ;;  %v2424_v49 = vsel %vm4200_vm5, %v3302_v41, %v2423_v42 }
  0x9b   : > { %v3325_v56 = vcombine.low %v2420_v24, %v2424_v49  ;;  %v2444_v57 = vsel %vm4200_vm5, %v3307_v19, %v2443_v46 }
  0x9c   : > { %1217 = vmatmul.mubr.bf16.gmra.mrb[8].mxu1 %v3748_v63  ;;  %2569 = vmatpush1.bf16.msra.mxu0 %v3745_v52  ;;  %v3296_v52 = vld [vmem:[%s3903_s17 + $0x28] sm:$0xe]  ;;  %v3328_v31 = vcombine.low %v2444_v57, %v2448_v58 }
  0x9d   : > { %3376 = vmatpush1.bf16.msra.mxu1 %v3749_v1  ;;  %1226 = vmatprep.mubr.bf16.mxu1 %v3786_v2  ;;  %v3304_v16 = vrot.slane %v3296_v52, 9 }
  0x9e   : > { %3369 = vmatprep.subr.bf16.mxu1 %v3754_v7  ;;  %2570 = vmatprep.subr.bf16.mxu0 %v3751_v38 }
  0x9f   : > { %2357 = vmatmul.mubr.bf16.gmra.mrb[8].mxu0 %v3275_v3  ;;  %v2432_v62 = vsel %vm4200_vm5, %v3304_v16, %v2431_v30 }
  0xa0   : > { %2571 = vmatpush1.bf16.msra.mxu0 %v3749_v1  ;;  %2366 = vmatprep.mubr.bf16.mxu0 %v3786_v2  ;;  %v3326_v36 = vcombine.low %v2428_v20, %v2432_v62 }
  0xa1   : > { %3377 = vmatpush1.bf16.msra.mxu1 %v3752_v10  ;;  %2572 = vmatprep.subr.bf16.mxu0 %v3754_v7 }
  0xa2   : > { %3370 = vmatprep.subr.bf16.mxu1 %v3758_v15 }
  0xa4   : > { %1227 = vmatmul.mubr.bf16.gmra.mrb[12].mxu1 %v3755_v34  ;;  %2573 = vmatpush1.bf16.msra.mxu0 %v3752_v10 }
  0xa5   : > { %3378 = vmatpush1.bf16.msra.mxu1 %v3756_v22  ;;  %2614 = vmatprep.mubr.bf16.mxu1 %v3786_v2 }
  0xa6   : > { %3371 = vmatprep.subr.bf16.mxu1 %v3761_v50  ;;  %2574 = vmatprep.subr.bf16.mxu0 %v3758_v15 }
  0xa7   : > { %2367 = vmatmul.mubr.bf16.gmra.mrb[12].mxu0 %v3276_v39 }
  0xa8   : > { %2575 = vmatpush1.bf16.msra.mxu0 %v3756_v22  ;;  %2594 = vmatprep.mubr.bf16.mxu0 %v3786_v2  ;;  %v2655_v22 = vsub.s32 0, %v2654_v28 }
  0xa9   : > { %3379 = vmatpush1.bf16.msra.mxu1 %v3759_v17  ;;  %2576 = vmatprep.subr.bf16.mxu0 %v3761_v50 }
  0xaa   : > { %v4658_v37 = vrot.slane %v2651_v35, %v2655_v22 }
  0xac   : > { %2615 = vmatmul.mubr.bf16.vlgmr.msra.gmra.mrb[16].mxu1 %v3327_v45  ;;  %2577 = vmatpush1.bf16.msra.mxu0 %v3759_v17 }
  0xad   : > { %2624 = vmatprep.mubr.bf16.mxu1 %v3786_v2 }
  0xaf   : > { %2595 = vmatmul.mubr.bf16.vlgmr.msra.gmra.mrb[0].mxu0 %v3325_v56 }
  0xb0   : > { %2604 = vmatprep.mubr.bf16.mxu0 %v3786_v2 }
  0xb4   : > { %2625 = vmatmul.mubr.bf16.gmra.mrb[20].mxu1 %v3328_v31 }
  0xb7   : > { %2605 = vmatmul.mubr.bf16.gmra.mrb[4].mxu0 %v3326_v36 }
 0x15f   : > { %v1198_v38 = vpop.f32.mrb[0].mxu1 }
 0x160   : > { %v1200_v63 = vpop.f32.mrb[1].mxu1 }
 0x161   : > { %v4641_v0 = vpop.f32.mrb[2].mxu1 }
 0x162   : > { %v4643_v54 = vpop.f32.mrb[3].mxu1 }
 0x167   : > { %v4645_v60 = vpop.f32.mrb[4].mxu1 }
 0x168   : > { %v4647_v1 = vpop.f32.mrb[5].mxu1 }
 0x169   : > { %v4649_v2 = vpop.f32.mrb[6].mxu1 }
 0x16a   : > { %v4651_v51 = vpop.f32.mrb[7].mxu1 }
 0x16f   : > { %v1218_v4 = vpop.f32.mrb[8].mxu1 }
 0x170   : > { %v1220_v5 = vpop.f32.mrb[9].mxu1 }
 0x171   : > { %v1222_v55 = vpop.f32.mrb[10].mxu1 }
 0x172   : > { %v1224_v7 = vpop.f32.mrb[11].mxu1  ;;  %v2358_v9 = vpop.f32.mrb[8].mxu0 }
 0x173   : > { %v3388_v3 = vadd.f32 %v2358_v9, %v1218_v4  ;;  %v2360_v10 = vpop.f32.mrb[9].mxu0 }
 0x174   : > { %v3390_v11 = vadd.f32 %v2360_v10, %v1220_v5  ;;  %v2362_v27 = vpop.f32.mrb[10].mxu0 }
 0x175   : > { %v3392_v12 = vadd.f32 %v2362_v27, %v1222_v55  ;;  %v2364_v13 = vpop.f32.mrb[11].mxu0 }
 0x176   : > { %v3394_v15 = vadd.f32 %v2364_v13, %v1224_v7 }
 0x177   : > { %v1228_v14 = vpop.f32.mrb[12].mxu1 }
 0x178   : > { %v1230_v6 = vpop.f32.mrb[13].mxu1 }
 0x179   : > { %v1232_v18 = vpop.f32.mrb[14].mxu1 }
 0x17a   : > { %v1234_v34 = vpop.f32.mrb[15].mxu1  ;;  %v2368_v47 = vpop.f32.mrb[12].mxu0 }
 0x17b   : > { %v3396_v29 = vadd.f32 %v2368_v47, %v1228_v14  ;;  %v2370_v25 = vpop.f32.mrb[13].mxu0 }
 0x17c   : > { %v4656_v50 = vadd.f32 %v2370_v25, %v1230_v6  ;;  %v2372_v33 = vpop.f32.mrb[14].mxu0 }
 0x17d   : > { %v4660_v39 = vadd.f32 %v2372_v33, %v1232_v18  ;;  %v2374_v17 = vpop.f32.mrb[15].mxu0 }
 0x17e   : > { %v4664_v40 = vadd.f32 %v2374_v17, %v1234_v34 }
 0x17f   : > { %v2616_v53 = vpop.f32.mrb[16].mxu1 }
 0x180   : > { %v3389_v41 = vadd.f32 %v3388_v3, %v2616_v53  ;;  %v2618_v42 = vpop.f32.mrb[17].mxu1 }
 0x181   : > { %v3391_v43 = vadd.f32 %v3390_v11, %v2618_v42  ;;  %v2620_v44 = vpop.f32.mrb[18].mxu1 }
 0x182   : > { %v2671_v45 = vadd.f32 %v3389_v41, %v4658_v37  ;;  %v3393_v19 = vadd.f32 %v3392_v12, %v2620_v44  ;;  %v2622_v46 = vpop.f32.mrb[19].mxu1  ;;  %v2596_v24 = vpop.f32.mrb[0].mxu0 }
 0x183   : > { %v2672_v48 = vadd.f32 %v3391_v43, %v4662_v21  ;;  %v3395_v23 = vadd.f32 %v3394_v15, %v2622_v46  ;;  %v3380_v52 = vadd.f32 %v2596_v24, %v1198_v38  ;;  %v2598_v56 = vpop.f32.mrb[1].mxu0 }
 0x184   : > { %vm2687_vm6 = vcmp.ge.f32.partialorder %v2671_v45, 0.0  ;;  %v2703_v49 = vmul.f32 0.1, %v2671_v45  ;;  %v2673_v32 = vadd.f32 %v3393_v19, %v4658_v37  ;;  %v3381_v61 = vadd.f32 %v2598_v56, %v1200_v63  ;;  %v2600_v16 = vpop.f32.mrb[2].mxu0 }
 0x185   : > { %vm2688_vm7 = vcmp.ge.f32.partialorder %v2672_v48, 0.0  ;;  %v2704_v57 = vmul.f32 0.1, %v2672_v48  ;;  %v2674_v58 = vadd.f32 %v3395_v23, %v4662_v21  ;;  %v2663_v31 = vadd.f32 %v3380_v52, %v4658_v37  ;;  %v2602_v36 = vpop.f32.mrb[3].mxu0 }
 0x186   : > { %v2719_v59 = vsel %vm2687_vm6, %v2671_v45, %v2703_v49  ;;  %vm2689_vm8 = vcmp.ge.f32.partialorder %v2673_v32, 0.0  ;;  %v2705_v30 = vmul.f32 0.1, %v2673_v32  ;;  %v3382_v62 = vadd.f32 %v2600_v16, %v4641_v0 }
 0x187   : > { %v2720_v20 = vsel %vm2688_vm7, %v2672_v48, %v2704_v57  ;;  %vm2690_vm9 = vcmp.ge.f32.partialorder %v2674_v58, 0.0  ;;  %v2626_v38 = vpop.f32.mrb[20].mxu1  ;;  %v2664_v4 = vadd.f32 %v3381_v61, %v4662_v21  ;;  %v3383_v55 = vadd.f32 %v2602_v36, %v4643_v54 }
 0x188   : > { %v3360_v63 = vpack.c.bf16 %v2720_v20, %v2719_v59  ;;  %v2721_v5 = vsel %vm2689_vm8, %v2673_v32, %v2705_v30  ;;  %v2628_v7 = vpop.f32.mrb[21].mxu1  ;;  %vm2679_vm10 = vcmp.ge.f32.partialorder %v2663_v31, 0.0  ;;  %v2695_v8 = vmul.f32 0.1, %v2663_v31 }
 0x189   : > { %v2665_v9 = vadd.f32 %v3382_v62, %v4658_v37  ;;  %v2706_v3 = vmul.f32 0.1, %v2674_v58  ;;  %v2630_v10 = vpop.f32.mrb[22].mxu1  ;;  %vm2680_vm11 = vcmp.ge.f32.partialorder %v2664_v4, 0.0  ;;  %v2696_v11 = vmul.f32 0.1, %v2664_v4 }
 0x18a   : > { %2795 = vst [vmem:[%s4675_s24 + $0x20] sm:$0xff] %v3360_v63  ;;  %v2666_v0 = vadd.f32 %v3383_v55, %v4662_v21  ;;  %v3397_v27 = vadd.f32 %v3396_v29, %v2626_v38  ;;  %v2632_v28 = vpop.f32.mrb[23].mxu1  ;;  %v2711_v12 = vsel %vm2679_vm10, %v2663_v31, %v2695_v8  ;;  %v2606_v18 = vpop.f32.mrb[4].mxu0  ;;  %v3399_v33 = vadd.f32 %v4656_v50, %v2628_v7 }
 0x18b   : > { %vm2681_vm12 = vcmp.ge.f32.partialorder %v2665_v9, 0.0  ;;  %v2697_v13 = vmul.f32 0.1, %v2665_v9  ;;  %v2722_v54 = vsel %vm2690_vm9, %v2674_v58, %v2706_v3  ;;  %v2712_v14 = vsel %vm2680_vm11, %v2664_v4, %v2696_v11  ;;  %v2608_v47 = vpop.f32.mrb[5].mxu0 }
 0x18c   : > { %vm2682_vm13 = vcmp.ge.f32.partialorder %v2666_v0, 0.0  ;;  %v2698_v15 = vmul.f32 0.1, %v2666_v0  ;;  %v3361_v6 = vpack.c.bf16 %v2722_v54, %v2721_v5  ;;  %v3356_v34 = vpack.c.bf16 %v2712_v14, %v2711_v12  ;;  %v2610_v17 = vpop.f32.mrb[6].mxu0 }
 0x18d   : > { %v2713_v22 = vsel %vm2681_vm12, %v2665_v9, %v2697_v13  ;;  %v3384_v35 = vadd.f32 %v2606_v18, %v4645_v60  ;;  %v2675_v26 = vadd.f32 %v3397_v27, %v4658_v37  ;;  %v3385_v25 = vadd.f32 %v2608_v47, %v4647_v1  ;;  %v2612_v60 = vpop.f32.mrb[7].mxu0 }
 0x18e   : > { %v2714_v29 = vsel %vm2682_vm13, %v2666_v0, %v2698_v15  ;;  %2796 = vst [vmem:[%s4675_s24 + $0x28] sm:$0xff] %v3361_v6  ;;  %v3401_v53 = vadd.f32 %v4660_v39, %v2630_v10  ;;  %2791 = vst [vmem:[%s4675_s24] sm:$0xff] %v3356_v34  ;;  %v2676_v45 = vadd.f32 %v3399_v33, %v4662_v21 }
 0x18f   : > { %v3357_v41 = vpack.c.bf16 %v2714_v29, %v2713_v22  ;;  %v2667_v42 = vadd.f32 %v3384_v35, %v4658_v37  ;;  %vm2691_vm14 = vcmp.ge.f32.partialorder %v2675_v26, 0.0  ;;  %v2707_v43 = vmul.f32 0.1, %v2675_v26 }
 0x190   : > { %v2668_v44 = vadd.f32 %v3385_v25, %v4662_v21  ;;  %v3386_v19 = vadd.f32 %v2610_v17, %v4649_v2  ;;  %v2677_v1 = vadd.f32 %v3401_v53, %v4658_v37  ;;  %v3387_v39 = vadd.f32 %v2612_v60, %v4651_v51 }
 0x191   : > { %2792 = vst [vmem:[%s4675_s24 + $0x8] sm:$0xff] %v3357_v41  ;;  %vm2683_vm15 = vcmp.ge.f32.partialorder %v2667_v42, 0.0  ;;  %v2699_v50 = vmul.f32 0.1, %v2667_v42  ;;  %v2723_v46 = vsel %vm2691_vm14, %v2675_v26, %v2707_v43  ;;  %vm2692_vm1 = vcmp.ge.f32.partialorder %v2676_v45, 0.0 }
 0x192   : > { %vm2684_vm0 = vcmp.ge.f32.partialorder %v2668_v44, 0.0  ;;  %v2700_v48 = vmul.f32 0.1, %v2668_v44  ;;  %v2708_v23 = vmul.f32 0.1, %v2676_v45  ;;  %v2669_v49 = vadd.f32 %v3386_v19, %v4658_v37 }
 0x193   : > { %v2715_v24 = vsel %vm2683_vm15, %v2667_v42, %v2699_v50  ;;  %vm2693_vm2 = vcmp.ge.f32.partialorder %v2677_v1, 0.0  ;;  %v2709_v32 = vmul.f32 0.1, %v2677_v1  ;;  %v2670_v56 = vadd.f32 %v3387_v39, %v4662_v21 }
 0x194   : > { %v2716_v2 = vsel %vm2684_vm0, %v2668_v44, %v2700_v48  ;;  %v2724_v52 = vsel %vm2692_vm1, %v2676_v45, %v2708_v23  ;;  %v3403_v57 = vadd.f32 %v4664_v40, %v2632_v28  ;;  %vm2685_vm3 = vcmp.ge.f32.partialorder %v2669_v49, 0.0 }
 0x195   : > { %v3358_v58 = vpack.c.bf16 %v2716_v2, %v2715_v24  ;;  %v3362_v51 = vpack.c.bf16 %v2724_v52, %v2723_v46  ;;  %v2701_v59 = vmul.f32 0.1, %v2669_v49  ;;  %vm2686_vm4 = vcmp.ge.f32.partialorder %v2670_v56, 0.0 }
 0x196   : > { %v2702_v61 = vmul.f32 0.1, %v2670_v56  ;;  %v2678_v16 = vadd.f32 %v3403_v57, %v4662_v21  ;;  %v2725_v30 = vsel %vm2693_vm2, %v2677_v1, %v2709_v32 }
 0x197   : > { %2793 = vst [vmem:[%s4675_s24 + $0x10] sm:$0xff] %v3358_v58  ;;  %2797 = vst [vmem:[%s4675_s24 + $0x30] sm:$0xff] %v3362_v51  ;;  %v2717_v37 = vsel %vm2685_vm3, %v2669_v49, %v2701_v59 }
 0x198   : > { %v2718_v31 = vsel %vm2686_vm4, %v2670_v56, %v2702_v61  ;;  %vm2694_vm5 = vcmp.ge.f32.partialorder %v2678_v16, 0.0  ;;  %v2710_v20 = vmul.f32 0.1, %v2678_v16 }
 0x199   : > { %v3359_v62 = vpack.c.bf16 %v2718_v31, %v2717_v37 }
 0x19a   : > { %v2726_v40 = vsel %vm2694_vm5, %v2678_v16, %v2710_v20 }
 0x19b   : > { %2794 = vst [vmem:[%s4675_s24 + $0x18] sm:$0xff] %v3359_v62  ;;  %v3363_v36 = vpack.c.bf16 %v2726_v40, %v2725_v30 }
 0x19d   : > { %2798 = vst [vmem:[%s4675_s24 + $0x38] sm:$0xff] %v3363_v36 }
 0x19e PF: > { %s13_s14 = sadd.s32 1, %s3784_s14   ;;  %s4724_s12 = smov %s3780_s13 }
 0x19f   : > { %p10_p5 = scmp.ge.s32.totalorder %s13_s14, 4   ;;  %s4725_s13 = smov %s4727_s15 }
 0x1a1   :  { %12 = sbr.rel (!%p10_p5) target bundleno = 2 (0x2), region = 79 }

// kernel: spp_block.9
= control target key start
LH: loop header
LB: loop body
LE: loop exit
PB: predicated region body
PF: predicated region fallthrough
CT: control target
= control target key end

     0   :  { %s5402_s12 = smov 0   ;;  %s8519_s0 = inlined_call_operand.vmem [shape: bf16[2,20,20,128], index: 0, kind: input, shape index: {}]   ;;  %s8520_s1 = inlined_call_operand.vmem [shape: bf16[4,128,128], index: 1, kind: input, shape index: {}]   ;;  %s8521_s2 = inlined_call_operand.vmem [shape: f32[1,128], index: 2, kind: input, shape index: {}]   ;;  %s8522_s3 = inlined_call_operand.vmem [shape: bf16[2,8,8,128], index: 3, kind: output, shape index: {}]  }
   0x1 LB: > { %s4935_s13 = sadd.s32 4294967295, %s5380_s12   ;;  %p4939_p0 = scmp.ge.s32.totalorder %s5380_s12, 1  ;;  %s5380_s12 = sphi %s5402_s12, %s13_s12  }
   0x2   : > { %p137_p1 = scmp.lt.s32.totalorder %s5380_s12, 3 }
   0x4   : > { %p138_p2 = pnand %p4939_p0, %p137_p1 }
   0x6   : > { %141 = sbr.rel (%p138_p2) target bundleno = 878 (0x36e), region = 32 }
   0xd   : > { %v5331_v0 = vld [vmem:[%s8520_s1 + $0x40] sm:$0xff]   ;;  %p161_p3 = scmp.lt.s32.totalorder %s4935_s13, 1  ;;  %v5332_v1 = vld [vmem:[%s8520_s1 + $0x48] sm:$0xff]   ;;  %v5333_v2 = vld [vmem:[%s8520_s1 + $0x50] sm:$0xff]   ;;  %vm232_vm0 = vsmask.f32 3328 }
   0xe   : > { %5202 = vmatprep.subr.bf16.mxu1 %v5331_v0  ;;  %v5336_v3 = vld [vmem:[%s8520_s1 + $0x80] sm:$0xff]   ;;  %v5338_v4 = vld [vmem:[%s8520_s1 + $0x88] sm:$0xff]   ;;  %v5334_v5 = vld [vmem:[%s8520_s1 + $0x58] sm:$0xff]   ;;  %vm233_vm1 = vsmask.f32 7440  ;;  %v8670_v36 = vmov 0 }
   0xf   : > { %5203 = vmatpush3.bf16.msra.mxu1 %v5331_v0  ;;  %s8954_s13 = smov (!%p161_p3, %s4935_s13), 1  ;;  %5250 = vmatprep.subr.bf16.mxu0 %v5336_v3  ;;  %v5340_v6 = vld [vmem:[%s8520_s1 + $0x90] sm:$0xff]   ;;  %v5335_v7 = vld [vmem:[%s8520_s1 + $0x60] sm:$0xff]   ;;  %v5342_v8 = vld [vmem:[%s8520_s1 + $0x98] sm:$0xff]   ;;  %vm755_vm3 = vcmask 1042432   ;;  %vm756_vm4 = vcmask 1046532  }
  0x10   : > { %5204 = vmatprep.subr.bf16.mxu1 %v5332_v1  ;;  %5251 = vmatpush3.bf16.msra.mxu0 %v5336_v3  ;;  %s5322_s26 = smul.u32 240, %s8954_s13  ;;  %v5337_v10 = vld [vmem:[%s8520_s1 + $0x68] sm:$0xff]   ;;  %v5339_v14 = vld [vmem:[%s8520_s1 + $0x70] sm:$0xff]   ;;  %vm5487_vm2 = vmor %vm232_vm0, %vm233_vm1  ;;  %vm958_vm6 = vsmask.f32 2304  ;;  %vm1561_vm9 = vcmask 1040384  }
  0x11   : > { %5252 = vmatprep.subr.bf16.mxu0 %v5338_v4  ;;  %v8671_v36 = vsel %vm5487_vm2, 4294967295, %v8670_v36  ;;  %v5341_v41 = vld [vmem:[%s8520_s1 + $0x78] sm:$0xff]   ;;  %vm5612_vm5 = vmor %vm755_vm3, %vm756_vm4  ;;  %vm959_vm7 = vsmask.f32 6416  ;;  %vm1562_vm10 = vcmask 1044484   ;;  %vm4111_vm3 = vcmask 1041408  }
  0x12   : > { %s5440_s6 = scalar_lea.vmem %s8519_s0, %s5322_s26  ;;  %8672 = vst [vmem:[#allocation2_spill] sm:$0xff] %v8671_v36  ;;  %vm5730_vm8 = vmor %vm958_vm6, %vm959_vm7  ;;  %vm1724_vm12 = vsmask.f32 256  ;;  %vm1725_vm13 = vsmask.f32 4368  ;;  %vm4112_vm4 = vcmask 1045508  }
  0x13   : > { %5205 = vmatpush3.bf16.msra.mxu1 %v5332_v1  ;;  %v5446_v9 = vld [vmem:[%s5440_s6 + $0x30] sm:$0xc]  ;;  %v5452_v11 = vld [vmem:[%s5440_s6 + $0x3c] sm:$0xc]  ;;  %v5455_v12 = vld [vmem:[%s5440_s6 + $0x34] sm:$0x7] }
  0x14   : > { %5206 = vmatprep.subr.bf16.mxu1 %v5333_v2  ;;  %5253 = vmatpush3.bf16.msra.mxu0 %v5338_v4  ;;  %v5458_v13 = vld [vmem:[%s5440_s6 + $0x40] sm:$0x7]  ;;  %v312_v15 = vshrl.u32 %v5446_v9, 16  ;;  %v315_v16 = vshll.u32 %v5446_v9, 16  ;;  %v5466_v17 = vld [vmem:[%s5440_s6 + $0x48] sm:$0xc]  ;;  %vm5865_vm11 = vmor %vm1561_vm9, %vm1562_vm10 }
  0x15   : > { %5254 = vmatprep.subr.bf16.mxu0 %v5340_v6  ;;  %v321_v18 = vshll.u32 %v5455_v12, 16  ;;  %v325_v19 = vshrl.u32 %v5455_v12, 16  ;;  %v331_v20 = vshrl.u32 %v5452_v11, 16  ;;  %v334_v21 = vshll.u32 %v5452_v11, 16  ;;  %v5473_v22 = vld [vmem:[%s5440_s6 + $0x4c] sm:$0x7]  ;;  %vm5956_vm14 = vmor %vm1724_vm12, %vm1725_vm13 }
  0x16   : > { %v314_v23 = vrot.slane %v312_v15, 4  ;;  %v317_v24 = vrot.slane %v315_v16, 5  ;;  %v340_v25 = vshll.u32 %v5458_v13, 16  ;;  %v344_v26 = vshrl.u32 %v5458_v13, 16  ;;  %v5483_v35 = vld [vmem:[%s5440_s6 + $0x54] sm:$0xc]  ;;  %vm6395_vm6 = vmor %vm4111_vm3, %vm4112_vm4 }
  0x17   : > { %5207 = vmatpush3.bf16.msra.mxu1 %v5333_v2  ;;  %v5477_v27 = vrot.slane %v321_v18, 5  ;;  %v327_v28 = vrot.slane %v325_v19, 4  ;;  %v333_v29 = vrot.slane %v331_v20, 4  ;;  %v336_v30 = vrot.slane %v334_v21, 5  ;;  %v5498_v42 = vld [vmem:[%s5440_s6 + $0x58] sm:$0x7] }
  0x18   : > { %5208 = vmatprep.subr.bf16.mxu1 %v5334_v5  ;;  %5255 = vmatpush3.bf16.msra.mxu0 %v5340_v6  ;;  %v318_v31 = vor.u32 %v317_v24, %v314_v23  ;;  %v5479_v32 = vrot.slane %v340_v25, 5  ;;  %v346_v33 = vrot.slane %v344_v26, 4  ;;  %v350_v34 = vshrl.u32 %v5466_v17, 16  ;;  %v5505_v47 = vld [vmem:[%s5440_s6 + $0x60] sm:$0xc]  ;;  %s5130_s14 = sshll.u32 %s8954_s13, 5 }
  0x19   : > { %5256 = vmatprep.subr.bf16.mxu0 %v5342_v8  ;;  %v328_v37 = vor.u32 %v327_v28, %v5477_v27  ;;  %v337_v38 = vor.u32 %v336_v30, %v333_v29  ;;  %v353_v39 = vshll.u32 %v5466_v17, 16  ;;  %v359_v40 = vshll.u32 %v5473_v22, 16  ;;  %v5521_v56 = vld [vmem:[%s5440_s6 + $0x64] sm:$0x7]  ;;  %v5533_v1 = vld [vmem:[%s5440_s6 + $0x6c] sm:$0xc]  ;;  %s8506_s17 = scalar_lea.vmem %s8522_s3, %s5130_s14 }
  0x1a   : > { %v5500_v43 = vrot.slane %v318_v31, 4  ;;  %v347_v44 = vor.u32 %v346_v33, %v5479_v32  ;;  %v352_v45 = vrot.slane %v350_v34, 4  ;;  %v363_v46 = vshrl.u32 %v5473_v22, 16  ;;  %v5537_v6 = vld [vmem:[%s5440_s6 + $0x70] sm:$0x7] }
  0x1b   : > { %5209 = vmatpush3.bf16.msra.mxu1 %v5334_v5  ;;  %v5507_v48 = vrot.slane %v328_v37, 4  ;;  %v5509_v49 = vrot.slane %v337_v38, 4  ;;  %v355_v50 = vrot.slane %v353_v39, 5  ;;  %v5511_v51 = vrot.slane %v359_v40, 5  ;;  %v5549_v25 = vld [vmem:[%s5440_s6 + $0x34] sm:$0x3] }
  0x1c   : > { %5210 = vmatprep.subr.bf16.mxu1 %v5335_v7  ;;  %5257 = vmatpush3.bf16.msra.mxu0 %v5342_v8  ;;  %v324_v52 = vsel %vm5487_vm2, %v5500_v43, %v5477_v27  ;;  %v5517_v53 = vrot.slane %v347_v44, 4  ;;  %v365_v54 = vrot.slane %v363_v46, 4  ;;  %v369_v55 = vshrl.u32 %v5483_v35, 16  ;;  %v5553_v30 = vld [vmem:[%s5440_s6 + $0x40] sm:$0x3] }
  0x1d   : > { %v343_v57 = vsel %vm5487_vm2, %v5509_v49, %v5479_v32  ;;  %v356_v58 = vor.u32 %v355_v50, %v352_v45  ;;  %v372_v59 = vshll.u32 %v5483_v35, 16  ;;  %v378_v60 = vshll.u32 %v5498_v42, 16  ;;  %v5559_v37 = vld [vmem:[%s5440_s6 + $0x4c] sm:$0x3]  ;;  %v5564_v43 = vld [vmem:[%s5440_s6 + $0x58] sm:$0x3] }
  0x1e   : > { %v366_v61 = vor.u32 %v365_v54, %v5511_v51  ;;  %v371_v62 = vrot.slane %v369_v55, 4  ;;  %v382_v63 = vshrl.u32 %v5498_v42, 16  ;;  %v388_v0 = vshrl.u32 %v5505_v47, 16  ;;  %v5567_v44 = vld [vmem:[%s5440_s6 + $0x64] sm:$0x3] }
  0x1f   : > { %5211 = vmatpush3.bf16.msra.mxu1 %v5335_v7  ;;  %v357_v2 = vrot.slane %v356_v58, 4  ;;  %v374_v3 = vrot.slane %v372_v59, 5  ;;  %v380_v4 = vrot.slane %v378_v60, 5  ;;  %v391_v5 = vshll.u32 %v5505_v47, 16  ;;  %v5584_v59 = vld [vmem:[%s5440_s6 + $0x30] sm:$0x8] }
  0x20   : > { %5212 = vmatprep.subr.bf16.mxu1 %v5337_v10  ;;  %v5539_v7 = vrot.slane %v366_v61, 4  ;;  %v384_v8 = vrot.slane %v382_v63, 4  ;;  %v401_v19 = vshrl.u32 %v5521_v56, 16  ;;  %v407_v23 = vshrl.u32 %v5533_v1, 16  ;;  %v5592_v61 = vld [vmem:[%s5440_s6 + $0x3c] sm:$0x8] }
  0x21   : > { %v362_v15 = vsel %vm5487_vm2, %v357_v2, %v5511_v51  ;;  %v375_v16 = vor.u32 %v374_v3, %v371_v62  ;;  %v393_v18 = vrot.slane %v391_v5, 5  ;;  %v410_v24 = vshll.u32 %v5533_v1, 16  ;;  %v5595_v62 = vld [vmem:[%s5440_s6 + $0x48] sm:$0x8]  ;;  %v5619_v3 = vld [vmem:[%s5440_s6 + $0x54] sm:$0x8] }
  0x22   : > { %v385_v20 = vor.u32 %v384_v8, %v380_v4  ;;  %v403_v28 = vrot.slane %v401_v19, 4  ;;  %v416_v29 = vshll.u32 %v5537_v6, 16  ;;  %v409_v32 = vrot.slane %v407_v23, 4  ;;  %v5343_v5 = vld [vmem:[%s8520_s1] sm:$0xff]  }
  0x23   : > { %5213 = vmatpush3.bf16.msra.mxu1 %v5337_v10  ;;  %v390_v10 = vrot.slane %v388_v0, 4  ;;  %v376_v26 = vrot.slane %v375_v16, 4  ;;  %v412_v33 = vrot.slane %v410_v24, 5  ;;  %v420_v34 = vshrl.u32 %v5537_v6, 16  ;;  %v5630_v8 = vld [vmem:[%s5440_s6 + $0x60] sm:$0x8] }
  0x24   : > { %5214 = vmatprep.subr.bf16.mxu1 %v5339_v14  ;;  %v5555_v31 = vrot.slane %v385_v20, 4  ;;  %v5570_v49 = vmax.bf16 %v324_v52, %v5446_v9  ;;  %v664_v50 = vmax.bf16 %v5507_v48, %v5549_v25  ;;  %v5579_v55 = vmax.bf16 %v343_v57, %v5452_v11  ;;  %v5598_v11 = vld [vmem:[%s5440_s6 + $0x70] sm:$0x3]  ;;  %v5344_v16 = vld [vmem:[%s8520_s1 + $0xa0] sm:$0xff]  }
  0x25   : > { %v394_v27 = vor.u32 %v393_v18, %v390_v10  ;;  %v381_v38 = vsel %vm5487_vm2, %v376_v26, %v380_v4  ;;  %v413_v45 = vor.u32 %v412_v33, %v409_v32  ;;  %v422_v46 = vrot.slane %v420_v34, 4  ;;  %v5640_v18 = vld [vmem:[%s5440_s6 + $0x6c] sm:$0x8]  ;;  %5258 = vmatprep.subr.bf16.mxu0 %v5344_v16 }
  0x26   : > { %v666_v58 = vmax.bf16 %v5517_v53, %v5553_v30  ;;  %v5587_v52 = vmax.bf16 %v362_v15, %v5466_v17  ;;  %v668_v48 = vmax.bf16 %v5539_v7, %v5559_v37  ;;  %v5601_v53 = vmax.bf16 %v381_v38, %v5483_v35  ;;  %5259 = vmatpush3.bf16.msra.mxu0 %v5344_v16 }
  0x27   : > { %5215 = vmatpush3.bf16.msra.mxu1 %v5339_v14  ;;  %v397_v14 = vshll.u32 %v5521_v56, 16  ;;  %v395_v39 = vrot.slane %v394_v27, 4  ;;  %v414_v60 = vrot.slane %v413_v45, 4  ;;  %v670_v57 = vmax.bf16 %v5555_v31, %v5564_v43  ;;  %v5682_v45 = vld [vmem:[%s5440_s6 + $0x34] sm:$0xf] }
  0x28   : > { %5216 = vmatprep.subr.bf16.mxu1 %v5341_v41  ;;  %v8673_v0 = vmov 0  ;;  %v4947_v4 = vrot.slane %v5584_v59, 9  ;;  %v4948_v10 = vrot.slane %v5592_v61, 9  ;;  %v4949_v15 = vrot.slane %v5595_v62, 9 }
  0x29   : > { %v399_v21 = vrot.slane %v397_v14, 5  ;;  %v8674_v0 = vsel %vm5612_vm5, 4294967295, %v8673_v0  ;;  %v785_v14 = vrot.slane %v5458_v13, 5  ;;  %v790_v20 = vrot.slane %v5473_v22, 5 }
  0x2a   : > { %8675 = vst [vmem:[#allocation3_spill] sm:$0xff] %v8674_v0  ;;  %v4950_v23 = vrot.slane %v5619_v3, 9  ;;  %v795_v24 = vrot.slane %v5498_v42, 5  ;;  %v800_v22 = vrot.slane %v5521_v56, 5  ;;  %v4952_v42 = vrot.slane %v5640_v18, 9 }
  0x2b   : > { %5217 = vmatpush3.bf16.msra.mxu1 %v5341_v41  ;;  %v404_v40 = vor.u32 %v403_v28, %v399_v21  ;;  %v418_v41 = vrot.slane %v416_v29, 5  ;;  %v400_v51 = vsel %vm5487_vm2, %v395_v39, %v399_v21  ;;  %v5649_v13 = vsel %vm5612_vm5, %v4948_v10, %v785_v14 }
  0x2c   : > { %v5606_v63 = vmax.bf16 %v400_v51, %v5505_v47  ;;  %v780_v47 = vrot.slane %v5455_v12, 5  ;;  %5226 = vmatprep.subr.bf16.mxu1 %v5343_v5  ;;  %v787_v21 = vrot.slane %v785_v14, 4  ;;  %v5655_v26 = vsel %vm5612_vm5, %v4949_v15, %v790_v20  ;;  %v5712_v5 = vld [vmem:[%s5440_s6 + $0x64] sm:$0xf] }
  0x2d   : > { %v5576_v54 = vrot.slane %v404_v40, 4  ;;  %v423_v9 = vor.u32 %v422_v46, %v418_v41  ;;  %v419_v35 = vsel %vm5487_vm2, %v414_v60, %v418_v41  ;;  %v792_v27 = vrot.slane %v790_v20, 4  ;;  %v5693_v60 = vld [vmem:[%s5440_s6 + $0x40] sm:$0xf] }
  0x2e   : > { %v5627_v7 = vmax.bf16 %v419_v35, %v5533_v1  ;;  %v5644_v1 = vsel %vm5612_vm5, %v4947_v4, %v780_v47  ;;  %v782_v19 = vrot.slane %v780_v47, 4  ;;  %v4951_v28 = vrot.slane %v5630_v8, 9  ;;  %v5704_v4 = vld [vmem:[%s5440_s6 + $0x4c] sm:$0xf] }
  0x2f   : > { %v672_v17 = vmax.bf16 %v5576_v54, %v5567_v44  ;;  %v424_v2 = vrot.slane %v423_v9, 4  ;;  %v5661_v29 = vsel %vm5612_vm5, %v4950_v23, %v795_v24  ;;  %v797_v31 = vrot.slane %v795_v24, 4 }
  0x30   : > { %v805_v32 = vrot.slane %v5537_v6, 5  ;;  %v5667_v33 = vsel %vm5612_vm5, %v4951_v28, %v800_v22  ;;  %v802_v34 = vrot.slane %v800_v22, 4  ;;  %v906_v38 = vmax.bf16 %v5644_v1, %v5570_v49 }
  0x31   : > { %v674_v12 = vmax.bf16 %v424_v2, %v5598_v11  ;;  %v5671_v56 = vmax.bf16 %v782_v19, %v664_v50  ;;  %v908_v6 = vmax.bf16 %v5649_v13, %v5579_v55  ;;  %v5679_v41 = vmax.bf16 %v787_v21, %v666_v58 }
  0x32   : > { %v5675_v39 = vsel %vm5612_vm5, %v4952_v42, %v805_v32  ;;  %v807_v40 = vrot.slane %v805_v32, 4  ;;  %v910_v46 = vmax.bf16 %v5655_v26, %v5587_v52  ;;  %v5686_v51 = vmax.bf16 %v792_v27, %v668_v48  ;;  %v5707_v48 = vld [vmem:[%s5440_s6 + $0x58] sm:$0xf] }
  0x33   : > { %v912_v50 = vmax.bf16 %v5661_v29, %v5601_v53  ;;  %v5690_v54 = vmax.bf16 %v797_v31, %v670_v57  ;;  %v914_v9 = vmax.bf16 %v5667_v33, %v5606_v63  ;;  %v5697_v58 = vmax.bf16 %v802_v34, %v672_v17 }
  0x34   : > { %v916_v35 = vmax.bf16 %v5675_v39, %v5627_v7  ;;  %v5701_v2 = vmax.bf16 %v807_v40, %v674_v12  ;;  %v1022_v57 = vshrl.u32 %v5584_v59, 16  ;;  %v8534_v47 = vshrl.u32 %v5682_v45, 16  ;;  %v5741_v40 = vld [vmem:[%s5440_s6 + $0x70] sm:$0xf]  ;;  %v5814_v7 = vld [vmem:[%s5440_s6 + $0x40] sm:$0x1] }
  0x35   : > { %v8530_v17 = vshll.u32 %v5682_v45, 16  ;;  %v1037_v10 = vshrl.u32 %v5592_v61, 16  ;;  %v8526_v14 = vshrl.u32 %v5693_v60, 16  ;;  %v8524_v15 = vshll.u32 %v5693_v60, 16 }
  0x36   : > { %v4967_v16 = vrot.slane %v1022_v57, 9  ;;  %v1029_v12 = vrot.slane %v8534_v47, 5  ;;  %v1052_v19 = vshrl.u32 %v5595_v62, 16  ;;  %v8523_v59 = vshrl.u32 %v5704_v4, 16 }
  0x37   : > { %v1032_v20 = vrot.slane %v8530_v17, 6  ;;  %v4968_v21 = vrot.slane %v1037_v10, 9  ;;  %v1044_v61 = vrot.slane %v8526_v14, 5  ;;  %v1047_v23 = vrot.slane %v8524_v15, 6 }
  0x38   : > { %v8676_v24 = vmov 0  ;;  %v4969_v27 = vrot.slane %v1052_v19, 9  ;;  %v1059_v62 = vrot.slane %v8523_v59, 5  ;;  %v8525_v28 = vshll.u32 %v5704_v4, 16 }
  0x39   : > { %v8677_v24 = vsel %vm5730_vm8, 4294967295, %v8676_v24  ;;  %v1067_v22 = vshrl.u32 %v5619_v3, 16  ;;  %v1033_v31 = vor.u32 %v1032_v20, %v1029_v12  ;;  %v1048_v42 = vor.u32 %v1047_v23, %v1044_v61 }
  0x3a   : > { %8678 = vst [vmem:[#allocation4_spill] sm:$0xff] %v8677_v24  ;;  %v8529_v32 = vshrl.u32 %v5707_v48, 16  ;;  %v8527_v34 = vshll.u32 %v5707_v48, 16  ;;  %v1062_v57 = vrot.slane %v8525_v28, 6  ;;  %v1082_v19 = vshrl.u32 %v5630_v8, 16 }
  0x3b   : > { %v4970_v10 = vrot.slane %v1067_v22, 9  ;;  %v8528_v59 = vshrl.u32 %v5712_v5, 16  ;;  %v1034_v15 = vsel %vm5730_vm8, %v4967_v16, %v1033_v31  ;;  %v1035_v3 = vrot.slane %v1033_v31, 4 }
  0x3c   : > { %v1049_v12 = vsel %vm5730_vm8, %v4968_v21, %v1048_v42  ;;  %v1050_v20 = vrot.slane %v1048_v42, 4  ;;  %v1063_v61 = vor.u32 %v1062_v57, %v1059_v62  ;;  %v1074_v23 = vrot.slane %v8529_v32, 5 }
  0x3d   : > { %v1077_v28 = vrot.slane %v8527_v34, 6  ;;  %v4971_v22 = vrot.slane %v1082_v19, 9  ;;  %v1089_v8 = vrot.slane %v8528_v59, 5  ;;  %v8533_v14 = vshll.u32 %v5712_v5, 16 }
  0x3e   : > { %v1097_v16 = vshrl.u32 %v5640_v18, 16  ;;  %v8532_v31 = vshrl.u32 %v5741_v40, 16  ;;  %v1064_v21 = vsel %vm5730_vm8, %v4969_v27, %v1063_v61  ;;  %v1065_v62 = vrot.slane %v1063_v61, 4 }
  0x3f   : > { %v1078_v42 = vor.u32 %v1077_v28, %v1074_v23  ;;  %v8531_v57 = vshll.u32 %v5741_v40, 16  ;;  %v1092_v34 = vrot.slane %v8533_v14, 6  ;;  %v1309_v18 = vmax.bf16 %v1034_v15, %v906_v38 }
  0x40   : > { %v4972_v19 = vrot.slane %v1097_v16, 9  ;;  %v1104_v59 = vrot.slane %v8532_v31, 5  ;;  %v1310_v28 = vmax.bf16 %v1035_v3, %v5671_v56  ;;  %v1311_v23 = vmax.bf16 %v1049_v12, %v908_v6  ;;  %v5827_v3 = vld [vmem:[%s5440_s6 + $0x4c] sm:$0x1]  ;;  %v5830_v12 = vld [vmem:[%s5440_s6 + $0x54] sm:$0xe] }
  0x41   : > { %v1079_v32 = vsel %vm5730_vm8, %v4970_v10, %v1078_v42  ;;  %v1080_v17 = vrot.slane %v1078_v42, 4  ;;  %v1107_v27 = vrot.slane %v8531_v57, 6  ;;  %v1093_v61 = vor.u32 %v1092_v34, %v1089_v8 }
  0x42   : > { %v1312_v16 = vmax.bf16 %v1050_v20, %v5679_v41  ;;  %v1313_v49 = vmax.bf16 %v1064_v21, %v910_v46  ;;  %v1314_v38 = vmax.bf16 %v1065_v62, %v5686_v51  ;;  %v1315_v56 = vmax.bf16 %v1079_v32, %v912_v50 }
  0x43   : > { %v1108_v1 = vor.u32 %v1107_v27, %v1104_v59  ;;  %v1316_v15 = vmax.bf16 %v1080_v17, %v5690_v54  ;;  %v1094_v55 = vsel %vm5730_vm8, %v4971_v22, %v1093_v61  ;;  %v1095_v13 = vrot.slane %v1093_v61, 4  ;;  %v5802_v17 = vld [vmem:[%s5440_s6 + $0x30] sm:$0xe]  ;;  %v5843_v27 = vld [vmem:[%s5440_s6 + $0x58] sm:$0x1] }
  0x44   : > { %v1369_v6 = vrot.slane %v5682_v45, 6  ;;  %v1371_v52 = vrot.slane %v5693_v60, 6  ;;  %v1317_v53 = vmax.bf16 %v1094_v55, %v914_v9  ;;  %v1373_v29 = vrot.slane %v5704_v4, 6  ;;  %v5808_v9 = vld [vmem:[%s5440_s6 + $0x34] sm:$0x1] }
  0x45   : > { %v1109_v26 = vsel %vm5730_vm8, %v4972_v19, %v1108_v1  ;;  %v1110_v41 = vrot.slane %v1108_v1, 4  ;;  %v1318_v46 = vmax.bf16 %v1095_v13, %v5697_v58  ;;  %v1375_v63 = vrot.slane %v5707_v48, 6  ;;  %v5811_v58 = vld [vmem:[%s5440_s6 + $0x3c] sm:$0xe] }
  0x46   : > { %v1319_v51 = vmax.bf16 %v1109_v26, %v916_v35  ;;  %v1370_v50 = vrot.slane %v1369_v6, 4  ;;  %v1372_v54 = vrot.slane %v1371_v52, 4  ;;  %v1374_v32 = vrot.slane %v1373_v29, 4 }
  0x47   : > { %v1320_v59 = vmax.bf16 %v1110_v41, %v5701_v2  ;;  %v1377_v33 = vrot.slane %v5712_v5, 6  ;;  %v1379_v39 = vrot.slane %v5741_v40, 6  ;;  %v5817_v35 = vmax.bf16 %v1369_v6, %v1309_v18  ;;  %v5824_v2 = vld [vmem:[%s5440_s6 + $0x48] sm:$0xe] }
  0x48   : > { %v5819_v34 = vmax.bf16 %v1370_v50, %v1310_v28  ;;  %v5821_v10 = vmax.bf16 %v1371_v52, %v1311_v23  ;;  %v1376_v20 = vrot.slane %v1375_v63, 4  ;;  %v5832_v8 = vmax.bf16 %v1372_v54, %v1312_v16  ;;  %v5852_v16 = vld [vmem:[%s5440_s6 + $0x60] sm:$0xe]  ;;  %v5873_v52 = vld [vmem:[%s5440_s6 + $0x70] sm:$0x1] }
  0x49   : > { %v1378_v22 = vrot.slane %v1377_v33, 4  ;;  %v5834_v21 = vmax.bf16 %v1373_v29, %v1313_v49  ;;  %v1380_v62 = vrot.slane %v1379_v39, 4  ;;  %v5836_v42 = vmax.bf16 %v1374_v32, %v1314_v38  ;;  %v5855_v49 = vld [vmem:[%s5440_s6 + $0x64] sm:$0x1] }
  0x4a   : > { %8679 = vst [vmem:[#allocation5_spill] sm:$0xff] %v5821_v10  ;;  %v5838_v19 = vmax.bf16 %v1375_v63, %v1315_v56  ;;  %v5840_v18 = vmax.bf16 %v1377_v33, %v1317_v53  ;;  %v5845_v28 = vmax.bf16 %v1376_v20, %v1316_v15  ;;  %v5849_v23 = vmax.bf16 %v1379_v39, %v1319_v51  ;;  %v5861_v56 = vld [vmem:[%s5440_s6 + $0x6c] sm:$0xe] }
  0x4b   : > { %8680 = vst [vmem:[#allocation6_spill] sm:$0xff] %v5834_v21  ;;  %v5847_v61 = vmax.bf16 %v1378_v22, %v1318_v46  ;;  %v1580_v1 = vrot.slane %v5802_v17, 7  ;;  %v5858_v38 = vmax.bf16 %v1380_v62, %v1320_v59  ;;  %v8686_v55 = vmov 0 }
  0x4c   : > { %8681 = vst [vmem:[#allocation7_spill] sm:$0xff] %v5838_v19  ;;  %8682 = vst [vmem:[#allocation8_spill] sm:$0xff] %v5840_v18  ;;  %v8687_v55 = vsel %vm5865_vm11, 4294967295, %v8686_v55  ;;  %v1582_v15 = vrot.slane %v5808_v9, 7  ;;  %v1584_v13 = vrot.slane %v5811_v58, 7  ;;  %v1586_v6 = vrot.slane %v5814_v7, 7 }
  0x4d   : > { %8683 = vst [vmem:[#allocation9_spill] sm:$0xff] %v5847_v61  ;;  %8684 = vst [vmem:[#allocation10_spill] sm:$0xff] %v5849_v23  ;;  %v1581_v26 = vrot.slane %v1580_v1, 4  ;;  %v1588_v41 = vrot.slane %v5824_v2, 7  ;;  %v1590_v53 = vrot.slane %v5827_v3, 7  ;;  %v1592_v29 = vrot.slane %v5830_v12, 7 }
  0x4e   : > { %8685 = vst [vmem:[#allocation11_spill] sm:$0xff] %v5858_v38  ;;  %8688 = vst [vmem:[#allocation12_spill] sm:$0xff] %v8687_v55  ;;  %v1585_v46 = vrot.slane %v1584_v13, 4  ;;  %v1594_v51 = vrot.slane %v5843_v27, 7  ;;  %v1596_v50 = vrot.slane %v5852_v16, 7  ;;  %v1598_v54 = vrot.slane %v5855_v49, 7 }
  0x4f   : > { %v5883_v59 = vsel %vm5865_vm11, %v1581_v26, %v1582_v15  ;;  %v1589_v32 = vrot.slane %v1588_v41, 4  ;;  %v1593_v63 = vrot.slane %v1592_v29, 4  ;;  %v1600_v33 = vrot.slane %v5861_v56, 7 }
  0x50   : > { %v5888_v39 = vsel %vm5865_vm11, %v1585_v46, %v1586_v6  ;;  %v1597_v20 = vrot.slane %v1596_v50, 4  ;;  %v1602_v22 = vrot.slane %v5873_v52, 7  ;;  %v5892_v62 = vmax.bf16 %v1580_v1, %v5817_v35 }
  0x51   : > { %v5896_v57 = vsel %vm5865_vm11, %v1589_v32, %v1590_v53  ;;  %v5900_v15 = vsel %vm5865_vm11, %v1593_v63, %v1594_v51  ;;  %v1601_v26 = vrot.slane %v1600_v33, 4  ;;  %v5909_v46 = vmax.bf16 %v1584_v13, %v5821_v10 }
  0x52   : > { %v5906_v6 = vsel %vm5865_vm11, %v1597_v20, %v1598_v54  ;;  %v5914_v53 = vmax.bf16 %v1588_v41, %v5834_v21  ;;  %v5923_v63 = vmax.bf16 %v1592_v29, %v5838_v19  ;;  %v5346_v54 = vld [vmem:[%s8520_s1 + $0xa8] sm:$0xff]   ;;  %v5931_v41 = vmax.bf16 %v1596_v50, %v5840_v18 }
  0x53   : > { %v5918_v51 = vsel %vm5865_vm11, %v1601_v26, %v1602_v22  ;;  %v5936_v22 = vmax.bf16 %v1600_v33, %v5849_v23  ;;  %v1792_v26 = vshrl.u32 %v5802_v17, 16  ;;  %v1795_v14 = vshll.u32 %v5802_v17, 16  ;;  %5260 = vmatprep.subr.bf16.mxu0 %v5346_v54  ;;  %v5348_v17 = vld [vmem:[%s8520_s1 + $0xb0] sm:$0xff]  }
  0x54   : > { %v1800_v47 = vshrl.u32 %v5549_v25, 16  ;;  %v1803_v50 = vshll.u32 %v5549_v25, 16  ;;  %v1808_v13 = vshrl.u32 %v5811_v58, 16  ;;  %v1811_v20 = vshll.u32 %v5811_v58, 16  ;;  %5261 = vmatpush3.bf16.msra.mxu0 %v5346_v54 }
  0x55   : > { %v1794_v33 = vrot.slane %v1792_v26, 7  ;;  %v1816_v32 = vshrl.u32 %v5553_v30, 16  ;;  %v1819_v29 = vshll.u32 %v5553_v30, 16  ;;  %v1824_v1 = vshrl.u32 %v5824_v2, 16  ;;  %5262 = vmatprep.subr.bf16.mxu0 %v5348_v17 }
  0x56   : > { %v1802_v31 = vrot.slane %v1800_v47, 7  ;;  %v1810_v24 = vrot.slane %v1808_v13, 7  ;;  %v1827_v25 = vshll.u32 %v5824_v2, 16  ;;  %v1832_v0 = vshrl.u32 %v5559_v37, 16 }
  0x57   : > { %v5960_v54 = vor.u32 %v1795_v14, %v1794_v33  ;;  %v1798_v30 = vrot.slane %v1794_v33, 4  ;;  %v1818_v26 = vrot.slane %v1816_v32, 7  ;;  %v1826_v36 = vrot.slane %v1824_v1, 7  ;;  %v5350_v14 = vld [vmem:[%s8520_s1 + $0xb8] sm:$0xff]  }
  0x58   : > { %v1805_v23 = vor.u32 %v1803_v50, %v1802_v31  ;;  %v5962_v18 = vor.u32 %v1811_v20, %v1810_v24  ;;  %v1814_v47 = vrot.slane %v1810_v24, 4  ;;  %v1834_v13 = vrot.slane %v1832_v0, 7  ;;  %5263 = vmatpush3.bf16.msra.mxu0 %v5348_v17 }
  0x59   : > { %v1821_v2 = vor.u32 %v1819_v29, %v1818_v26  ;;  %v5964_v19 = vor.u32 %v1827_v25, %v1826_v36  ;;  %v1830_v21 = vrot.slane %v1826_v36, 4  ;;  %v1835_v10 = vshll.u32 %v5559_v37, 16  ;;  %5264 = vmatprep.subr.bf16.mxu0 %v5350_v14 }
  0x5a   : > { %v1806_v1 = vsel %vm5956_vm14, %v1798_v30, %v1805_v23  ;;  %v1840_v31 = vshrl.u32 %v5830_v12, 16  ;;  %v1843_v32 = vshll.u32 %v5830_v12, 16  ;;  %v1848_v0 = vshrl.u32 %v5564_v43, 16 }
  0x5b   : > { %v1822_v24 = vsel %vm5956_vm14, %v1814_v47, %v1821_v2  ;;  %v1837_v20 = vor.u32 %v1835_v10, %v1834_v13  ;;  %v1851_v36 = vshll.u32 %v5564_v43, 16  ;;  %v1856_v37 = vshrl.u32 %v5852_v16, 16 }
  0x5c   : > { %v1842_v29 = vrot.slane %v1840_v31, 7  ;;  %v1850_v50 = vrot.slane %v1848_v0, 7  ;;  %v1859_v33 = vshll.u32 %v5852_v16, 16  ;;  %v1864_v23 = vshrl.u32 %v5567_v44, 16  ;;  %5265 = vmatpush3.bf16.msra.mxu0 %v5350_v14 }
  0x5d   : > { %v1838_v12 = vsel %vm5956_vm14, %v1830_v21, %v1837_v20  ;;  %v1858_v17 = vrot.slane %v1856_v37, 7  ;;  %v1867_v25 = vshll.u32 %v5567_v44, 16  ;;  %v1872_v10 = vshrl.u32 %v5861_v56, 16 }
  0x5e   : > { %v5985_v30 = vor.u32 %v1843_v32, %v1842_v29  ;;  %v1846_v43 = vrot.slane %v1842_v29, 4  ;;  %v1853_v26 = vor.u32 %v1851_v36, %v1850_v50  ;;  %v1866_v47 = vrot.slane %v1864_v23, 7 }
  0x5f   : > { %v5987_v13 = vor.u32 %v1859_v33, %v1858_v17  ;;  %v1862_v2 = vrot.slane %v1858_v17, 4  ;;  %v1874_v16 = vrot.slane %v1872_v10, 7  ;;  %v1875_v31 = vshll.u32 %v5861_v56, 16 }
  0x60   : > { %v1854_v14 = vsel %vm5956_vm14, %v1846_v43, %v1853_v26  ;;  %v1869_v21 = vor.u32 %v1867_v25, %v1866_v47  ;;  %v1880_v44 = vshrl.u32 %v5598_v11, 16  ;;  %v1883_v32 = vshll.u32 %v5598_v11, 16 }
  0x61   : > { %v5994_v0 = vor.u32 %v1875_v31, %v1874_v16  ;;  %v1878_v20 = vrot.slane %v1874_v16, 4  ;;  %v2095_v36 = vmax.bf16 %v5960_v54, %v5892_v62  ;;  %v8691_v37 = vmax.bf16 %v5883_v59, %v5819_v34 }
  0x62   : > { %v1870_v29 = vsel %vm5956_vm14, %v1862_v2, %v1869_v21  ;;  %v1882_v50 = vrot.slane %v1880_v44, 7  ;;  %v2097_v33 = vmax.bf16 %v5962_v18, %v5909_v46  ;;  %v8692_v11 = vmax.bf16 %v5888_v39, %v5832_v8  ;;  %v6027_v46 = vld [vmem:[%s5440_s6 + $0x38] sm:$0x1]  ;;  %v6030_v39 = vld [vmem:[%s5440_s6 + $0x44] sm:$0x1] }
  0x63   : > { %v6001_v56 = vmax.bf16 %v1806_v1, %v8691_v37  ;;  %v2099_v62 = vmax.bf16 %v5964_v19, %v5914_v53  ;;  %v8693_v59 = vmax.bf16 %v5896_v57, %v5836_v42  ;;  %v2101_v1 = vmax.bf16 %v5985_v30, %v5923_v63  ;;  %v6133_v63 = vld [vmem:[%s5440_s6 + $0x70] sm:$0xe] }
  0x64   : > { %v6010_v23 = vmax.bf16 %v1822_v24, %v8692_v11  ;;  %v8694_v17 = vmax.bf16 %v5900_v15, %v5845_v28  ;;  %v1885_v24 = vor.u32 %v1883_v32, %v1882_v50  ;;  %v2103_v19 = vmax.bf16 %v5987_v13, %v5931_v41  ;;  %v2133_v15 = vld [vmem:[%s5440_s6 + $0x50] sm:$0x1]  ;;  %v2134_v32 = vld [vmem:[%s5440_s6 + $0x5c] sm:$0x1] }
  0x65   : > { %v6017_v54 = vmax.bf16 %v1838_v12, %v8693_v59  ;;  %v8695_v57 = vmax.bf16 %v5906_v6, %v5847_v61  ;;  %vm2147_vm15 = vsmask.f32 1280  ;;  %vm2148_vm0 = vsmask.f32 5392  ;;  %v6074_v12 = vld [vmem:[%s5440_s6 + $0x74] sm:$0x1] }
  0x66   : > { %v6024_v18 = vmax.bf16 %v1854_v14, %v8694_v17  ;;  %v8696_v25 = vshrl.u32 %v5682_v45, 16  ;;  %v8697_v43 = vshll.u32 %v5682_v45, 16  ;;  %v1886_v47 = vsel %vm5956_vm14, %v1878_v20, %v1885_v24  ;;  %vm6062_vm1 = vmor %vm2147_vm15, %vm2148_vm0  ;;  %v2135_v24 = vld [vmem:[%s5440_s6 + $0x68] sm:$0x1] }
  0x67   : > { %v6037_v53 = vmax.bf16 %v1870_v29, %v8695_v57  ;;  %v2191_v6 = vshll.u32 %v6027_v46, 16  ;;  %v8698_v2 = vshrl.u32 %v5693_v60, 16  ;;  %v8699_v31 = vshll.u32 %v5693_v60, 16 }
  0x68   : > { %v2186_v10 = vrot.slane %v8696_v25, 6  ;;  %v2187_v26 = vrot.slane %v8697_v43, 7  ;;  %v8700_v21 = vmax.bf16 %v5918_v51, %v5858_v38  ;;  %v2200_v37 = vshll.u32 %v6030_v39, 16 }
  0x69   : > { %v2195_v16 = vrot.slane %v8698_v2, 6  ;;  %v2196_v14 = vrot.slane %v8699_v31, 7  ;;  %v8701_v29 = vshrl.u32 %v5704_v4, 16  ;;  %v8702_v50 = vmov 0 }
  0x6a   : > { %v6056_v44 = vmax.bf16 %v1886_v47, %v8700_v21  ;;  %v2188_v45 = vor.u32 %v2187_v26, %v2186_v10  ;;  %v8703_v50 = vsel %vm6062_vm1, 4294967295, %v8702_v50  ;;  %v2193_v11 = vrot.slane %v2191_v6, 7 }
  0x6b   : > { %v2204_v20 = vrot.slane %v8701_v29, 6  ;;  %8704 = vst [vmem:[#allocation13_spill] sm:$0xff] %v8703_v50  ;;  %v2197_v60 = vor.u32 %v2196_v14, %v2195_v16  ;;  %v8705_v59 = vshll.u32 %v5704_v4, 16  ;;  %v2209_v51 = vshll.u32 %v2133_v15, 16 }
  0x6c   : > { %v2189_v57 = vrot.slane %v2188_v45, 4  ;;  %v2202_v25 = vrot.slane %v2200_v37, 7  ;;  %v8706_v10 = vshrl.u32 %v5707_v48, 16  ;;  %v8707_v26 = vshll.u32 %v5707_v48, 16 }
  0x6d   : > { %v2205_v17 = vrot.slane %v8705_v59, 7  ;;  %v2198_v2 = vrot.slane %v2197_v60, 4  ;;  %v2211_v21 = vrot.slane %v2209_v51, 7  ;;  %v2218_v29 = vshll.u32 %v2134_v32, 16 }
  0x6e   : > { %v2213_v43 = vrot.slane %v8706_v10, 6  ;;  %v2214_v47 = vrot.slane %v8707_v26, 7  ;;  %v2194_v4 = vsel %vm6062_vm1, %v2189_v57, %v2193_v11  ;;  %v8708_v15 = vshrl.u32 %v5712_v5, 16 }
  0x6f   : > { %v2206_v31 = vor.u32 %v2205_v17, %v2204_v20  ;;  %v8709_v14 = vshll.u32 %v5712_v5, 16  ;;  %v2203_v48 = vsel %vm6062_vm1, %v2198_v2, %v2202_v25  ;;  %v2220_v10 = vrot.slane %v2218_v29, 7 }
  0x70   : > { %v2215_v6 = vor.u32 %v2214_v47, %v2213_v43  ;;  %v2222_v16 = vrot.slane %v8708_v15, 6  ;;  %v2227_v20 = vshll.u32 %v2135_v24, 16  ;;  %v8710_v51 = vshrl.u32 %v5741_v40, 16 }
  0x71   : > { %v2223_v37 = vrot.slane %v8709_v14, 7  ;;  %v2207_v59 = vrot.slane %v2206_v31, 4  ;;  %v8711_v57 = vshll.u32 %v5741_v40, 16  ;;  %v2236_v25 = vshll.u32 %v6074_v12, 16 }
  0x72   : > { %v2216_v17 = vrot.slane %v2215_v6, 4  ;;  %v2231_v11 = vrot.slane %v8710_v51, 6  ;;  %v2229_v26 = vrot.slane %v2227_v20, 7  ;;  %v2378_v47 = vmax.bf16 %v2188_v45, %v2095_v36 }
  0x73   : > { %v2224_v32 = vor.u32 %v2223_v37, %v2222_v16  ;;  %v2232_v43 = vrot.slane %v8711_v57, 7  ;;  %v6090_v5 = vsel %vm6062_vm1, %v2207_v59, %v2211_v21  ;;  %v2379_v15 = vmax.bf16 %v2194_v4, %v6001_v56  ;;  %v6102_v37 = vld [vmem:[%s5440_s6 + $0x34] sm:$0xe]  ;;  %v6105_v59 = vld [vmem:[%s5440_s6 + $0x40] sm:$0xe] }
  0x74   : > { %v6095_v24 = vsel %vm6062_vm1, %v2216_v17, %v2220_v10  ;;  %v2238_v40 = vrot.slane %v2236_v25, 7  ;;  %v2380_v16 = vmax.bf16 %v2197_v60, %v2097_v33  ;;  %v2381_v21 = vmax.bf16 %v2203_v48, %v6010_v23  ;;  %v6117_v33 = vld [vmem:[%s5440_s6 + $0x58] sm:$0xe]  ;;  %v6120_v23 = vld [vmem:[%s5440_s6 + $0x64] sm:$0xe] }
  0x75   : > { %v2225_v2 = vrot.slane %v2224_v32, 4  ;;  %v2233_v29 = vor.u32 %v2232_v43, %v2231_v11  ;;  %v6099_v14 = vmax.bf16 %v2206_v31, %v2099_v62  ;;  %v2384_v56 = vmax.bf16 %v2215_v6, %v2101_v1 }
  0x76   : > { %v2386_v60 = vmax.bf16 %v2224_v32, %v2103_v19  ;;  %v8712_v4 = vmax.bf16 %v5994_v0, %v5936_v22  ;;  %v2486_v1 = vrot.slane %v6102_v37, 7  ;;  %v2488_v6 = vrot.slane %v6027_v46, 7 }
  0x77   : > { %v6109_v36 = vsel %vm6062_vm1, %v2225_v2, %v2229_v26  ;;  %v2234_v45 = vrot.slane %v2233_v29, 4  ;;  %v2490_v20 = vrot.slane %v6105_v59, 7  ;;  %v2492_v13 = vrot.slane %v6030_v39, 7 }
  0x78   : > { %v2388_v48 = vmax.bf16 %v2233_v29, %v8712_v4  ;;  %v2498_v19 = vrot.slane %v6117_v33, 7  ;;  %v2502_v22 = vrot.slane %v6120_v23, 7  ;;  %v2487_v0 = vrot.slane %v2486_v1, 4 }
  0x79   : > { %v2239_v30 = vsel %vm6062_vm1, %v2234_v45, %v2238_v40  ;;  %v2491_v17 = vrot.slane %v2490_v20, 4  ;;  %v2506_v32 = vrot.slane %v6133_v63, 7  ;;  %v2508_v51 = vrot.slane %v6074_v12, 7  ;;  %v2634_v40 = vld [vmem:[%s5440_s6 + $0x30] sm:$0xf] }
  0x7a   : > { %v2389_v41 = vmax.bf16 %v2239_v30, %v6056_v44  ;;  %v6146_v11 = vrot.slane %v2498_v19, 4  ;;  %v6148_v46 = vrot.slane %v2502_v22, 4  ;;  %v6150_v57 = vmax.bf16 %v2486_v1, %v2378_v47 }
  0x7b   : > { %v6152_v44 = vmax.bf16 %v2490_v20, %v2380_v16  ;;  %v2489_v39 = vsel %vm5865_vm11, %v2487_v0, %v2488_v6  ;;  %v2493_v43 = vsel %vm5865_vm11, %v2491_v17, %v2492_v13  ;;  %v2507_v26 = vrot.slane %v2506_v32, 4  ;;  %v2635_v16 = vld [vmem:[%s5440_s6 + $0x3c] sm:$0xf]  ;;  %v2637_v6 = vld [vmem:[%s5440_s6 + $0x54] sm:$0xf] }
  0x7c   : > { %8713 = vst [vmem:[#allocation14_spill] sm:$0xff] %v6150_v57  ;;  %v6158_v25 = vmax.bf16 %v2498_v19, %v2384_v56  ;;  %v6160_v12 = vmax.bf16 %v2489_v39, %v2379_v15  ;;  %v6166_v2 = vmax.bf16 %v2493_v43, %v2381_v21  ;;  %v6168_v29 = vmax.bf16 %v2502_v22, %v2386_v60  ;;  %v2638_v20 = vld [vmem:[%s5440_s6 + $0x60] sm:$0xf]  ;;  %v6189_v13 = vld [vmem:[%s5440_s6 + $0x6c] sm:$0xf] }
  0x7d   : > { %8714 = vst [vmem:[#allocation15_spill] sm:$0xff] %v6152_v44  ;;  %v6164_v47 = vmax.bf16 %v6152_v44, %v6150_v57  ;;  %v2509_v45 = vsel %vm5865_vm11, %v2507_v26, %v2508_v51  ;;  %v6174_v4 = vmax.bf16 %v2506_v32, %v2388_v48  ;;  %v2678_v56 = vrot.slane %v2634_v40, 6  ;;  %8723 = vst [vmem:[#allocation24_spill] sm:$0xff] %v6189_v13 }
  0x7e   : > { %8715 = vst [vmem:[#allocation16_spill] sm:$0xff] %v6158_v25  ;;  %8716 = vst [vmem:[#allocation17_spill] sm:$0xff] %v6160_v12  ;;  %v2680_v30 = vrot.slane %v2635_v16, 6  ;;  %v6178_v15 = vmax.bf16 %v6166_v2, %v6160_v12  ;;  %v3719_v21 = vmax.bf16 %v6168_v29, %v6158_v25  ;;  %v6184_v60 = vmax.bf16 %v2509_v45, %v2389_v41 }
  0x7f   : > { %8717 = vst [vmem:[#allocation18_spill] sm:$0xff] %v6164_v47  ;;  %8718 = vst [vmem:[#allocation19_spill] sm:$0xff] %v6166_v2  ;;  %v3729_v1 = vmax.bf16 %v6164_v47, %v6158_v25  ;;  %v6191_v48 = vrot.slane %v2678_v56, 4  ;;  %v2684_v22 = vrot.slane %v2637_v6, 6  ;;  %v2686_v0 = vrot.slane %v2638_v20, 6 }
  0x80   : > { %8719 = vst [vmem:[#allocation20_spill] sm:$0xff] %v6168_v29  ;;  %8720 = vst [vmem:[#allocation21_spill] sm:$0xff] %v6174_v4  ;;  %v6193_v19 = vrot.slane %v2680_v30, 4  ;;  %v6199_v32 = vmax.bf16 %v3719_v21, %v6174_v4  ;;  %v8562_v51 = vrot.slane %v6189_v13, 6  ;;  %v6209_v26 = vmax.bf16 %v2678_v56, %v6150_v57  ;;  %v2636_v21 = vld [vmem:[%s5440_s6 + $0x48] sm:$0xf] }
  0x81   : > { %8721 = vst [vmem:[#allocation22_spill] sm:$0xff] %v6178_v15  ;;  %8722 = vst [vmem:[#allocation23_spill] sm:$0xff] %v6184_v60  ;;  %v6196_v17 = vmax.bf16 %v3729_v1, %v6168_v29  ;;  %v6204_v39 = vrot.slane %v2684_v22, 4  ;;  %v6206_v43 = vrot.slane %v2686_v0, 4  ;;  %v2759_v45 = vmax.bf16 %v6191_v48, %v6160_v12 }
  0x82   : > { %v6217_v31 = vmax.bf16 %v2680_v30, %v6152_v44  ;;  %v2761_v41 = vmax.bf16 %v6193_v19, %v6166_v2  ;;  %v6222_v62 = vmax.bf16 %v2684_v22, %v6158_v25  ;;  %v6225_v10 = vmax.bf16 %v2686_v0, %v6168_v29 }
  0x83   : > { %8724 = vst [vmem:[#allocation25_spill] sm:$0xff] %v6204_v39  ;;  %8725 = vst [vmem:[#allocation26_spill] sm:$0xff] %v6206_v43  ;;  %v6230_v56 = vmax.bf16 %v8562_v51, %v6174_v4  ;;  %v2847_v48 = vshrl.u32 %v2634_v40, 16  ;;  %v2850_v1 = vshll.u32 %v2634_v40, 16  ;;  %v2856_v43 = vshll.u32 %v5808_v9, 16 }
  0x84   : > { %v2861_v30 = vshrl.u32 %v2635_v16, 16  ;;  %v2864_v39 = vshll.u32 %v2635_v16, 16  ;;  %v2870_v47 = vshll.u32 %v5814_v7, 16  ;;  %v2875_v22 = vshrl.u32 %v2636_v21, 16 }
  0x85   : > { %v2849_v19 = vrot.slane %v2847_v48, 6  ;;  %v2852_v2 = vrot.slane %v2850_v1, 7  ;;  %v2878_v25 = vshll.u32 %v2636_v21, 16  ;;  %v2858_v44 = vrot.slane %v2856_v43, 7 }
  0x86   : > { %v2863_v0 = vrot.slane %v2861_v30, 6  ;;  %v2866_v29 = vrot.slane %v2864_v39, 7  ;;  %v2872_v12 = vrot.slane %v2870_v47, 7  ;;  %v2877_v51 = vrot.slane %v2875_v22, 6 }
  0x87   : > { %v6234_v57 = vor.u32 %v2852_v2, %v2849_v19  ;;  %v2880_v60 = vrot.slane %v2878_v25, 7  ;;  %v2884_v40 = vshll.u32 %v5827_v3, 16  ;;  %v2889_v9 = vshrl.u32 %v2637_v6, 16 }
  0x88   : > { %v6237_v15 = vor.u32 %v2866_v29, %v2863_v0  ;;  %v2892_v16 = vshll.u32 %v2637_v6, 16  ;;  %v2898_v7 = vshll.u32 %v5843_v27, 16  ;;  %v2903_v21 = vshrl.u32 %v2638_v20, 16 }
  0x89   : > { %v2854_v1 = vrot.slane %v6234_v57, 4  ;;  %v6241_v48 = vor.u32 %v2880_v60, %v2877_v51  ;;  %v2886_v43 = vrot.slane %v2884_v40, 7  ;;  %v2891_v2 = vrot.slane %v2889_v9, 6 }
  0x8a   : > { %v2868_v47 = vrot.slane %v6237_v15, 4  ;;  %v2894_v39 = vrot.slane %v2892_v16, 7  ;;  %v2900_v30 = vrot.slane %v2898_v7, 7  ;;  %v2905_v29 = vrot.slane %v2903_v21, 6  ;;  %v6269_v21 = vld [vmem:[%s5440_s6 + $0x38] sm:$0x3] }
  0x8b   : > { %8726 = vst [vmem:[#allocation27_spill] sm:$0xff] %v6241_v48  ;;  %v2859_v3 = vsel %vm6062_vm1, %v2854_v1, %v2858_v44  ;;  %v2882_v25 = vrot.slane %v6241_v48, 4  ;;  %v2906_v6 = vshll.u32 %v2638_v20, 16  ;;  %v2912_v51 = vshll.u32 %v5855_v49, 16 }
  0x8c   : > { %v2873_v27 = vsel %vm6062_vm1, %v2868_v47, %v2872_v12  ;;  %v6249_v60 = vor.u32 %v2894_v39, %v2891_v2  ;;  %v2917_v19 = vshrl.u32 %v6189_v13, 16  ;;  %v2920_v44 = vshll.u32 %v6189_v13, 16 }
  0x8d   : > { %v6255_v22 = vsel %vm6062_vm1, %v2882_v25, %v2886_v43  ;;  %v2908_v0 = vrot.slane %v2906_v6, 7  ;;  %v2926_v40 = vshll.u32 %v5873_v52, 16  ;;  %v2914_v12 = vrot.slane %v2912_v51, 7 }
  0x8e   : > { %8727 = vst [vmem:[#allocation28_spill] sm:$0xff] %v6255_v22  ;;  %v2896_v20 = vrot.slane %v6249_v60, 4  ;;  %v2919_v9 = vrot.slane %v2917_v19, 6  ;;  %v3118_v16 = vmax.bf16 %v6234_v57, %v6209_v26  ;;  %v2922_v7 = vrot.slane %v2920_v44, 7 }
  0x8f   : > { %v6262_v49 = vor.u32 %v2908_v0, %v2905_v29  ;;  %v6264_v1 = vrot.slane %v2926_v40, 7  ;;  %v6266_v43 = vmax.bf16 %v2859_v3, %v2759_v45  ;;  %v3120_v47 = vmax.bf16 %v6237_v15, %v6217_v31  ;;  %v6287_v3 = vld [vmem:[%s5440_s6 + $0x44] sm:$0x3] }
  0x90   : > { %v6273_v52 = vsel %vm6062_vm1, %v2896_v20, %v2900_v30  ;;  %v6277_v2 = vmax.bf16 %v2873_v27, %v2761_v41  ;;  %v3124_v57 = vmax.bf16 %v6249_v60, %v6222_v62  ;;  %v6282_v39 = vor.u32 %v2922_v7, %v2919_v9  ;;  %v3157_v27 = vld [vmem:[%s5440_s6 + $0x5c] sm:$0x3] }
  0x91   : > { %8728 = vst [vmem:[#allocation29_spill] sm:$0xff] %v6264_v1  ;;  %8729 = vst [vmem:[#allocation30_spill] sm:$0xff] %v6273_v52  ;;  %v2910_v26 = vrot.slane %v6262_v49, 4  ;;  %v3126_v45 = vmax.bf16 %v6262_v49, %v6225_v10  ;;  %v3235_v30 = vshrl.u32 %v6102_v37, 16  ;;  %v3238_v25 = vshll.u32 %v6102_v37, 16 }
  0x92   : > { %8730 = vst [vmem:[#allocation31_spill] sm:$0xff] %v6282_v39  ;;  %v3243_v31 = vshrl.u32 %v6269_v21, 16  ;;  %v3246_v15 = vshll.u32 %v6269_v21, 16  ;;  %v3251_v62 = vshrl.u32 %v6105_v59, 16  ;;  %v3128_v10 = vmax.bf16 %v6282_v39, %v6230_v56 }
  0x93   : > { %v6296_v41 = vsel %vm6062_vm1, %v2910_v26, %v2914_v12  ;;  %v3237_v6 = vrot.slane %v3235_v30, 7  ;;  %v3254_v51 = vshll.u32 %v6105_v59, 16  ;;  %v3259_v19 = vshrl.u32 %v6287_v3, 16  ;;  %v3158_v12 = vld [vmem:[%s5440_s6 + $0x68] sm:$0x3] }
  0x94   : > { %8731 = vst [vmem:[#allocation32_spill] sm:$0xff] %v6296_v41  ;;  %v3245_v60 = vrot.slane %v3243_v31, 7  ;;  %v3253_v37 = vrot.slane %v3251_v62, 7  ;;  %v3262_v40 = vshll.u32 %v6287_v3, 16  ;;  %v3283_v20 = vshrl.u32 %v6117_v33, 16 }
  0x95   : > { %v3240_v0 = vor.u32 %v3238_v25, %v3237_v6  ;;  %v3241_v44 = vrot.slane %v3237_v6, 4  ;;  %v3261_v26 = vrot.slane %v3259_v19, 7  ;;  %v3286_v30 = vshll.u32 %v6117_v33, 16 }
  0x96   : > { %v3248_v9 = vor.u32 %v3246_v15, %v3245_v60  ;;  %v3256_v49 = vor.u32 %v3254_v51, %v3253_v37  ;;  %v3257_v7 = vrot.slane %v3253_v37, 4  ;;  %v3285_v56 = vrot.slane %v3283_v20, 7 }
  0x97   : > { %v3291_v31 = vshrl.u32 %v3157_v27, 16  ;;  %v3294_v62 = vshll.u32 %v3157_v27, 16  ;;  %v3264_v29 = vor.u32 %v3262_v40, %v3261_v26  ;;  %v3299_v25 = vshrl.u32 %v6120_v23, 16 }
  0x98   : > { %v3249_v59 = vsel %vm5956_vm14, %v3241_v44, %v3248_v9  ;;  %v3302_v6 = vshll.u32 %v6120_v23, 16  ;;  %v3288_v41 = vor.u32 %v3286_v30, %v3285_v56  ;;  %v3289_v52 = vrot.slane %v3285_v56, 4  ;;  %v3574_v30 = vld [vmem:[%s5440_s6 + $0x34] sm:$0xc] }
  0x99   : > { %v3293_v15 = vrot.slane %v3291_v31, 7  ;;  %v3307_v60 = vshrl.u32 %v3158_v12, 16  ;;  %v3265_v37 = vsel %vm5956_vm14, %v3257_v7, %v3264_v29  ;;  %v3301_v33 = vrot.slane %v3299_v25, 7  ;;  %v3575_v31 = vld [vmem:[%s5440_s6 + $0x40] sm:$0xc] }
  0x9a   : > { %v3310_v51 = vshll.u32 %v3158_v12, 16  ;;  %v3315_v27 = vshrl.u32 %v6133_v63, 16  ;;  %v3318_v40 = vshll.u32 %v6133_v63, 16  ;;  %v3538_v20 = vmax.bf16 %v3240_v0, %v3118_v16  ;;  %v3577_v25 = vld [vmem:[%s5440_s6 + $0x58] sm:$0xc] }
  0x9b   : > { %v3296_v19 = vor.u32 %v3294_v62, %v3293_v15  ;;  %v3309_v44 = vrot.slane %v3307_v60, 7  ;;  %v3304_v23 = vor.u32 %v3302_v6, %v3301_v33  ;;  %v3305_v9 = vrot.slane %v3301_v33, 4  ;;  %v8744_v60 = vld [vmem:[#allocation6_spill] sm:$0xff]  ;;  %v192_v33 = vld [vmem:[%s5440_s6 + $0x78] sm:$0xc] }
  0x9c   : > { %v6316_v26 = vrot.slane %v3315_v27, 7  ;;  %v3539_v56 = vmax.bf16 %v3249_v59, %v6266_v43  ;;  %v3540_v7 = vmax.bf16 %v3256_v49, %v3120_v47  ;;  %v3541_v62 = vmax.bf16 %v3265_v37, %v6277_v2 }
  0x9d   : > { %v6323_v29 = vsel %vm5956_vm14, %v3289_v52, %v3296_v19  ;;  %v3312_v12 = vor.u32 %v3310_v51, %v3309_v44  ;;  %v3544_v0 = vmax.bf16 %v3288_v41, %v3124_v57  ;;  %v6329_v6 = vmax.bf16 %v3304_v23, %v3126_v45  ;;  %v8742_v45 = vld [vmem:[#allocation5_spill] sm:$0xff]  ;;  %v5352_v44 = vld [vmem:[%s8520_s1 + $0xc0] sm:$0xff]  }
  0x9e   : > { %8732 = vst [vmem:[#allocation33_spill] sm:$0xff] %v6316_v26  ;;  %8733 = vst [vmem:[#allocation34_spill] sm:$0xff] %v6323_v29  ;;  %v3320_v63 = vor.u32 %v3318_v40, %v6316_v26  ;;  %v6335_v59 = vmax.bf16 %v3574_v30, %v3538_v20  ;;  %v6338_v52 = vmax.bf16 %v3539_v56, %v6269_v21  ;;  %v6375_v19 = vld [vmem:[%s5440_s6 + $0x7c] sm:$0x7]  ;;  %v8747_v40 = vld [vmem:[#allocation7_spill] sm:$0xff]  ;;  %v426_v56 = vshrl.u32 %v192_v33, 16 }
  0x9f   : > { %8734 = vst [vmem:[#allocation35_spill] sm:$0xff] %v6329_v6  ;;  %v6333_v43 = vsel %vm5956_vm14, %v3305_v9, %v3312_v12  ;;  %v6340_v47 = vmax.bf16 %v3575_v31, %v3540_v7  ;;  %v6345_v49 = vmax.bf16 %v3541_v62, %v6287_v3  ;;  %v6347_v57 = vmax.bf16 %v3577_v25, %v3544_v0  ;;  %v8748_v31 = vld [vmem:[#allocation8_spill] sm:$0xff]  ;;  %v194_v62 = vld [vmem:[%s5440_s6 + $0x84] sm:$0xc] }
  0xa0   : > { %8735 = vst [vmem:[#allocation36_spill] sm:$0xff] %v6333_v43  ;;  %8736 = vst [vmem:[#allocation37_spill] sm:$0xff] %v6335_v59  ;;  %v6342_v2 = vmax.bf16 %v3320_v63, %v3128_v10  ;;  %v3647_v41 = vmax.bf16 %v8742_v45, %v5817_v35  ;;  %v3648_v21 = vmax.bf16 %v5832_v8, %v5819_v34  ;;  %v429_v30 = vshll.u32 %v192_v33, 16 }
  0xa1   : > { %8737 = vst [vmem:[#allocation38_spill] sm:$0xff] %v6338_v52  ;;  %8738 = vst [vmem:[#allocation39_spill] sm:$0xff] %v6340_v47  ;;  %v6353_v15 = vmax.bf16 %v6340_v47, %v6335_v59  ;;  %v3649_v37 = vmax.bf16 %v8744_v60, %v8742_v45  ;;  %v6361_v10 = vmax.bf16 %v6345_v49, %v6338_v52  ;;  %5274 = vmatprep.subr.bf16.mxu0 %v5352_v44  ;;  %v223_v44 = vld [vmem:[%s5440_s6 + $0x88] sm:$0x7]  ;;  %v6404_v59 = vld [vmem:[%s5440_s6 + $0x7c] sm:$0x3] }
  0xa2   : > { %8739 = vst [vmem:[#allocation40_spill] sm:$0xff] %v6342_v2  ;;  %8740 = vst [vmem:[#allocation41_spill] sm:$0xff] %v6345_v49  ;;  %v3650_v35 = vmax.bf16 %v5836_v42, %v5832_v8  ;;  %v3663_v34 = vmax.bf16 %v3647_v41, %v8744_v60  ;;  %v3664_v27 = vmax.bf16 %v3648_v21, %v5836_v42  ;;  %v435_v25 = vshll.u32 %v6375_v19, 16 }
  0xa3   : > { %8741 = vst [vmem:[#allocation42_spill] sm:$0xff] %v6347_v57  ;;  %8743 = vst [vmem:[#allocation5_spill] sm:$0xff] %v6353_v15  ;;  %v6370_v51 = vmax.bf16 %v6353_v15, %v6347_v57  ;;  %v3665_v20 = vmax.bf16 %v3649_v37, %v8747_v40  ;;  %v439_v63 = vshrl.u32 %v6375_v19, 16  ;;  %v428_v41 = vrot.slane %v426_v56, 4  ;;  %v8749_v37 = vld [vmem:[#allocation10_spill] sm:$0xff] }
  0xa4   : > { %8745 = vst [vmem:[#allocation6_spill] sm:$0xff] %v6361_v10  ;;  %v3666_v8 = vmax.bf16 %v3650_v35, %v5845_v28  ;;  %v3679_v23 = vmax.bf16 %v3663_v34, %v8747_v40  ;;  %v3680_v9 = vmax.bf16 %v3664_v27, %v5845_v28  ;;  %v431_v21 = vrot.slane %v429_v30, 5 }
  0xa5   : > { %8746 = vst [vmem:[#allocation43_spill] sm:$0xff] %v6370_v51  ;;  %v3681_v12 = vmax.bf16 %v3665_v20, %v8748_v31  ;;  %v8750_v27 = vmov 0  ;;  %v437_v20 = vrot.slane %v435_v25, 5  ;;  %v445_v56 = vshrl.u32 %v194_v62, 16 }
  0xa6   : > { %v3682_v7 = vmax.bf16 %v3666_v8, %v5847_v61  ;;  %v3695_v0 = vmax.bf16 %v3679_v23, %v8748_v31  ;;  %v3696_v45 = vmax.bf16 %v3680_v9, %v5847_v61  ;;  %v8751_v27 = vsel %vm6395_vm6, 4294967295, %v8750_v27 }
  0xa7   : > { %v3697_v35 = vmax.bf16 %v3681_v12, %v8749_v37  ;;  %8752 = vst [vmem:[#allocation7_spill] sm:$0xff] %v8751_v27  ;;  %v441_v8 = vrot.slane %v439_v63, 4  ;;  %v432_v9 = vor.u32 %v431_v21, %v428_v41  ;;  %v448_v15 = vshll.u32 %v194_v62, 16  ;;  %v706_v21 = vld [vmem:[%s5440_s6 + $0x84] sm:$0x8] }
  0xa8   : > { %v3698_v34 = vmax.bf16 %v3682_v7, %v5858_v38  ;;  %v5007_v23 = vrot.slane %v3695_v0, 10  ;;  %v4116_v16 = vrot.slane %v3696_v45, 6  ;;  %v705_v7 = vld [vmem:[%s5440_s6 + $0x78] sm:$0x8]  ;;  %v447_v2 = vrot.slane %v445_v56, 4 }
  0xa9   : > { %v5008_v30 = vrot.slane %v3697_v35, 10  ;;  %v442_v12 = vor.u32 %v441_v8, %v437_v20  ;;  %v433_v49 = vrot.slane %v432_v9, 4  ;;  %v454_v25 = vshll.u32 %v223_v44, 16 }
  0xaa   : > { %v4120_v3 = vrot.slane %v3698_v34, 6  ;;  %v4117_v52 = vsel %vm6395_vm6, %v5007_v23, %v4116_v16  ;;  %v450_v45 = vrot.slane %v448_v15, 5  ;;  %v458_v41 = vshrl.u32 %v223_v44, 16  ;;  %v6412_v16 = vld [vmem:[%s5440_s6 + $0x7c] sm:$0xf] }
  0xab   : > { %v443_v0 = vrot.slane %v442_v12, 4  ;;  %v438_v8 = vsel %vm5487_vm2, %v433_v49, %v437_v20  ;;  %v456_v6 = vrot.slane %v454_v25, 5  ;;  %v4953_v43 = vrot.slane %v705_v7, 9  ;;  %v6419_v25 = vld [vmem:[%s5440_s6 + $0x88] sm:$0x3] }
  0xac   : > { %v4121_v63 = vsel %vm6395_vm6, %v5008_v30, %v4120_v3  ;;  %v451_v23 = vor.u32 %v450_v45, %v447_v2  ;;  %v460_v9 = vrot.slane %v458_v41, 4  ;;  %v675_v56 = vmax.bf16 %v438_v8, %v192_v33 }
  0xad   : > { %v5031_v35 = vcombine.low %v4117_v52, %v4121_v63  ;;  %v676_v29 = vmax.bf16 %v443_v0, %v6404_v59  ;;  %v810_v15 = vrot.slane %v6375_v19, 5  ;;  %v4954_v3 = vrot.slane %v706_v21, 9  ;;  %v6426_v19 = vld [vmem:[%s5440_s6 + $0x88] sm:$0xf] }
  0xae   : > { %v815_v30 = vrot.slane %v223_v44, 5  ;;  %v1112_v52 = vshrl.u32 %v705_v7, 16  ;;  %v452_v12 = vrot.slane %v451_v23, 4  ;;  %v461_v63 = vor.u32 %v460_v9, %v456_v6 }
  0xaf   : > { %5218 = vmatprep.mubr.bf16.mxu1 %v5031_v35  ;;  %v8575_v49 = vshrl.u32 %v6412_v16, 16  ;;  %v8576_v20 = vshll.u32 %v6412_v16, 16  ;;  %v811_v33 = vsel %vm5612_vm5, %v4953_v43, %v810_v15  ;;  %v812_v45 = vrot.slane %v810_v15, 4 }
  0xb0   : > { %v816_v0 = vsel %vm5612_vm5, %v4954_v3, %v815_v30  ;;  %v817_v41 = vrot.slane %v815_v30, 4  ;;  %v457_v44 = vsel %vm5487_vm2, %v452_v12, %v456_v6  ;;  %v462_v7 = vrot.slane %v461_v63, 4 }
  0xb1   : > { %v918_v35 = vmax.bf16 %v811_v33, %v675_v56  ;;  %v4973_v8 = vrot.slane %v1112_v52, 9  ;;  %v677_v23 = vmax.bf16 %v457_v44, %v194_v62  ;;  %v919_v9 = vmax.bf16 %v812_v45, %v676_v29  ;;  %v1501_v29 = vld [vmem:[%s5440_s6 + $0x78] sm:$0xe]  ;;  %v1502_v52 = vld [vmem:[%s5440_s6 + $0x7c] sm:$0x1] }
  0xb2   : > { %v1119_v43 = vrot.slane %v8575_v49, 5  ;;  %v1122_v15 = vrot.slane %v8576_v20, 6  ;;  %v678_v3 = vmax.bf16 %v462_v7, %v6419_v25  ;;  %v1127_v30 = vshrl.u32 %v706_v21, 16 }
  0xb3   : > { %v1132_v26 = vshrl.u32 %v6426_v19, 16  ;;  %v1135_v6 = vshll.u32 %v6426_v19, 16  ;;  %v920_v12 = vmax.bf16 %v816_v0, %v677_v23  ;;  %v1381_v56 = vrot.slane %v6412_v16, 6 }
  0xb4   : > { %v1123_v63 = vor.u32 %v1122_v15, %v1119_v43  ;;  %v1383_v62 = vrot.slane %v6426_v19, 6  ;;  %v921_v33 = vmax.bf16 %v817_v41, %v678_v3  ;;  %v4974_v45 = vrot.slane %v1127_v30, 9 }
  0xb5   : > { %v1134_v44 = vrot.slane %v1132_v26, 5  ;;  %v1137_v49 = vrot.slane %v1135_v6, 6  ;;  %v1382_v39 = vrot.slane %v1381_v56, 4  ;;  %v1604_v0 = vrot.slane %v1501_v29, 7 }
  0xb6   : > { %v1124_v7 = vsel %vm5730_vm8, %v4973_v8, %v1123_v63  ;;  %v1125_v21 = vrot.slane %v1123_v63, 4  ;;  %v1384_v1 = vrot.slane %v1383_v62, 4  ;;  %v1606_v23 = vrot.slane %v1502_v52, 7 }
  0xb7   : > { %v1138_v13 = vor.u32 %v1137_v49, %v1134_v44  ;;  %v1321_v47 = vmax.bf16 %v1124_v7, %v918_v35  ;;  %v1888_v15 = vshrl.u32 %v1501_v29, 16  ;;  %v1891_v19 = vshll.u32 %v1501_v29, 16 }
  0xb8   : > { %v1322_v43 = vmax.bf16 %v1125_v21, %v919_v9  ;;  %v1896_v57 = vshrl.u32 %v6404_v59, 16  ;;  %v1605_v8 = vrot.slane %v1604_v0, 4  ;;  %v1899_v7 = vshll.u32 %v6404_v59, 16  ;;  %v6455_v21 = vld [vmem:[%s5440_s6 + $0x80] sm:$0x1] }
  0xb9   : > { %v1139_v41 = vsel %vm5730_vm8, %v4974_v45, %v1138_v13  ;;  %v1140_v3 = vrot.slane %v1138_v13, 4  ;;  %v6446_v30 = vmax.bf16 %v1381_v56, %v1321_v47  ;;  %v1890_v49 = vrot.slane %v1888_v15, 7 }
  0xba   : > { %v1323_v63 = vmax.bf16 %v1139_v41, %v920_v12  ;;  %v6448_v10 = vmax.bf16 %v1382_v39, %v1322_v43  ;;  %v1898_v35 = vrot.slane %v1896_v57, 7  ;;  %v1607_v9 = vsel %vm5865_vm11, %v1605_v8, %v1606_v23  ;;  %v6465_v23 = vld [vmem:[%s5440_s6 + $0x7c] sm:$0xe] }
  0xbb   : > { %8756 = vst [vmem:[#allocation44_spill] sm:$0xff] %v6446_v30  ;;  %v1324_v44 = vmax.bf16 %v1140_v3, %v921_v33  ;;  %v1704_v29 = vmax.bf16 %v1604_v0, %v6446_v30  ;;  %v1893_v12 = vor.u32 %v1891_v19, %v1890_v49  ;;  %v1894_v39 = vrot.slane %v1890_v49, 4  ;;  %8758 = vst [vmem:[#allocation46_spill] sm:$0xff] %v6465_v23 }
  0xbc   : > { %8757 = vst [vmem:[#allocation45_spill] sm:$0xff] %v6448_v10  ;;  %v6457_v13 = vmax.bf16 %v1383_v62, %v1323_v63  ;;  %v1705_v47 = vmax.bf16 %v1607_v9, %v6448_v10  ;;  %v1901_v45 = vor.u32 %v1899_v7, %v1898_v35  ;;  %v1912_v57 = vshrl.u32 %v6419_v25, 16 }
  0xbd   : > { %v6460_v56 = vmax.bf16 %v1384_v1, %v1324_v44  ;;  %v1915_v33 = vshll.u32 %v6419_v25, 16  ;;  %v2107_v0 = vmax.bf16 %v1893_v12, %v1704_v29  ;;  %v8759_v59 = vshrl.u32 %v6412_v16, 16 }
  0xbe   : > { %v8760_v62 = vshll.u32 %v6412_v16, 16  ;;  %v2245_v41 = vshll.u32 %v6455_v21, 16  ;;  %v1902_v1 = vsel %vm5956_vm14, %v1894_v39, %v1901_v45  ;;  %v1914_v19 = vrot.slane %v1912_v57, 7 }
  0xbf   : > { %v2240_v43 = vrot.slane %v8759_v59, 6  ;;  %v2249_v3 = vrot.slane %v1132_v26, 6  ;;  %v2250_v8 = vrot.slane %v1135_v6, 7  ;;  %v6474_v63 = vmax.bf16 %v1902_v1, %v1705_v47  ;;  %v6510_v1 = vld [vmem:[%s5440_s6 + $0x1c] sm:$0x7] }
  0xc0   : > { %v2241_v15 = vrot.slane %v8760_v62, 7  ;;  %v2247_v49 = vrot.slane %v2245_v41, 7  ;;  %v2510_v35 = vrot.slane %v6465_v23, 7  ;;  %v6477_v44 = vor.u32 %v1915_v33, %v1914_v19 }
  0xc1   : > { %v6479_v9 = vor.u32 %v2250_v8, %v2249_v3  ;;  %v2940_v16 = vshll.u32 %v1502_v52, 16  ;;  %v3331_v29 = vshrl.u32 %v6465_v23, 16  ;;  %v3651_v57 = vmax.bf16 %v8747_v40, %v8744_v60 }
  0xc2   : > { %v2242_v25 = vor.u32 %v2241_v15, %v2240_v43  ;;  %v6482_v39 = vrot.slane %v2510_v35, 4  ;;  %v3653_v59 = vmax.bf16 %v8748_v31, %v8747_v40  ;;  %v176_v43 = vld [vmem:[%s5440_s6 + $0x18] sm:$0xc]  ;;  %v3654_v60 = vmax.bf16 %v5847_v61, %v5845_v28 }
  0xc3   : > { %v6486_v47 = vrot.slane %v2940_v16, 7  ;;  %v6488_v45 = vrot.slane %v3331_v29, 7  ;;  %v3667_v41 = vmax.bf16 %v3651_v57, %v8748_v31  ;;  %v8765_v40 = vmax.bf16 %v6196_v17, %v6174_v4  ;;  %v6529_v29 = vld [vmem:[%s5440_s6 + $0x24] sm:$0xc] }
  0xc4   : > { %v2243_v7 = vrot.slane %v2242_v25, 4  ;;  %v2390_v12 = vmax.bf16 %v2242_v25, %v2107_v0  ;;  %v3652_v0 = vmax.bf16 %v5845_v28, %v5836_v42  ;;  %v3669_v8 = vmax.bf16 %v3653_v59, %v8749_v37 }
  0xc5   : > { %8761 = vst [vmem:[#allocation47_spill] sm:$0xff] %v6486_v47  ;;  %8762 = vst [vmem:[#allocation48_spill] sm:$0xff] %v6488_v45  ;;  %v3670_v28 = vmax.bf16 %v3654_v60, %v5858_v38  ;;  %v3683_v25 = vmax.bf16 %v3667_v41, %v8749_v37  ;;  %v283_v17 = vshll.u32 %v6510_v1, 16  ;;  %v6543_v45 = vld [vmem:[%s5440_s6 + $0x1c] sm:$0x3] }
  0xc6   : > { %v6494_v52 = vsel %vm6062_vm1, %v2243_v7, %v2247_v49  ;;  %v6496_v33 = vmax.bf16 %v2510_v35, %v2390_v12  ;;  %v3668_v3 = vmax.bf16 %v3652_v0, %v5847_v61  ;;  %v274_v49 = vshrl.u32 %v176_v43, 16  ;;  %v698_v47 = vld [vmem:[%s5440_s6 + $0x24] sm:$0x8] }
  0xc7   : > { %v277_v35 = vshll.u32 %v176_v43, 16  ;;  %v3685_v16 = vmax.bf16 %v3669_v8, %v6446_v30  ;;  %v287_v7 = vshrl.u32 %v6510_v1, 16  ;;  %v3686_v12 = vmax.bf16 %v3670_v28, %v6448_v10 }
  0xc8   : > { %8763 = vst [vmem:[#allocation49_spill] sm:$0xff] %v6496_v33  ;;  %v6514_v42 = vmax.bf16 %v6199_v32, %v6496_v33  ;;  %v6520_v19 = vmax.bf16 %v8765_v40, %v6496_v33  ;;  %v3684_v32 = vmax.bf16 %v3668_v3, %v5858_v38  ;;  %v3699_v57 = vmax.bf16 %v3683_v25, %v6446_v30  ;;  %v215_v40 = vld [vmem:[%s5440_s6 + $0x28] sm:$0x7]  ;;  %v6590_v30 = vld [vmem:[%s5440_s6 + $0x24] sm:$0xe] }
  0xc9   : > { %v276_v0 = vrot.slane %v274_v49, 4  ;;  %v279_v59 = vrot.slane %v277_v35, 5  ;;  %v3701_v41 = vmax.bf16 %v3685_v16, %v6457_v13  ;;  %v285_v3 = vrot.slane %v283_v17, 5  ;;  %v697_v35 = vld [vmem:[%s5440_s6 + $0x18] sm:$0x8] }
  0xca   : > { %8764 = vst [vmem:[#allocation50_spill] sm:$0xff] %v6514_v42  ;;  %v3700_v60 = vmax.bf16 %v3684_v32, %v6448_v10  ;;  %v289_v8 = vrot.slane %v287_v7, 4  ;;  %v3702_v15 = vmax.bf16 %v3686_v12, %v6460_v56  ;;  %v5009_v26 = vrot.slane %v3699_v57, 10  ;;  %v6553_v10 = vld [vmem:[%s5440_s6 + $0x1c] sm:$0xf] }
  0xcb   : > { %v280_v62 = vor.u32 %v279_v59, %v276_v0  ;;  %v293_v28 = vshrl.u32 %v6529_v29, 16  ;;  %v5010_v25 = vrot.slane %v3701_v41, 10  ;;  %v296_v49 = vshll.u32 %v6529_v29, 16 }
  0xcc   : > { %v4124_v6 = vrot.slane %v3700_v60, 6  ;;  %v290_v23 = vor.u32 %v289_v8, %v285_v3  ;;  %v4128_v32 = vrot.slane %v3702_v15, 6  ;;  %v302_v7 = vshll.u32 %v215_v40, 16 }
  0xcd   : > { %v281_v16 = vrot.slane %v280_v62, 4  ;;  %v295_v17 = vrot.slane %v293_v28, 4  ;;  %v298_v0 = vrot.slane %v296_v49, 5  ;;  %v306_v59 = vshrl.u32 %v215_v40, 16 }
  0xce   : > { %v4125_v12 = vsel %vm6395_vm6, %v5009_v26, %v4124_v6  ;;  %v291_v57 = vrot.slane %v290_v23, 4  ;;  %v4129_v60 = vsel %vm6395_vm6, %v5010_v25, %v4128_v32  ;;  %v304_v8 = vrot.slane %v302_v7, 5  ;;  %v5345_v26 = vld [vmem:[%s8520_s1 + $0x8] sm:$0xff]  }
  0xcf   : > { %v286_v41 = vsel %vm5487_vm2, %v281_v16, %v285_v3  ;;  %v4945_v15 = vrot.slane %v697_v35, 9  ;;  %v5032_v62 = vcombine.low %v4125_v12, %v4129_v60  ;;  %v299_v23 = vor.u32 %v298_v0, %v295_v17  ;;  %v5363_v17 = vld [vmem:[%s8520_s1] sm:$0xff]  }
  0xd0   : > { %v308_v6 = vrot.slane %v306_v59, 4  ;;  %v6558_v28 = vmax.bf16 %v286_v41, %v176_v43  ;;  %v660_v49 = vmax.bf16 %v291_v57, %v6543_v45  ;;  %v770_v25 = vrot.slane %v6510_v1, 5  ;;  %v6567_v43 = vld [vmem:[%s5440_s6 + $0x28] sm:$0x3]  ;;  %v5347_v59 = vld [vmem:[%s8520_s1 + $0x10] sm:$0xff]  }
  0xd1   : > { %v4946_v3 = vrot.slane %v698_v47, 9  ;;  %v775_v32 = vrot.slane %v215_v40, 5  ;;  %5219 = vmatmul.mubr.bf16.vlgmr.msra.gmra.mrb[0].mxu1 %v5032_v62  ;;  %v300_v16 = vrot.slane %v299_v23, 4  ;;  %v992_v12 = vshrl.u32 %v697_v35, 16  ;;  %v6574_v35 = vld [vmem:[%s5440_s6 + $0x28] sm:$0xf] }
  0xd2   : > { %v309_v7 = vor.u32 %v308_v6, %v304_v8  ;;  %v8594_v60 = vshrl.u32 %v6553_v10, 16  ;;  %5227 = vmatpush3.bf16.msra.mxu1 %v5363_v17  ;;  %v771_v57 = vsel %vm5612_vm5, %v4945_v15, %v770_v25  ;;  %v772_v1 = vrot.slane %v770_v25, 4  ;;  %v6587_v17 = vld [vmem:[%s5440_s6 + $0x18] sm:$0xe] }
  0xd3   : > { %v776_v40 = vsel %vm5612_vm5, %v4946_v3, %v775_v32  ;;  %v777_v0 = vrot.slane %v775_v32, 4  ;;  %5228 = vmatprep.subr.bf16.mxu1 %v5345_v26  ;;  %v305_v41 = vsel %vm5487_vm2, %v300_v16, %v304_v8  ;;  %v902_v15 = vmax.bf16 %v771_v57, %v6558_v28 }
  0xd4   : > { %v310_v62 = vrot.slane %v309_v7, 4  ;;  %v4965_v23 = vrot.slane %v992_v12, 9  ;;  %v661_v6 = vmax.bf16 %v305_v41, %v6529_v29  ;;  %v903_v25 = vmax.bf16 %v772_v1, %v660_v49  ;;  %v6596_v29 = vld [vmem:[%s5440_s6 + $0x1c] sm:$0x1]  ;;  %v6603_v1 = vld [vmem:[%s5440_s6 + $0x28] sm:$0x1] }
  0xd5   : > { %v999_v3 = vrot.slane %v8594_v60, 5  ;;  %v8593_v32 = vshll.u32 %v6553_v10, 16  ;;  %v1007_v8 = vshrl.u32 %v698_v47, 16  ;;  %v8599_v28 = vshrl.u32 %v6574_v35, 16  ;;  %8766 = vst [vmem:[#allocation51_spill] sm:$0xff] %v6596_v29  ;;  %8767 = vst [vmem:[#allocation52_spill] sm:$0xff] %v6603_v1 }
  0xd6   : > { %v662_v38 = vmax.bf16 %v310_v62, %v6567_v43  ;;  %v8600_v16 = vshll.u32 %v6574_v35, 16  ;;  %5229 = vmatpush3.bf16.msra.mxu1 %v5345_v26  ;;  %v904_v49 = vmax.bf16 %v776_v40, %v661_v6  ;;  %v1365_v12 = vrot.slane %v6553_v10, 6  ;;  %v5349_v47 = vld [vmem:[%s8520_s1 + $0x18] sm:$0xff]   ;;  %v6613_v6 = vld [vmem:[%s5440_s6 + $0x84] sm:$0xe] }
  0xd7   : > { %v1002_v7 = vrot.slane %v8593_v32, 6  ;;  %v1367_v57 = vrot.slane %v6574_v35, 6  ;;  %5230 = vmatprep.subr.bf16.mxu1 %v5347_v59  ;;  %v4966_v62 = vrot.slane %v1007_v8, 9  ;;  %v1014_v26 = vrot.slane %v8599_v28, 5 }
  0xd8   : > { %v905_v41 = vmax.bf16 %v777_v0, %v662_v38  ;;  %v1017_v40 = vrot.slane %v8600_v16, 6  ;;  %v1366_v60 = vrot.slane %v1365_v12, 4  ;;  %v1572_v37 = vrot.slane %v6587_v17, 7  ;;  %v6622_v16 = vld [vmem:[%s5440_s6 + $0x88] sm:$0x1] }
  0xd9   : > { %v1003_v32 = vor.u32 %v1002_v7, %v999_v3  ;;  %v1368_v61 = vrot.slane %v1367_v57, 4  ;;  %v1574_v2 = vrot.slane %v6596_v29, 7  ;;  %v1576_v38 = vrot.slane %v6590_v30, 7  ;;  %v5351_v7 = vld [vmem:[%s8520_s1 + $0x20] sm:$0xff]  }
  0xda   : > { %v1018_v31 = vor.u32 %v1017_v40, %v1014_v26  ;;  %v1578_v0 = vrot.slane %v6603_v1, 7  ;;  %5231 = vmatpush3.bf16.msra.mxu1 %v5347_v59  ;;  %v1573_v34 = vrot.slane %v1572_v37, 4  ;;  %v1608_v3 = vrot.slane %v6613_v6, 7 }
  0xdb   : > { %v1004_v8 = vsel %vm5730_vm8, %v4965_v23, %v1003_v32  ;;  %v1005_v28 = vrot.slane %v1003_v32, 4  ;;  %5232 = vmatprep.subr.bf16.mxu1 %v5349_v47  ;;  %v1577_v59 = vrot.slane %v1576_v38, 4  ;;  %v1610_v1 = vrot.slane %v6622_v16, 7 }
  0xdc   : > { %v1019_v26 = vsel %vm5730_vm8, %v4966_v62, %v1018_v31  ;;  %v1020_v40 = vrot.slane %v1018_v31, 4  ;;  %v1305_v33 = vmax.bf16 %v1004_v8, %v902_v15  ;;  %v1575_v23 = vsel %vm5865_vm11, %v1573_v34, %v1574_v2 }
  0xdd   : > { %v1306_v4 = vmax.bf16 %v1005_v28, %v903_v25  ;;  %v1307_v27 = vmax.bf16 %v1019_v26, %v904_v49  ;;  %v1609_v32 = vrot.slane %v1608_v3, 4  ;;  %v1579_v48 = vsel %vm5865_vm11, %v1577_v59, %v1578_v0  ;;  %v5353_v28 = vld [vmem:[%s8520_s1 + $0x28] sm:$0xff]  }
  0xde   : > { %v1308_v51 = vmax.bf16 %v1020_v40, %v905_v41  ;;  %v1445_v22 = vmax.bf16 %v1365_v12, %v1305_v33  ;;  %5233 = vmatpush3.bf16.msra.mxu1 %v5349_v47  ;;  %v1706_v31 = vmax.bf16 %v1608_v3, %v6457_v13  ;;  %v1760_v15 = vshrl.u32 %v6587_v17, 16  ;;  %v2129_v41 = vld [vmem:[%s5440_s6 + $0x20] sm:$0x1] }
  0xdf   : > { %v1446_v29 = vmax.bf16 %v1366_v60, %v1306_v4  ;;  %v1447_v20 = vmax.bf16 %v1367_v57, %v1307_v27  ;;  %5234 = vmatprep.subr.bf16.mxu1 %v5351_v7  ;;  %v1611_v34 = vsel %vm5865_vm11, %v1609_v32, %v1610_v1  ;;  %v1763_v33 = vshll.u32 %v6587_v17, 16 }
  0xe0   : > { %v1448_v25 = vmax.bf16 %v1368_v61, %v1308_v51  ;;  %v1688_v2 = vmax.bf16 %v1572_v37, %v1445_v22  ;;  %v1707_v27 = vmax.bf16 %v1611_v34, %v6460_v56  ;;  %v1762_v60 = vrot.slane %v1760_v15, 7 }
  0xe1   : > { %v6643_v49 = vmax.bf16 %v1575_v23, %v1446_v29  ;;  %v6645_v4 = vmax.bf16 %v1576_v38, %v1447_v20  ;;  %v1768_v61 = vshrl.u32 %v6543_v45, 16  ;;  %v1771_v22 = vshll.u32 %v6543_v45, 16 }
  0xe2   : > { %v6648_v12 = vmax.bf16 %v1579_v48, %v1448_v25  ;;  %v1776_v51 = vshrl.u32 %v6590_v30, 16  ;;  %v1765_v37 = vor.u32 %v1763_v33, %v1762_v60  ;;  %v1766_v17 = vrot.slane %v1762_v60, 4  ;;  %5235 = vmatpush3.bf16.msra.mxu1 %v5351_v7  ;;  %v2130_v33 = vld [vmem:[%s5440_s6 + $0x2c] sm:$0x1] }
  0xe3   : > { %v1779_v57 = vshll.u32 %v6590_v30, 16  ;;  %v1784_v29 = vshrl.u32 %v6567_v43, 16  ;;  %v1770_v20 = vrot.slane %v1768_v61, 7  ;;  %v1787_v47 = vshll.u32 %v6567_v43, 16  ;;  %5236 = vmatprep.subr.bf16.mxu1 %v5353_v28  ;;  %v2138_v60 = vld [vmem:[%s5440_s6 + $0x8c] sm:$0x1] }
  0xe4   : > { %v1778_v1 = vrot.slane %v1776_v51, 7  ;;  %v1904_v48 = vshrl.u32 %v6613_v6, 16  ;;  %v1907_v45 = vshll.u32 %v6613_v6, 16  ;;  %v2091_v38 = vmax.bf16 %v1765_v37, %v1688_v2  ;;  %v6674_v37 = vld [vmem:[%s5440_s6 + $0x1c] sm:$0xe] }
  0xe5   : > { %v1786_v62 = vrot.slane %v1784_v29, 7  ;;  %v8768_v0 = vshrl.u32 %v6553_v10, 16  ;;  %v1773_v8 = vor.u32 %v1771_v22, %v1770_v20  ;;  %v8769_v43 = vshll.u32 %v6553_v10, 16 }
  0xe6   : > { %v1781_v3 = vor.u32 %v1779_v57, %v1778_v1  ;;  %v1782_v7 = vrot.slane %v1778_v1, 4  ;;  %v1906_v26 = vrot.slane %v1904_v48, 7  ;;  %v2173_v23 = vshll.u32 %v2129_v41, 16  ;;  %5237 = vmatpush3.bf16.msra.mxu1 %v5353_v28 }
  0xe7   : > { %v2168_v30 = vrot.slane %v8768_v0, 6  ;;  %v1789_v40 = vor.u32 %v1787_v47, %v1786_v62  ;;  %v2169_v59 = vrot.slane %v8769_v43, 7  ;;  %v8770_v32 = vshrl.u32 %v6574_v35, 16  ;;  %v6684_v0 = vld [vmem:[%s5440_s6 + $0x28] sm:$0xe] }
  0xe8   : > { %v1774_v6 = vsel %vm5956_vm14, %v1766_v17, %v1773_v8  ;;  %v1909_v25 = vor.u32 %v1907_v45, %v1906_v26  ;;  %v1910_v34 = vrot.slane %v1906_v26, 4  ;;  %v2093_v2 = vmax.bf16 %v1781_v3, %v6645_v4  ;;  %v6697_v43 = vld [vmem:[%s5440_s6 + $0x88] sm:$0xe] }
  0xe9   : > { %v2177_v15 = vrot.slane %v8770_v32, 6  ;;  %v1790_v61 = vsel %vm5956_vm14, %v1782_v7, %v1789_v40  ;;  %v2092_v10 = vmax.bf16 %v1774_v6, %v6643_v49  ;;  %v2170_v22 = vor.u32 %v2169_v59, %v2168_v30  ;;  %v6687_v30 = vld [vmem:[%s5440_s6 + $0x4c] sm:$0xe] }
  0xea   : > { %v2175_v51 = vrot.slane %v2173_v23, 7  ;;  %v1918_v28 = vsel %vm5956_vm14, %v1910_v34, %v6477_v44  ;;  %v2094_v17 = vmax.bf16 %v1790_v61, %v6648_v12  ;;  %v2109_v4 = vmax.bf16 %v1909_v25, %v1706_v31  ;;  %v5364_v25 = vld [vmem:[%s5440_s6 + $0x50] sm:$0x1] }
  0xeb   : > { %v8771_v57 = vshll.u32 %v6574_v35, 16  ;;  %v2110_v20 = vmax.bf16 %v1918_v28, %v1707_v27  ;;  %v2171_v1 = vrot.slane %v2170_v22, 4  ;;  %v2182_v47 = vshll.u32 %v2130_v33, 16 }
  0xec   : > { %v2254_v48 = vshll.u32 %v2138_v60, 16  ;;  %v2374_v62 = vmax.bf16 %v2170_v22, %v2091_v38  ;;  %v2392_v45 = vmax.bf16 %v6479_v9, %v2109_v4  ;;  %v2478_v44 = vrot.slane %v6674_v37, 7 }
  0xed   : > { %v2178_v29 = vrot.slane %v8771_v57, 7  ;;  %v2176_v31 = vsel %vm6062_vm1, %v2171_v1, %v2175_v51  ;;  %v2184_v35 = vrot.slane %v2182_v47, 7  ;;  %v2480_v12 = vrot.slane %v2129_v41, 7  ;;  %v5366_v51 = vld [vmem:[%s5440_s6 + $0x68] sm:$0x1] }
  0xee   : > { %v2256_v27 = vrot.slane %v2254_v48, 7  ;;  %v2375_v3 = vmax.bf16 %v2176_v31, %v2092_v10  ;;  %v2479_v38 = vrot.slane %v2478_v44, 4  ;;  %v8772_v26 = vrot.slane %v6479_v9, 4  ;;  %v5365_v10 = vld [vmem:[%s5440_s6 + $0x5c] sm:$0x1] }
  0xef   : > { %v2179_v49 = vor.u32 %v2178_v29, %v2177_v15  ;;  %v2482_v59 = vrot.slane %v6684_v0, 7  ;;  %v2484_v23 = vrot.slane %v2130_v33, 7  ;;  %v2494_v32 = vrot.slane %v6687_v30, 7 }
  0xf0   : > { %v2257_v40 = vsel %vm6062_vm1, %v8772_v26, %v2256_v27  ;;  %v2481_v6 = vsel %vm5865_vm11, %v2479_v38, %v2480_v12  ;;  %v2496_v9 = vrot.slane %v5364_v25, 7  ;;  %v2500_v22 = vrot.slane %v5365_v10, 7 }
  0xf1   : > { %v2180_v8 = vrot.slane %v2179_v49, 4  ;;  %v2376_v7 = vmax.bf16 %v2179_v49, %v2093_v2  ;;  %v2393_v15 = vmax.bf16 %v2257_v40, %v2110_v20  ;;  %v2483_v2 = vrot.slane %v2482_v59, 4  ;;  %v5367_v40 = vld [vmem:[%s5440_s6 + $0x48] sm:$0xf] }
  0xf2   : > { %v2495_v61 = vrot.slane %v2494_v32, 4  ;;  %v2504_v28 = vrot.slane %v5366_v51, 7  ;;  %v2512_v33 = vrot.slane %v6455_v21, 7  ;;  %v2514_v4 = vrot.slane %v6697_v43, 7 }
  0xf3   : > { %v2185_v41 = vsel %vm6062_vm1, %v2180_v8, %v2184_v35  ;;  %v2516_v57 = vrot.slane %v2138_v60, 7  ;;  %v2485_v29 = vsel %vm5865_vm11, %v2483_v2, %v2484_v23  ;;  %v6717_v1 = vmax.bf16 %v2478_v44, %v2374_v62 }
  0xf4   : > { %v2377_v34 = vmax.bf16 %v2185_v41, %v2094_v17  ;;  %v2497_v20 = vsel %vm5865_vm11, %v2495_v61, %v2496_v9  ;;  %v2501_v17 = vsel %vm5865_vm11, %v6146_v11, %v2500_v22  ;;  %v2505_v21 = vsel %vm5865_vm11, %v6148_v46, %v2504_v28 }
  0xf5   : > { %v2513_v60 = vsel %vm5865_vm11, %v6482_v39, %v2512_v33  ;;  %v2515_v47 = vrot.slane %v2514_v4, 4  ;;  %v6725_v48 = vmax.bf16 %v2481_v6, %v2375_v3  ;;  %v6727_v49 = vmax.bf16 %v2482_v59, %v2376_v7  ;;  %v8777_v3 = vld [vmem:[#allocation22_spill] sm:$0xff]  ;;  %v8778_v7 = vld [vmem:[#allocation23_spill] sm:$0xff]  ;;  %v5355_v33 = vld [vmem:[%s8520_s1 + $0x30] sm:$0xff]  }
  0xf6   : > { %v6729_v31 = vmax.bf16 %v2485_v29, %v2377_v34  ;;  %v6732_v11 = vmax.bf16 %v2494_v32, %v6099_v14  ;;  %v8773_v62 = vmax.bf16 %v6090_v5, %v6017_v54  ;;  %v8774_v44 = vmax.bf16 %v6095_v24, %v6024_v18  ;;  %v2632_v54 = vld [vmem:[%s5440_s6 + $0x18] sm:$0xf]  ;;  %v8780_v29 = vld [vmem:[#allocation51_spill] sm:$0xff]  ;;  %5238 = vmatprep.subr.bf16.mxu1 %v5355_v33 }
  0xf7   : > { %v2517_v39 = vsel %vm5865_vm11, %v2515_v47, %v2516_v57  ;;  %v8775_v27 = vmax.bf16 %v6109_v36, %v6037_v53  ;;  %v8776_v14 = vmax.bf16 %v6494_v52, %v6474_v63  ;;  %v3793_v5 = vmax.bf16 %v6520_v19, %v6727_v49  ;;  %v2633_v36 = vld [vmem:[%s5440_s6 + $0x24] sm:$0xf]  ;;  %5239 = vmatpush3.bf16.msra.mxu1 %v5355_v33 }
  0xf8   : > { %v6737_v46 = vmax.bf16 %v2497_v20, %v8773_v62  ;;  %v6744_v35 = vmax.bf16 %v2501_v17, %v8774_v44  ;;  %v8779_v18 = vmax.bf16 %v8777_v3, %v8778_v7  ;;  %v3767_v38 = vmax.bf16 %v6514_v42, %v6732_v11 }
  0xf9   : > { %v6749_v12 = vmax.bf16 %v2505_v21, %v8775_v27  ;;  %v6754_v8 = vmax.bf16 %v2513_v60, %v8776_v14  ;;  %v6765_v53 = vmax.bf16 %v2514_v4, %v2392_v45  ;;  %v6768_v26 = vmax.bf16 %v2517_v39, %v2393_v15  ;;  %v8781_v60 = vld [vmem:[#allocation52_spill] sm:$0xff]  ;;  %v8782_v39 = vld [vmem:[#allocation27_spill] sm:$0xff]  ;;  %v5357_v27 = vld [vmem:[%s8520_s1 + $0x38] sm:$0xff]  }
  0xfa   : > { %v3746_v24 = vmax.bf16 %v8779_v18, %v6729_v31  ;;  %v2674_v63 = vrot.slane %v2632_v54, 6  ;;  %v2676_v52 = vrot.slane %v2633_v36, 6  ;;  %v2682_v59 = vrot.slane %v5367_v40, 6  ;;  %5240 = vmatprep.subr.bf16.mxu1 %v5357_v27 }
  0xfb   : > { %v6772_v23 = vmax.bf16 %v3793_v5, %v6732_v11  ;;  %v6776_v32 = vmax.bf16 %v3767_v38, %v6765_v53  ;;  %v2819_v41 = vshrl.u32 %v2632_v54, 16  ;;  %v2822_v57 = vshll.u32 %v2632_v54, 16  ;;  %5241 = vmatpush3.bf16.msra.mxu1 %v5357_v27 }
  0xfc   : > { %v3762_v19 = vmax.bf16 %v3746_v24, %v6737_v46  ;;  %v2675_v6 = vrot.slane %v2674_v63, 4  ;;  %v2677_v25 = vrot.slane %v2676_v52, 4  ;;  %v2683_v45 = vrot.slane %v2682_v59, 4  ;;  %v6809_v24 = vld [vmem:[%s5440_s6 + $0x20] sm:$0x3] }
  0xfd   : > { %v6779_v9 = vmax.bf16 %v2674_v63, %v6717_v1  ;;  %v3825_v34 = vmax.bf16 %v6772_v23, %v6765_v53  ;;  %v6785_v2 = vmax.bf16 %v2676_v52, %v6727_v49  ;;  %v6788_v61 = vmax.bf16 %v2682_v59, %v6732_v11  ;;  %v8784_v63 = vld [vmem:[#allocation28_spill] sm:$0xff] }
  0xfe   : > { %v3778_v15 = vmax.bf16 %v3762_v19, %v6744_v35  ;;  %v2755_v10 = vmax.bf16 %v2675_v6, %v6725_v48  ;;  %v2757_v22 = vmax.bf16 %v2677_v25, %v6729_v31  ;;  %v2763_v51 = vmax.bf16 %v2683_v45, %v6737_v46  ;;  %v3153_v25 = vld [vmem:[%s5440_s6 + $0x2c] sm:$0x3] }
  0xff   : > { %v2821_v28 = vrot.slane %v2819_v41, 6  ;;  %v2828_v20 = vshll.u32 %v8780_v29, 16  ;;  %v2833_v17 = vshrl.u32 %v2633_v36, 16  ;;  %v2836_v21 = vshll.u32 %v2633_v36, 16 }
 0x100   : > { %v3794_v4 = vmax.bf16 %v3778_v15, %v6749_v12  ;;  %v2842_v47 = vshll.u32 %v8781_v60, 16  ;;  %v2954_v62 = vshll.u32 %v6622_v16, 16  ;;  %v3122_v44 = vmax.bf16 %v8782_v39, %v6788_v61  ;;  %v3156_v60 = vld [vmem:[%s5440_s6 + $0x50] sm:$0x3]  ;;  %v8794_v39 = vld [vmem:[#allocation43_spill] sm:$0xff] }
 0x101   : > { %v2824_v54 = vrot.slane %v2822_v57, 7  ;;  %v2830_v5 = vrot.slane %v2828_v20, 7  ;;  %v2835_v18 = vrot.slane %v2833_v17, 6  ;;  %v2838_v38 = vrot.slane %v2836_v21, 7 }
 0x102   : > { %v6806_v14 = vmax.bf16 %v3794_v4, %v6754_v8  ;;  %v2844_v16 = vrot.slane %v2842_v47, 7  ;;  %v6811_v36 = vrot.slane %v2954_v62, 7  ;;  %v6814_v52 = vmax.bf16 %v8784_v63, %v2763_v51 }
 0x103   : > { %v2825_v59 = vor.u32 %v2824_v54, %v2821_v28  ;;  %v3203_v19 = vshrl.u32 %v6674_v37, 16  ;;  %v3206_v41 = vshll.u32 %v6674_v37, 16  ;;  %v2839_v6 = vor.u32 %v2838_v38, %v2835_v18 }
 0x104   : > { %8783 = vst [vmem:[#allocation22_spill] sm:$0xff] %v6811_v36  ;;  %8785 = vst [vmem:[#allocation23_spill] sm:$0xff] %v6814_v52  ;;  %v3826_v40 = vmax.bf16 %v6806_v14, %v6768_v26  ;;  %v3211_v45 = vshrl.u32 %v6809_v24, 16  ;;  %v3214_v15 = vshll.u32 %v6809_v24, 16  ;;  %v3219_v33 = vshrl.u32 %v6684_v0, 16 }
 0x105   : > { %v2826_v51 = vrot.slane %v2825_v59, 4  ;;  %v3114_v4 = vmax.bf16 %v2825_v59, %v6779_v9  ;;  %v3205_v57 = vrot.slane %v3203_v19, 7  ;;  %v3222_v29 = vshll.u32 %v6684_v0, 16 }
 0x106   : > { %v2840_v28 = vrot.slane %v2839_v6, 4  ;;  %v3116_v20 = vmax.bf16 %v2839_v6, %v6785_v2  ;;  %v3213_v37 = vrot.slane %v3211_v45, 7  ;;  %v3221_v17 = vrot.slane %v3219_v33, 7 }
 0x107   : > { %v2831_v21 = vsel %vm6062_vm1, %v2826_v51, %v2830_v5  ;;  %v3208_v47 = vor.u32 %v3206_v41, %v3205_v57  ;;  %v3209_v62 = vrot.slane %v3205_v57, 4  ;;  %v3227_v54 = vshrl.u32 %v3153_v25, 16 }
 0x108   : > { %v2845_v18 = vsel %vm6062_vm1, %v2840_v28, %v2844_v16  ;;  %v3115_v9 = vmax.bf16 %v2831_v21, %v2755_v10  ;;  %v3216_v38 = vor.u32 %v3214_v15, %v3213_v37  ;;  %v3224_v63 = vor.u32 %v3222_v29, %v3221_v17  ;;  %v3572_v29 = vld [vmem:[%s5440_s6 + $0x1c] sm:$0xc] }
 0x109   : > { %v3117_v0 = vmax.bf16 %v2845_v18, %v2757_v22  ;;  %v3225_v27 = vrot.slane %v3221_v17, 4  ;;  %v3229_v59 = vrot.slane %v3227_v54, 7  ;;  %v3230_v2 = vshll.u32 %v3153_v25, 16 }
 0x10a   : > { %v3217_v19 = vsel %vm5956_vm14, %v3209_v62, %v3216_v38  ;;  %v3267_v5 = vshrl.u32 %v6687_v30, 16  ;;  %v3270_v41 = vshll.u32 %v6687_v30, 16  ;;  %v3275_v6 = vshrl.u32 %v3156_v60, 16  ;;  %v3573_v30 = vld [vmem:[%s5440_s6 + $0x28] sm:$0xc] }
 0x10b   : > { %v3232_v45 = vor.u32 %v3230_v2, %v3229_v59  ;;  %v3278_v33 = vshll.u32 %v3156_v60, 16  ;;  %v3347_v10 = vshrl.u32 %v6697_v43, 16  ;;  %v3350_v16 = vshll.u32 %v6697_v43, 16 }
 0x10c   : > { %v3269_v22 = vrot.slane %v3267_v5, 7  ;;  %v3277_v15 = vrot.slane %v3275_v6, 7  ;;  %v3534_v51 = vmax.bf16 %v3208_v47, %v3114_v4  ;;  %v3535_v57 = vmax.bf16 %v3217_v19, %v3115_v9  ;;  %v3576_v47 = vld [vmem:[%s5440_s6 + $0x4c] sm:$0xc] }
 0x10d   : > { %v3233_v28 = vsel %vm5956_vm14, %v3225_v27, %v3232_v45  ;;  %v6841_v37 = vrot.slane %v3347_v10, 7  ;;  %v3536_v17 = vmax.bf16 %v3224_v63, %v3116_v20  ;;  %v3711_v21 = vmax.bf16 %v6727_v49, %v6717_v1  ;;  %v8793_v27 = vld [vmem:[#allocation14_spill] sm:$0xff]  ;;  %v196_v45 = vld [vmem:[%s5440_s6 + $0x90] sm:$0xc] }
 0x10e   : > { %v3272_v60 = vor.u32 %v3270_v41, %v3269_v22  ;;  %v3273_v62 = vrot.slane %v3269_v22, 4  ;;  %v3280_v54 = vor.u32 %v3278_v33, %v3277_v15  ;;  %v3537_v43 = vmax.bf16 %v3233_v28, %v3117_v0  ;;  %v8798_v41 = vld [vmem:[#allocation15_spill] sm:$0xff]  ;;  %v224_v33 = vld [vmem:[%s5440_s6 + $0x94] sm:$0x7]  ;;  %v8799_v10 = vld [vmem:[#allocation42_spill] sm:$0xff] }
 0x10f   : > { %8786 = vst [vmem:[#allocation51_spill] sm:$0xff] %v6841_v37  ;;  %v6847_v18 = vor.u32 %v3350_v16, %v6841_v37  ;;  %v6851_v9 = vmax.bf16 %v3572_v29, %v3534_v51  ;;  %v6854_v38 = vmax.bf16 %v3535_v57, %v6809_v24  ;;  %v6863_v49 = vmax.bf16 %v3573_v30, %v3536_v17  ;;  %v8800_v16 = vld [vmem:[#allocation39_spill] sm:$0xff] }
 0x110   : > { %v6858_v20 = vsel %vm5956_vm14, %v3273_v62, %v3280_v54  ;;  %v3542_v1 = vmax.bf16 %v3272_v60, %v3122_v44  ;;  %v6865_v63 = vmax.bf16 %v3537_v43, %v3153_v25  ;;  %v3712_v24 = vmax.bf16 %v6729_v31, %v6725_v48  ;;  %v8795_v25 = vld [vmem:[#allocation6_spill] sm:$0xff]  ;;  %v8797_v48 = vld [vmem:[#allocation17_spill] sm:$0xff]  ;;  %v8805_v29 = vld [vmem:[#allocation19_spill] sm:$0xff] }
 0x111   : > { %8787 = vst [vmem:[#allocation52_spill] sm:$0xff] %v6847_v18  ;;  %8788 = vst [vmem:[#allocation27_spill] sm:$0xff] %v6851_v9  ;;  %v3727_v59 = vmax.bf16 %v3711_v21, %v8793_v27  ;;  %v6875_v61 = vrot.slane %v3825_v34, 10  ;;  %v3877_v44 = vmax.bf16 %v8794_v39, %v6863_v49  ;;  %v3843_v5 = vmax.bf16 %v6863_v49, %v6851_v9 }
 0x112   : > { %8789 = vst [vmem:[#allocation28_spill] sm:$0xff] %v6854_v38  ;;  %8790 = vst [vmem:[#allocation53_spill] sm:$0xff] %v6858_v20  ;;  %v6881_v19 = vmax.bf16 %v3576_v47, %v3542_v1  ;;  %v3728_v31 = vmax.bf16 %v3712_v24, %v8797_v48  ;;  %v3844_v23 = vmax.bf16 %v6865_v63, %v6854_v38  ;;  %v6892_v34 = vrot.slane %v3826_v40, 6  ;;  %v198_v40 = vld [vmem:[%s5440_s6 + $0x9c] sm:$0xc]  ;;  %v8809_v24 = vld [vmem:[#allocation16_spill] sm:$0xff] }
 0x113   : > { %8791 = vst [vmem:[#allocation54_spill] sm:$0xff] %v6863_v49  ;;  %8792 = vst [vmem:[#allocation55_spill] sm:$0xff] %v6865_v63  ;;  %v3743_v6 = vmax.bf16 %v3727_v59, %v8798_v41  ;;  %v8801_v22 = vmax.bf16 %v8799_v10, %v8800_v16  ;;  %v464_v54 = vshrl.u32 %v196_v45, 16  ;;  %v467_v43 = vshll.u32 %v196_v45, 16  ;;  %v225_v59 = vld [vmem:[%s5440_s6 + $0xa0] sm:$0x7] }
 0x114   : > { %8796 = vst [vmem:[#allocation14_spill] sm:$0xff] %v6881_v19  ;;  %v6904_v51 = vmax.bf16 %v8799_v10, %v6881_v19  ;;  %v6907_v57 = vmax.bf16 %v3877_v44, %v6881_v19  ;;  %v3891_v14 = vmax.bf16 %v8794_v39, %v6881_v19  ;;  %v3744_v28 = vmax.bf16 %v3728_v31, %v8805_v29  ;;  %v8811_v16 = vld [vmem:[#allocation21_spill] sm:$0xff]  ;;  %v6933_v38 = vld [vmem:[%s5440_s6 + $0x94] sm:$0x3] }
 0x115   : > { %v6900_v15 = vmax.bf16 %v8801_v22, %v6881_v19  ;;  %v3759_v17 = vmax.bf16 %v3743_v6, %v6732_v11  ;;  %v6915_v30 = vmax.bf16 %v8795_v25, %v3844_v23  ;;  %v473_v47 = vshll.u32 %v224_v33, 16  ;;  %v707_v22 = vld [vmem:[%s5440_s6 + $0x90] sm:$0x8] }
 0x116   : > { %8803 = vst [vmem:[#allocation17_spill] sm:$0xff] %v6904_v51  ;;  %8804 = vst [vmem:[#allocation15_spill] sm:$0xff] %v6907_v57  ;;  %v6921_v62 = vmax.bf16 %v3891_v14, %v3843_v5  ;;  %v3760_v1 = vmax.bf16 %v3744_v28, %v6737_v46  ;;  %v477_v39 = vshrl.u32 %v224_v33, 16  ;;  %v483_v44 = vshrl.u32 %v198_v40, 16  ;;  %v8810_v14 = vld [vmem:[#allocation20_spill] sm:$0xff] }
 0x117   : > { %8802 = vst [vmem:[#allocation43_spill] sm:$0xff] %v6900_v15  ;;  %8806 = vst [vmem:[#allocation19_spill] sm:$0xff] %v6915_v30  ;;  %v3775_v27 = vmax.bf16 %v3759_v17, %v8809_v24  ;;  %v466_v48 = vrot.slane %v464_v54, 4  ;;  %v469_v31 = vrot.slane %v467_v43, 5  ;;  %v475_v6 = vrot.slane %v473_v47, 5 }
 0x118   : > { %8808 = vst [vmem:[#allocation7_spill] sm:$0xff] %v6921_v62  ;;  %v486_v23 = vshll.u32 %v198_v40, 16  ;;  %v3776_v5 = vmax.bf16 %v3760_v1, %v6744_v35  ;;  %v479_v0 = vrot.slane %v477_v39, 4  ;;  %v485_v4 = vrot.slane %v483_v44, 4  ;;  %v708_v43 = vld [vmem:[%s5440_s6 + $0x9c] sm:$0x8] }
 0x119   : > { %v3791_v2 = vmax.bf16 %v3775_v27, %v8810_v14  ;;  %v470_v60 = vor.u32 %v469_v31, %v466_v48  ;;  %v492_v10 = vshll.u32 %v225_v59, 16  ;;  %v496_v17 = vshrl.u32 %v225_v59, 16  ;;  %v8812_v48 = vld [vmem:[#allocation49_spill] sm:$0xff] }
 0x11a   : > { %v488_v28 = vrot.slane %v486_v23, 5  ;;  %v3792_v19 = vmax.bf16 %v3776_v5, %v6749_v12  ;;  %v480_v49 = vor.u32 %v479_v0, %v475_v6  ;;  %v4955_v47 = vrot.slane %v707_v22, 9 }
 0x11b   : > { %v3807_v54 = vmax.bf16 %v3791_v2, %v8811_v16  ;;  %v471_v9 = vrot.slane %v470_v60, 4  ;;  %v494_v27 = vrot.slane %v492_v10, 5  ;;  %v498_v39 = vrot.slane %v496_v17, 4 }
 0x11c   : > { %v489_v1 = vor.u32 %v488_v28, %v485_v4  ;;  %v3808_v44 = vmax.bf16 %v3792_v19, %v8778_v7  ;;  %v481_v23 = vrot.slane %v480_v49, 4  ;;  %v820_v30 = vrot.slane %v224_v33, 5  ;;  %v6941_v4 = vld [vmem:[%s5440_s6 + $0xa0] sm:$0x3]  ;;  %v6945_v19 = vld [vmem:[%s5440_s6 + $0x94] sm:$0xf] }
 0x11d   : > { %v3823_v31 = vmax.bf16 %v3807_v54, %v8812_v48  ;;  %v476_v2 = vsel %vm5487_vm2, %v471_v9, %v475_v6  ;;  %v499_v63 = vor.u32 %v498_v39, %v494_v27  ;;  %v4956_v25 = vrot.slane %v708_v43, 9 }
 0x11e   : > { %v490_v0 = vrot.slane %v489_v1, 4  ;;  %v3824_v52 = vmax.bf16 %v3808_v44, %v6754_v8  ;;  %v679_v10 = vmax.bf16 %v476_v2, %v196_v45  ;;  %v680_v28 = vmax.bf16 %v481_v23, %v6933_v38  ;;  %v6953_v23 = vld [vmem:[%s5440_s6 + $0xa0] sm:$0xf] }
 0x11f   : > { %v5055_v60 = vrot.slane %v3823_v31, 10  ;;  %v500_v33 = vrot.slane %v499_v63, 4  ;;  %v821_v9 = vsel %vm5612_vm5, %v4955_v47, %v820_v30  ;;  %v822_v6 = vrot.slane %v820_v30, 4 }
 0x120   : > { %v495_v49 = vsel %vm5487_vm2, %v490_v0, %v494_v27  ;;  %v4439_v54 = vrot.slane %v3824_v52, 6  ;;  %v825_v39 = vrot.slane %v225_v59, 5  ;;  %v922_v44 = vmax.bf16 %v821_v9, %v679_v10  ;;  %v1505_v59 = vld [vmem:[%s5440_s6 + $0x90] sm:$0xe] }
 0x121   : > { %v681_v1 = vmax.bf16 %v495_v49, %v198_v40  ;;  %v682_v45 = vmax.bf16 %v500_v33, %v6941_v4  ;;  %v923_v31 = vmax.bf16 %v822_v6, %v680_v28  ;;  %v1142_v2 = vshrl.u32 %v707_v22, 16  ;;  %v1507_v6 = vld [vmem:[%s5440_s6 + $0x9c] sm:$0xe] }
 0x122   : > { %v8628_v27 = vshrl.u32 %v6945_v19, 16  ;;  %v4440_v63 = vsel %vm6395_vm6, %v5055_v60, %v4439_v54  ;;  %v826_v30 = vsel %vm5612_vm5, %v4956_v25, %v825_v39  ;;  %v827_v52 = vrot.slane %v825_v39, 4  ;;  %v6970_v60 = vld [vmem:[%s5440_s6 + $0x94] sm:$0x1] }
 0x123   : > { %v8627_v40 = vshll.u32 %v6945_v19, 16  ;;  %v8815_v47 = vsel %vm6395_vm6, %v6875_v61, %v6892_v34  ;;  %v924_v0 = vmax.bf16 %v826_v30, %v681_v1  ;;  %v4975_v10 = vrot.slane %v1142_v2, 9  ;;  %v6980_v1 = vld [vmem:[%s5440_s6 + $0xa0] sm:$0x1] }
 0x124   : > { %v5079_v22 = vcombine.low %v4440_v63, %v8815_v47  ;;  %v1149_v28 = vrot.slane %v8628_v27, 5  ;;  %v925_v49 = vmax.bf16 %v827_v52, %v682_v45  ;;  %v1157_v33 = vshrl.u32 %v708_v43, 16 }
 0x125   : > { %v1152_v25 = vrot.slane %v8627_v40, 6  ;;  %v8631_v9 = vshrl.u32 %v6953_v23, 16  ;;  %v8634_v54 = vshll.u32 %v6953_v23, 16  ;;  %v1385_v61 = vrot.slane %v6945_v19, 6 }
 0x126   : > { %5266 = vmatprep.mubr.bf16.mxu0 %v5079_v22  ;;  %v1387_v34 = vrot.slane %v6953_v23, 6  ;;  %v1612_v39 = vrot.slane %v1505_v59, 7  ;;  %v4976_v63 = vrot.slane %v1157_v33, 9  ;;  %v1614_v43 = vrot.slane %v6970_v60, 7 }
 0x127   : > { %v1153_v2 = vor.u32 %v1152_v25, %v1149_v28  ;;  %v1164_v45 = vrot.slane %v8631_v9, 5  ;;  %v1167_v30 = vrot.slane %v8634_v54, 6  ;;  %v1386_v52 = vrot.slane %v1385_v61, 4 }
 0x128   : > { %v1388_v47 = vrot.slane %v1387_v34, 4  ;;  %v1613_v22 = vrot.slane %v1612_v39, 4  ;;  %v1616_v18 = vrot.slane %v1507_v6, 7  ;;  %v1618_v37 = vrot.slane %v6980_v1, 7 }
 0x129   : > { %v1154_v27 = vsel %vm5730_vm8, %v4975_v10, %v1153_v2  ;;  %v1155_v20 = vrot.slane %v1153_v2, 4  ;;  %v1168_v28 = vor.u32 %v1167_v30, %v1164_v45  ;;  %v1920_v9 = vshrl.u32 %v1505_v59, 16 }
 0x12a   : > { %v1325_v25 = vmax.bf16 %v1154_v27, %v922_v44  ;;  %v1615_v33 = vsel %vm5865_vm11, %v1613_v22, %v1614_v43  ;;  %v1617_v42 = vrot.slane %v1616_v18, 4  ;;  %v1923_v62 = vshll.u32 %v1505_v59, 16 }
 0x12b   : > { %v1326_v36 = vmax.bf16 %v1155_v20, %v923_v31  ;;  %v1928_v54 = vshrl.u32 %v6933_v38, 16  ;;  %v1169_v57 = vsel %vm5730_vm8, %v4976_v63, %v1168_v28  ;;  %v1170_v51 = vrot.slane %v1168_v28, 4 }
 0x12c   : > { %v6995_v10 = vmax.bf16 %v1385_v61, %v1325_v25  ;;  %v1922_v2 = vrot.slane %v1920_v9, 7  ;;  %v1327_v15 = vmax.bf16 %v1169_v57, %v924_v0  ;;  %v1619_v44 = vsel %vm5865_vm11, %v1617_v42, %v1618_v37  ;;  %v2139_v37 = vld [vmem:[%s5440_s6 + $0x98] sm:$0x1]  ;;  %v2422_v25 = vld [vmem:[%s5440_s6 + $0x94] sm:$0xe] }
 0x12d   : > { %v6997_v45 = vmax.bf16 %v1386_v52, %v1326_v36  ;;  %v1930_v27 = vrot.slane %v1928_v54, 7  ;;  %v1328_v20 = vmax.bf16 %v1170_v51, %v925_v49  ;;  %v1931_v9 = vshll.u32 %v6933_v38, 16 }
 0x12e   : > { %v1708_v31 = vmax.bf16 %v1612_v39, %v6995_v10  ;;  %v1925_v59 = vor.u32 %v1923_v62, %v1922_v2  ;;  %v1926_v43 = vrot.slane %v1922_v2, 4  ;;  %v7002_v30 = vmax.bf16 %v1387_v34, %v1327_v15  ;;  %v2140_v39 = vld [vmem:[%s5440_s6 + $0xa4] sm:$0x1] }
 0x12f   : > { %v1709_v61 = vmax.bf16 %v1615_v33, %v6997_v45  ;;  %v1936_v57 = vshrl.u32 %v1507_v6, 16  ;;  %v7006_v0 = vmax.bf16 %v1388_v47, %v1328_v20  ;;  %v1939_v36 = vshll.u32 %v1507_v6, 16 }
 0x130   : > { %v1944_v63 = vshrl.u32 %v6941_v4, 16  ;;  %v1947_v42 = vshll.u32 %v6941_v4, 16  ;;  %v1710_v51 = vmax.bf16 %v1616_v18, %v7002_v30  ;;  %v1933_v62 = vor.u32 %v1931_v9, %v1930_v27 }
 0x131   : > { %v1938_v49 = vrot.slane %v1936_v57, 7  ;;  %v2111_v15 = vmax.bf16 %v1925_v59, %v1708_v31  ;;  %v1711_v54 = vmax.bf16 %v1619_v44, %v7006_v0  ;;  %v8817_v38 = vshrl.u32 %v6945_v19, 16 }
 0x132   : > { %v1946_v34 = vrot.slane %v1944_v63, 7  ;;  %v8818_v6 = vshll.u32 %v6945_v19, 16  ;;  %v1934_v4 = vsel %vm5956_vm14, %v1926_v43, %v1933_v62  ;;  %v2263_v18 = vshll.u32 %v2139_v37, 16  ;;  %v2423_v63 = vld [vmem:[%s5440_s6 + $0xa0] sm:$0xe] }
 0x133   : > { %v2258_v52 = vrot.slane %v8817_v38, 6  ;;  %v1941_v22 = vor.u32 %v1939_v36, %v1938_v49  ;;  %v1942_v28 = vrot.slane %v1938_v49, 4  ;;  %v2112_v2 = vmax.bf16 %v1934_v4, %v1709_v61 }
 0x134   : > { %v2259_v47 = vrot.slane %v8818_v6, 7  ;;  %v1949_v33 = vor.u32 %v1947_v42, %v1946_v34  ;;  %v8819_v44 = vshrl.u32 %v6953_v23, 16  ;;  %v2265_v59 = vrot.slane %v2263_v18, 7 }
 0x135   : > { %v2113_v31 = vmax.bf16 %v1941_v22, %v1710_v51  ;;  %v8820_v9 = vshll.u32 %v6953_v23, 16  ;;  %v2272_v19 = vshll.u32 %v2140_v39, 16  ;;  %v2518_v49 = vrot.slane %v2422_v25, 7 }
 0x136   : > { %v2260_v27 = vor.u32 %v2259_v47, %v2258_v52  ;;  %v2267_v20 = vrot.slane %v8819_v44, 6  ;;  %v1950_v43 = vsel %vm5956_vm14, %v1942_v28, %v1949_v33  ;;  %v2520_v34 = vrot.slane %v2139_v37, 7 }
 0x137   : > { %v2268_v57 = vrot.slane %v8820_v9, 7  ;;  %v2114_v38 = vmax.bf16 %v1950_v43, %v1711_v54  ;;  %v2274_v61 = vrot.slane %v2272_v19, 7  ;;  %v2519_v51 = vrot.slane %v2518_v49, 4 }
 0x138   : > { %v2261_v36 = vrot.slane %v2260_v27, 4  ;;  %v2394_v62 = vmax.bf16 %v2260_v27, %v2111_v15  ;;  %v2522_v6 = vrot.slane %v2423_v63, 7  ;;  %v2524_v47 = vrot.slane %v2140_v39, 7 }
 0x139   : > { %v2269_v42 = vor.u32 %v2268_v57, %v2267_v20  ;;  %v2521_v28 = vsel %vm5865_vm11, %v2519_v51, %v2520_v34  ;;  %v2968_v54 = vshll.u32 %v6970_v60, 16  ;;  %v2982_v33 = vshll.u32 %v6980_v1, 16  ;;  %v8827_v34 = vld [vmem:[#allocation10_spill] sm:$0xff]  ;;  %v8829_v51 = vld [vmem:[#allocation11_spill] sm:$0xff] }
 0x13a   : > { %v2266_v52 = vsel %vm6062_vm1, %v2261_v36, %v2265_v59  ;;  %v7030_v18 = vmax.bf16 %v2518_v49, %v2394_v62  ;;  %v2523_v15 = vrot.slane %v2522_v6, 4  ;;  %v3363_v1 = vshrl.u32 %v2422_v25, 16 }
 0x13b   : > { %v2270_v23 = vrot.slane %v2269_v42, 4  ;;  %v2395_v4 = vmax.bf16 %v2266_v52, %v2112_v2  ;;  %v2396_v22 = vmax.bf16 %v2269_v42, %v2113_v31  ;;  %v7046_v31 = vrot.slane %v2968_v54, 7  ;;  %v8833_v54 = vld [vmem:[#allocation45_spill] sm:$0xff] }
 0x13c   : > { %v3799_v27 = vmax.bf16 %v6776_v32, %v7030_v18  ;;  %v2525_v20 = vsel %vm5865_vm11, %v2523_v15, %v2524_v47  ;;  %v7048_v59 = vrot.slane %v2982_v33, 7  ;;  %v3366_v9 = vshll.u32 %v2422_v25, 16 }
 0x13d   : > { %v2275_v37 = vsel %vm6062_vm1, %v2270_v23, %v2274_v61  ;;  %v7040_v39 = vmax.bf16 %v2521_v28, %v2395_v4  ;;  %v7042_v2 = vmax.bf16 %v2522_v6, %v2396_v22  ;;  %8821 = vst [vmem:[#allocation16_spill] sm:$0xff] %v7046_v31  ;;  %v3379_v57 = vshrl.u32 %v2423_v63, 16  ;;  %v8826_v61 = vld [vmem:[#allocation8_spill] sm:$0xff] }
 0x13e   : > { %v2397_v44 = vmax.bf16 %v2275_v37, %v2114_v38  ;;  %8822 = vst [vmem:[#allocation56_spill] sm:$0xff] %v7048_v59  ;;  %v3382_v32 = vshll.u32 %v2423_v63, 16  ;;  %v7055_v43 = vrot.slane %v3363_v1, 7  ;;  %v3717_v62 = vmax.bf16 %v6732_v11, %v8798_v41  ;;  %v8825_v38 = vld [vmem:[#allocation18_spill] sm:$0xff]  ;;  %v8828_v63 = vld [vmem:[#allocation9_spill] sm:$0xff]  ;;  %v8832_v28 = vld [vmem:[#allocation44_spill] sm:$0xff] }
 0x13f   : > { %v7051_v60 = vmax.bf16 %v3799_v27, %v7042_v2  ;;  %v7057_v36 = vrot.slane %v3379_v57, 7  ;;  %v3718_v49 = vmax.bf16 %v6737_v46, %v8805_v29  ;;  %v3731_v42 = vmax.bf16 %v8825_v38, %v6732_v11  ;;  %v710_v29 = vld [vmem:[%s5440_s6 + $0xb4] sm:$0x8] }
 0x140   : > { %v7053_v19 = vmax.bf16 %v2525_v20, %v2397_v44  ;;  %8823 = vst [vmem:[#allocation57_spill] sm:$0xff] %v7055_v43  ;;  %v3732_v25 = vmax.bf16 %v8777_v3, %v6737_v46  ;;  %v3655_v52 = vmax.bf16 %v8827_v34, %v8826_v61  ;;  %v3656_v6 = vmax.bf16 %v8829_v51, %v8828_v63 }
 0x141   : > { %8824 = vst [vmem:[#allocation58_spill] sm:$0xff] %v7057_v36  ;;  %v7072_v47 = vor.u32 %v3366_v9, %v7055_v43  ;;  %v7076_v23 = vor.u32 %v3382_v32, %v7057_v36  ;;  %v3733_v11 = vmax.bf16 %v3717_v62, %v8809_v24  ;;  %v3734_v3 = vmax.bf16 %v3718_v49, %v6744_v35 }
 0x142   : > { %v3747_v4 = vmax.bf16 %v3731_v42, %v8809_v24  ;;  %v3748_v22 = vmax.bf16 %v3732_v25, %v6744_v35  ;;  %v3657_v15 = vmax.bf16 %v8832_v28, %v8827_v34  ;;  %v3658_v33 = vmax.bf16 %v8833_v54, %v8829_v51 }
 0x143   : > { %8830 = vst [vmem:[#allocation18_spill] sm:$0xff] %v7072_v47  ;;  %8831 = vst [vmem:[#allocation8_spill] sm:$0xff] %v7076_v23  ;;  %v3671_v37 = vmax.bf16 %v3655_v52, %v8832_v28  ;;  %v3672_v27 = vmax.bf16 %v3656_v6, %v8833_v54  ;;  %v3749_v44 = vmax.bf16 %v3733_v11, %v8810_v14  ;;  %v4958_v23 = vrot.slane %v710_v29, 9 }
 0x144   : > { %v3750_v20 = vmax.bf16 %v3734_v3, %v6749_v12  ;;  %v3763_v1 = vmax.bf16 %v3747_v4, %v8810_v14  ;;  %v3764_v24 = vmax.bf16 %v3748_v22, %v6749_v12  ;;  %v3673_v9 = vmax.bf16 %v3657_v15, %v6457_v13  ;;  %v7110_v4 = vld [vmem:[%s5440_s6 + $0xa8] sm:$0xc] }
 0x145   : > { %v3674_v57 = vmax.bf16 %v3658_v33, %v6460_v56  ;;  %v3687_v32 = vmax.bf16 %v3671_v37, %v6457_v13  ;;  %v3688_v62 = vmax.bf16 %v3672_v27, %v6460_v56  ;;  %v3765_v49 = vmax.bf16 %v3749_v44, %v8811_v16 }
 0x146   : > { %v3766_v38 = vmax.bf16 %v3750_v20, %v8778_v7  ;;  %v3779_v42 = vmax.bf16 %v3763_v1, %v8811_v16  ;;  %v3780_v25 = vmax.bf16 %v3764_v24, %v8778_v7  ;;  %v3689_v61 = vmax.bf16 %v3673_v9, %v6995_v10  ;;  %v226_v24 = vld [vmem:[%s5440_s6 + $0xac] sm:$0x7] }
 0x147   : > { %v3690_v34 = vmax.bf16 %v3674_v57, %v6997_v45  ;;  %v3703_v52 = vmax.bf16 %v3687_v32, %v6995_v10  ;;  %v3704_v63 = vmax.bf16 %v3688_v62, %v6997_v45  ;;  %v3781_v51 = vmax.bf16 %v3765_v49, %v8812_v48 }
 0x148   : > { %v3782_v6 = vmax.bf16 %v3766_v38, %v6754_v8  ;;  %v3795_v11 = vmax.bf16 %v3779_v42, %v8812_v48  ;;  %v3796_v3 = vmax.bf16 %v3780_v25, %v6754_v8  ;;  %v3705_v22 = vmax.bf16 %v3689_v61, %v7002_v30 }
 0x149   : > { %v3706_v15 = vmax.bf16 %v3690_v34, %v7006_v0  ;;  %v5011_v33 = vrot.slane %v3703_v52, 10  ;;  %v4132_v37 = vrot.slane %v3704_v63, 6  ;;  %v3797_v27 = vmax.bf16 %v3781_v51, %v6765_v53  ;;  %v7129_v34 = vld [vmem:[%s5440_s6 + $0xb4] sm:$0xc] }
 0x14a   : > { %v3798_v44 = vmax.bf16 %v3782_v6, %v6768_v26  ;;  %v3811_v20 = vmax.bf16 %v3795_v11, %v6765_v53  ;;  %v3812_v1 = vmax.bf16 %v3796_v3, %v6768_v26  ;;  %v5012_v57 = vrot.slane %v3705_v22, 10 }
 0x14b   : > { %v4133_v9 = vsel %vm6395_vm6, %v5011_v33, %v4132_v37  ;;  %v4136_v32 = vrot.slane %v3706_v15, 6  ;;  %v502_v62 = vshrl.u32 %v7110_v4, 16  ;;  %v3813_v49 = vmax.bf16 %v3797_v27, %v7030_v18  ;;  %v227_v15 = vld [vmem:[%s5440_s6 + $0xb8] sm:$0x7] }
 0x14c   : > { %v3814_v38 = vmax.bf16 %v3798_v44, %v7040_v39  ;;  %v3827_v42 = vmax.bf16 %v3811_v20, %v7030_v18  ;;  %v3828_v25 = vmax.bf16 %v3812_v1, %v7040_v39  ;;  %v505_v63 = vshll.u32 %v7110_v4, 16  ;;  %v709_v20 = vld [vmem:[%s5440_s6 + $0xa8] sm:$0x8] }
 0x14d   : > { %v4137_v61 = vsel %vm6395_vm6, %v5012_v57, %v4136_v32  ;;  %v504_v52 = vrot.slane %v502_v62, 4  ;;  %v511_v51 = vshll.u32 %v226_v24, 16  ;;  %v3829_v6 = vmax.bf16 %v3813_v49, %v7042_v2 }
 0x14e   : > { %v3830_v11 = vmax.bf16 %v3814_v38, %v7053_v19  ;;  %v5057_v3 = vrot.slane %v3827_v42, 10  ;;  %v4447_v22 = vrot.slane %v3828_v25, 6  ;;  %v5033_v33 = vcombine.low %v4133_v9, %v4137_v61 }
 0x14f   : > { %v507_v37 = vrot.slane %v505_v63, 5  ;;  %v513_v27 = vrot.slane %v511_v51, 5  ;;  %v515_v44 = vshrl.u32 %v226_v24, 16  ;;  %v5058_v57 = vrot.slane %v3829_v6, 10  ;;  %v5354_v6 = vld [vmem:[%s8520_s1 + $0xc8] sm:$0xff]  }
 0x150   : > { %v4448_v1 = vsel %vm6395_vm6, %v5057_v3, %v4447_v22  ;;  %v4451_v32 = vrot.slane %v3830_v11, 6  ;;  %v521_v62 = vshrl.u32 %v7129_v34, 16  ;;  %5222 = vmatprep.mubr.bf16.mxu1 %v5033_v33  ;;  %v524_v42 = vshll.u32 %v7129_v34, 16  ;;  %v7147_v33 = vld [vmem:[%s5440_s6 + $0xac] sm:$0x3] }
 0x151   : > { %v508_v49 = vor.u32 %v507_v37, %v504_v52  ;;  %v517_v38 = vrot.slane %v515_v44, 4  ;;  %v530_v25 = vshll.u32 %v227_v15, 16  ;;  %v534_v63 = vshrl.u32 %v227_v15, 16 }
 0x152   : > { %v4452_v9 = vsel %vm6395_vm6, %v5058_v57, %v4451_v32  ;;  %v523_v61 = vrot.slane %v521_v62, 4  ;;  %v4957_v51 = vrot.slane %v709_v20, 9  ;;  %v526_v52 = vrot.slane %v524_v42, 5 }
 0x153   : > { %v5080_v3 = vcombine.low %v4448_v1, %v4452_v9  ;;  %v509_v11 = vrot.slane %v508_v49, 4  ;;  %v518_v22 = vor.u32 %v517_v38, %v513_v27  ;;  %v532_v37 = vrot.slane %v530_v25, 5  ;;  %v7152_v9 = vld [vmem:[%s5440_s6 + $0xac] sm:$0xf]  ;;  %v5368_v49 = vld [vmem:[%s8520_s1 + $0xc0] sm:$0xff]  }
 0x154   : > { %v536_v44 = vrot.slane %v534_v63, 4  ;;  %v830_v41 = vrot.slane %v226_v24, 5  ;;  %v527_v1 = vor.u32 %v526_v52, %v523_v61  ;;  %v835_v62 = vrot.slane %v227_v15, 5 }
 0x155   : > { %5267 = vmatmul.mubr.bf16.vlgmr.msra.gmra.mrb[0].mxu0 %v5080_v3  ;;  %v514_v57 = vsel %vm5487_vm2, %v509_v11, %v513_v27  ;;  %v519_v32 = vrot.slane %v518_v22, 4  ;;  %v7161_v27 = vld [vmem:[%s5440_s6 + $0xb8] sm:$0x3]  ;;  %v5356_v11 = vld [vmem:[%s8520_s1 + $0xd0] sm:$0xff]   ;;  %v8639_v52 = vshrl.u32 %v7152_v9, 16 }
 0x156   : > { %5275 = vmatpush3.bf16.msra.mxu0 %v5368_v49  ;;  %v537_v38 = vor.u32 %v536_v44, %v532_v37  ;;  %v683_v42 = vmax.bf16 %v514_v57, %v7110_v4  ;;  %v831_v24 = vsel %vm5612_vm5, %v4957_v51, %v830_v41  ;;  %v832_v25 = vrot.slane %v830_v41, 4  ;;  %v7170_v51 = vld [vmem:[%s5440_s6 + $0xb8] sm:$0xf] }
 0x157   : > { %5276 = vmatprep.subr.bf16.mxu0 %v5354_v6  ;;  %v528_v61 = vrot.slane %v527_v1, 4  ;;  %v684_v15 = vmax.bf16 %v519_v32, %v7147_v33  ;;  %v836_v63 = vsel %vm5612_vm5, %v4958_v23, %v835_v62  ;;  %v837_v3 = vrot.slane %v835_v62, 4 }
 0x158   : > { %v538_v4 = vrot.slane %v537_v38, 4  ;;  %v926_v22 = vmax.bf16 %v831_v24, %v683_v42  ;;  %v1172_v41 = vshrl.u32 %v709_v20, 16  ;;  %v8638_v23 = vshll.u32 %v7152_v9, 16  ;;  %v7181_v20 = vld [vmem:[%s5440_s6 + $0xac] sm:$0x1] }
 0x159   : > { %v533_v44 = vsel %vm5487_vm2, %v528_v61, %v532_v37  ;;  %v927_v57 = vmax.bf16 %v832_v25, %v684_v15  ;;  %v1187_v32 = vshrl.u32 %v710_v29, 16  ;;  %v1179_v38 = vrot.slane %v8639_v52, 5  ;;  %v7184_v42 = vld [vmem:[%s5440_s6 + $0xb4] sm:$0xe]  ;;  %v7201_v52 = vld [vmem:[%s5440_s6 + $0xb8] sm:$0x1] }
 0x15a   : > { %5277 = vmatpush3.bf16.msra.mxu0 %v5354_v6  ;;  %v685_v1 = vmax.bf16 %v533_v44, %v7129_v34  ;;  %v686_v62 = vmax.bf16 %v538_v4, %v7161_v27  ;;  %v4977_v49 = vrot.slane %v1172_v41, 9  ;;  %v1182_v37 = vrot.slane %v8638_v23, 6  ;;  %v5358_v6 = vld [vmem:[%s8520_s1 + $0xd8] sm:$0xff]   ;;  %v1509_v41 = vld [vmem:[%s5440_s6 + $0xa8] sm:$0xe] }
 0x15b   : > { %v4978_v24 = vrot.slane %v1187_v32, 9  ;;  %v8643_v29 = vshrl.u32 %v7170_v51, 16  ;;  %v8642_v34 = vshll.u32 %v7170_v51, 16  ;;  %5278 = vmatprep.subr.bf16.mxu0 %v5356_v11  ;;  %v1389_v15 = vrot.slane %v7152_v9, 6 }
 0x15c   : > { %v928_v25 = vmax.bf16 %v836_v63, %v685_v1  ;;  %v929_v61 = vmax.bf16 %v837_v3, %v686_v62  ;;  %v1391_v4 = vrot.slane %v7170_v51, 6  ;;  %v1183_v44 = vor.u32 %v1182_v37, %v1179_v38 }
 0x15d   : > { %v1194_v32 = vrot.slane %v8643_v29, 5  ;;  %v1197_v23 = vrot.slane %v8642_v34, 6  ;;  %v1620_v47 = vrot.slane %v1509_v41, 7  ;;  %v1390_v36 = vrot.slane %v1389_v15, 4  ;;  %v5359_v34 = vld [vmem:[%s8520_s1 + $0xe0] sm:$0xff]  }
 0x15e   : > { %v1392_v43 = vrot.slane %v1391_v4, 4  ;;  %v1622_v63 = vrot.slane %v7181_v20, 7  ;;  %v1624_v3 = vrot.slane %v7184_v42, 7  ;;  %5279 = vmatpush3.bf16.msra.mxu0 %v5356_v11  ;;  %v1184_v1 = vsel %vm5730_vm8, %v4977_v49, %v1183_v44 }
 0x15f   : > { %v1185_v62 = vrot.slane %v1183_v44, 4  ;;  %v1198_v38 = vor.u32 %v1197_v23, %v1194_v32  ;;  %v1621_v37 = vrot.slane %v1620_v47, 4  ;;  %5280 = vmatprep.subr.bf16.mxu0 %v5358_v6  ;;  %v1329_v29 = vmax.bf16 %v1184_v1, %v926_v22 }
 0x160   : > { %v1625_v59 = vrot.slane %v1624_v3, 4  ;;  %v1626_v31 = vrot.slane %v7201_v52, 7  ;;  %v1952_v48 = vshrl.u32 %v1509_v41, 16  ;;  %v1955_v5 = vshll.u32 %v1509_v41, 16  ;;  %v7237_v41 = vld [vmem:[%s5440_s6 + $0xb0] sm:$0x1] }
 0x161   : > { %v1199_v16 = vsel %vm5730_vm8, %v4978_v24, %v1198_v38  ;;  %v1200_v11 = vrot.slane %v1198_v38, 4  ;;  %v1330_v14 = vmax.bf16 %v1185_v62, %v927_v57  ;;  %v1623_v49 = vsel %vm5865_vm11, %v1621_v37, %v1622_v63  ;;  %v5360_v57 = vld [vmem:[%s8520_s1 + $0xe8] sm:$0xff]  }
 0x162   : > { %v1331_v23 = vmax.bf16 %v1199_v16, %v928_v25  ;;  %v7215_v44 = vmax.bf16 %v1389_v15, %v1329_v29  ;;  %v1627_v32 = vsel %vm5865_vm11, %v1625_v59, %v1626_v31  ;;  %v1954_v17 = vrot.slane %v1952_v48, 7  ;;  %5281 = vmatpush3.bf16.msra.mxu0 %v5358_v6 }
 0x163   : > { %v1332_v22 = vmax.bf16 %v1200_v11, %v929_v61  ;;  %v7219_v1 = vmax.bf16 %v1390_v36, %v1330_v14  ;;  %v1960_v24 = vshrl.u32 %v7147_v33, 16  ;;  %5282 = vmatprep.subr.bf16.mxu0 %v5359_v34  ;;  %v1963_v48 = vshll.u32 %v7147_v33, 16 }
 0x164   : > { %v7225_v16 = vmax.bf16 %v1391_v4, %v1331_v23  ;;  %v1712_v29 = vmax.bf16 %v1620_v47, %v7215_v44  ;;  %v1958_v25 = vrot.slane %v1954_v17, 4  ;;  %v1957_v59 = vor.u32 %v1955_v5, %v1954_v17  ;;  %v5361_v17 = vld [vmem:[%s8520_s1 + $0xf0] sm:$0xff]  }
 0x165   : > { %v7229_v31 = vmax.bf16 %v1392_v43, %v1332_v22  ;;  %v1713_v14 = vmax.bf16 %v1623_v49, %v7219_v1  ;;  %v1962_v36 = vrot.slane %v1960_v24, 7  ;;  %v1968_v61 = vshrl.u32 %v7184_v42, 16  ;;  %v7259_v24 = vld [vmem:[%s5440_s6 + $0xa8] sm:$0xf] }
 0x166   : > { %v1714_v6 = vmax.bf16 %v1624_v3, %v7225_v16  ;;  %v1971_v15 = vshll.u32 %v7184_v42, 16  ;;  %v1976_v4 = vshrl.u32 %v7161_v27, 16  ;;  %5283 = vmatpush3.bf16.msra.mxu0 %v5359_v34  ;;  %v1979_v33 = vshll.u32 %v7161_v27, 16  ;;  %v7245_v42 = vld [vmem:[%s5440_s6 + $0xbc] sm:$0x1] }
 0x167   : > { %v1715_v43 = vmax.bf16 %v1627_v32, %v7229_v31  ;;  %v1965_v47 = vor.u32 %v1963_v48, %v1962_v36  ;;  %v2115_v5 = vmax.bf16 %v1957_v59, %v1712_v29  ;;  %5284 = vmatprep.subr.bf16.mxu0 %v5360_v57  ;;  %v1970_v63 = vrot.slane %v1968_v61, 7 }
 0x168   : > { %v1978_v3 = vrot.slane %v1976_v4, 7  ;;  %v8834_v62 = vshrl.u32 %v7152_v9, 16  ;;  %v8835_v34 = vshll.u32 %v7152_v9, 16  ;;  %v2281_v27 = vshll.u32 %v7237_v41, 16 }
 0x169   : > { %v1966_v11 = vsel %vm5956_vm14, %v1958_v25, %v1965_v47  ;;  %v8836_v49 = vshrl.u32 %v7170_v51, 16  ;;  %v8837_v32 = vshll.u32 %v7170_v51, 16  ;;  %v1973_v29 = vor.u32 %v1971_v15, %v1970_v63  ;;  %v5362_v51 = vld [vmem:[%s8520_s1 + $0xf8] sm:$0xff]   ;;  %v7270_v15 = vld [vmem:[%s5440_s6 + $0xb4] sm:$0xf] }
 0x16a   : > { %v2276_v38 = vrot.slane %v8834_v62, 6  ;;  %v2277_v37 = vrot.slane %v8835_v34, 7  ;;  %v1974_v48 = vrot.slane %v1970_v63, 4  ;;  %v1981_v59 = vor.u32 %v1979_v33, %v1978_v3  ;;  %5285 = vmatpush3.bf16.msra.mxu0 %v5360_v57 }
 0x16b   : > { %v2285_v23 = vrot.slane %v8836_v49, 6  ;;  %v2286_v22 = vrot.slane %v8837_v32, 7  ;;  %v7261_v36 = vmax.bf16 %v1966_v11, %v1713_v14  ;;  %v2283_v61 = vrot.slane %v2281_v27, 7  ;;  %5286 = vmatprep.subr.bf16.mxu0 %v5361_v17 }
 0x16c   : > { %v2278_v9 = vor.u32 %v2277_v37, %v2276_v38  ;;  %v2290_v4 = vshll.u32 %v7245_v42, 16  ;;  %v1982_v47 = vsel %vm5956_vm14, %v1974_v48, %v1981_v59  ;;  %v2117_v62 = vmax.bf16 %v1973_v29, %v1714_v6  ;;  %v4983_v29 = vld [vmem:[%s5440_s6 + $0x48] sm:$0x8] }
 0x16d   : > { %v2287_v25 = vor.u32 %v2286_v22, %v2285_v23  ;;  %v2987_v14 = vshrl.u32 %v7259_v24, 16  ;;  %v2990_v57 = vshll.u32 %v7259_v24, 16  ;;  %v7274_v33 = vmax.bf16 %v1982_v47, %v1715_v43 }
 0x16e   : > { %v2279_v63 = vrot.slane %v2278_v9, 4  ;;  %v2292_v38 = vrot.slane %v2290_v4, 7  ;;  %v7276_v34 = vmax.bf16 %v2278_v9, %v2115_v5  ;;  %5287 = vmatpush3.bf16.msra.mxu0 %v5361_v17  ;;  %v2996_v43 = vshll.u32 %v7181_v20, 16 }
 0x16f   : > { %v2288_v3 = vrot.slane %v2287_v25, 4  ;;  %v7278_v37 = vmax.bf16 %v2287_v25, %v2117_v62  ;;  %v2989_v11 = vrot.slane %v2987_v14, 6  ;;  %v2992_v27 = vrot.slane %v2990_v57, 7  ;;  %5288 = vmatprep.subr.bf16.mxu0 %v5362_v51  ;;  %v4984_v62 = vld [vmem:[%s5440_s6 + $0x4c] sm:$0x7] }
 0x170   : > { %v7282_v6 = vsel %vm6062_vm1, %v2279_v63, %v2283_v61  ;;  %v3001_v23 = vshrl.u32 %v7270_v15, 16  ;;  %v3004_v22 = vshll.u32 %v7270_v15, 16  ;;  %v2998_v48 = vrot.slane %v2996_v43, 7  ;;  %v4985_v14 = vld [vmem:[%s5440_s6 + $0x54] sm:$0x8] }
 0x171   : > { %v7286_v49 = vsel %vm6062_vm1, %v2288_v3, %v2292_v38  ;;  %v2399_v5 = vmax.bf16 %v7282_v6, %v7261_v36  ;;  %v7294_v32 = vor.u32 %v2992_v27, %v2989_v11  ;;  %v3010_v20 = vshll.u32 %v7201_v52, 16  ;;  %v4987_v11 = vld [vmem:[%s5440_s6 + $0x60] sm:$0x8] }
 0x172   : > { %v2401_v17 = vmax.bf16 %v7286_v49, %v7274_v33  ;;  %v3003_v59 = vrot.slane %v3001_v23, 6  ;;  %v3659_v9 = vmax.bf16 %v6457_v13, %v8832_v28  ;;  %v3006_v25 = vrot.slane %v3004_v22, 7  ;;  %5289 = vmatpush3.bf16.msra.mxu0 %v5362_v51  ;;  %v4986_v28 = vld [vmem:[%s5440_s6 + $0x58] sm:$0x7] }
 0x173   : > { %v2994_v61 = vrot.slane %v7294_v32, 4  ;;  %v3660_v4 = vmax.bf16 %v6460_v56, %v8833_v54  ;;  %v3661_v47 = vmax.bf16 %v6995_v10, %v6457_v13  ;;  %v3012_v57 = vrot.slane %v3010_v20, 7 }
 0x174   : > { %v3662_v52 = vmax.bf16 %v6997_v45, %v6460_v56  ;;  %v3675_v63 = vmax.bf16 %v3659_v9, %v6995_v10  ;;  %v4999_v3 = vrot.slane %v4983_v29, 11  ;;  %v7316_v54 = vor.u32 %v3006_v25, %v3003_v59  ;;  %v4989_v9 = vld [vmem:[%s5440_s6 + $0x6c] sm:$0x8] }
 0x175   : > { %v7314_v38 = vsel %vm6062_vm1, %v2994_v61, %v2998_v48  ;;  %v3676_v13 = vmax.bf16 %v3660_v4, %v6997_v45  ;;  %v3677_v51 = vmax.bf16 %v3661_v47, %v7002_v30  ;;  %v4049_v27 = vrot.slane %v4984_v62, 7  ;;  %v4988_v45 = vld [vmem:[%s5440_s6 + $0x64] sm:$0x7]  ;;  %v4990_v61 = vld [vmem:[%s5440_s6 + $0x70] sm:$0x7] }
 0x176   : > { %v3678_v56 = vmax.bf16 %v3662_v52, %v7006_v0  ;;  %v3691_v10 = vmax.bf16 %v3675_v63, %v7002_v30  ;;  %v5000_v43 = vrot.slane %v4985_v14, 11  ;;  %v3008_v23 = vrot.slane %v7316_v54, 4  ;;  %v4992_v14 = vld [vmem:[%s5440_s6 + $0x7c] sm:$0x7] }
 0x177   : > { %v3692_v22 = vmax.bf16 %v3676_v13, %v7006_v0  ;;  %v3693_v29 = vmax.bf16 %v3677_v51, %v7215_v44  ;;  %v4053_v48 = vrot.slane %v4986_v28, 7  ;;  %v4050_v30 = vsel %vm5865_vm11, %v4999_v3, %v4049_v27  ;;  %v4993_v13 = vld [vmem:[%s5440_s6 + $0x84] sm:$0x8]  ;;  %v4994_v51 = vld [vmem:[%s5440_s6 + $0x88] sm:$0x7] }
 0x178   : > { %v3694_v59 = vmax.bf16 %v3678_v56, %v7219_v1  ;;  %v3707_v20 = vmax.bf16 %v3691_v10, %v7215_v44  ;;  %v5001_v25 = vrot.slane %v4987_v11, 11  ;;  %v7335_v4 = vsel %vm6062_vm1, %v3008_v23, %v3012_v57  ;;  %v4991_v44 = vld [vmem:[%s5440_s6 + $0x78] sm:$0x8] }
 0x179   : > { %v3708_v0 = vmax.bf16 %v3692_v22, %v7219_v1  ;;  %v3709_v47 = vmax.bf16 %v3693_v29, %v7225_v16  ;;  %v4054_v62 = vsel %vm5865_vm11, %v5000_v43, %v4053_v48  ;;  %v4057_v3 = vrot.slane %v4988_v45, 7  ;;  %v2424_v1 = vld [vmem:[%s5440_s6 + $0xac] sm:$0xe]  ;;  %v2425_v22 = vld [vmem:[%s5440_s6 + $0xb8] sm:$0xe] }
 0x17a   : > { %v3710_v52 = vmax.bf16 %v3694_v59, %v7229_v31  ;;  %v5013_v63 = vrot.slane %v3707_v20, 10  ;;  %v5043_v28 = vcombine.low %v4050_v30, %v4054_v62  ;;  %v5002_v56 = vrot.slane %v4989_v9, 11 }
 0x17b   : > { %v4140_v57 = vrot.slane %v3708_v0, 6  ;;  %v5014_v11 = vrot.slane %v3709_v47, 10  ;;  %v4061_v10 = vrot.slane %v4990_v61, 7  ;;  %v4058_v16 = vsel %vm5865_vm11, %v5001_v25, %v4057_v3 }
 0x17c   : > { %v4144_v27 = vrot.slane %v3710_v52, 6  ;;  %v5003_v43 = vrot.slane %v4991_v44, 11  ;;  %v4065_v23 = vrot.slane %v4992_v14, 7  ;;  %v5004_v48 = vrot.slane %v4993_v13, 11 }
 0x17d   : > { %v4141_v31 = vsel %vm6395_vm6, %v5013_v63, %v4140_v57  ;;  %v4062_v29 = vsel %vm5865_vm11, %v5002_v56, %v4061_v10  ;;  %v4069_v45 = vrot.slane %v4994_v51, 7  ;;  %v2526_v9 = vrot.slane %v2424_v1, 7  ;;  %v3164_v57 = vld [vmem:[%s5440_s6 + $0xb0] sm:$0x3] }
 0x17e   : > { %v4145_v59 = vsel %vm6395_vm6, %v5014_v11, %v4144_v27  ;;  %v5044_v20 = vcombine.low %v4058_v16, %v4062_v29  ;;  %v4066_v30 = vsel %vm5865_vm11, %v5003_v43, %v4065_v23  ;;  %v2528_v0 = vrot.slane %v7237_v41, 7  ;;  %v3165_v16 = vld [vmem:[%s5440_s6 + $0xbc] sm:$0x3] }
 0x17f   : > { %v5034_v61 = vcombine.low %v4141_v31, %v4145_v59  ;;  %v4070_v25 = vsel %vm5865_vm11, %v5004_v48, %v4069_v45  ;;  %v2530_v47 = vrot.slane %v2425_v22, 7  ;;  %v2527_v44 = vrot.slane %v2526_v9, 4 }
 0x180   : > { %v5045_v62 = vcombine.low %v4066_v30, %v4070_v25  ;;  %v2532_v14 = vrot.slane %v7245_v42, 7  ;;  %v7363_v52 = vmax.bf16 %v2526_v9, %v7276_v34  ;;  %v2698_v13 = vrot.slane %v7259_v24, 6 }
 0x181   : > { %5223 = vmatmul.mubr.bf16.gmra.mrb[4].mxu1 %v5034_v61  ;;  %v2531_v63 = vrot.slane %v2530_v47, 4  ;;  %v7366_v3 = vmax.bf16 %v2530_v47, %v7278_v37  ;;  %v2700_v51 = vrot.slane %v7270_v15, 6  ;;  %v2529_v41 = vsel %vm5865_vm11, %v2527_v44, %v2528_v0  ;;  %v3584_v61 = vld [vmem:[%s5440_s6 + $0xac] sm:$0xc] }
 0x182   : > { %5242 = vmatprep.mubr.bf16.mxu1 %v5043_v28  ;;  %v3831_v42 = vmax.bf16 %v7051_v60, %v7363_v52  ;;  %v3395_v34 = vshrl.u32 %v2424_v1, 16  ;;  %v3398_v11 = vshll.u32 %v2424_v1, 16  ;;  %v7380_v24 = vmax.bf16 %v2529_v41, %v2399_v5  ;;  %v4997_v41 = vld [vmem:[%s5440_s6 + $0x9c] sm:$0x8] }
 0x183   : > { %v2533_v56 = vsel %vm5865_vm11, %v2531_v63, %v2532_v14  ;;  %v2699_v15 = vrot.slane %v2698_v13, 4  ;;  %v2701_v37 = vrot.slane %v2700_v51, 4  ;;  %v2778_v60 = vmax.bf16 %v2698_v13, %v7363_v52  ;;  %v4995_v13 = vld [vmem:[%s5440_s6 + $0x90] sm:$0x8] }
 0x184   : > { %v7385_v28 = vmax.bf16 %v2533_v56, %v2401_v17  ;;  %v2780_v10 = vmax.bf16 %v2700_v51, %v7366_v3  ;;  %v3397_v1 = vrot.slane %v3395_v34, 7  ;;  %v3403_v43 = vshrl.u32 %v3164_v57, 16  ;;  %v4996_v51 = vld [vmem:[%s5440_s6 + $0x94] sm:$0x7] }
 0x185   : > { %v2779_v27 = vmax.bf16 %v2699_v15, %v7380_v24  ;;  %v3406_v36 = vshll.u32 %v3164_v57, 16  ;;  %v3411_v6 = vshrl.u32 %v2425_v22, 16  ;;  %v3138_v23 = vmax.bf16 %v7294_v32, %v2778_v60  ;;  %v8842_v57 = vld [vmem:[#allocation43_spill] sm:$0xff] }
 0x186   : > { %v2781_v5 = vmax.bf16 %v2701_v37, %v7385_v28  ;;  %v3140_v33 = vmax.bf16 %v7316_v54, %v2780_v10  ;;  %v3400_v49 = vor.u32 %v3398_v11, %v3397_v1  ;;  %v3401_v31 = vrot.slane %v3397_v1, 4  ;;  %v4998_v10 = vld [vmem:[%s5440_s6 + $0xa0] sm:$0x7] }
 0x187   : > { %v7395_v17 = vmax.bf16 %v7314_v38, %v2779_v27  ;;  %v3405_v29 = vrot.slane %v3403_v43, 7  ;;  %v3413_v48 = vrot.slane %v3411_v6, 7  ;;  %v3414_v59 = vshll.u32 %v2425_v22, 16  ;;  %v204_v43 = vld [vmem:[%s5440_s6 + $0xc0] sm:$0xc] }
 0x188   : > { %v7398_v45 = vmax.bf16 %v7335_v4, %v2781_v5  ;;  %v3419_v30 = vshrl.u32 %v3165_v16, 16  ;;  %v3422_v9 = vshll.u32 %v3165_v16, 16  ;;  %v3558_v54 = vmax.bf16 %v3400_v49, %v3138_v23 }
 0x189   : > { %8838 = vst [vmem:[#allocation10_spill] sm:$0xff] %v7395_v17  ;;  %5243 = vmatmul.mubr.bf16.vlgmr.msra.gmra.mrb[0].mxu1 %v5044_v20  ;;  %v3408_v25 = vor.u32 %v3406_v36, %v3405_v29  ;;  %v3417_v32 = vrot.slane %v3413_v48, 4  ;;  %v3720_v38 = vmax.bf16 %v6744_v35, %v6737_v46  ;;  %v3416_v0 = vor.u32 %v3414_v59, %v3413_v48  ;;  %v7438_v36 = vld [vmem:[%s5440_s6 + $0xc4] sm:$0x7] }
 0x18a   : > { %8839 = vst [vmem:[#allocation9_spill] sm:$0xff] %v7398_v45  ;;  %5246 = vmatprep.mubr.bf16.mxu1 %v5045_v62  ;;  %v3421_v47 = vrot.slane %v3419_v30, 7  ;;  %v3722_v4 = vmax.bf16 %v6749_v12, %v6744_v35  ;;  %v7409_v20 = vmax.bf16 %v3584_v61, %v3558_v54  ;;  %v7412_v14 = vrot.slane %v3831_v42, 10  ;;  %v8847_v29 = vld [vmem:[#allocation50_spill] sm:$0xff] }
 0x18b   : > { %v7407_v22 = vsel %vm5956_vm14, %v3401_v31, %v3408_v25  ;;  %v3736_v44 = vmax.bf16 %v3720_v38, %v6749_v12  ;;  %v7416_v63 = vmax.bf16 %v3416_v0, %v3140_v33  ;;  %v5005_v5 = vrot.slane %v4995_v13, 11 }
 0x18c   : > { %8840 = vst [vmem:[#allocation11_spill] sm:$0xff] %v7407_v22  ;;  %v3424_v46 = vor.u32 %v3422_v9, %v3421_v47  ;;  %v3738_v27 = vmax.bf16 %v3722_v4, %v8778_v7  ;;  %v4073_v23 = vrot.slane %v4996_v51, 7  ;;  %v5006_v33 = vrot.slane %v4997_v41, 11  ;;  %v206_v47 = vld [vmem:[%s5440_s6 + $0xcc] sm:$0xc] }
 0x18d   : > { %8841 = vst [vmem:[#allocation44_spill] sm:$0xff] %v7416_v63  ;;  %v3752_v16 = vmax.bf16 %v3736_v44, %v8778_v7  ;;  %v3769_v48 = vmax.bf16 %v8847_v29, %v6765_v53  ;;  %v4077_v59 = vrot.slane %v4998_v10, 7  ;;  %v540_v9 = vshrl.u32 %v204_v43, 16  ;;  %v229_v4 = vld [vmem:[%s5440_s6 + $0xd0] sm:$0x7] }
 0x18e   : > { %v7432_v1 = vsel %vm5956_vm14, %v3417_v32, %v3424_v46  ;;  %v3754_v49 = vmax.bf16 %v3738_v27, %v6754_v8  ;;  %v4074_v30 = vsel %vm5865_vm11, %v5005_v5, %v4073_v23  ;;  %v543_v61 = vshll.u32 %v204_v43, 16 }
 0x18f   : > { %8846 = vst [vmem:[#allocation45_spill] sm:$0xff] %v7432_v1  ;;  %v3768_v31 = vmax.bf16 %v3752_v16, %v6754_v8  ;;  %v549_v25 = vshll.u32 %v7438_v36, 16  ;;  %v3785_v38 = vmax.bf16 %v3769_v48, %v7030_v18  ;;  %v4078_v0 = vsel %vm5865_vm11, %v5006_v33, %v4077_v59 }
 0x190   : > { %v3770_v32 = vmax.bf16 %v3754_v49, %v6768_v26  ;;  %v5046_v44 = vcombine.low %v4074_v30, %v4078_v0  ;;  %v542_v46 = vrot.slane %v540_v9, 4  ;;  %v545_v13 = vrot.slane %v543_v61, 5  ;;  %v711_v30 = vld [vmem:[%s5440_s6 + $0xc0] sm:$0x8] }
 0x191   : > { %v3784_v54 = vmax.bf16 %v3768_v31, %v6768_v26  ;;  %v551_v51 = vrot.slane %v549_v25, 5  ;;  %v3801_v27 = vmax.bf16 %v3785_v38, %v7042_v2  ;;  %v553_v16 = vshrl.u32 %v7438_v36, 16 }
 0x192   : > { %v3786_v41 = vmax.bf16 %v3770_v32, %v7040_v39  ;;  %5247 = vmatmul.mubr.bf16.gmra.mrb[4].mxu1 %v5046_v44  ;;  %v546_v5 = vor.u32 %v545_v13, %v542_v46  ;;  %v559_v23 = vshrl.u32 %v206_v47, 16  ;;  %v562_v33 = vshll.u32 %v206_v47, 16  ;;  %v7468_v46 = vld [vmem:[%s5440_s6 + $0xc4] sm:$0x3] }
 0x193   : > { %v3800_v10 = vmax.bf16 %v3784_v54, %v7040_v39  ;;  %v568_v49 = vshll.u32 %v229_v4, 16  ;;  %v3817_v48 = vmax.bf16 %v3801_v27, %v7363_v52  ;;  %v555_v59 = vrot.slane %v553_v16, 4  ;;  %v712_v16 = vld [vmem:[%s5440_s6 + $0xcc] sm:$0x8] }
 0x194   : > { %v3802_v31 = vmax.bf16 %v3786_v41, %v7053_v19  ;;  %v547_v9 = vrot.slane %v546_v5, 4  ;;  %v561_v61 = vrot.slane %v559_v23, 4  ;;  %v564_v25 = vrot.slane %v562_v33, 5 }
 0x195   : > { %v3816_v29 = vmax.bf16 %v3800_v10, %v7053_v19  ;;  %v570_v32 = vrot.slane %v568_v49, 5  ;;  %v3833_v0 = vmax.bf16 %v3817_v48, %v7366_v3  ;;  %v556_v44 = vor.u32 %v555_v59, %v551_v51 }
 0x196   : > { %v3818_v54 = vmax.bf16 %v3802_v31, %v7380_v24  ;;  %v552_v41 = vsel %vm5487_vm2, %v547_v9, %v551_v51  ;;  %v565_v10 = vor.u32 %v564_v25, %v561_v61  ;;  %v572_v27 = vshrl.u32 %v229_v4, 16 }
 0x197   : > { %v3832_v38 = vmax.bf16 %v3816_v29, %v7380_v24  ;;  %v4959_v6 = vrot.slane %v711_v30, 9  ;;  %v5060_v33 = vrot.slane %v3833_v0, 10  ;;  %v557_v49 = vrot.slane %v556_v44, 4 }
 0x198   : > { %v3834_v5 = vmax.bf16 %v3818_v54, %v7385_v28  ;;  %v566_v31 = vrot.slane %v565_v10, 4  ;;  %v574_v29 = vrot.slane %v572_v27, 4  ;;  %v687_v48 = vmax.bf16 %v552_v41, %v204_v43  ;;  %v7484_v43 = vld [vmem:[%s5440_s6 + $0xc4] sm:$0xf]  ;;  %v7489_v41 = vld [vmem:[%s5440_s6 + $0xd0] sm:$0x3] }
 0x199   : > { %v4455_v23 = vrot.slane %v3832_v38, 6  ;;  %v840_v59 = vrot.slane %v7438_v36, 5  ;;  %v688_v61 = vmax.bf16 %v557_v49, %v7468_v46  ;;  %v4960_v25 = vrot.slane %v712_v16, 9 }
 0x19a   : > { %v4459_v9 = vrot.slane %v3834_v5, 6  ;;  %v571_v54 = vsel %vm5487_vm2, %v566_v31, %v570_v32  ;;  %v575_v38 = vor.u32 %v574_v29, %v570_v32  ;;  %v845_v27 = vrot.slane %v229_v4, 5  ;;  %v7492_v32 = vld [vmem:[%s5440_s6 + $0xd0] sm:$0xf] }
 0x19b   : > { %v4456_v51 = vsel %vm6395_vm6, %v7412_v14, %v4455_v23  ;;  %v841_v44 = vsel %vm5612_vm5, %v4959_v6, %v840_v59  ;;  %v842_v10 = vrot.slane %v840_v59, 4  ;;  %v689_v14 = vmax.bf16 %v571_v54, %v206_v47  ;;  %v7501_v54 = vld [vmem:[%s5440_s6 + $0xc4] sm:$0x1] }
 0x19c   : > { %v4460_v36 = vsel %vm6395_vm6, %v5060_v33, %v4459_v9  ;;  %v930_v5 = vmax.bf16 %v841_v44, %v687_v48  ;;  %v576_v49 = vrot.slane %v575_v38, 4  ;;  %v1202_v29 = vshrl.u32 %v711_v30, 16 }
 0x19d   : > { %v5081_v23 = vcombine.low %v4456_v51, %v4460_v36  ;;  %v931_v31 = vmax.bf16 %v842_v10, %v688_v61  ;;  %v846_v6 = vsel %vm5612_vm5, %v4960_v25, %v845_v27  ;;  %v847_v59 = vrot.slane %v845_v27, 4  ;;  %v1513_v61 = vld [vmem:[%s5440_s6 + $0xc0] sm:$0xe]  ;;  %v1515_v10 = vld [vmem:[%s5440_s6 + $0xcc] sm:$0xe] }
 0x19e   : > { %v8650_v33 = vshrl.u32 %v7484_v43, 16  ;;  %v8649_v9 = vshll.u32 %v7484_v43, 16  ;;  %v690_v47 = vmax.bf16 %v576_v49, %v7489_v41  ;;  %v932_v4 = vmax.bf16 %v846_v6, %v689_v14  ;;  %v7513_v6 = vld [vmem:[%s5440_s6 + $0xd0] sm:$0x1] }
 0x19f   : > { %5270 = vmatprep.mubr.bf16.mxu0 %v5081_v23  ;;  %v4979_v48 = vrot.slane %v1202_v29, 9  ;;  %v1217_v51 = vshrl.u32 %v712_v16, 16  ;;  %v1222_v38 = vshrl.u32 %v7492_v32, 16  ;;  %v1225_v44 = vshll.u32 %v7492_v32, 16 }
 0x1a0   : > { %v1209_v30 = vrot.slane %v8650_v33, 5  ;;  %v1212_v25 = vrot.slane %v8649_v9, 6  ;;  %v933_v36 = vmax.bf16 %v847_v59, %v690_v47  ;;  %v1393_v14 = vrot.slane %v7484_v43, 6 }
 0x1a1   : > { %v4980_v27 = vrot.slane %v1217_v51, 9  ;;  %v1395_v16 = vrot.slane %v7492_v32, 6  ;;  %v1224_v49 = vrot.slane %v1222_v38, 5  ;;  %v1227_v29 = vrot.slane %v1225_v44, 6 }
 0x1a2   : > { %v1213_v23 = vor.u32 %v1212_v25, %v1209_v30  ;;  %v1628_v62 = vrot.slane %v1513_v61, 7  ;;  %v1394_v60 = vrot.slane %v1393_v14, 4  ;;  %v1630_v56 = vrot.slane %v7501_v54, 7 }
 0x1a3   : > { %v1396_v42 = vrot.slane %v1395_v16, 4  ;;  %v1632_v34 = vrot.slane %v1515_v10, 7  ;;  %v1228_v47 = vor.u32 %v1227_v29, %v1224_v49  ;;  %v1634_v32 = vrot.slane %v7513_v6, 7 }
 0x1a4   : > { %v1214_v9 = vsel %vm5730_vm8, %v4979_v48, %v1213_v23  ;;  %v1215_v59 = vrot.slane %v1213_v23, 4  ;;  %v1629_v51 = vrot.slane %v1628_v62, 4  ;;  %v1984_v30 = vshrl.u32 %v1513_v61, 16 }
 0x1a5   : > { %v1333_v33 = vmax.bf16 %v1214_v9, %v930_v5  ;;  %v1633_v45 = vrot.slane %v1632_v34, 4  ;;  %v1229_v25 = vsel %vm5730_vm8, %v4980_v27, %v1228_v47  ;;  %v1230_v1 = vrot.slane %v1228_v47, 4 }
 0x1a6   : > { %v1334_v63 = vmax.bf16 %v1215_v59, %v931_v31  ;;  %v1631_v17 = vsel %vm5865_vm11, %v1629_v51, %v1630_v56  ;;  %v1335_v22 = vmax.bf16 %v1229_v25, %v932_v4  ;;  %v1986_v23 = vrot.slane %v1984_v30, 7  ;;  %v7538_v30 = vld [vmem:[%s5440_s6 + $0xc4] sm:$0xe] }
 0x1a7   : > { %v1473_v37 = vmax.bf16 %v1393_v14, %v1333_v33  ;;  %v1635_v48 = vsel %vm5865_vm11, %v1633_v45, %v1634_v32  ;;  %v1336_v49 = vmax.bf16 %v1230_v1, %v933_v36  ;;  %v1987_v9 = vshll.u32 %v1513_v61, 16 }
 0x1a8   : > { %v1474_v5 = vmax.bf16 %v1394_v60, %v1334_v63  ;;  %v1992_v29 = vshrl.u32 %v7468_v46, 16  ;;  %v1475_v15 = vmax.bf16 %v1395_v16, %v1335_v22  ;;  %v1990_v27 = vrot.slane %v1986_v23, 4  ;;  %v2143_v63 = vld [vmem:[%s5440_s6 + $0xc8] sm:$0x1] }
 0x1a9   : > { %v1716_v11 = vmax.bf16 %v1628_v62, %v1473_v37  ;;  %v1995_v31 = vshll.u32 %v7468_v46, 16  ;;  %v1476_v59 = vmax.bf16 %v1396_v42, %v1336_v49  ;;  %v1989_v4 = vor.u32 %v1987_v9, %v1986_v23  ;;  %v2144_v46 = vld [vmem:[%s5440_s6 + $0xd4] sm:$0x1] }
 0x1aa   : > { %v1717_v56 = vmax.bf16 %v1631_v17, %v1474_v5  ;;  %v1994_v33 = vrot.slane %v1992_v29, 7  ;;  %v1718_v14 = vmax.bf16 %v1632_v34, %v1475_v15  ;;  %v2000_v47 = vshrl.u32 %v1515_v10, 16  ;;  %v7541_v29 = vld [vmem:[%s5440_s6 + $0xd0] sm:$0xe] }
 0x1ab   : > { %v2003_v45 = vshll.u32 %v1515_v10, 16  ;;  %v2008_v1 = vshrl.u32 %v7489_v41, 16  ;;  %v1719_v60 = vmax.bf16 %v1635_v48, %v1476_v59  ;;  %v2011_v22 = vshll.u32 %v7489_v41, 16 }
 0x1ac   : > { %v1997_v61 = vor.u32 %v1995_v31, %v1994_v33  ;;  %v2119_v62 = vmax.bf16 %v1989_v4, %v1716_v11  ;;  %v2002_v37 = vrot.slane %v2000_v47, 7  ;;  %v8850_v42 = vshrl.u32 %v7484_v43, 16 }
 0x1ad   : > { %v2010_v36 = vrot.slane %v2008_v1, 7  ;;  %v8851_v34 = vshll.u32 %v7484_v43, 16  ;;  %v2299_v16 = vshll.u32 %v2143_v63, 16  ;;  %v2303_v51 = vrot.slane %v1222_v38, 6 }
 0x1ae   : > { %v2294_v17 = vrot.slane %v8850_v42, 6  ;;  %v1998_v10 = vsel %vm5956_vm14, %v1990_v27, %v1997_v61  ;;  %v2304_v32 = vrot.slane %v1225_v44, 7  ;;  %v2005_v41 = vor.u32 %v2003_v45, %v2002_v37  ;;  %v2646_v61 = vld [vmem:[%s5440_s6 + $0xc0] sm:$0xf] }
 0x1af   : > { %v2295_v15 = vrot.slane %v8851_v34, 7  ;;  %v2006_v11 = vrot.slane %v2002_v37, 4  ;;  %v2013_v25 = vor.u32 %v2011_v22, %v2010_v36  ;;  %v2120_v48 = vmax.bf16 %v1998_v10, %v1717_v56 }
 0x1b0   : > { %v2301_v49 = vrot.slane %v2299_v16, 7  ;;  %v2305_v5 = vor.u32 %v2304_v32, %v2303_v51  ;;  %v2308_v9 = vshll.u32 %v2144_v46, 16  ;;  %v2121_v27 = vmax.bf16 %v2005_v41, %v1718_v14 }
 0x1b1   : > { %v2296_v23 = vor.u32 %v2295_v15, %v2294_v17  ;;  %v2014_v43 = vsel %vm5956_vm14, %v2006_v11, %v2013_v25  ;;  %v2534_v38 = vrot.slane %v7538_v30, 7  ;;  %v2536_v44 = vrot.slane %v2143_v63, 7 }
 0x1b2   : > { %v2122_v31 = vmax.bf16 %v2014_v43, %v1719_v60  ;;  %v2306_v4 = vrot.slane %v2305_v5, 4  ;;  %v2310_v33 = vrot.slane %v2308_v9, 7  ;;  %v2404_v47 = vmax.bf16 %v2305_v5, %v2121_v27 }
 0x1b3   : > { %v2297_v59 = vrot.slane %v2296_v23, 4  ;;  %v2402_v56 = vmax.bf16 %v2296_v23, %v2119_v62  ;;  %v2535_v45 = vrot.slane %v2534_v38, 4  ;;  %v2538_v1 = vrot.slane %v7541_v29, 7  ;;  %v2647_v62 = vld [vmem:[%s5440_s6 + $0xcc] sm:$0xf] }
 0x1b4   : > { %v2311_v14 = vsel %vm6062_vm1, %v2306_v4, %v2310_v33  ;;  %v2540_v37 = vrot.slane %v2144_v46, 7  ;;  %v2702_v36 = vrot.slane %v2646_v61, 6  ;;  %v2704_v16 = vrot.slane %v2647_v62, 6 }
 0x1b5   : > { %v2302_v22 = vsel %vm6062_vm1, %v2297_v59, %v2301_v49  ;;  %v2405_v60 = vmax.bf16 %v2311_v14, %v2122_v31  ;;  %v2537_v42 = vsel %vm5865_vm11, %v2535_v45, %v2536_v44  ;;  %v2539_v17 = vrot.slane %v2538_v1, 4 }
 0x1b6   : > { %v2403_v63 = vmax.bf16 %v2302_v22, %v2120_v48  ;;  %v7555_v34 = vmax.bf16 %v2534_v38, %v2402_v56  ;;  %v7557_v15 = vmax.bf16 %v2538_v1, %v2404_v47  ;;  %v2703_v10 = vrot.slane %v2702_v36, 4 }
 0x1b7   : > { %v2541_v51 = vsel %vm5865_vm11, %v2539_v17, %v2540_v37  ;;  %v3015_v46 = vshrl.u32 %v2646_v61, 16  ;;  %v3018_v41 = vshll.u32 %v2646_v61, 16  ;;  %v2705_v25 = vrot.slane %v2704_v16, 4 }
 0x1b8   : > { %v7561_v32 = vmax.bf16 %v2537_v42, %v2403_v63  ;;  %v7563_v11 = vmax.bf16 %v2541_v51, %v2405_v60  ;;  %v7566_v48 = vmax.bf16 %v2702_v36, %v7555_v34  ;;  %v7569_v23 = vmax.bf16 %v2704_v16, %v7557_v15  ;;  %v8856_v63 = vld [vmem:[#allocation20_spill] sm:$0xff]  ;;  %v8857_v60 = vld [vmem:[#allocation21_spill] sm:$0xff] }
 0x1b9   : > { %v3017_v5 = vrot.slane %v3015_v46, 6  ;;  %v3020_v9 = vrot.slane %v3018_v41, 7  ;;  %v3024_v43 = vshll.u32 %v7501_v54, 16  ;;  %v3029_v38 = vshrl.u32 %v2647_v62, 16  ;;  %v8858_v16 = vld [vmem:[#allocation49_spill] sm:$0xff] }
 0x1ba   : > { %8852 = vst [vmem:[#allocation43_spill] sm:$0xff] %v7566_v48  ;;  %8853 = vst [vmem:[#allocation50_spill] sm:$0xff] %v7569_v23  ;;  %v2783_v49 = vmax.bf16 %v2703_v10, %v7561_v32  ;;  %v2785_v27 = vmax.bf16 %v2705_v25, %v7563_v11  ;;  %v3032_v44 = vshll.u32 %v2647_v62, 16  ;;  %v3038_v31 = vshll.u32 %v7513_v6, 16  ;;  %v172_v41 = vld [vmem:[%s5440_s6] sm:$0xc] }
 0x1bb   : > { %v7575_v59 = vor.u32 %v3020_v9, %v3017_v5  ;;  %v3026_v4 = vrot.slane %v3024_v43, 7  ;;  %v3427_v33 = vshrl.u32 %v7538_v30, 16  ;;  %v3031_v47 = vrot.slane %v3029_v38, 6  ;;  %v7603_v25 = vld [vmem:[%s5440_s6 + $0x4] sm:$0x7] }
 0x1bc   : > { %v3034_v45 = vrot.slane %v3032_v44, 7  ;;  %v3040_v1 = vrot.slane %v3038_v31, 7  ;;  %v3443_v54 = vshrl.u32 %v7541_v29, 16  ;;  %v3723_v42 = vmax.bf16 %v8857_v60, %v8856_v63 }
 0x1bd   : > { %8854 = vst [vmem:[#allocation59_spill] sm:$0xff] %v7575_v59  ;;  %v3022_v61 = vrot.slane %v7575_v59, 4  ;;  %v7583_v6 = vrot.slane %v3427_v33, 7  ;;  %v3724_v17 = vmax.bf16 %v8778_v7, %v6749_v12  ;;  %v3725_v51 = vmax.bf16 %v8858_v16, %v8857_v60 }
 0x1be   : > { %v7586_v37 = vor.u32 %v3034_v45, %v3031_v47  ;;  %v7588_v36 = vrot.slane %v3443_v54, 7  ;;  %v3726_v46 = vmax.bf16 %v6754_v8, %v8778_v7  ;;  %v3739_v44 = vmax.bf16 %v3723_v42, %v8858_v16 }
 0x1bf   : > { %v3027_v62 = vsel %vm6062_vm1, %v3022_v61, %v3026_v4  ;;  %v3740_v31 = vmax.bf16 %v3724_v17, %v6754_v8  ;;  %v3741_v4 = vmax.bf16 %v3725_v51, %v6765_v53  ;;  %v236_v45 = vshrl.u32 %v172_v41, 16  ;;  %v174_v17 = vld [vmem:[%s5440_s6 + $0xc] sm:$0xc] }
 0x1c0   : > { %8855 = vst [vmem:[#allocation60_spill] sm:$0xff] %v7586_v37  ;;  %v3036_v5 = vrot.slane %v7586_v37, 4  ;;  %v7606_v9 = vmax.bf16 %v3027_v62, %v2783_v49  ;;  %v3742_v33 = vmax.bf16 %v3726_v46, %v6768_v26  ;;  %v239_v54 = vshll.u32 %v172_v41, 16 }
 0x1c1   : > { %v245_v49 = vshll.u32 %v7603_v25, 16  ;;  %v3755_v63 = vmax.bf16 %v3739_v44, %v6765_v53  ;;  %v3756_v60 = vmax.bf16 %v3740_v31, %v6768_v26  ;;  %v3757_v42 = vmax.bf16 %v3741_v4, %v7030_v18 }
 0x1c2   : > { %8859 = vst [vmem:[#allocation20_spill] sm:$0xff] %v7606_v9  ;;  %v3041_v47 = vsel %vm6062_vm1, %v3036_v5, %v3040_v1  ;;  %v3758_v62 = vmax.bf16 %v3742_v33, %v7040_v39  ;;  %v238_v51 = vrot.slane %v236_v45, 4  ;;  %v241_v46 = vrot.slane %v239_v54, 5  ;;  %v213_v54 = vld [vmem:[%s5440_s6 + $0x10] sm:$0x7] }
 0x1c3   : > { %v7618_v61 = vmax.bf16 %v3041_v47, %v2785_v27  ;;  %v247_v38 = vrot.slane %v245_v49, 5  ;;  %v3771_v1 = vmax.bf16 %v3755_v63, %v7030_v18  ;;  %v3772_v5 = vmax.bf16 %v3756_v60, %v7040_v39 }
 0x1c4   : > { %v3773_v27 = vmax.bf16 %v3757_v42, %v7042_v2  ;;  %v249_v47 = vshrl.u32 %v7603_v25, 16  ;;  %v3774_v44 = vmax.bf16 %v3758_v62, %v7053_v19  ;;  %v242_v31 = vor.u32 %v241_v46, %v238_v51 }
 0x1c5   : > { %8860 = vst [vmem:[#allocation21_spill] sm:$0xff] %v7618_v61  ;;  %v255_v43 = vshrl.u32 %v174_v17, 16  ;;  %v258_v4 = vshll.u32 %v174_v17, 16  ;;  %v3787_v10 = vmax.bf16 %v3771_v1, %v7042_v2  ;;  %v3788_v33 = vmax.bf16 %v3772_v5, %v7053_v19 }
 0x1c6   : > { %v3789_v45 = vmax.bf16 %v3773_v27, %v7363_v52  ;;  %v251_v49 = vrot.slane %v249_v47, 4  ;;  %v3790_v63 = vmax.bf16 %v3774_v44, %v7380_v24  ;;  %v243_v60 = vrot.slane %v242_v31, 4 }
 0x1c7   : > { %v257_v42 = vrot.slane %v255_v43, 4  ;;  %v260_v22 = vrot.slane %v258_v4, 5  ;;  %v3803_v14 = vmax.bf16 %v3787_v10, %v7363_v52  ;;  %v3804_v62 = vmax.bf16 %v3788_v33, %v7380_v24  ;;  %v7645_v52 = vld [vmem:[%s5440_s6 + $0x4] sm:$0x3] }
 0x1c8   : > { %v3805_v51 = vmax.bf16 %v3789_v45, %v7366_v3  ;;  %v252_v46 = vor.u32 %v251_v49, %v247_v38  ;;  %v3806_v1 = vmax.bf16 %v3790_v63, %v7385_v28  ;;  %v248_v5 = vsel %vm5487_vm2, %v243_v60, %v247_v38 }
 0x1c9   : > { %v261_v27 = vor.u32 %v260_v22, %v257_v42  ;;  %v264_v47 = vshll.u32 %v213_v54, 16  ;;  %v3819_v44 = vmax.bf16 %v3803_v14, %v7366_v3  ;;  %v3820_v43 = vmax.bf16 %v3804_v62, %v7385_v28  ;;  %v695_v28 = vld [vmem:[%s5440_s6] sm:$0x8]  ;;  %v696_v62 = vld [vmem:[%s5440_s6 + $0xc] sm:$0x8] }
 0x1ca   : > { %v3821_v31 = vmax.bf16 %v3805_v51, %v7555_v34  ;;  %v253_v24 = vrot.slane %v252_v46, 4  ;;  %v3822_v10 = vmax.bf16 %v3806_v1, %v7561_v32  ;;  %v268_v45 = vshrl.u32 %v213_v54, 16 }
 0x1cb   : > { %v262_v4 = vrot.slane %v261_v27, 4  ;;  %v266_v33 = vrot.slane %v264_v47, 5  ;;  %v3835_v38 = vmax.bf16 %v3819_v44, %v7555_v34  ;;  %v3836_v22 = vmax.bf16 %v3820_v43, %v7561_v32  ;;  %v7665_v27 = vld [vmem:[%s5440_s6 + $0x10] sm:$0x3] }
 0x1cc   : > { %v3837_v49 = vmax.bf16 %v3821_v31, %v7557_v15  ;;  %v7651_v3 = vmax.bf16 %v248_v5, %v172_v41  ;;  %v3838_v14 = vmax.bf16 %v3822_v10, %v7563_v11  ;;  %v270_v60 = vrot.slane %v268_v45, 4 }
 0x1cd   : > { %v267_v63 = vsel %vm5487_vm2, %v262_v4, %v266_v33  ;;  %v656_v42 = vmax.bf16 %v253_v24, %v7645_v52  ;;  %v5061_v51 = vrot.slane %v3835_v38, 10  ;;  %v4463_v46 = vrot.slane %v3836_v22, 6  ;;  %v7672_v4 = vld [vmem:[%s5440_s6 + $0x4] sm:$0xf] }
 0x1ce   : > { %v5062_v34 = vrot.slane %v3837_v49, 10  ;;  %v7659_v32 = vmax.bf16 %v267_v63, %v174_v17  ;;  %v4467_v15 = vrot.slane %v3838_v14, 6  ;;  %v271_v41 = vor.u32 %v270_v60, %v266_v33  ;;  %v1481_v63 = vld [vmem:[%s5440_s6] sm:$0xe]  ;;  %v7684_v60 = vld [vmem:[%s5440_s6 + $0xc] sm:$0xe] }
 0x1cf   : > { %v4943_v1 = vrot.slane %v695_v28, 9  ;;  %v760_v5 = vrot.slane %v7603_v25, 5  ;;  %v4464_v11 = vsel %vm6395_vm6, %v5061_v51, %v4463_v46  ;;  %v4944_v47 = vrot.slane %v696_v62, 9  ;;  %v7675_v25 = vld [vmem:[%s5440_s6 + $0x10] sm:$0xf] }
 0x1d0   : > { %v765_v44 = vrot.slane %v213_v54, 5  ;;  %v962_v43 = vshrl.u32 %v695_v28, 16  ;;  %v4468_v31 = vsel %vm6395_vm6, %v5062_v34, %v4467_v15  ;;  %v272_v17 = vrot.slane %v271_v41, 4  ;;  %v7690_v41 = vld [vmem:[%s5440_s6 + $0x4] sm:$0x1] }
 0x1d1   : > { %v761_v24 = vsel %vm5612_vm5, %v4943_v1, %v760_v5  ;;  %v762_v10 = vrot.slane %v760_v5, 4  ;;  %v5082_v33 = vcombine.low %v4464_v11, %v4468_v31  ;;  %v8657_v51 = vshrl.u32 %v7672_v4, 16  ;;  %v7696_v5 = vld [vmem:[%s5440_s6 + $0x10] sm:$0x1] }
 0x1d2   : > { %v766_v54 = vsel %vm5612_vm5, %v4944_v47, %v765_v44  ;;  %v767_v45 = vrot.slane %v765_v44, 4  ;;  %v898_v38 = vmax.bf16 %v761_v24, %v7651_v3  ;;  %v658_v22 = vmax.bf16 %v272_v17, %v7665_v27 }
 0x1d3   : > { %v899_v49 = vmax.bf16 %v762_v10, %v656_v42  ;;  %v900_v28 = vmax.bf16 %v766_v54, %v7659_v32  ;;  %v4963_v14 = vrot.slane %v962_v43, 9  ;;  %5271 = vmatmul.mubr.bf16.gmra.mrb[4].mxu0 %v5082_v33  ;;  %v8655_v46 = vshll.u32 %v7672_v4, 16 }
 0x1d4   : > { %v977_v34 = vshrl.u32 %v696_v62, 16  ;;  %v8656_v15 = vshrl.u32 %v7675_v25, 16  ;;  %v901_v3 = vmax.bf16 %v767_v45, %v658_v22  ;;  %v8659_v1 = vshll.u32 %v7675_v25, 16 }
 0x1d5   : > { %v1361_v42 = vrot.slane %v7672_v4, 6  ;;  %v1363_v32 = vrot.slane %v7675_v25, 6  ;;  %v969_v11 = vrot.slane %v8657_v51, 5  ;;  %v972_v47 = vrot.slane %v8655_v46, 6 }
 0x1d6   : > { %v4964_v62 = vrot.slane %v977_v34, 9  ;;  %v984_v44 = vrot.slane %v8656_v15, 5  ;;  %v987_v43 = vrot.slane %v8659_v1, 6  ;;  %v1564_v24 = vrot.slane %v1481_v63, 7 }
 0x1d7   : > { %v1362_v31 = vrot.slane %v1361_v42, 4  ;;  %v1364_v17 = vrot.slane %v1363_v32, 4  ;;  %v973_v10 = vor.u32 %v972_v47, %v969_v11  ;;  %v1566_v33 = vrot.slane %v7690_v41, 7 }
 0x1d8   : > { %v1568_v54 = vrot.slane %v7684_v60, 7  ;;  %v1570_v45 = vrot.slane %v7696_v5, 7  ;;  %v988_v22 = vor.u32 %v987_v43, %v984_v44  ;;  %v1565_v56 = vrot.slane %v1564_v24, 4 }
 0x1d9   : > { %v1728_v46 = vshrl.u32 %v1481_v63, 16  ;;  %v1731_v34 = vshll.u32 %v1481_v63, 16  ;;  %v974_v15 = vsel %vm5730_vm8, %v4963_v14, %v973_v10  ;;  %v975_v51 = vrot.slane %v973_v10, 4 }
 0x1da   : > { %v1569_v0 = vrot.slane %v1568_v54, 4  ;;  %v1736_v1 = vshrl.u32 %v7645_v52, 16  ;;  %v989_v11 = vsel %vm5730_vm8, %v4964_v62, %v988_v22  ;;  %v990_v47 = vrot.slane %v988_v22, 4 }
 0x1db   : > { %v1301_v13 = vmax.bf16 %v974_v15, %v898_v38  ;;  %v1567_v61 = vsel %vm5865_vm11, %v1565_v56, %v1566_v33  ;;  %v1302_v9 = vmax.bf16 %v975_v51, %v899_v49  ;;  %v1303_v44 = vmax.bf16 %v989_v11, %v900_v28 }
 0x1dc   : > { %v1571_v63 = vsel %vm5865_vm11, %v1569_v0, %v1570_v45  ;;  %v1730_v43 = vrot.slane %v1728_v46, 7  ;;  %v1304_v23 = vmax.bf16 %v990_v47, %v901_v3  ;;  %v1738_v10 = vrot.slane %v1736_v1, 7  ;;  %v2127_v46 = vld [vmem:[%s5440_s6 + $0x8] sm:$0x1] }
 0x1dd   : > { %v1441_v14 = vmax.bf16 %v1361_v42, %v1301_v13  ;;  %v1739_v37 = vshll.u32 %v7645_v52, 16  ;;  %v1442_v48 = vmax.bf16 %v1362_v31, %v1302_v9  ;;  %v1443_v40 = vmax.bf16 %v1363_v32, %v1303_v44 }
 0x1de   : > { %v1733_v62 = vor.u32 %v1731_v34, %v1730_v43  ;;  %v1734_v38 = vrot.slane %v1730_v43, 4  ;;  %v1444_v15 = vmax.bf16 %v1364_v17, %v1304_v23  ;;  %v1744_v49 = vshrl.u32 %v7684_v60, 16  ;;  %v2128_v23 = vld [vmem:[%s5440_s6 + $0x14] sm:$0x1] }
 0x1df   : > { %v1684_v22 = vmax.bf16 %v1564_v24, %v1441_v14  ;;  %v1741_v56 = vor.u32 %v1739_v37, %v1738_v10  ;;  %v1685_v28 = vmax.bf16 %v1567_v61, %v1442_v48  ;;  %v1686_v0 = vmax.bf16 %v1568_v54, %v1443_v40  ;;  %v7730_v61 = vld [vmem:[%s5440_s6 + $0x4] sm:$0xe]  ;;  %v7739_v14 = vld [vmem:[%s5440_s6 + $0x10] sm:$0xe] }
 0x1e0   : > { %v1747_v51 = vshll.u32 %v7684_v60, 16  ;;  %v1752_v13 = vshrl.u32 %v7665_v27, 16  ;;  %v1687_v3 = vmax.bf16 %v1571_v63, %v1444_v15  ;;  %v1746_v52 = vrot.slane %v1744_v49, 7 }
 0x1e1   : > { %v1742_v9 = vsel %vm5956_vm14, %v1734_v38, %v1741_v56  ;;  %v1755_v1 = vshll.u32 %v7665_v27, 16  ;;  %v2087_v37 = vmax.bf16 %v1733_v62, %v1684_v22  ;;  %v8861_v48 = vshrl.u32 %v7672_v4, 16 }
 0x1e2   : > { %v1754_v42 = vrot.slane %v1752_v13, 7  ;;  %v2088_v32 = vmax.bf16 %v1742_v9, %v1685_v28  ;;  %v1749_v60 = vor.u32 %v1747_v51, %v1746_v52  ;;  %v1750_v31 = vrot.slane %v1746_v52, 4  ;;  %v2630_v9 = vld [vmem:[%s5440_s6] sm:$0xf] }
 0x1e3   : > { %v2150_v40 = vrot.slane %v8861_v48, 6  ;;  %v8862_v17 = vshll.u32 %v7672_v4, 16  ;;  %v2155_v33 = vshll.u32 %v2127_v46, 16  ;;  %v8863_v45 = vshrl.u32 %v7675_v25, 16 }
 0x1e4   : > { %v1757_v54 = vor.u32 %v1755_v1, %v1754_v42  ;;  %v8864_v34 = vshll.u32 %v7675_v25, 16  ;;  %v2164_v47 = vshll.u32 %v2128_v23, 16  ;;  %v2089_v44 = vmax.bf16 %v1749_v60, %v1686_v0  ;;  %v2631_v60 = vld [vmem:[%s5440_s6 + $0xc] sm:$0xf] }
 0x1e5   : > { %v2151_v24 = vrot.slane %v8862_v17, 7  ;;  %v2159_v27 = vrot.slane %v8863_v45, 6  ;;  %v2157_v43 = vrot.slane %v2155_v33, 7  ;;  %v2470_v10 = vrot.slane %v7730_v61, 7  ;;  %v2641_v17 = vld [vmem:[%s5440_s6 + $0x84] sm:$0xf] }
 0x1e6   : > { %v2160_v11 = vrot.slane %v8864_v34, 7  ;;  %v1758_v4 = vsel %vm5956_vm14, %v1750_v31, %v1757_v54  ;;  %v2166_v38 = vrot.slane %v2164_v47, 7  ;;  %v2472_v15 = vrot.slane %v2127_v46, 7  ;;  %v2640_v31 = vld [vmem:[%s5440_s6 + $0x78] sm:$0xf]  ;;  %v8865_v54 = vld [vmem:[#allocation24_spill] sm:$0xff] }
 0x1e7   : > { %v2152_v63 = vor.u32 %v2151_v24, %v2150_v40  ;;  %v2090_v22 = vmax.bf16 %v1758_v4, %v1687_v3  ;;  %v2471_v49 = vrot.slane %v2470_v10, 4  ;;  %v2474_v51 = vrot.slane %v7739_v14, 7  ;;  %v2642_v47 = vld [vmem:[%s5440_s6 + $0x90] sm:$0xf] }
 0x1e8   : > { %v2161_v62 = vor.u32 %v2160_v11, %v2159_v27  ;;  %v2476_v13 = vrot.slane %v2128_v23, 7  ;;  %v2670_v3 = vrot.slane %v2630_v9, 6  ;;  %v2672_v33 = vrot.slane %v2631_v60, 6 }
 0x1e9   : > { %v2153_v56 = vrot.slane %v2152_v63, 4  ;;  %v2370_v25 = vmax.bf16 %v2152_v63, %v2087_v37  ;;  %v2473_v1 = vsel %vm5865_vm11, %v2471_v49, %v2472_v15  ;;  %v2475_v48 = vrot.slane %v2474_v51, 4 }
 0x1ea   : > { %v2162_v28 = vrot.slane %v2161_v62, 4  ;;  %v2372_v0 = vmax.bf16 %v2161_v62, %v2089_v44  ;;  %v2671_v24 = vrot.slane %v2670_v3, 4  ;;  %v8866_v45 = vrot.slane %v8865_v54, 6  ;;  %v7763_v44 = vld [vmem:[%s5440_s6 + $0x9c] sm:$0xf]  ;;  %v8870_v54 = vld [vmem:[#allocation31_spill] sm:$0xff] }
 0x1eb   : > { %v2158_v52 = vsel %vm6062_vm1, %v2153_v56, %v2157_v43  ;;  %v2590_v46 = vmax.bf16 %v2470_v10, %v2370_v25  ;;  %v2477_v34 = vsel %vm5865_vm11, %v2475_v48, %v2476_v13  ;;  %v2692_v63 = vrot.slane %v2641_v17, 6 }
 0x1ec   : > { %v2167_v42 = vsel %vm6062_vm1, %v2162_v28, %v2166_v38  ;;  %v2371_v37 = vmax.bf16 %v2158_v52, %v2088_v32  ;;  %v2592_v40 = vmax.bf16 %v2474_v51, %v2372_v0  ;;  %v7757_v27 = vrot.slane %v8866_v45, 4  ;;  %v8867_v51 = vld [vmem:[#allocation25_spill] sm:$0xff]  ;;  %v8868_v52 = vld [vmem:[#allocation26_spill] sm:$0xff] }
 0x1ed   : > { %v2373_v23 = vmax.bf16 %v2167_v42, %v2090_v22  ;;  %v2690_v32 = vrot.slane %v2640_v31, 6  ;;  %v2673_v10 = vrot.slane %v2672_v33, 4  ;;  %v2694_v4 = vrot.slane %v2642_v47, 6 }
 0x1ee   : > { %v2591_v11 = vmax.bf16 %v2473_v1, %v2371_v37  ;;  %v2696_v62 = vrot.slane %v7763_v44, 6  ;;  %v7768_v15 = vrot.slane %v2692_v63, 4  ;;  %v7770_v22 = vmax.bf16 %v2670_v3, %v2590_v46 }
 0x1ef   : > { %v2593_v43 = vmax.bf16 %v2477_v34, %v2373_v23  ;;  %v7766_v38 = vrot.slane %v2690_v32, 4  ;;  %v7774_v25 = vrot.slane %v2694_v4, 4  ;;  %v7778_v28 = vmax.bf16 %v2672_v33, %v2592_v40 }
 0x1f0   : > { %v7772_v56 = vmax.bf16 %v2671_v24, %v2591_v11  ;;  %v7776_v49 = vrot.slane %v2696_v62, 4  ;;  %v2765_v13 = vmax.bf16 %v8867_v51, %v6744_v35  ;;  %v2767_v1 = vmax.bf16 %v8868_v52, %v6749_v12 }
 0x1f1   : > { %v7780_v0 = vmax.bf16 %v2673_v10, %v2593_v43  ;;  %v2769_v46 = vmax.bf16 %v7757_v27, %v8778_v7  ;;  %v7789_v3 = vmax.bf16 %v2690_v32, %v8858_v16  ;;  %v2771_v42 = vmax.bf16 %v7766_v38, %v6754_v8 }
 0x1f2   : > { %v7794_v37 = vmax.bf16 %v2692_v63, %v6765_v53  ;;  %v2773_v48 = vmax.bf16 %v7768_v15, %v6768_v26  ;;  %v7799_v35 = vmax.bf16 %v2694_v4, %v7030_v18  ;;  %v2775_v12 = vmax.bf16 %v7774_v25, %v7040_v39  ;;  %v8869_v18 = vld [vmem:[#allocation29_spill] sm:$0xff] }
 0x1f3   : > { %v7804_v7 = vmax.bf16 %v2696_v62, %v7042_v2  ;;  %v2777_v16 = vmax.bf16 %v7776_v49, %v7053_v19  ;;  %v2791_v40 = vshrl.u32 %v2630_v9, 16  ;;  %v2794_v8 = vshll.u32 %v2630_v9, 16 }
 0x1f4   : > { %v2800_v53 = vshll.u32 %v7690_v41, 16  ;;  %v2805_v23 = vshrl.u32 %v2631_v60, 16  ;;  %v2808_v24 = vshll.u32 %v2631_v60, 16  ;;  %v2814_v26 = vshll.u32 %v7696_v5, 16 }
 0x1f5   : > { %v2793_v33 = vrot.slane %v2791_v40, 6  ;;  %v8871_v45 = vrot.slane %v8870_v54, 4  ;;  %v2931_v2 = vshrl.u32 %v2640_v31, 16  ;;  %v2796_v27 = vrot.slane %v2794_v8, 7 }
 0x1f6   : > { %v2802_v34 = vrot.slane %v2800_v53, 7  ;;  %v2807_v11 = vrot.slane %v2805_v23, 6  ;;  %v2810_v32 = vrot.slane %v2808_v24, 7  ;;  %v2816_v63 = vrot.slane %v2814_v26, 7 }
 0x1f7   : > { %v2929_v39 = vsel %vm6062_vm1, %v8871_v45, %v8869_v18  ;;  %v2933_v9 = vrot.slane %v2931_v2, 6  ;;  %v2934_v43 = vshll.u32 %v2640_v31, 16  ;;  %v2945_v41 = vshrl.u32 %v2641_v17, 16 }
 0x1f8   : > { %v7815_v10 = vor.u32 %v2796_v27, %v2793_v33  ;;  %v7817_v60 = vor.u32 %v2810_v32, %v2807_v11  ;;  %v2948_v5 = vshll.u32 %v2641_v17, 16  ;;  %v2959_v4 = vshrl.u32 %v2642_v47, 16  ;;  %v8872_v11 = vld [vmem:[#allocation30_spill] sm:$0xff] }
 0x1f9   : > { %v2936_v62 = vrot.slane %v2934_v43, 7  ;;  %v2947_v38 = vrot.slane %v2945_v41, 6  ;;  %v2962_v15 = vshll.u32 %v2642_v47, 16  ;;  %v2973_v25 = vshrl.u32 %v7763_v44, 16 }
 0x1fa   : > { %v2798_v51 = vrot.slane %v7815_v10, 4  ;;  %v2812_v52 = vrot.slane %v7817_v60, 4  ;;  %v2950_v40 = vrot.slane %v2948_v5, 7  ;;  %v2961_v8 = vrot.slane %v2959_v4, 6  ;;  %v8874_v5 = vld [vmem:[#allocation32_spill] sm:$0xff] }
 0x1fb   : > { %v7822_v53 = vor.u32 %v2936_v62, %v2933_v9  ;;  %v2964_v31 = vrot.slane %v2962_v15, 7  ;;  %v2975_v23 = vrot.slane %v2973_v25, 6  ;;  %v2976_v24 = vshll.u32 %v7763_v44, 16  ;;  %v8875_v62 = vld [vmem:[#allocation22_spill] sm:$0xff] }
 0x1fc   : > { %v7827_v17 = vsel %vm6062_vm1, %v2798_v51, %v2802_v34  ;;  %v7831_v47 = vsel %vm6062_vm1, %v2812_v52, %v2816_v63  ;;  %v7833_v33 = vor.u32 %v2950_v40, %v2947_v38  ;;  %v7848_v32 = vmax.bf16 %v8872_v11, %v2765_v13  ;;  %v8873_v63 = vld [vmem:[#allocation47_spill] sm:$0xff]  ;;  %v8876_v52 = vld [vmem:[#allocation16_spill] sm:$0xff]  ;;  %v7922_v34 = vld [vmem:[%s5440_s6 + $0xa4] sm:$0x3] }
 0x1fd   : > { %v2938_v18 = vrot.slane %v7822_v53, 4  ;;  %v7838_v54 = vor.u32 %v2964_v31, %v2961_v8  ;;  %v2978_v45 = vrot.slane %v2976_v24, 7  ;;  %v7857_v4 = vmax.bf16 %v8874_v5, %v2767_v1  ;;  %v7869_v51 = vld [vmem:[%s5440_s6 + $0x8] sm:$0x3]  ;;  %v7889_v24 = vld [vmem:[%s5440_s6 + $0x74] sm:$0x3] }
 0x1fe   : > { %v2952_v2 = vrot.slane %v7833_v33, 4  ;;  %v7862_v15 = vmax.bf16 %v2929_v39, %v2769_v46  ;;  %v3179_v11 = vshrl.u32 %v7869_v51, 16  ;;  %v3190_v5 = vshll.u32 %v7739_v14, 16  ;;  %v8878_v46 = vld [vmem:[#allocation48_spill] sm:$0xff] }
 0x1ff   : > { %v2943_v9 = vsel %vm6062_vm1, %v2938_v18, %v8873_v63  ;;  %v2966_v43 = vrot.slane %v7838_v54, 4  ;;  %v7854_v41 = vor.u32 %v2978_v45, %v2975_v23  ;;  %v7886_v23 = vld [vmem:[%s5440_s6 + $0x14] sm:$0x3]  ;;  %v3171_v18 = vshrl.u32 %v7730_v61, 16 }
 0x200   : > { %v2957_v38 = vsel %vm6062_vm1, %v2952_v2, %v8875_v62  ;;  %v7866_v25 = vmax.bf16 %v2943_v9, %v2771_v42  ;;  %v8877_v45 = vld [vmem:[#allocation56_spill] sm:$0xff]  ;;  %v3174_v2 = vshll.u32 %v7730_v61, 16  ;;  %v7906_v62 = vld [vmem:[%s5440_s6 + $0x80] sm:$0x3]  ;;  %v3195_v61 = vshrl.u32 %v7886_v23, 16 }
 0x201   : > { %v2971_v40 = vsel %vm6062_vm1, %v2966_v43, %v8876_v52  ;;  %v2980_v1 = vrot.slane %v7854_v41, 4  ;;  %v7877_v31 = vmax.bf16 %v2957_v38, %v2773_v48  ;;  %v3173_v9 = vrot.slane %v3171_v18, 7 }
 0x202   : > { %v7881_v39 = vmax.bf16 %v2971_v40, %v2775_v12  ;;  %v3182_v12 = vshll.u32 %v7869_v51, 16  ;;  %v3187_v43 = vshrl.u32 %v7739_v14, 16  ;;  %v3181_v38 = vrot.slane %v3179_v11, 7  ;;  %v8879_v11 = vld [vmem:[#allocation46_spill] sm:$0xff] }
 0x203   : > { %v2985_v48 = vsel %vm6062_vm1, %v2980_v1, %v8877_v45  ;;  %v3198_v52 = vshll.u32 %v7886_v23, 16  ;;  %v3323_v40 = vshrl.u32 %v7889_v24, 16  ;;  %v7912_v1 = vld [vmem:[%s5440_s6 + $0x8c] sm:$0x3]  ;;  %v3176_v19 = vor.u32 %v3174_v2, %v3173_v9  ;;  %v7916_v45 = vld [vmem:[%s5440_s6 + $0x98] sm:$0x3] }
 0x204   : > { %v7901_v63 = vmax.bf16 %v2985_v48, %v2777_v16  ;;  %v3177_v49 = vrot.slane %v3173_v9, 4  ;;  %v3189_v16 = vrot.slane %v3187_v43, 7  ;;  %v3326_v18 = vshll.u32 %v7889_v24, 16 }
 0x205   : > { %v3184_v14 = vor.u32 %v3182_v12, %v3181_v38  ;;  %v3197_v48 = vrot.slane %v3195_v61, 7  ;;  %v3325_v42 = vrot.slane %v3323_v40, 7  ;;  %v8880_v8 = vshll.u32 %v8879_v11, 16 }
 0x206   : > { %v3192_v27 = vor.u32 %v3190_v5, %v3189_v16  ;;  %v3193_v44 = vrot.slane %v3189_v16, 4  ;;  %v3339_v26 = vshrl.u32 %v7906_v62, 16  ;;  %v3342_v2 = vshll.u32 %v7906_v62, 16  ;;  %v8881_v16 = vld [vmem:[#allocation33_spill] sm:$0xff] }
 0x207   : > { %v3336_v13 = vor.u32 %v8880_v8, %v8878_v46  ;;  %v3185_v9 = vsel %vm5956_vm14, %v3177_v49, %v3184_v14  ;;  %v3200_v43 = vor.u32 %v3198_v52, %v3197_v48  ;;  %v3328_v50 = vor.u32 %v3326_v18, %v3325_v42 }
 0x208   : > { %v3355_v12 = vshrl.u32 %v7912_v1, 16  ;;  %v3341_v38 = vrot.slane %v3339_v26, 7  ;;  %v3358_v61 = vshll.u32 %v7912_v1, 16  ;;  %v3371_v8 = vshrl.u32 %v7916_v45, 16 }
 0x209   : > { %v3374_v40 = vshll.u32 %v7916_v45, 16  ;;  %v3201_v5 = vsel %vm5956_vm14, %v3193_v44, %v3200_v43  ;;  %v8882_v11 = vrot.slane %v8881_v16, 4  ;;  %v3387_v42 = vshrl.u32 %v7922_v34, 16  ;;  %v7974_v16 = vld [vmem:[%s5440_s6 + $0x4] sm:$0xc] }
 0x20a   : > { %v3357_v49 = vrot.slane %v3355_v12, 7  ;;  %v3344_v52 = vor.u32 %v3342_v2, %v3341_v38  ;;  %v3373_v26 = vrot.slane %v3371_v8, 7  ;;  %v3390_v18 = vshll.u32 %v7922_v34, 16 }
 0x20b   : > { %v3329_v55 = vsel %vm5956_vm14, %v8882_v11, %v3328_v50  ;;  %v8883_v14 = vmax.bf16 %v7815_v10, %v7770_v22  ;;  %v3389_v44 = vrot.slane %v3387_v42, 7  ;;  %v8884_v43 = vmax.bf16 %v7827_v17, %v7772_v56  ;;  %v8888_v56 = vld [vmem:[#allocation34_spill] sm:$0xff] }
 0x20c   : > { %v3360_v59 = vor.u32 %v3358_v61, %v3357_v49  ;;  %v8885_v2 = vmax.bf16 %v7817_v60, %v7778_v28  ;;  %v8886_v38 = vrot.slane %v8878_v46, 4  ;;  %v3376_v22 = vor.u32 %v3374_v40, %v3373_v26  ;;  %v3571_v49 = vld [vmem:[%s5440_s6 + $0x10] sm:$0xc]  ;;  %v8897_v42 = vld [vmem:[#allocation58_spill] sm:$0xff] }
 0x20d   : > { %v7943_v48 = vmax.bf16 %v3176_v19, %v8883_v14  ;;  %v7948_v50 = vmax.bf16 %v3185_v9, %v8884_v43  ;;  %v8887_v10 = vmax.bf16 %v7831_v47, %v7780_v0  ;;  %v3545_v17 = vmax.bf16 %v8888_v56, %v7848_v32  ;;  %v8889_v9 = vld [vmem:[#allocation51_spill] sm:$0xff]  ;;  %v8892_v0 = vld [vmem:[#allocation57_spill] sm:$0xff] }
 0x20e   : > { %v3532_v12 = vmax.bf16 %v3192_v27, %v8885_v2  ;;  %v7957_v8 = vsel %vm5956_vm14, %v8886_v38, %v3344_v52  ;;  %v8890_v61 = vrot.slane %v8889_v9, 4  ;;  %v3392_v60 = vor.u32 %v3390_v18, %v3389_v44  ;;  %v8891_v27 = vld [vmem:[#allocation36_spill] sm:$0xff]  ;;  %v5370_v56 = vld [vmem:[%s5440_s6 + $0x5c] sm:$0x3] }
 0x20f   : > { %v3533_v19 = vmax.bf16 %v3201_v5, %v8887_v10  ;;  %v3547_v46 = vmax.bf16 %v8891_v27, %v7857_v4  ;;  %v3549_v40 = vmax.bf16 %v3329_v55, %v7862_v15  ;;  %v8893_v47 = vrot.slane %v8892_v0, 4  ;;  %v8896_v55 = vld [vmem:[#allocation52_spill] sm:$0xff] }
 0x210   : > { %v7968_v28 = vsel %vm5956_vm14, %v8890_v61, %v3360_v59  ;;  %v8894_v5 = vmax.bf16 %v7822_v53, %v7789_v3  ;;  %v3551_v59 = vmax.bf16 %v7957_v8, %v7866_v25  ;;  %v8895_v4 = vmax.bf16 %v7833_v33, %v7794_v37  ;;  %v3578_v33 = vld [vmem:[%s5440_s6 + $0x64] sm:$0xc]  ;;  %v3579_v18 = vld [vmem:[%s5440_s6 + $0x70] sm:$0xc]  ;;  %v5369_v8 = vld [vmem:[%s5440_s6 + $0x50] sm:$0x3] }
 0x211   : > { %v7980_v32 = vsel %vm5956_vm14, %v8893_v47, %v3376_v22  ;;  %v8898_v52 = vrot.slane %v8897_v42, 4  ;;  %v3553_v3 = vmax.bf16 %v7968_v28, %v7877_v31  ;;  %v8899_v53 = vmax.bf16 %v7838_v54, %v7799_v35  ;;  %v8902_v44 = vld [vmem:[#allocation8_spill] sm:$0xff]  ;;  %v8903_v22 = vld [vmem:[#allocation53_spill] sm:$0xff]  ;;  %v8906_v61 = vld [vmem:[#allocation35_spill] sm:$0xff] }
 0x212   : > { %v3550_v11 = vmax.bf16 %v3336_v13, %v8894_v5  ;;  %v3552_v15 = vmax.bf16 %v8896_v55, %v8895_v4  ;;  %v8900_v13 = vld [vmem:[#allocation18_spill] sm:$0xff]  ;;  %v3555_v37 = vmax.bf16 %v7980_v32, %v7881_v39  ;;  %v8901_v14 = vmax.bf16 %v7854_v41, %v7804_v7  ;;  %v8904_v7 = vld [vmem:[#allocation23_spill] sm:$0xff] }
 0x213   : > { %v7996_v26 = vsel %vm5956_vm14, %v8898_v52, %v3392_v60  ;;  %v3554_v25 = vmax.bf16 %v8900_v13, %v8899_v53  ;;  %v3590_v35 = vmax.bf16 %v7974_v16, %v7943_v48  ;;  %v3591_v54 = vmax.bf16 %v7948_v50, %v7869_v51  ;;  %v5371_v60 = vld [vmem:[%s5440_s6 + $0x68] sm:$0x3]  ;;  %v8909_v5 = vld [vmem:[#allocation6_spill] sm:$0xff]  ;;  %v8914_v53 = vld [vmem:[#allocation17_spill] sm:$0xff] }
 0x214   : > { %v8012_v43 = vmax.bf16 %v8902_v44, %v8901_v14  ;;  %v3557_v31 = vmax.bf16 %v7996_v26, %v7901_v63  ;;  %v8020_v2 = vmax.bf16 %v3571_v49, %v3532_v12  ;;  %v8023_v38 = vmax.bf16 %v3533_v19, %v7886_v23  ;;  %v8907_v12 = vld [vmem:[#allocation40_spill] sm:$0xff]  ;;  %v8908_v19 = vld [vmem:[#allocation41_spill] sm:$0xff]  ;;  %v8912_v49 = vld [vmem:[#allocation19_spill] sm:$0xff] }
 0x215   : > { %v8905_v41 = vmax.bf16 %v8903_v22, %v8904_v7  ;;  %v8032_v9 = vmax.bf16 %v5370_v56, %v3545_v17  ;;  %v8035_v28 = vmax.bf16 %v3578_v33, %v8906_v61  ;;  %v8038_v27 = vmax.bf16 %v5371_v60, %v3547_v46  ;;  %v8910_v17 = vld [vmem:[#allocation55_spill] sm:$0xff]  ;;  %v3580_v61 = vld [vmem:[%s5440_s6 + $0x7c] sm:$0xc] }
 0x216   : > { %v8041_v0 = vmax.bf16 %v3579_v18, %v8907_v12  ;;  %v8044_v23 = vmax.bf16 %v3549_v40, %v7889_v24  ;;  %v8911_v4 = vmax.bf16 %v8909_v5, %v8910_v17  ;;  %v8913_v40 = vmax.bf16 %v8842_v57, %v7409_v20  ;;  %v8916_v18 = vld [vmem:[#allocation15_spill] sm:$0xff] }
 0x217   : > { %v8029_v10 = vmax.bf16 %v5369_v8, %v8905_v41  ;;  %v3867_v24 = vmax.bf16 %v7409_v20, %v8035_v28  ;;  %v8915_v13 = vmax.bf16 %v8914_v53, %v7409_v20  ;;  %v8917_v14 = vmax.bf16 %v8916_v18, %v7409_v20  ;;  %v8918_v41 = vld [vmem:[#allocation7_spill] sm:$0xff] }
 0x218   : > { %v3897_v52 = vmax.bf16 %v8913_v40, %v8035_v28  ;;  %v8919_v57 = vmax.bf16 %v8918_v41, %v7409_v20  ;;  %v3869_v12 = vmax.bf16 %v7409_v20, %v8041_v0  ;;  %v3868_v20 = vmax.bf16 %v8044_v23, %v8038_v27 }
 0x219   : > { %v3850_v47 = vmax.bf16 %v8029_v10, %v8908_v19  ;;  %v3878_v55 = vmax.bf16 %v8911_v4, %v8029_v10  ;;  %v3892_v42 = vmax.bf16 %v8912_v49, %v8029_v10  ;;  %v8056_v46 = vmax.bf16 %v8032_v9, %v8029_v10  ;;  %v3581_v49 = vld [vmem:[%s5440_s6 + $0x88] sm:$0xc] }
 0x21a   : > { %v3895_v33 = vmax.bf16 %v8915_v13, %v8035_v28  ;;  %v3925_v44 = vmax.bf16 %v8917_v14, %v8035_v28  ;;  %v3939_v56 = vmax.bf16 %v8919_v57, %v8035_v28  ;;  %v3883_v4 = vmax.bf16 %v3867_v24, %v8041_v0 }
 0x21b   : > { %v3866_v8 = vmax.bf16 %v3850_v47, %v8032_v9  ;;  %v3894_v22 = vmax.bf16 %v3878_v55, %v8032_v9  ;;  %v3908_v7 = vmax.bf16 %v3892_v42, %v8032_v9  ;;  %v3880_v60 = vmax.bf16 %v8056_v46, %v8038_v27  ;;  %v3582_v55 = vld [vmem:[%s5440_s6 + $0x94] sm:$0xc] }
 0x21c   : > { %v3913_v47 = vmax.bf16 %v3897_v52, %v8041_v0  ;;  %v3911_v18 = vmax.bf16 %v3895_v33, %v8041_v0  ;;  %v3941_v14 = vmax.bf16 %v3925_v44, %v8041_v0  ;;  %v3955_v41 = vmax.bf16 %v3939_v56, %v8041_v0 }
 0x21d   : > { %v3882_v42 = vmax.bf16 %v3866_v8, %v8038_v27  ;;  %v3910_v40 = vmax.bf16 %v3894_v22, %v8038_v27  ;;  %v3924_v13 = vmax.bf16 %v3908_v7, %v8038_v27  ;;  %v3896_v24 = vmax.bf16 %v3880_v60, %v8044_v23 }
 0x21e   : > { %v8100_v22 = vmax.bf16 %v3580_v61, %v3550_v11  ;;  %v8103_v7 = vmax.bf16 %v3551_v59, %v7906_v62  ;;  %v8105_v33 = vmax.bf16 %v3581_v49, %v3552_v15  ;;  %v8108_v44 = vmax.bf16 %v3553_v3, %v7912_v1 }
 0x21f   : > { %v3898_v52 = vmax.bf16 %v3882_v42, %v8044_v23  ;;  %v3926_v57 = vmax.bf16 %v3910_v40, %v8044_v23  ;;  %v3940_v8 = vmax.bf16 %v3924_v13, %v8044_v23  ;;  %v8110_v56 = vmax.bf16 %v3582_v55, %v3554_v25  ;;  %v3583_v13 = vld [vmem:[%s5440_s6 + $0xa0] sm:$0xc] }
 0x220   : > { %v3885_v60 = vmax.bf16 %v3869_v12, %v8100_v22  ;;  %v3899_v42 = vmax.bf16 %v3883_v4, %v8100_v22  ;;  %v3929_v40 = vmax.bf16 %v3913_v47, %v8100_v22  ;;  %v3927_v11 = vmax.bf16 %v3911_v18, %v8100_v22 }
 0x221   : > { %v3957_v61 = vmax.bf16 %v3941_v14, %v8100_v22  ;;  %v3971_v62 = vmax.bf16 %v3955_v41, %v8100_v22  ;;  %v3870_v59 = vmax.bf16 %v8103_v7, %v8044_v23  ;;  %v3884_v1 = vmax.bf16 %v3868_v20, %v8103_v7 }
 0x222   : > { %v3914_v15 = vmax.bf16 %v3898_v52, %v8103_v7  ;;  %v3912_v3 = vmax.bf16 %v3896_v24, %v8103_v7  ;;  %v3942_v25 = vmax.bf16 %v3926_v57, %v8103_v7  ;;  %v3956_v12 = vmax.bf16 %v3940_v8, %v8103_v7 }
 0x223   : > { %v3901_v4 = vmax.bf16 %v3885_v60, %v8105_v33  ;;  %v3915_v47 = vmax.bf16 %v3899_v42, %v8105_v33  ;;  %v3945_v49 = vmax.bf16 %v3929_v40, %v8105_v33  ;;  %v3943_v55 = vmax.bf16 %v3927_v11, %v8105_v33 }
 0x224   : > { %v3973_v18 = vmax.bf16 %v3957_v61, %v8105_v33  ;;  %v3987_v14 = vmax.bf16 %v3971_v62, %v8105_v33  ;;  %v3886_v41 = vmax.bf16 %v3870_v59, %v8108_v44  ;;  %v3900_v20 = vmax.bf16 %v3884_v1, %v8108_v44 }
 0x225   : > { %v3930_v24 = vmax.bf16 %v3914_v15, %v8108_v44  ;;  %v3928_v52 = vmax.bf16 %v3912_v3, %v8108_v44  ;;  %v3958_v57 = vmax.bf16 %v3942_v25, %v8108_v44  ;;  %v3972_v8 = vmax.bf16 %v3956_v12, %v8108_v44 }
 0x226   : > { %v3917_v60 = vmax.bf16 %v3901_v4, %v8110_v56  ;;  %v3931_v42 = vmax.bf16 %v3915_v47, %v8110_v56  ;;  %v3961_v40 = vmax.bf16 %v3945_v49, %v8110_v56  ;;  %v3959_v11 = vmax.bf16 %v3943_v55, %v8110_v56 }
 0x227   : > { %v3989_v61 = vmax.bf16 %v3973_v18, %v8110_v56  ;;  %v4003_v62 = vmax.bf16 %v3987_v14, %v8110_v56  ;;  %v8148_v59 = vmax.bf16 %v3555_v37, %v7916_v45  ;;  %v8151_v1 = vmax.bf16 %v3583_v13, %v8012_v43  ;;  %v8920_v45 = vld [vmem:[#allocation27_spill] sm:$0xff]  ;;  %v8921_v13 = vld [vmem:[#allocation28_spill] sm:$0xff] }
 0x228   : > { %v8157_v15 = vmax.bf16 %v3557_v31, %v7922_v34  ;;  %v3839_v3 = vmax.bf16 %v8020_v2, %v3590_v35  ;;  %v3840_v39 = vmax.bf16 %v8023_v38, %v3591_v54  ;;  %v3841_v32 = vmax.bf16 %v8920_v45, %v8020_v2  ;;  %v3585_v2 = vld [vmem:[%s5440_s6 + $0xb8] sm:$0xc] }
 0x229   : > { %v3902_v37 = vmax.bf16 %v3886_v41, %v8148_v59  ;;  %v3916_v63 = vmax.bf16 %v3900_v20, %v8148_v59  ;;  %v3946_v34 = vmax.bf16 %v3930_v24, %v8148_v59  ;;  %v3944_v26 = vmax.bf16 %v3928_v52, %v8148_v59  ;;  %v8922_v20 = vld [vmem:[#allocation54_spill] sm:$0xff]  ;;  %v5372_v52 = vld [vmem:[%s5440_s6 + $0xb0] sm:$0x3] }
 0x22a   : > { %v3974_v48 = vmax.bf16 %v3958_v57, %v8148_v59  ;;  %v3988_v16 = vmax.bf16 %v3972_v8, %v8148_v59  ;;  %v3933_v43 = vmax.bf16 %v3917_v60, %v8151_v1  ;;  %v8177_v51 = vmax.bf16 %v3931_v42, %v8151_v1  ;;  %v8923_v57 = vld [vmem:[#allocation11_spill] sm:$0xff]  ;;  %v8924_v8 = vld [vmem:[#allocation10_spill] sm:$0xff] }
 0x22b   : > { %v3977_v50 = vmax.bf16 %v3961_v40, %v8151_v1  ;;  %v3975_v31 = vmax.bf16 %v3959_v11, %v8151_v1  ;;  %v4005_v35 = vmax.bf16 %v3989_v61, %v8151_v1  ;;  %v4019_v54 = vmax.bf16 %v4003_v62, %v8151_v1  ;;  %v8926_v40 = vld [vmem:[#allocation44_spill] sm:$0xff] }
 0x22c   : > { %v3918_v25 = vmax.bf16 %v3902_v37, %v8157_v15  ;;  %v3932_v12 = vmax.bf16 %v3916_v63, %v8157_v15  ;;  %v3962_v4 = vmax.bf16 %v3946_v34, %v8157_v15  ;;  %v3960_v47 = vmax.bf16 %v3944_v26, %v8157_v15  ;;  %v5373_v37 = vld [vmem:[%s5440_s6 + $0xbc] sm:$0x3] }
 0x22d   : > { %v3990_v49 = vmax.bf16 %v3974_v48, %v8157_v15  ;;  %v4004_v55 = vmax.bf16 %v3988_v16, %v8157_v15  ;;  %v3842_v18 = vmax.bf16 %v8921_v13, %v8023_v38  ;;  %v3855_v14 = vmax.bf16 %v3839_v3, %v8920_v45  ;;  %v8927_v38 = vld [vmem:[#allocation45_spill] sm:$0xff] }
 0x22e   : > { %v3856_v41 = vmax.bf16 %v3840_v39, %v8921_v13  ;;  %v3857_v24 = vmax.bf16 %v3841_v32, %v8922_v20  ;;  %v8925_v60 = vmax.bf16 %v8923_v57, %v8924_v8  ;;  %v8200_v11 = vmax.bf16 %v3585_v2, %v8926_v40  ;;  %v8928_v63 = vld [vmem:[#allocation9_spill] sm:$0xff]  ;;  %v8931_v2 = vld [vmem:[#allocation38_spill] sm:$0xff]  ;;  %v8932_v57 = vld [vmem:[#allocation39_spill] sm:$0xff] }
 0x22f   : > { %v3858_v61 = vmax.bf16 %v3842_v18, %v8910_v17  ;;  %v3871_v62 = vmax.bf16 %v3855_v14, %v8922_v20  ;;  %v8929_v3 = vmax.bf16 %v8927_v38, %v8928_v63  ;;  %v5093_v39 = vrot.slane %v4019_v54, 10  ;;  %v8930_v34 = vld [vmem:[#allocation37_spill] sm:$0xff] }
 0x230   : > { %v3619_v42 = vmax.bf16 %v5372_v52, %v8925_v60  ;;  %v3872_v32 = vmax.bf16 %v3856_v41, %v8910_v17  ;;  %v3873_v26 = vmax.bf16 %v3857_v24, %v8930_v34  ;;  %v8228_v24 = vmax.bf16 %v3977_v50, %v8200_v11 }
 0x231   : > { %v8208_v45 = vmax.bf16 %v5373_v37, %v8929_v3  ;;  %v3874_v13 = vmax.bf16 %v3858_v61, %v8931_v2  ;;  %v3887_v18 = vmax.bf16 %v3871_v62, %v8930_v34  ;;  %v8934_v62 = vld [vmem:[#allocation42_spill] sm:$0xff] }
 0x232   : > { %v3934_v48 = vmax.bf16 %v3918_v25, %v3619_v42  ;;  %v8212_v16 = vmax.bf16 %v3932_v12, %v3619_v42  ;;  %v3978_v52 = vmax.bf16 %v3962_v4, %v3619_v42  ;;  %v3976_v14 = vmax.bf16 %v3960_v47, %v3619_v42  ;;  %v8933_v4 = vld [vmem:[#allocation14_spill] sm:$0xff] }
 0x233   : > { %v3888_v20 = vmax.bf16 %v3872_v32, %v8931_v2  ;;  %v3889_v8 = vmax.bf16 %v3873_v26, %v8932_v57  ;;  %v4006_v60 = vmax.bf16 %v3990_v49, %v3619_v42  ;;  %v4020_v40 = vmax.bf16 %v4004_v55, %v3619_v42  ;;  %v3166_v32 = vld [vmem:[%s5440_s6 + $0xc8] sm:$0x3] }
 0x234   : > { %v3890_v54 = vmax.bf16 %v3874_v13, %v8908_v19  ;;  %v3903_v17 = vmax.bf16 %v3887_v18, %v8932_v57  ;;  %v8221_v25 = vmax.bf16 %v3933_v43, %v8200_v11  ;;  %v3963_v12 = vmax.bf16 %v8177_v51, %v8200_v11  ;;  %v230_v51 = vld [vmem:[%s5440_s6 + $0xdc] sm:$0x7] }
 0x235   : > { %v3904_v41 = vmax.bf16 %v3888_v20, %v8908_v19  ;;  %v3905_v47 = vmax.bf16 %v3889_v8, %v8933_v4  ;;  %v8231_v49 = vmax.bf16 %v3975_v31, %v8200_v11  ;;  %v4021_v43 = vmax.bf16 %v4005_v35, %v8200_v11 }
 0x236   : > { %v3906_v55 = vmax.bf16 %v3890_v54, %v8029_v10  ;;  %v3919_v42 = vmax.bf16 %v3903_v17, %v8933_v4  ;;  %v8237_v61 = vmax.bf16 %v3934_v48, %v8208_v45  ;;  %v3964_v50 = vmax.bf16 %v8212_v16, %v8208_v45 }
 0x237   : > { %v3920_v19 = vmax.bf16 %v3904_v41, %v8029_v10  ;;  %v3921_v37 = vmax.bf16 %v3905_v47, %v8934_v62  ;;  %v8244_v38 = vmax.bf16 %v3978_v52, %v8208_v45  ;;  %v8249_v35 = vmax.bf16 %v3976_v14, %v8208_v45 }
 0x238   : > { %v3922_v31 = vmax.bf16 %v3906_v55, %v8032_v9  ;;  %v3935_v63 = vmax.bf16 %v3919_v42, %v8934_v62  ;;  %v4022_v3 = vmax.bf16 %v4006_v60, %v8208_v45  ;;  %v4649_v26 = vrot.slane %v4020_v40, 6  ;;  %v3167_v60 = vld [vmem:[%s5440_s6 + $0xd4] sm:$0x3] }
 0x239   : > { %v3936_v10 = vmax.bf16 %v3920_v19, %v8032_v9  ;;  %v3937_v34 = vmax.bf16 %v3921_v37, %v8035_v28  ;;  %v5094_v48 = vrot.slane %v4021_v43, 10  ;;  %v8935_v52 = vshll.u32 %v7538_v30, 16 }
 0x23a   : > { %v3938_v2 = vmax.bf16 %v3922_v31, %v8038_v27  ;;  %v3951_v13 = vmax.bf16 %v3935_v63, %v8035_v28  ;;  %v4653_v18 = vrot.slane %v4022_v3, 6  ;;  %v4650_v8 = vsel %vm6395_vm6, %v5093_v39, %v4649_v26 }
 0x23b   : > { %v3432_v20 = vor.u32 %v8935_v52, %v7583_v6  ;;  %v3952_v14 = vmax.bf16 %v3936_v10, %v8038_v27  ;;  %v3953_v57 = vmax.bf16 %v3937_v34, %v8041_v0  ;;  %v3435_v54 = vshrl.u32 %v3166_v32, 16  ;;  %v3587_v52 = vld [vmem:[%s5440_s6 + $0xd0] sm:$0xc] }
 0x23c   : > { %v3954_v40 = vmax.bf16 %v3938_v2, %v8044_v23  ;;  %v3967_v17 = vmax.bf16 %v3951_v13, %v8041_v0  ;;  %v4654_v41 = vsel %vm6395_vm6, %v5094_v48, %v4653_v18  ;;  %v3438_v4 = vshll.u32 %v3166_v32, 16  ;;  %v8937_v48 = vld [vmem:[#allocation59_spill] sm:$0xff]  ;;  %v3586_v18 = vld [vmem:[%s5440_s6 + $0xc4] sm:$0xc] }
 0x23d   : > { %v3968_v30 = vmax.bf16 %v3952_v14, %v8044_v23  ;;  %v3969_v47 = vmax.bf16 %v3953_v57, %v8100_v22  ;;  %v5116_v55 = vcombine.low %v4650_v8, %v4654_v41  ;;  %v3437_v42 = vrot.slane %v3435_v54, 7  ;;  %v8938_v2 = vld [vmem:[#allocation43_spill] sm:$0xff]  ;;  %v8941_v8 = vld [vmem:[#allocation60_spill] sm:$0xff]  ;;  %v8942_v54 = vld [vmem:[#allocation50_spill] sm:$0xff] }
 0x23e   : > { %v3970_v39 = vmax.bf16 %v3954_v40, %v8103_v7  ;;  %v3983_v43 = vmax.bf16 %v3967_v17, %v8100_v22  ;;  %v8936_v19 = vshll.u32 %v7541_v29, 16  ;;  %v3451_v37 = vshrl.u32 %v3167_v60, 16 }
 0x23f   : > { %v3984_v31 = vmax.bf16 %v3968_v30, %v8103_v7  ;;  %v3985_v63 = vmax.bf16 %v3969_v47, %v8105_v33  ;;  %v3440_v23 = vor.u32 %v3438_v4, %v3437_v42  ;;  %v3454_v3 = vshll.u32 %v3167_v60, 16  ;;  %v8944_v4 = vld [vmem:[#allocation20_spill] sm:$0xff] }
 0x240   : > { %v3448_v0 = vor.u32 %v8936_v19, %v7588_v36  ;;  %v3986_v10 = vmax.bf16 %v3970_v39, %v8108_v44  ;;  %v3999_v34 = vmax.bf16 %v3983_v43, %v8105_v33  ;;  %v3453_v26 = vrot.slane %v3451_v37, 7 }
 0x241   : > { %v8939_v13 = vmax.bf16 %v8937_v48, %v8938_v2  ;;  %v4000_v29 = vmax.bf16 %v3984_v31, %v8108_v44  ;;  %v4001_v14 = vmax.bf16 %v3985_v63, %v8110_v56  ;;  %v8940_v7 = vrot.slane %v7583_v6, 4  ;;  %v8946_v63 = vld [vmem:[#allocation21_spill] sm:$0xff] }
 0x242   : > { %v8943_v40 = vmax.bf16 %v8941_v8, %v8942_v54  ;;  %v4002_v17 = vmax.bf16 %v3986_v10, %v8148_v59  ;;  %v4015_v41 = vmax.bf16 %v3999_v34, %v8110_v56  ;;  %v8945_v19 = vrot.slane %v7588_v36, 4 }
 0x243   : > { %v3562_v22 = vmax.bf16 %v3432_v20, %v8939_v13  ;;  %v3441_v57 = vsel %vm5956_vm14, %v8940_v7, %v3440_v23  ;;  %v3456_v20 = vor.u32 %v3454_v3, %v3453_v26  ;;  %v4016_v44 = vmax.bf16 %v4000_v29, %v8148_v59  ;;  %v208_v26 = vld [vmem:[%s5440_s6 + $0xd8] sm:$0xc] }
 0x244   : > { %v3564_v33 = vmax.bf16 %v3448_v0, %v8943_v40  ;;  %v3563_v30 = vmax.bf16 %v3441_v57, %v8944_v4  ;;  %v4017_v47 = vmax.bf16 %v4001_v14, %v8151_v1  ;;  %v4018_v39 = vmax.bf16 %v4002_v17, %v8157_v15  ;;  %v231_v14 = vld [vmem:[%s5440_s6 + $0xe8] sm:$0x7] }
 0x245   : > { %v3622_v42 = vmax.bf16 %v3586_v18, %v3562_v22  ;;  %v5091_v43 = vrot.slane %v4015_v41, 10  ;;  %v3457_v56 = vsel %vm5956_vm14, %v8945_v19, %v3456_v20  ;;  %v4641_v37 = vrot.slane %v4016_v44, 6  ;;  %v8947_v22 = vld [vmem:[#allocation5_spill] sm:$0xff] }
 0x246   : > { %v8299_v6 = vmax.bf16 %v3587_v52, %v3564_v33  ;;  %v3623_v0 = vmax.bf16 %v3563_v30, %v3166_v32  ;;  %v5092_v31 = vrot.slane %v4017_v47, 10  ;;  %v3565_v59 = vmax.bf16 %v3457_v56, %v8946_v63  ;;  %v210_v52 = vld [vmem:[%s5440_s6 + $0xe4] sm:$0xc]  ;;  %v713_v47 = vld [vmem:[%s5440_s6 + $0xd8] sm:$0x8] }
 0x247   : > { %v3965_v1 = vmax.bf16 %v8221_v25, %v3622_v42  ;;  %v4645_v23 = vrot.slane %v4018_v39, 6  ;;  %v8311_v15 = vmax.bf16 %v3963_v12, %v3622_v42  ;;  %v4009_v3 = vmax.bf16 %v8228_v24, %v3622_v42  ;;  %v714_v56 = vld [vmem:[%s5440_s6 + $0xe4] sm:$0x8] }
 0x248   : > { %v4007_v36 = vmax.bf16 %v8231_v49, %v3622_v42  ;;  %v4642_v10 = vsel %vm6395_vm6, %v5091_v43, %v4641_v37  ;;  %v3966_v32 = vmax.bf16 %v8237_v61, %v3623_v0  ;;  %v8321_v34 = vmax.bf16 %v3964_v50, %v3623_v0 }
 0x249   : > { %v4010_v25 = vmax.bf16 %v8244_v38, %v3623_v0  ;;  %v4646_v11 = vsel %vm6395_vm6, %v5092_v31, %v4645_v23  ;;  %v4008_v12 = vmax.bf16 %v8249_v35, %v3623_v0  ;;  %v8330_v24 = vmax.bf16 %v3965_v1, %v8299_v6 }
 0x24a   : > { %v3995_v49 = vmax.bf16 %v8311_v15, %v8299_v6  ;;  %v5115_v45 = vcombine.low %v4642_v10, %v4646_v11  ;;  %v4025_v16 = vmax.bf16 %v4009_v3, %v8299_v6  ;;  %v8335_v61 = vmax.bf16 %v3565_v59, %v3167_v60  ;;  %v8354_v59 = vld [vmem:[%s5440_s6 + $0xdc] sm:$0x3] }
 0x24b   : > { %v578_v50 = vshrl.u32 %v208_v26, 16  ;;  %v581_v38 = vshll.u32 %v208_v26, 16  ;;  %v587_v48 = vshll.u32 %v230_v51, 16  ;;  %v4023_v18 = vmax.bf16 %v4007_v36, %v8947_v22 }
 0x24c   : > { %5290 = vmatprep.mubr.bf16.mxu0 %v5115_v45  ;;  %v8338_v2 = vmax.bf16 %v3966_v32, %v8335_v61  ;;  %v3996_v35 = vmax.bf16 %v8321_v34, %v8335_v61  ;;  %v4026_v13 = vmax.bf16 %v4010_v25, %v8335_v61  ;;  %v4024_v29 = vmax.bf16 %v4008_v12, %v8909_v5  ;;  %v8359_v45 = vld [vmem:[%s5440_s6 + $0xdc] sm:$0xf] }
 0x24d   : > { %5291 = vmatmul.mubr.bf16.vlgmr.msra.gmra.mrb[0].mxu0 %v5116_v55  ;;  %v5096_v60 = vrot.slane %v4025_v16, 10  ;;  %v580_v7 = vrot.slane %v578_v50, 4  ;;  %v583_v57 = vrot.slane %v581_v38, 5  ;;  %v5095_v8 = vrot.slane %v4023_v18, 10  ;;  %v8362_v16 = vld [vmem:[%s5440_s6 + $0xe8] sm:$0x3] }
 0x24e   : > { %v4661_v54 = vrot.slane %v4026_v13, 6  ;;  %v589_v40 = vrot.slane %v587_v48, 5  ;;  %v591_v33 = vshrl.u32 %v230_v51, 16  ;;  %v4657_v17 = vrot.slane %v4024_v29, 6 }
 0x24f   : > { %v584_v41 = vor.u32 %v583_v57, %v580_v7  ;;  %v597_v20 = vshrl.u32 %v210_v52, 16  ;;  %v600_v4 = vshll.u32 %v210_v52, 16  ;;  %v606_v5 = vshll.u32 %v231_v14, 16 }
 0x250   : > { %v4662_v55 = vsel %vm6395_vm6, %v5096_v60, %v4661_v54  ;;  %v593_v30 = vrot.slane %v591_v33, 4  ;;  %v610_v44 = vshrl.u32 %v231_v14, 16  ;;  %v4658_v42 = vsel %vm6395_vm6, %v5095_v8, %v4657_v17  ;;  %v8368_v60 = vld [vmem:[%s5440_s6 + $0xe8] sm:$0xf] }
 0x251   : > { %v585_v39 = vrot.slane %v584_v41, 4  ;;  %v599_v43 = vrot.slane %v597_v20, 4  ;;  %v602_v19 = vrot.slane %v600_v4, 5  ;;  %v5117_v0 = vcombine.low %v4658_v42, %v4662_v55  ;;  %v1517_v41 = vld [vmem:[%s5440_s6 + $0xd8] sm:$0xe] }
 0x252   : > { %v594_v37 = vor.u32 %v593_v30, %v589_v40  ;;  %v608_v31 = vrot.slane %v606_v5, 5  ;;  %v612_v63 = vrot.slane %v610_v44, 4  ;;  %v4961_v36 = vrot.slane %v713_v47, 9  ;;  %v8382_v5 = vld [vmem:[%s5440_s6 + $0xdc] sm:$0x1] }
 0x253   : > { %v590_v23 = vsel %vm5487_vm2, %v585_v39, %v589_v40  ;;  %v603_v3 = vor.u32 %v602_v19, %v599_v43  ;;  %v850_v10 = vrot.slane %v230_v51, 5  ;;  %5294 = vmatprep.mubr.bf16.mxu0 %v5117_v0  ;;  %v4962_v12 = vrot.slane %v714_v56, 9  ;;  %v1519_v39 = vld [vmem:[%s5440_s6 + $0xe4] sm:$0xe]  ;;  %v8388_v43 = vld [vmem:[%s5440_s6 + $0xe8] sm:$0x1] }
 0x254   : > { %v595_v32 = vrot.slane %v594_v37, 4  ;;  %v613_v25 = vor.u32 %v612_v63, %v608_v31  ;;  %v691_v11 = vmax.bf16 %v590_v23, %v208_v26  ;;  %v855_v22 = vrot.slane %v231_v14, 5 }
 0x255   : > { %v604_v50 = vrot.slane %v603_v3, 4  ;;  %v851_v48 = vsel %vm5612_vm5, %v4961_v36, %v850_v10  ;;  %v852_v13 = vrot.slane %v850_v10, 4  ;;  %v1232_v26 = vshrl.u32 %v713_v47, 16 }
 0x256   : > { %v614_v18 = vrot.slane %v613_v25, 4  ;;  %v692_v29 = vmax.bf16 %v595_v32, %v8354_v59  ;;  %v934_v51 = vmax.bf16 %v851_v48, %v691_v11  ;;  %v856_v57 = vsel %vm5612_vm5, %v4962_v12, %v855_v22 }
 0x257   : > { %v609_v7 = vsel %vm5487_vm2, %v604_v50, %v608_v31  ;;  %v857_v8 = vrot.slane %v855_v22, 4  ;;  %v1237_v54 = vshrl.u32 %v8359_v45, 16  ;;  %v4981_v17 = vrot.slane %v1232_v26, 9 }
 0x258   : > { %v693_v14 = vmax.bf16 %v609_v7, %v210_v52  ;;  %v694_v40 = vmax.bf16 %v614_v18, %v8362_v16  ;;  %v935_v33 = vmax.bf16 %v852_v13, %v692_v29  ;;  %v1240_v4 = vshll.u32 %v8359_v45, 16 }
 0x259   : > { %v1239_v20 = vrot.slane %v1237_v54, 5  ;;  %v1247_v55 = vshrl.u32 %v714_v56, 16  ;;  %v1252_v30 = vshrl.u32 %v8368_v60, 16  ;;  %v1255_v42 = vshll.u32 %v8368_v60, 16 }
 0x25a   : > { %v936_v44 = vmax.bf16 %v856_v57, %v693_v14  ;;  %v937_v47 = vmax.bf16 %v857_v8, %v694_v40  ;;  %v1397_v52 = vrot.slane %v8359_v45, 6  ;;  %v1242_v19 = vrot.slane %v1240_v4, 6 }
 0x25b   : > { %v4982_v0 = vrot.slane %v1247_v55, 9  ;;  %v1254_v56 = vrot.slane %v1252_v30, 5  ;;  %v1399_v37 = vrot.slane %v8368_v60, 6  ;;  %v1257_v31 = vrot.slane %v1255_v42, 6 }
 0x25c   : > { %v1398_v63 = vrot.slane %v1397_v52, 4  ;;  %v1636_v1 = vrot.slane %v1517_v41, 7  ;;  %v1638_v23 = vrot.slane %v8382_v5, 7  ;;  %v1243_v3 = vor.u32 %v1242_v19, %v1239_v20  ;;  %v8402_v29 = vpop.f32.mrb[0].mxu1 }
 0x25d   : > { %v1400_v36 = vrot.slane %v1399_v37, 4  ;;  %v1640_v10 = vrot.slane %v1519_v39, 7  ;;  %v1642_v32 = vrot.slane %v8388_v43, 7  ;;  %v1258_v25 = vor.u32 %v1257_v31, %v1254_v56  ;;  %v8408_v40 = vpop.f32.mrb[1].mxu1 }
 0x25e   : > { %v1637_v11 = vrot.slane %v1636_v1, 4  ;;  %v2016_v12 = vshrl.u32 %v1517_v41, 16  ;;  %v2019_v50 = vshll.u32 %v1517_v41, 16  ;;  %v1244_v48 = vsel %vm5730_vm8, %v4981_v17, %v1243_v3  ;;  %v8412_v19 = vpop.f32.mrb[2].mxu1 }
 0x25f   : > { %v1245_v13 = vrot.slane %v1243_v3, 4  ;;  %v1641_v22 = vrot.slane %v1640_v10, 4  ;;  %v2024_v18 = vshrl.u32 %v8354_v59, 16  ;;  %v1259_v26 = vsel %vm5730_vm8, %v4982_v0, %v1258_v25 }
 0x260   : > { %v1260_v7 = vrot.slane %v1258_v25, 4  ;;  %v1337_v57 = vmax.bf16 %v1244_v48, %v934_v51  ;;  %v1639_v14 = vsel %vm5865_vm11, %v1637_v11, %v1638_v23  ;;  %v1339_v20 = vmax.bf16 %v1259_v26, %v936_v44  ;;  %v8415_v51 = vpop.f32.mrb[3].mxu1 }
 0x261   : > { %v1338_v41 = vmax.bf16 %v1245_v13, %v935_v33  ;;  %v1643_v17 = vsel %vm5865_vm11, %v1641_v22, %v1642_v32  ;;  %v2018_v55 = vrot.slane %v2016_v12, 7  ;;  %v2026_v3 = vrot.slane %v2024_v18, 7  ;;  %v2145_v22 = vld [vmem:[%s5440_s6 + $0xe0] sm:$0x1] }
 0x262   : > { %v1340_v56 = vmax.bf16 %v1260_v7, %v937_v47  ;;  %v1477_v31 = vmax.bf16 %v1397_v52, %v1337_v57  ;;  %v2027_v0 = vshll.u32 %v8354_v59, 16  ;;  %v1479_v23 = vmax.bf16 %v1399_v37, %v1339_v20 }
 0x263   : > { %v1478_v25 = vmax.bf16 %v1398_v63, %v1338_v41  ;;  %v2021_v11 = vor.u32 %v2019_v50, %v2018_v55  ;;  %v2022_v33 = vrot.slane %v2018_v55, 4  ;;  %v2032_v32 = vshrl.u32 %v1519_v39, 16  ;;  %v2146_v50 = vld [vmem:[%s5440_s6 + $0xec] sm:$0x1] }
 0x264   : > { %v1480_v44 = vmax.bf16 %v1400_v36, %v1340_v56  ;;  %v1720_v38 = vmax.bf16 %v1636_v1, %v1477_v31  ;;  %v2029_v48 = vor.u32 %v2027_v0, %v2026_v3  ;;  %v1722_v13 = vmax.bf16 %v1640_v10, %v1479_v23  ;;  %v8426_v10 = vld [vmem:[%s5440_s6 + $0xdc] sm:$0xe] }
 0x265   : > { %v1721_v12 = vmax.bf16 %v1639_v14, %v1478_v25  ;;  %v2035_v47 = vshll.u32 %v1519_v39, 16  ;;  %v2040_v52 = vshrl.u32 %v8362_v16, 16  ;;  %v2034_v63 = vrot.slane %v2032_v32, 7 }
 0x266   : > { %v1723_v18 = vmax.bf16 %v1643_v17, %v1480_v44  ;;  %v2030_v59 = vsel %vm5956_vm14, %v2022_v33, %v2029_v48  ;;  %v2043_v37 = vshll.u32 %v8362_v16, 16  ;;  %v2123_v1 = vmax.bf16 %v2021_v11, %v1720_v38  ;;  %v8440_v11 = vpop.f32.mrb[4].mxu1 }
 0x267   : > { %v2042_v26 = vrot.slane %v2040_v52, 7  ;;  %v2124_v36 = vmax.bf16 %v2030_v59, %v1721_v12  ;;  %v2312_v7 = vrot.slane %v1237_v54, 6  ;;  %v2037_v39 = vor.u32 %v2035_v47, %v2034_v63  ;;  %v8435_v54 = vld [vmem:[%s5440_s6 + $0xe8] sm:$0xe]  ;;  %v8442_v44 = vpop.f32.mrb[5].mxu1 }
 0x268   : > { %v2038_v57 = vrot.slane %v2034_v63, 4  ;;  %v2313_v14 = vrot.slane %v1240_v4, 7  ;;  %v2317_v41 = vshll.u32 %v2145_v22, 16  ;;  %v2321_v16 = vrot.slane %v1252_v30, 6  ;;  %v8446_v47 = vpop.f32.mrb[6].mxu1 }
 0x269   : > { %v2045_v20 = vor.u32 %v2043_v37, %v2042_v26  ;;  %v2322_v17 = vrot.slane %v1255_v42, 7  ;;  %v2326_v55 = vshll.u32 %v2146_v50, 16  ;;  %v2125_v56 = vmax.bf16 %v2037_v39, %v1722_v13  ;;  %v2648_v13 = vld [vmem:[%s5440_s6 + $0xd8] sm:$0xf]  ;;  %v8452_v37 = vpop.f32.mrb[7].mxu1 }
 0x26a   : > { %v2314_v31 = vor.u32 %v2313_v14, %v2312_v7  ;;  %v2319_v3 = vrot.slane %v2317_v41, 7  ;;  %v2542_v0 = vrot.slane %v8426_v10, 7  ;;  %v2544_v23 = vrot.slane %v2145_v22, 7 }
 0x26b   : > { %v2046_v45 = vsel %vm5956_vm14, %v2038_v57, %v2045_v20  ;;  %v2323_v4 = vor.u32 %v2322_v17, %v2321_v16  ;;  %v2328_v25 = vrot.slane %v2326_v55, 7  ;;  %v2546_v32 = vrot.slane %v8435_v54, 7 }
 0x26c   : > { %v2126_v30 = vmax.bf16 %v2046_v45, %v1723_v18  ;;  %v2315_v60 = vrot.slane %v2314_v31, 4  ;;  %v2406_v42 = vmax.bf16 %v2314_v31, %v2123_v1  ;;  %v2543_v33 = vrot.slane %v2542_v0, 4 }
 0x26d   : > { %v2324_v38 = vrot.slane %v2323_v4, 4  ;;  %v2408_v48 = vmax.bf16 %v2323_v4, %v2125_v56  ;;  %v2548_v12 = vrot.slane %v2146_v50, 7  ;;  %v2706_v63 = vrot.slane %v2648_v13, 6  ;;  %v2649_v50 = vld [vmem:[%s5440_s6 + $0xe4] sm:$0xf] }
 0x26e   : > { %v2320_v22 = vsel %vm6062_vm1, %v2315_v60, %v2319_v3  ;;  %v2545_v18 = vsel %vm5865_vm11, %v2543_v33, %v2544_v23  ;;  %v2626_v59 = vmax.bf16 %v2542_v0, %v2406_v42  ;;  %v2547_v7 = vrot.slane %v2546_v32, 4 }
 0x26f   : > { %v2329_v26 = vsel %vm6062_vm1, %v2324_v38, %v2328_v25  ;;  %v2407_v1 = vmax.bf16 %v2320_v22, %v2124_v36  ;;  %v2628_v39 = vmax.bf16 %v2546_v32, %v2408_v48  ;;  %v2707_v14 = vrot.slane %v2706_v63, 4  ;;  %v3169_v32 = vld [vmem:[%s5440_s6 + $0xec] sm:$0x3] }
 0x270   : > { %v2409_v57 = vmax.bf16 %v2329_v26, %v2126_v30  ;;  %v2708_v41 = vrot.slane %v2649_v50, 6  ;;  %v2786_v20 = vmax.bf16 %v2706_v63, %v2626_v59  ;;  %v2549_v16 = vsel %vm5865_vm11, %v2547_v7, %v2548_v12  ;;  %v3168_v30 = vld [vmem:[%s5440_s6 + $0xe0] sm:$0x3] }
 0x271   : > { %v2627_v17 = vmax.bf16 %v2545_v18, %v2407_v1  ;;  %v3043_v55 = vshrl.u32 %v2648_v13, 16  ;;  %v3046_v56 = vshll.u32 %v2648_v13, 16  ;;  %v3052_v36 = vshll.u32 %v8382_v5, 16 }
 0x272   : > { %v2629_v31 = vmax.bf16 %v2549_v16, %v2409_v57  ;;  %v2709_v3 = vrot.slane %v2708_v41, 4  ;;  %v2788_v0 = vmax.bf16 %v2708_v41, %v2628_v39  ;;  %v3057_v23 = vshrl.u32 %v2649_v50, 16 }
 0x273   : > { %v2787_v45 = vmax.bf16 %v2707_v14, %v2627_v17  ;;  %v3045_v4 = vrot.slane %v3043_v55, 6  ;;  %v3048_v25 = vrot.slane %v3046_v56, 7  ;;  %v3054_v42 = vrot.slane %v3052_v36, 7 }
 0x274   : > { %v2789_v60 = vmax.bf16 %v2709_v3, %v2629_v31  ;;  %v3060_v33 = vshll.u32 %v2649_v50, 16  ;;  %v3066_v8 = vshll.u32 %v8388_v43, 16  ;;  %v3059_v48 = vrot.slane %v3057_v23, 6 }
 0x275   : > { %v3049_v38 = vor.u32 %v3048_v25, %v3045_v4  ;;  %v3459_v12 = vshrl.u32 %v8426_v10, 16  ;;  %v3462_v13 = vshll.u32 %v8426_v10, 16  ;;  %v3467_v5 = vshrl.u32 %v3168_v30, 16  ;;  %v3588_v25 = vld [vmem:[%s5440_s6 + $0xdc] sm:$0xc] }
 0x276   : > { %v3062_v22 = vrot.slane %v3060_v33, 7  ;;  %v3068_v18 = vrot.slane %v3066_v8, 7  ;;  %v3470_v59 = vshll.u32 %v3168_v30, 16  ;;  %v3475_v7 = vshrl.u32 %v8435_v54, 16  ;;  %v3589_v33 = vld [vmem:[%s5440_s6 + $0xe8] sm:$0xc] }
 0x277   : > { %v3050_v63 = vrot.slane %v3049_v38, 4  ;;  %v3146_v26 = vmax.bf16 %v3049_v38, %v2786_v20  ;;  %v3461_v1 = vrot.slane %v3459_v12, 7  ;;  %v3469_v50 = vrot.slane %v3467_v5, 7 }
 0x278   : > { %v3063_v39 = vor.u32 %v3062_v22, %v3059_v48  ;;  %v3478_v43 = vshll.u32 %v8435_v54, 16  ;;  %v3483_v57 = vshrl.u32 %v3169_v32, 16  ;;  %v3477_v16 = vrot.slane %v3475_v7, 7 }
 0x279   : > { %v3055_v14 = vsel %vm6062_vm1, %v3050_v63, %v3054_v42  ;;  %v3464_v10 = vor.u32 %v3462_v13, %v3461_v1  ;;  %v3465_v41 = vrot.slane %v3461_v1, 4  ;;  %v3472_v20 = vor.u32 %v3470_v59, %v3469_v50 }
 0x27a   : > { %v3064_v17 = vrot.slane %v3063_v39, 4  ;;  %v3147_v55 = vmax.bf16 %v3055_v14, %v2787_v45  ;;  %v3148_v56 = vmax.bf16 %v3063_v39, %v2788_v0  ;;  %v3480_v31 = vor.u32 %v3478_v43, %v3477_v16 }
 0x27b   : > { %v3481_v3 = vrot.slane %v3477_v16, 4  ;;  %v3485_v36 = vrot.slane %v3483_v57, 7  ;;  %v3486_v4 = vshll.u32 %v3169_v32, 16  ;;  %v3473_v23 = vsel %vm5956_vm14, %v3465_v41, %v3472_v20 }
 0x27c   : > { %v3069_v54 = vsel %vm6062_vm1, %v3064_v17, %v3068_v18  ;;  %v3566_v42 = vmax.bf16 %v3464_v10, %v3146_v26  ;;  %v3567_v48 = vmax.bf16 %v3473_v23, %v3147_v55  ;;  %v3568_v12 = vmax.bf16 %v3480_v31, %v3148_v56 }
 0x27d   : > { %v3149_v8 = vmax.bf16 %v3069_v54, %v2789_v60  ;;  %v3488_v38 = vor.u32 %v3486_v4, %v3485_v36  ;;  %v3853_v18 = vmax.bf16 %v8035_v28, %v8934_v62 }
 0x27e   : > { %v3626_v45 = vmax.bf16 %v3588_v25, %v3566_v42  ;;  %v3627_v13 = vmax.bf16 %v3567_v48, %v3168_v30  ;;  %v3628_v22 = vmax.bf16 %v3589_v33, %v3568_v12 }
 0x27f   : > { %v3489_v0 = vsel %vm5956_vm14, %v3481_v3, %v3488_v38 }
 0x280   : > { %v3569_v5 = vmax.bf16 %v3489_v0, %v3149_v8  ;;  %v3997_v59 = vmax.bf16 %v8330_v24, %v3626_v45  ;;  %v4011_v52 = vmax.bf16 %v3995_v49, %v3626_v45  ;;  %v3998_v60 = vmax.bf16 %v8338_v2, %v3627_v13 }
 0x281   : > { %v4012_v63 = vmax.bf16 %v3996_v35, %v3627_v13  ;;  %v3854_v24 = vmax.bf16 %v8038_v27, %v8032_v9  ;;  %v5127_v9 = vld [vmem:[%s8521_s2] ss:$0 sm:$0xff] }
 0x282   : > { %v4013_v58 = vmax.bf16 %v3997_v59, %v3628_v22  ;;  %v3629_v26 = vmax.bf16 %v3569_v5, %v3169_v32  ;;  %v4027_v30 = vmax.bf16 %v4011_v52, %v8914_v53 }
 0x283   : > { %v4028_v1 = vmax.bf16 %v4012_v63, %v8056_v46 }
 0x284   : > { %v4014_v6 = vmax.bf16 %v3998_v60, %v3629_v26  ;;  %v4029_v15 = vmax.bf16 %v4013_v58, %v3853_v18  ;;  %v5097_v49 = vrot.slane %v4027_v30, 10 }
 0x285   : > { %v4665_v7 = vrot.slane %v4028_v1, 6 }
 0x286   : > { %v4030_v28 = vmax.bf16 %v4014_v6, %v3854_v24  ;;  %v5098_v62 = vrot.slane %v4029_v15, 10 }
 0x287   : > { %v4666_v2 = vsel %vm6395_vm6, %v5097_v49, %v4665_v7 }
 0x288   : > { %v4669_v34 = vrot.slane %v4030_v28, 6 }
 0x28a   : > { %v4670_v61 = vsel %vm6395_vm6, %v5098_v62, %v4669_v34 }
 0x28b   : > { %v5118_v35 = vcombine.low %v4666_v2, %v4670_v61 }
 0x28d   : > { %5295 = vmatmul.mubr.bf16.gmra.mrb[4].mxu0 %v5118_v35 }
 0x320   : > { %v5292_v53 = vpop.f32.mrb[0].mxu0 }
 0x321   : > { %v5298_v27 = vadd.f32 %v5292_v53, %v8402_v29  ;;  %v4786_v46 = vpop.f32.mrb[1].mxu0 }
 0x322   : > { %v5299_v32 = vadd.f32 %v4786_v46, %v8408_v40  ;;  %v5293_v39 = vpop.f32.mrb[2].mxu0 }
 0x323   : > { %v4834_v50 = vadd.f32 %v5298_v27, %v5127_v9  ;;  %v5300_v43 = vadd.f32 %v5293_v39, %v8412_v19  ;;  %v4789_v57 = vpop.f32.mrb[3].mxu0 }
 0x324   : > { %v4832_v21 = vadd.f32 %v5299_v32, %v5127_v9  ;;  %v5301_v14 = vadd.f32 %v4789_v57, %v8415_v51 }
 0x325   : > { %v4850_v10 = vmul.f32 0.1, %v4834_v50  ;;  %v4835_v41 = vadd.f32 %v5300_v43, %v5127_v9  ;;  %vm4842_vm2 = vcmp.ge.f32.partialorder %v4834_v50, 0.0 }
 0x326   : > { %v4848_v16 = vmul.f32 0.1, %v4832_v21  ;;  %v4833_v17 = vadd.f32 %v5301_v14, %v5127_v9  ;;  %vm4840_vm5 = vcmp.ge.f32.partialorder %v4832_v21, 0.0 }
 0x327   : > { %vm4843_vm7 = vcmp.ge.f32.partialorder %v4835_v41, 0.0  ;;  %v4851_v29 = vmul.f32 0.1, %v4835_v41  ;;  %v4858_v40 = vsel %vm4842_vm2, %v4834_v50, %v4850_v10 }
 0x328   : > { %vm4841_vm8 = vcmp.ge.f32.partialorder %v4833_v17, 0.0  ;;  %v4849_v55 = vmul.f32 0.1, %v4833_v17  ;;  %v4856_v51 = vsel %vm4840_vm5, %v4832_v21, %v4848_v16 }
 0x329   : > { %v4859_v19 = vsel %vm4843_vm7, %v4835_v41, %v4851_v29 }
 0x32a   : > { %v5139_v56 = vpack.c.bf16 %v4859_v19, %v4858_v40  ;;  %v4857_v20 = vsel %vm4841_vm8, %v4833_v17, %v4849_v55 }
 0x32b   : > { %v5134_v31 = vpack.c.bf16 %v4857_v20, %v4856_v51 }
 0x32c   : > { %5151 = vst [vmem:[%s8506_s17 + $0x8] sm:$0xff] %v5139_v56  }
 0x32d   : > { %5135 = vst [vmem:[%s8506_s17] sm:$0xff] %v5134_v31  }
 0x360   : > { %v5296_v3 = vpop.f32.mrb[4].mxu0 }
 0x361   : > { %v5302_v36 = vadd.f32 %v5296_v3, %v8440_v11  ;;  %v4802_v4 = vpop.f32.mrb[5].mxu0 }
 0x362   : > { %v5303_v25 = vadd.f32 %v4802_v4, %v8442_v44  ;;  %v5297_v54 = vpop.f32.mrb[6].mxu0 }
 0x363   : > { %v4838_v23 = vadd.f32 %v5302_v36, %v5127_v9  ;;  %v5304_v42 = vadd.f32 %v5297_v54, %v8446_v47  ;;  %v4805_v33 = vpop.f32.mrb[7].mxu0 }
 0x364   : > { %v4836_v8 = vadd.f32 %v5303_v25, %v5127_v9  ;;  %v5305_v38 = vadd.f32 %v4805_v33, %v8452_v37 }
 0x365   : > { %v4854_v48 = vmul.f32 0.1, %v4838_v23  ;;  %v4839_v12 = vadd.f32 %v5304_v42, %v5127_v9  ;;  %vm4846_vm9 = vcmp.ge.f32.partialorder %v4838_v23, 0.0 }
 0x366   : > { %v4852_v45 = vmul.f32 0.1, %v4836_v8  ;;  %v4837_v0 = vadd.f32 %v5305_v38, %v5127_v9  ;;  %vm4844_vm10 = vcmp.ge.f32.partialorder %v4836_v8, 0.0 }
 0x367   : > { %vm4847_vm11 = vcmp.ge.f32.partialorder %v4839_v12, 0.0  ;;  %v4855_v11 = vmul.f32 0.1, %v4839_v12  ;;  %v4862_v13 = vsel %vm4846_vm9, %v4838_v23, %v4854_v48 }
 0x368   : > { %vm4845_vm12 = vcmp.ge.f32.partialorder %v4837_v0, 0.0  ;;  %v4853_v44 = vmul.f32 0.1, %v4837_v0  ;;  %v4860_v5 = vsel %vm4844_vm10, %v4836_v8, %v4852_v45 }
 0x369   : > { %v4863_v22 = vsel %vm4847_vm11, %v4839_v12, %v4855_v11 }
 0x36a   : > { %v5149_v47 = vpack.c.bf16 %v4863_v22, %v4862_v13  ;;  %v4861_v59 = vsel %vm4845_vm12, %v4837_v0, %v4853_v44 }
 0x36b   : > { %v5144_v52 = vpack.c.bf16 %v4861_v59, %v4860_v5 }
 0x36c   : > { %5153 = vst [vmem:[%s8506_s17 + $0x18] sm:$0xff] %v5149_v47  }
 0x36d   : > { %5152 = vst [vmem:[%s8506_s17 + $0x10] sm:$0xff] %v5144_v52  }
 0x36e PF: > { %s13_s12 = sadd.s32 1, %s5380_s12  }
 0x36f   : > { %p10_p4 = scmp.ge.s32.totalorder %s13_s12, 4  }
 0x371   :  { %12 = sbr.rel (!%p10_p4) target bundleno = 1 (0x1), region = 66 }

</bundles_post_ra>
